<compile_context>
chip_gen: v7x
topology: tpu7x:2x2x1
jax: 0.10.0
libtpu: 0.0.40
codegen_flags: <defaults>
</compile_context>

<pallas_src>
import functools
import math

import jax
import jax.numpy as jnp
from jax.experimental import pallas as pl
from jax.experimental.pallas import tpu as pltpu

DP = 128          # lane-aligned padded width for d_model and for each head's block
LN_EPS = 1e-5     # nn.LayerNorm default


# ------------------------------------------------------------------ in-kernel helpers

def _layer_norm(x, gamma, beta, d_model):
    # One-pass statistics over the REAL d_model features: padded lanes are exactly 0 so
    # they contribute nothing to either sum; gamma/beta are 0 in padded lanes so the
    # padded part of the residual stream stays exactly 0.
    inv_n = 1.0 / d_model
    mu = jnp.sum(x, axis=-1, keepdims=True) * inv_n
    ex2 = jnp.sum(x * x, axis=-1, keepdims=True) * inv_n
    var = ex2 - mu * mu
    return (x - mu) * jax.lax.rsqrt(var + LN_EPS) * gamma + beta


def _mha_heads(q_src, q_off, kv_src, k_off, v_off, mask, h):
    """Per-head attention on 128-lane-aligned head blocks.

    q_src : (Sq, *) f32 slab; head hd's queries live at columns [q_off + hd*DP, ...).
    kv_src: (Skv, *) f32 slab with K blocks at k_off and V blocks at v_off.
    Returns the head-contiguous context slab (Sq, h*DP) f32 (padded head lanes are 0),
    ready for ONE (Sq, h*DP) x (h*DP, DP) output-projection matmul.
    The 1/sqrt(d_model) score scale is already folded into the Q projection weights.
    """
    ctxs = []
    for hd in range(h):
        q = q_src[:, q_off + hd * DP:q_off + (hd + 1) * DP].astype(jnp.bfloat16)
        k = kv_src[:, k_off + hd * DP:k_off + (hd + 1) * DP].astype(jnp.bfloat16)
        v = kv_src[:, v_off + hd * DP:v_off + (hd + 1) * DP].astype(jnp.bfloat16)
        s = jax.lax.dot_general(q, k, (((1,), (1,)), ((), ())),
                                preferred_element_type=jnp.float32)
        if mask is not None:
            s = s + mask
        s = s - jnp.max(s, axis=-1, keepdims=True)
        p = jnp.exp(s)
        p = p * pl.reciprocal(jnp.sum(p, axis=-1, keepdims=True), approx=True)
        ctxs.append(jnp.dot(p.astype(jnp.bfloat16), v,
                            preferred_element_type=jnp.float32))
    return jnp.concatenate(ctxs, axis=-1)                 # (Sq, h*DP)


# ------------------------------------------------------------------ fused stack kernels

def _encoder_stack_kernel(x_ref, wqkv_ref, bqkv_ref, wf_ref, w1_ref, w2_ref, vec_ref,
                          o_ref, carry_ref, *, h, d_model):
    # grid = (B, L): one batch element per outer step, layers run sequentially (inner).
    l = pl.program_id(1)
    nl = pl.num_programs(1)

    @pl.when(l == 0)
    def _():
        carry_ref[...] = x_ref[0]                         # load residual stream once

    x = carry_ref[...]                                    # (S, DP) f32
    vecs = vec_ref[0]                                     # (8, DP) f32
    hdp = h * DP

    # self-attention (fused QKV projection)
    qkv = jnp.dot(x.astype(jnp.bfloat16), wqkv_ref[0],
                  preferred_element_type=jnp.float32) + bqkv_ref[0]     # (S, 3*h*DP)
    ctx = _mha_heads(qkv, 0, qkv, hdp, 2 * hdp, None, h)                 # (S, h*DP)
    attended = jnp.dot(ctx.astype(jnp.bfloat16), wf_ref[0],
                       preferred_element_type=jnp.float32) + vecs[0:1]
    an1 = _layer_norm(x + attended, vecs[1:2], vecs[2:3], d_model)

    # feed forward
    h1 = jnp.dot(an1.astype(jnp.bfloat16), w1_ref[0],
                 preferred_element_type=jnp.float32) + vecs[3:4]
    h1 = jnp.maximum(h1, 0.0)
    ff = jnp.dot(h1.astype(jnp.bfloat16), w2_ref[0],
                 preferred_element_type=jnp.float32) + vecs[4:5]
    out = _layer_norm(an1 + ff, vecs[5:6], vecs[6:7], d_model)

    carry_ref[...] = out

    @pl.when(l == nl - 1)
    def _():
        o_ref[0] = out


def _decoder_stack_kernel(dec_ref, enc_ref, mask_ref,
                          wqkv1_ref, bqkv1_ref, wf1_ref,
                          wq2_ref, bq2_ref, wkv2_ref, bkv2_ref, wf2_ref,
                          w1_ref, w2_ref, vec_ref, wo_ref, bo_ref,
                          logits_ref, carry_ref, *, h, d_model):
    l = pl.program_id(1)
    nl = pl.num_programs(1)

    @pl.when(l == 0)
    def _():
        carry_ref[...] = dec_ref[0]

    dec = carry_ref[...]                                  # (Sd, DP) f32
    enc = enc_ref[0]                                      # (Se, DP) f32
    mask = mask_ref[...]                                  # (Sd, Sd) additive causal mask
    vecs = vec_ref[0]                                     # (16, DP) f32
    hdp = h * DP

    # masked self-attention
    qkv = jnp.dot(dec.astype(jnp.bfloat16), wqkv1_ref[0],
                  preferred_element_type=jnp.float32) + bqkv1_ref[0]
    ctx1 = _mha_heads(qkv, 0, qkv, hdp, 2 * hdp, mask, h)
    mask_attended = jnp.dot(ctx1.astype(jnp.bfloat16), wf1_ref[0],
                            preferred_element_type=jnp.float32) + vecs[0:1]
    an1 = _layer_norm(dec + mask_attended, vecs[1:2], vecs[2:3], d_model)

    # cross-attention (reference queries `mask_attended`, NOT an1; K/V from encoder out)
    q2 = jnp.dot(mask_attended.astype(jnp.bfloat16), wq2_ref[0],
                 preferred_element_type=jnp.float32) + bq2_ref[0]        # (Sd, h*DP)
    kv2 = jnp.dot(enc.astype(jnp.bfloat16), wkv2_ref[0],
                  preferred_element_type=jnp.float32) + bkv2_ref[0]      # (Se, 2*h*DP)
    ctx2 = _mha_heads(q2, 0, kv2, 0, hdp, None, h)
    attended = jnp.dot(ctx2.astype(jnp.bfloat16), wf2_ref[0],
                       preferred_element_type=jnp.float32) + vecs[3:4]
    an2 = _layer_norm(an1 + attended, vecs[4:5], vecs[5:6], d_model)

    # feed forward
    h1 = jnp.dot(an2.astype(jnp.bfloat16), w1_ref[0],
                 preferred_element_type=jnp.float32) + vecs[6:7]
    h1 = jnp.maximum(h1, 0.0)
    ff = jnp.dot(h1.astype(jnp.bfloat16), w2_ref[0],
                 preferred_element_type=jnp.float32) + vecs[7:8]
    out = _layer_norm(an2 + ff, vecs[8:9], vecs[9:10], d_model)

    carry_ref[...] = out

    # fold the final vocab projection into the last layer step (128 padded lanes,
    # sliced to num_out outside the kernel)
    @pl.when(l == nl - 1)
    def _():
        logits_ref[0] = jnp.dot(out.astype(jnp.bfloat16), wo_ref[...],
                                preferred_element_type=jnp.float32) + bo_ref[...]


# ------------------------------------------------------------------ pallas_call wrappers

def encoder_stack_forward(ep, x, h, d_model):
    B, S, _ = x.shape
    L = ep["wqkv"].shape[0]
    bmap = lambda b, l: (b, 0, 0)          # activation blocks: per-batch, layer-invariant
    lmap = lambda b, l: (l, 0, 0)          # weight blocks: per-layer
    wspec = lambda a: pl.BlockSpec((1,) + a.shape[1:], lmap)
    args = (x, ep["wqkv"], ep["bqkv"], ep["wf"], ep["w1"], ep["w2"], ep["vecs"])
    in_specs = [pl.BlockSpec((1, S, DP), bmap)] + [wspec(a) for a in args[1:]]
    return pl.pallas_call(
        functools.partial(_encoder_stack_kernel, h=h, d_model=d_model),
        out_shape=jax.ShapeDtypeStruct((B, S, DP), jnp.float32),
        grid=(B, L),
        in_specs=in_specs,
        out_specs=pl.BlockSpec((1, S, DP), bmap),
        scratch_shapes=[pltpu.VMEM((S, DP), jnp.float32)],
        compiler_params=pltpu.CompilerParams(
            dimension_semantics=("parallel", "arbitrary")),
    )(*args)


def decoder_stack_forward(dp, enc, dec, mask, wo, bo, h, d_model):
    B, Sd, _ = dec.shape
    Se = enc.shape[1]
    L = dp["wqkv1"].shape[0]
    bmap = lambda b, l: (b, 0, 0)
    lmap = lambda b, l: (l, 0, 0)
    cmap = lambda b, l: (0, 0)
    wspec = lambda a: pl.BlockSpec((1,) + a.shape[1:], lmap)
    weight_args = (dp["wqkv1"], dp["bqkv1"], dp["wf1"],
                   dp["wq2"], dp["bq2"], dp["wkv2"], dp["bkv2"], dp["wf2"],
                   dp["w1"], dp["w2"], dp["vecs"])
    in_specs = ([pl.BlockSpec((1, Sd, DP), bmap),
                 pl.BlockSpec((1, Se, DP), bmap),
                 pl.BlockSpec(mask.shape, cmap)]
                + [wspec(a) for a in weight_args]
                + [pl.BlockSpec(wo.shape, cmap), pl.BlockSpec(bo.shape, cmap)])
    return pl.pallas_call(
        functools.partial(_decoder_stack_kernel, h=h, d_model=d_model),
        out_shape=jax.ShapeDtypeStruct((B, Sd, DP), jnp.float32),
        grid=(B, L),
        in_specs=in_specs,
        out_specs=pl.BlockSpec((1, Sd, DP), bmap),
        scratch_shapes=[pltpu.VMEM((Sd, DP), jnp.float32)],
        compiler_params=pltpu.CompilerParams(
            dimension_semantics=("parallel", "arbitrary")),
    )(dec, enc, mask, *weight_args, wo, bo)


# ------------------------------------------------------------------ plain-JAX glue

def positional_encoding(max_len, d_model):
    pos = jnp.arange(max_len, dtype=jnp.float32)[:, None]
    even = jnp.arange(0, d_model, 2, dtype=jnp.float32)
    odd = jnp.arange(1, d_model, 2, dtype=jnp.float32)
    pe = jnp.zeros((max_len, d_model), jnp.float32)
    pe = pe.at[:, 0::2].set(jnp.sin(pos / (10000.0 ** (even / d_model))))
    pe = pe.at[:, 1::2].set(jnp.cos(pos / (10000.0 ** (odd / d_model))))
    return pe


def get_causal_mask(seq_len):
    # TODO(synk): `get_causal_mask` is not defined in the reference source; the standard
    # additive causal mask (large negative strictly above the diagonal) is assumed.
    i = jnp.arange(seq_len)
    return jnp.where(i[None, :] > i[:, None], -1e9, 0.0).astype(jnp.float32)


def transformer_forward(params, encoder_input, decoder_input, d_model, h, num_out):
    B, Se = encoder_input.shape
    _, Sd = decoder_input.shape
    pe = positional_encoding(max(Se, Sd), d_model)

    enc0 = jnp.take(params["input_emb"], encoder_input, axis=0) + pe[:Se]
    enc0 = jnp.pad(enc0, ((0, 0), (0, 0), (0, DP - d_model)))            # (B, Se, DP)
    enc = encoder_stack_forward(params["enc"], enc0, h, d_model)

    dec0 = jnp.take(params["output_emb"], decoder_input, axis=0) + pe[:Sd]
    dec0 = jnp.pad(dec0, ((0, 0), (0, 0), (0, DP - d_model)))            # (B, Sd, DP)
    mask = get_causal_mask(Sd)

    logits = decoder_stack_forward(params["dec"], enc, dec0, mask,
                                   params["wo"], params["bo"], h, d_model)
    return logits[:, :, :num_out]


# ------------------------------------------------------------------ parameter init
# Weights are initialized in the torch (head-interleaved) layout, then re-laid-out ONCE:
# each head gets its own 128-lane column group (zero-padded from d_model to 128), rows
# corresponding to the padded residual-stream lanes are zero, and the 1/sqrt(d_model)
# attention scale is folded into the Q projection.  Pure reparametrization of the module.

def init_linear(key, in_dim, out_dim):
    k1, k2 = jax.random.split(key)
    bound = 1.0 / math.sqrt(in_dim)
    w = jax.random.uniform(k1, (in_dim, out_dim), jnp.float32, -bound, bound)
    b = jax.random.uniform(k2, (out_dim,), jnp.float32, -bound, bound)
    return w, b


def _pad_to(x, shape):
    return jnp.pad(x, [(0, t - s) for s, t in zip(x.shape, shape)])


def _qkv_cols(w, b, d_model, h):
    # torch col f = d*h + head  ->  col head*DP + d (zero-padded); rows padded to DP.
    in_dim = w.shape[0]
    w3 = _pad_to(w.reshape(in_dim, d_model, h).transpose(0, 2, 1), (in_dim, h, DP))
    wn = _pad_to(w3.reshape(in_dim, h * DP), (DP, h * DP))
    bn = _pad_to(b.reshape(d_model, h).T, (h, DP)).reshape(1, h * DP)
    return wn, bn


def _final_rows(w, b, d_model, h):
    # torch row g = d*h + head  ->  row head*DP + d (zero-padded); cols padded to DP.
    out_dim = w.shape[1]
    w3 = _pad_to(w.reshape(d_model, h, out_dim).transpose(1, 0, 2), (h, DP, out_dim))
    wn = _pad_to(w3.reshape(h * DP, out_dim), (h * DP, DP))
    bn = _pad_to(b.reshape(1, -1), (1, DP))
    return wn, bn


def init_mha(key, d_model, h, fused_qkv):
    ks = jax.random.split(key, 4)
    wq, bq = init_linear(ks[0], d_model, d_model * h)
    wk, bk = init_linear(ks[1], d_model, d_model * h)
    wv, bv = init_linear(ks[2], d_model, d_model * h)
    wf, bf = init_linear(ks[3], d_model * h, d_model)
    scale = 1.0 / math.sqrt(d_model)                       # fold score scale into Q proj
    wq, bq = _qkv_cols(wq * scale, bq * scale, d_model, h)
    wk, bk = _qkv_cols(wk, bk, d_model, h)
    wv, bv = _qkv_cols(wv, bv, d_model, h)
    wf, bf = _final_rows(wf, bf, d_model, h)
    if fused_qkv:
        return dict(wqkv=jnp.concatenate([wq, wk, wv], axis=1).astype(jnp.bfloat16),
                    bqkv=jnp.concatenate([bq, bk, bv], axis=1),
                    wf=wf.astype(jnp.bfloat16), bf=bf)
    return dict(wq=wq.astype(jnp.bfloat16), bq=bq,
                wkv=jnp.concatenate([wk, wv], axis=1).astype(jnp.bfloat16),
                bkv=jnp.concatenate([bk, bv], axis=1),
                wf=wf.astype(jnp.bfloat16), bf=bf)


def init_ff(key, d_model):
    k1, k2 = jax.random.split(key)
    dff = 4 * d_model                                      # == DP (asserted below)
    w1, b1 = init_linear(k1, d_model, dff)
    w2, b2 = init_linear(k2, dff, d_model)
    return dict(w1=_pad_to(w1, (DP, dff)).astype(jnp.bfloat16),
                b1=b1.reshape(1, dff),
                w2=_pad_to(w2, (dff, DP)).astype(jnp.bfloat16),
                b2=_pad_to(b2.reshape(1, -1), (1, DP)))


def _ln_params(d_model):
    gamma = _pad_to(jnp.ones((1, d_model), jnp.float32), (1, DP))   # padded lanes = 0
    beta = jnp.zeros((1, DP), jnp.float32)
    return gamma, beta


def init_encoder_layer(key, d_model, h):
    k1, k2 = jax.random.split(key)
    mha = init_mha(k1, d_model, h, fused_qkv=True)
    ff = init_ff(k2, d_model)
    g1, be1 = _ln_params(d_model)
    g2, be2 = _ln_params(d_model)
    pad = jnp.zeros((1, DP), jnp.float32)
    # rows: 0=bf 1=gamma1 2=beta1 3=ff.b1 4=ff.b2 5=gamma2 6=beta2 7=pad
    vecs = jnp.concatenate([mha["bf"], g1, be1, ff["b1"], ff["b2"], g2, be2, pad], axis=0)
    return dict(wqkv=mha["wqkv"], bqkv=mha["bqkv"], wf=mha["wf"],
                w1=ff["w1"], w2=ff["w2"], vecs=vecs)


def init_decoder_layer(key, d_model, h):
    k1, k2, k3 = jax.random.split(key, 3)
    m1 = init_mha(k1, d_model, h, fused_qkv=True)          # masked self-attention
    m2 = init_mha(k2, d_model, h, fused_qkv=False)         # cross-attention
    ff = init_ff(k3, d_model)
    g1, be1 = _ln_params(d_model)
    g2, be2 = _ln_params(d_model)
    g3, be3 = _ln_params(d_model)
    pad = jnp.zeros((1, DP), jnp.float32)
    # rows: 0=bf1 1=g1 2=be1 3=bf2 4=g2 5=be2 6=ff.b1 7=ff.b2 8=g3 9=be3 10..15=pad
    vecs = jnp.concatenate([m1["bf"], g1, be1, m2["bf"], g2, be2,
                            ff["b1"], ff["b2"], g3, be3] + [pad] * 6, axis=0)
    return dict(wqkv1=m1["wqkv"], bqkv1=m1["bqkv"], wf1=m1["wf"],
                wq2=m2["wq"], bq2=m2["bq"], wkv2=m2["wkv"], bkv2=m2["bkv"], wf2=m2["wf"],
                w1=ff["w1"], w2=ff["w2"], vecs=vecs)


def _stack_layers(layers):
    return jax.tree_util.tree_map(lambda *xs: jnp.stack(xs, axis=0), *layers)


def init_transformer(key, num_in, num_out, d_model, h, num_stack):
    assert d_model <= DP and 4 * d_model == DP and num_out <= DP, \
        "this script assumes d_model*4 == 128 and num_out <= 128 for the lane packing"
    keys = jax.random.split(key, 3 + 2 * num_stack)
    enc_layers = [init_encoder_layer(keys[3 + i], d_model, h) for i in range(num_stack)]
    dec_layers = [init_decoder_layer(keys[3 + num_stack + i], d_model, h)
                  for i in range(num_stack)]
    # final vocab projection, padded to 128 lanes (unmasked stores; sliced in JAX)
    wo, bo = init_linear(keys[2], d_model, num_out)
    return dict(
        input_emb=jax.random.normal(keys[0], (num_in, d_model), jnp.float32),
        output_emb=jax.random.normal(keys[1], (num_out, d_model), jnp.float32),
        enc=_stack_layers(enc_layers),
        dec=_stack_layers(dec_layers),
        wo=_pad_to(wo, (DP, DP)).astype(jnp.bfloat16),
        bo=_pad_to(bo.reshape(1, -1), (1, DP)))


# --------------------------------------------------------------------- main

if __name__ == "__main__":
    D_MODEL = 32
    H = 8
    NUM_STACK = 2
    NUM_IN_EMB = 11
    NUM_OUT_EMB = 13
    B = 2
    S_ENC = 10
    S_DEC = 8

    root = jax.random.PRNGKey(0)
    kp, ke, kd = jax.random.split(root, 3)
    params = init_transformer(kp, NUM_IN_EMB, NUM_OUT_EMB, D_MODEL, H, NUM_STACK)

    encoder_tokens = jax.random.randint(ke, (B, S_ENC), 0, NUM_IN_EMB, dtype=jnp.int32)
    decoder_tokens = jax.random.randint(kd, (B, S_DEC), 0, NUM_OUT_EMB, dtype=jnp.int32)

    fwd = jax.jit(functools.partial(transformer_forward,
                                    d_model=D_MODEL, h=H, num_out=NUM_OUT_EMB))
    out = jax.block_until_ready(fwd(params, encoder_tokens, decoder_tokens))

    assert out.shape == (B, S_DEC, NUM_OUT_EMB), out.shape
    assert bool(jnp.all(jnp.isfinite(out)))
    print("KERNEL_OK")
</pallas_src>

<mosaic_0001>
module attributes {stable_mosaic.version = 11 : i64} {
  func.func @_encoder_stack_kernel(%arg0: i32, %arg1: i32, %arg2: memref<1x10x128xf32, #tpu.memory_space<vmem>>, %arg3: memref<1x128x3072xbf16, #tpu.memory_space<vmem>>, %arg4: memref<1x1x3072xf32, #tpu.memory_space<vmem>>, %arg5: memref<1x1024x128xbf16, #tpu.memory_space<vmem>>, %arg6: memref<1x128x128xbf16, #tpu.memory_space<vmem>>, %arg7: memref<1x128x128xbf16, #tpu.memory_space<vmem>>, %arg8: memref<1x8x128xf32, #tpu.memory_space<vmem>>, %arg9: memref<1x10x128xf32, #tpu.memory_space<vmem>>, %arg10: memref<10x128xf32, #tpu.memory_space<vmem>>) attributes {dimension_semantics = [#tpu.dimension_semantics<parallel>, #tpu.dimension_semantics<arbitrary>], iteration_bounds = array<i64: 2, 2>, scalar_prefetch = 0 : i64, scratch_operands = 1 : i64, tpu.core_type = #tpu.core_type<tc>, window_params = [{transform_indices = @transform_0, window_bounds = array<i64: 1, 10, 128>}, {transform_indices = @transform_1, window_bounds = array<i64: 1, 128, 3072>}, {transform_indices = @transform_2, window_bounds = array<i64: 1, 1, 3072>}, {transform_indices = @transform_3, window_bounds = array<i64: 1, 1024, 128>}, {transform_indices = @transform_4, window_bounds = array<i64: 1, 128, 128>}, {transform_indices = @transform_5, window_bounds = array<i64: 1, 128, 128>}, {transform_indices = @transform_6, window_bounds = array<i64: 1, 8, 128>}, {transform_indices = @transform_7, window_bounds = array<i64: 1, 10, 128>}]} {
    %c0_i32 = arith.constant 0 : i32
    %0 = arith.cmpi eq, %arg1, %c0_i32 : i32
    %1 = arith.extui %0 : i1 to i32
    %c0_i32_0 = arith.constant 0 : i32
    %2 = arith.cmpi ne, %1, %c0_i32_0 : i32
    scf.if %2 {
      %c0_69 = arith.constant 0 : index
      %c0_70 = arith.constant 0 : index
      %c0_71 = arith.constant 0 : index
      %244 = vector.load %arg2[%c0_69, %c0_70, %c0_71] : memref<1x10x128xf32, #tpu.memory_space<vmem>>, vector<1x10x128xf32>
      %245 = vector.shape_cast %244 : vector<1x10x128xf32> to vector<10x128xf32>
      %c0_72 = arith.constant 0 : index
      %c0_73 = arith.constant 0 : index
      %246 = vector.load %arg10[%c0_72, %c0_73] : memref<10x128xf32, #tpu.memory_space<vmem>>, vector<10x128xf32>
      tpu.vector_store %arg10[%c0_72, %c0_73], %245 {strides = array<i32>} : memref<10x128xf32, #tpu.memory_space<vmem>>, vector<10x128xf32>,
    } else {
    }
    %c0 = arith.constant 0 : index
    %c0_1 = arith.constant 0 : index
    %3 = vector.load %arg10[%c0, %c0_1] : memref<10x128xf32, #tpu.memory_space<vmem>>, vector<10x128xf32>
    %c0_2 = arith.constant 0 : index
    %c0_3 = arith.constant 0 : index
    %c0_4 = arith.constant 0 : index
    %4 = vector.load %arg8[%c0_2, %c0_3, %c0_4] : memref<1x8x128xf32, #tpu.memory_space<vmem>>, vector<1x8x128xf32>
    %5 = vector.shape_cast %4 : vector<1x8x128xf32> to vector<8x128xf32>
    %6 = arith.truncf %3 : vector<10x128xf32> to vector<10x128xbf16>
    %c0_5 = arith.constant 0 : index
    %c0_6 = arith.constant 0 : index
    %c0_7 = arith.constant 0 : index
    %7 = vector.load %arg3[%c0_5, %c0_6, %c0_7] : memref<1x128x3072xbf16, #tpu.memory_space<vmem>>, vector<1x128x3072xbf16>
    %8 = vector.shape_cast %7 : vector<1x128x3072xbf16> to vector<128x3072xbf16>
    %cst = arith.constant dense<0.000000e+00> : vector<10x3072xf32>
    %9 = tpu.matmul %6, %8, %cst {dimension_numbers = #tpu.dot_dimension_numbers<[1], [0], [0], [1], [0, 0, 1, 1], [], []>} : vector<10x128xbf16>, vector<128x3072xbf16>, vector<10x3072xf32> -> vector<10x3072xf32>
    %c0_8 = arith.constant 0 : index
    %c0_9 = arith.constant 0 : index
    %c0_10 = arith.constant 0 : index
    %10 = vector.load %arg4[%c0_8, %c0_9, %c0_10] : memref<1x1x3072xf32, #tpu.memory_space<vmem>>, vector<1x1x3072xf32>
    %11 = vector.shape_cast %10 : vector<1x1x3072xf32> to vector<1x3072xf32>
    %12 = vector.broadcast %11 : vector<1x3072xf32> to vector<10x3072xf32>
    %13 = arith.addf %9, %12 : vector<10x3072xf32>
    %14 = vector.extract_strided_slice %13 {offsets = [0, 0], sizes = [10, 128], strides = [1, 1]} : vector<10x3072xf32> to vector<10x128xf32>
    %15 = arith.truncf %14 : vector<10x128xf32> to vector<10x128xbf16>
    %16 = vector.extract_strided_slice %13 {offsets = [0, 1024], sizes = [10, 128], strides = [1, 1]} : vector<10x3072xf32> to vector<10x128xf32>
    %17 = arith.truncf %16 : vector<10x128xf32> to vector<10x128xbf16>
    %18 = vector.extract_strided_slice %13 {offsets = [0, 2048], sizes = [10, 128], strides = [1, 1]} : vector<10x3072xf32> to vector<10x128xf32>
    %19 = arith.truncf %18 : vector<10x128xf32> to vector<10x128xbf16>
    %cst_11 = arith.constant dense<0.000000e+00> : vector<10x10xf32>
    %20 = tpu.matmul %15, %17, %cst_11 {dimension_numbers = #tpu.dot_dimension_numbers<[1], [1], [0], [0], [0, 0, 1, 0], [], []>} : vector<10x128xbf16>, vector<10x128xbf16>, vector<10x10xf32> -> vector<10x10xf32>
    %cst_12 = arith.constant dense<0xFF800000> : vector<10xf32>
    %21 = vector.multi_reduction <maximumf>, %20, %cst_12 [1] : vector<10x10xf32> to vector<10xf32>
    %22 = vector.shape_cast %21 : vector<10xf32> to vector<10x1xf32>
    %23 = vector.broadcast %22 : vector<10x1xf32> to vector<10x10xf32>
    %24 = arith.subf %20, %23 : vector<10x10xf32>
    %25 = math.exp %24 : vector<10x10xf32>
    %cst_13 = arith.constant dense<0.000000e+00> : vector<10xf32>
    %26 = vector.multi_reduction <add>, %25, %cst_13 [1] : vector<10x10xf32> to vector<10xf32>
    %27 = vector.shape_cast %26 : vector<10xf32> to vector<10x1xf32>
    %28 = tpu.reciprocal %27 {approx = true} : vector<10x1xf32> -> vector<10x1xf32>
    %29 = vector.broadcast %28 : vector<10x1xf32> to vector<10x10xf32>
    %30 = arith.mulf %25, %29 : vector<10x10xf32>
    %31 = arith.truncf %30 : vector<10x10xf32> to vector<10x10xbf16>
    %cst_14 = arith.constant dense<0.000000e+00> : vector<10x128xf32>
    %32 = tpu.matmul %31, %19, %cst_14 {dimension_numbers = #tpu.dot_dimension_numbers<[1], [0], [0], [1], [0, 0, 1, 1], [], []>} : vector<10x10xbf16>, vector<10x128xbf16>, vector<10x128xf32> -> vector<10x128xf32>
    %33 = vector.extract_strided_slice %13 {offsets = [0, 128], sizes = [10, 128], strides = [1, 1]} : vector<10x3072xf32> to vector<10x128xf32>
    %34 = arith.truncf %33 : vector<10x128xf32> to vector<10x128xbf16>
    %35 = vector.extract_strided_slice %13 {offsets = [0, 1152], sizes = [10, 128], strides = [1, 1]} : vector<10x3072xf32> to vector<10x128xf32>
    %36 = arith.truncf %35 : vector<10x128xf32> to vector<10x128xbf16>
    %37 = vector.extract_strided_slice %13 {offsets = [0, 2176], sizes = [10, 128], strides = [1, 1]} : vector<10x3072xf32> to vector<10x128xf32>
    %38 = arith.truncf %37 : vector<10x128xf32> to vector<10x128xbf16>
    %cst_15 = arith.constant dense<0.000000e+00> : vector<10x10xf32>
    %39 = tpu.matmul %34, %36, %cst_15 {dimension_numbers = #tpu.dot_dimension_numbers<[1], [1], [0], [0], [0, 0, 1, 0], [], []>} : vector<10x128xbf16>, vector<10x128xbf16>, vector<10x10xf32> -> vector<10x10xf32>
    %cst_16 = arith.constant dense<0xFF800000> : vector<10xf32>
    %40 = vector.multi_reduction <maximumf>, %39, %cst_16 [1] : vector<10x10xf32> to vector<10xf32>
    %41 = vector.shape_cast %40 : vector<10xf32> to vector<10x1xf32>
    %42 = vector.broadcast %41 : vector<10x1xf32> to vector<10x10xf32>
    %43 = arith.subf %39, %42 : vector<10x10xf32>
    %44 = math.exp %43 : vector<10x10xf32>
    %cst_17 = arith.constant dense<0.000000e+00> : vector<10xf32>
    %45 = vector.multi_reduction <add>, %44, %cst_17 [1] : vector<10x10xf32> to vector<10xf32>
    %46 = vector.shape_cast %45 : vector<10xf32> to vector<10x1xf32>
    %47 = tpu.reciprocal %46 {approx = true} : vector<10x1xf32> -> vector<10x1xf32>
    %48 = vector.broadcast %47 : vector<10x1xf32> to vector<10x10xf32>
    %49 = arith.mulf %44, %48 : vector<10x10xf32>
    %50 = arith.truncf %49 : vector<10x10xf32> to vector<10x10xbf16>
    %cst_18 = arith.constant dense<0.000000e+00> : vector<10x128xf32>
    %51 = tpu.matmul %50, %38, %cst_18 {dimension_numbers = #tpu.dot_dimension_numbers<[1], [0], [0], [1], [0, 0, 1, 1], [], []>} : vector<10x10xbf16>, vector<10x128xbf16>, vector<10x128xf32> -> vector<10x128xf32>
    %52 = vector.extract_strided_slice %13 {offsets = [0, 256], sizes = [10, 128], strides = [1, 1]} : vector<10x3072xf32> to vector<10x128xf32>
    %53 = arith.truncf %52 : vector<10x128xf32> to vector<10x128xbf16>
    %54 = vector.extract_strided_slice %13 {offsets = [0, 1280], sizes = [10, 128], strides = [1, 1]} : vector<10x3072xf32> to vector<10x128xf32>
    %55 = arith.truncf %54 : vector<10x128xf32> to vector<10x128xbf16>
    %56 = vector.extract_strided_slice %13 {offsets = [0, 2304], sizes = [10, 128], strides = [1, 1]} : vector<10x3072xf32> to vector<10x128xf32>
    %57 = arith.truncf %56 : vector<10x128xf32> to vector<10x128xbf16>
    %cst_19 = arith.constant dense<0.000000e+00> : vector<10x10xf32>
    %58 = tpu.matmul %53, %55, %cst_19 {dimension_numbers = #tpu.dot_dimension_numbers<[1], [1], [0], [0], [0, 0, 1, 0], [], []>} : vector<10x128xbf16>, vector<10x128xbf16>, vector<10x10xf32> -> vector<10x10xf32>
    %cst_20 = arith.constant dense<0xFF800000> : vector<10xf32>
    %59 = vector.multi_reduction <maximumf>, %58, %cst_20 [1] : vector<10x10xf32> to vector<10xf32>
    %60 = vector.shape_cast %59 : vector<10xf32> to vector<10x1xf32>
    %61 = vector.broadcast %60 : vector<10x1xf32> to vector<10x10xf32>
    %62 = arith.subf %58, %61 : vector<10x10xf32>
    %63 = math.exp %62 : vector<10x10xf32>
    %cst_21 = arith.constant dense<0.000000e+00> : vector<10xf32>
    %64 = vector.multi_reduction <add>, %63, %cst_21 [1] : vector<10x10xf32> to vector<10xf32>
    %65 = vector.shape_cast %64 : vector<10xf32> to vector<10x1xf32>
    %66 = tpu.reciprocal %65 {approx = true} : vector<10x1xf32> -> vector<10x1xf32>
    %67 = vector.broadcast %66 : vector<10x1xf32> to vector<10x10xf32>
    %68 = arith.mulf %63, %67 : vector<10x10xf32>
    %69 = arith.truncf %68 : vector<10x10xf32> to vector<10x10xbf16>
    %cst_22 = arith.constant dense<0.000000e+00> : vector<10x128xf32>
    %70 = tpu.matmul %69, %57, %cst_22 {dimension_numbers = #tpu.dot_dimension_numbers<[1], [0], [0], [1], [0, 0, 1, 1], [], []>} : vector<10x10xbf16>, vector<10x128xbf16>, vector<10x128xf32> -> vector<10x128xf32>
    %71 = vector.extract_strided_slice %13 {offsets = [0, 384], sizes = [10, 128], strides = [1, 1]} : vector<10x3072xf32> to vector<10x128xf32>
    %72 = arith.truncf %71 : vector<10x128xf32> to vector<10x128xbf16>
    %73 = vector.extract_strided_slice %13 {offsets = [0, 1408], sizes = [10, 128], strides = [1, 1]} : vector<10x3072xf32> to vector<10x128xf32>
    %74 = arith.truncf %73 : vector<10x128xf32> to vector<10x128xbf16>
    %75 = vector.extract_strided_slice %13 {offsets = [0, 2432], sizes = [10, 128], strides = [1, 1]} : vector<10x3072xf32> to vector<10x128xf32>
    %76 = arith.truncf %75 : vector<10x128xf32> to vector<10x128xbf16>
    %cst_23 = arith.constant dense<0.000000e+00> : vector<10x10xf32>
    %77 = tpu.matmul %72, %74, %cst_23 {dimension_numbers = #tpu.dot_dimension_numbers<[1], [1], [0], [0], [0, 0, 1, 0], [], []>} : vector<10x128xbf16>, vector<10x128xbf16>, vector<10x10xf32> -> vector<10x10xf32>
    %cst_24 = arith.constant dense<0xFF800000> : vector<10xf32>
    %78 = vector.multi_reduction <maximumf>, %77, %cst_24 [1] : vector<10x10xf32> to vector<10xf32>
    %79 = vector.shape_cast %78 : vector<10xf32> to vector<10x1xf32>
    %80 = vector.broadcast %79 : vector<10x1xf32> to vector<10x10xf32>
    %81 = arith.subf %77, %80 : vector<10x10xf32>
    %82 = math.exp %81 : vector<10x10xf32>
    %cst_25 = arith.constant dense<0.000000e+00> : vector<10xf32>
    %83 = vector.multi_reduction <add>, %82, %cst_25 [1] : vector<10x10xf32> to vector<10xf32>
    %84 = vector.shape_cast %83 : vector<10xf32> to vector<10x1xf32>
    %85 = tpu.reciprocal %84 {approx = true} : vector<10x1xf32> -> vector<10x1xf32>
    %86 = vector.broadcast %85 : vector<10x1xf32> to vector<10x10xf32>
    %87 = arith.mulf %82, %86 : vector<10x10xf32>
    %88 = arith.truncf %87 : vector<10x10xf32> to vector<10x10xbf16>
    %cst_26 = arith.constant dense<0.000000e+00> : vector<10x128xf32>
    %89 = tpu.matmul %88, %76, %cst_26 {dimension_numbers = #tpu.dot_dimension_numbers<[1], [0], [0], [1], [0, 0, 1, 1], [], []>} : vector<10x10xbf16>, vector<10x128xbf16>, vector<10x128xf32> -> vector<10x128xf32>
    %90 = vector.extract_strided_slice %13 {offsets = [0, 512], sizes = [10, 128], strides = [1, 1]} : vector<10x3072xf32> to vector<10x128xf32>
    %91 = arith.truncf %90 : vector<10x128xf32> to vector<10x128xbf16>
    %92 = vector.extract_strided_slice %13 {offsets = [0, 1536], sizes = [10, 128], strides = [1, 1]} : vector<10x3072xf32> to vector<10x128xf32>
    %93 = arith.truncf %92 : vector<10x128xf32> to vector<10x128xbf16>
    %94 = vector.extract_strided_slice %13 {offsets = [0, 2560], sizes = [10, 128], strides = [1, 1]} : vector<10x3072xf32> to vector<10x128xf32>
    %95 = arith.truncf %94 : vector<10x128xf32> to vector<10x128xbf16>
    %cst_27 = arith.constant dense<0.000000e+00> : vector<10x10xf32>
    %96 = tpu.matmul %91, %93, %cst_27 {dimension_numbers = #tpu.dot_dimension_numbers<[1], [1], [0], [0], [0, 0, 1, 0], [], []>} : vector<10x128xbf16>, vector<10x128xbf16>, vector<10x10xf32> -> vector<10x10xf32>
    %cst_28 = arith.constant dense<0xFF800000> : vector<10xf32>
    %97 = vector.multi_reduction <maximumf>, %96, %cst_28 [1] : vector<10x10xf32> to vector<10xf32>
    %98 = vector.shape_cast %97 : vector<10xf32> to vector<10x1xf32>
    %99 = vector.broadcast %98 : vector<10x1xf32> to vector<10x10xf32>
    %100 = arith.subf %96, %99 : vector<10x10xf32>
    %101 = math.exp %100 : vector<10x10xf32>
    %cst_29 = arith.constant dense<0.000000e+00> : vector<10xf32>
    %102 = vector.multi_reduction <add>, %101, %cst_29 [1] : vector<10x10xf32> to vector<10xf32>
    %103 = vector.shape_cast %102 : vector<10xf32> to vector<10x1xf32>
    %104 = tpu.reciprocal %103 {approx = true} : vector<10x1xf32> -> vector<10x1xf32>
    %105 = vector.broadcast %104 : vector<10x1xf32> to vector<10x10xf32>
    %106 = arith.mulf %101, %105 : vector<10x10xf32>
    %107 = arith.truncf %106 : vector<10x10xf32> to vector<10x10xbf16>
    %cst_30 = arith.constant dense<0.000000e+00> : vector<10x128xf32>
    %108 = tpu.matmul %107, %95, %cst_30 {dimension_numbers = #tpu.dot_dimension_numbers<[1], [0], [0], [1], [0, 0, 1, 1], [], []>} : vector<10x10xbf16>, vector<10x128xbf16>, vector<10x128xf32> -> vector<10x128xf32>
    %109 = vector.extract_strided_slice %13 {offsets = [0, 640], sizes = [10, 128], strides = [1, 1]} : vector<10x3072xf32> to vector<10x128xf32>
    %110 = arith.truncf %109 : vector<10x128xf32> to vector<10x128xbf16>
    %111 = vector.extract_strided_slice %13 {offsets = [0, 1664], sizes = [10, 128], strides = [1, 1]} : vector<10x3072xf32> to vector<10x128xf32>
    %112 = arith.truncf %111 : vector<10x128xf32> to vector<10x128xbf16>
    %113 = vector.extract_strided_slice %13 {offsets = [0, 2688], sizes = [10, 128], strides = [1, 1]} : vector<10x3072xf32> to vector<10x128xf32>
    %114 = arith.truncf %113 : vector<10x128xf32> to vector<10x128xbf16>
    %cst_31 = arith.constant dense<0.000000e+00> : vector<10x10xf32>
    %115 = tpu.matmul %110, %112, %cst_31 {dimension_numbers = #tpu.dot_dimension_numbers<[1], [1], [0], [0], [0, 0, 1, 0], [], []>} : vector<10x128xbf16>, vector<10x128xbf16>, vector<10x10xf32> -> vector<10x10xf32>
    %cst_32 = arith.constant dense<0xFF800000> : vector<10xf32>
    %116 = vector.multi_reduction <maximumf>, %115, %cst_32 [1] : vector<10x10xf32> to vector<10xf32>
    %117 = vector.shape_cast %116 : vector<10xf32> to vector<10x1xf32>
    %118 = vector.broadcast %117 : vector<10x1xf32> to vector<10x10xf32>
    %119 = arith.subf %115, %118 : vector<10x10xf32>
    %120 = math.exp %119 : vector<10x10xf32>
    %cst_33 = arith.constant dense<0.000000e+00> : vector<10xf32>
    %121 = vector.multi_reduction <add>, %120, %cst_33 [1] : vector<10x10xf32> to vector<10xf32>
    %122 = vector.shape_cast %121 : vector<10xf32> to vector<10x1xf32>
    %123 = tpu.reciprocal %122 {approx = true} : vector<10x1xf32> -> vector<10x1xf32>
    %124 = vector.broadcast %123 : vector<10x1xf32> to vector<10x10xf32>
    %125 = arith.mulf %120, %124 : vector<10x10xf32>
    %126 = arith.truncf %125 : vector<10x10xf32> to vector<10x10xbf16>
    %cst_34 = arith.constant dense<0.000000e+00> : vector<10x128xf32>
    %127 = tpu.matmul %126, %114, %cst_34 {dimension_numbers = #tpu.dot_dimension_numbers<[1], [0], [0], [1], [0, 0, 1, 1], [], []>} : vector<10x10xbf16>, vector<10x128xbf16>, vector<10x128xf32> -> vector<10x128xf32>
    %128 = vector.extract_strided_slice %13 {offsets = [0, 768], sizes = [10, 128], strides = [1, 1]} : vector<10x3072xf32> to vector<10x128xf32>
    %129 = arith.truncf %128 : vector<10x128xf32> to vector<10x128xbf16>
    %130 = vector.extract_strided_slice %13 {offsets = [0, 1792], sizes = [10, 128], strides = [1, 1]} : vector<10x3072xf32> to vector<10x128xf32>
    %131 = arith.truncf %130 : vector<10x128xf32> to vector<10x128xbf16>
    %132 = vector.extract_strided_slice %13 {offsets = [0, 2816], sizes = [10, 128], strides = [1, 1]} : vector<10x3072xf32> to vector<10x128xf32>
    %133 = arith.truncf %132 : vector<10x128xf32> to vector<10x128xbf16>
    %cst_35 = arith.constant dense<0.000000e+00> : vector<10x10xf32>
    %134 = tpu.matmul %129, %131, %cst_35 {dimension_numbers = #tpu.dot_dimension_numbers<[1], [1], [0], [0], [0, 0, 1, 0], [], []>} : vector<10x128xbf16>, vector<10x128xbf16>, vector<10x10xf32> -> vector<10x10xf32>
    %cst_36 = arith.constant dense<0xFF800000> : vector<10xf32>
    %135 = vector.multi_reduction <maximumf>, %134, %cst_36 [1] : vector<10x10xf32> to vector<10xf32>
    %136 = vector.shape_cast %135 : vector<10xf32> to vector<10x1xf32>
    %137 = vector.broadcast %136 : vector<10x1xf32> to vector<10x10xf32>
    %138 = arith.subf %134, %137 : vector<10x10xf32>
    %139 = math.exp %138 : vector<10x10xf32>
    %cst_37 = arith.constant dense<0.000000e+00> : vector<10xf32>
    %140 = vector.multi_reduction <add>, %139, %cst_37 [1] : vector<10x10xf32> to vector<10xf32>
    %141 = vector.shape_cast %140 : vector<10xf32> to vector<10x1xf32>
    %142 = tpu.reciprocal %141 {approx = true} : vector<10x1xf32> -> vector<10x1xf32>
    %143 = vector.broadcast %142 : vector<10x1xf32> to vector<10x10xf32>
    %144 = arith.mulf %139, %143 : vector<10x10xf32>
    %145 = arith.truncf %144 : vector<10x10xf32> to vector<10x10xbf16>
    %cst_38 = arith.constant dense<0.000000e+00> : vector<10x128xf32>
    %146 = tpu.matmul %145, %133, %cst_38 {dimension_numbers = #tpu.dot_dimension_numbers<[1], [0], [0], [1], [0, 0, 1, 1], [], []>} : vector<10x10xbf16>, vector<10x128xbf16>, vector<10x128xf32> -> vector<10x128xf32>
    %147 = vector.extract_strided_slice %13 {offsets = [0, 896], sizes = [10, 128], strides = [1, 1]} : vector<10x3072xf32> to vector<10x128xf32>
    %148 = arith.truncf %147 : vector<10x128xf32> to vector<10x128xbf16>
    %149 = vector.extract_strided_slice %13 {offsets = [0, 1920], sizes = [10, 128], strides = [1, 1]} : vector<10x3072xf32> to vector<10x128xf32>
    %150 = arith.truncf %149 : vector<10x128xf32> to vector<10x128xbf16>
    %151 = vector.extract_strided_slice %13 {offsets = [0, 2944], sizes = [10, 128], strides = [1, 1]} : vector<10x3072xf32> to vector<10x128xf32>
    %152 = arith.truncf %151 : vector<10x128xf32> to vector<10x128xbf16>
    %cst_39 = arith.constant dense<0.000000e+00> : vector<10x10xf32>
    %153 = tpu.matmul %148, %150, %cst_39 {dimension_numbers = #tpu.dot_dimension_numbers<[1], [1], [0], [0], [0, 0, 1, 0], [], []>} : vector<10x128xbf16>, vector<10x128xbf16>, vector<10x10xf32> -> vector<10x10xf32>
    %cst_40 = arith.constant dense<0xFF800000> : vector<10xf32>
    %154 = vector.multi_reduction <maximumf>, %153, %cst_40 [1] : vector<10x10xf32> to vector<10xf32>
    %155 = vector.shape_cast %154 : vector<10xf32> to vector<10x1xf32>
    %156 = vector.broadcast %155 : vector<10x1xf32> to vector<10x10xf32>
    %157 = arith.subf %153, %156 : vector<10x10xf32>
    %158 = math.exp %157 : vector<10x10xf32>
    %cst_41 = arith.constant dense<0.000000e+00> : vector<10xf32>
    %159 = vector.multi_reduction <add>, %158, %cst_41 [1] : vector<10x10xf32> to vector<10xf32>
    %160 = vector.shape_cast %159 : vector<10xf32> to vector<10x1xf32>
    %161 = tpu.reciprocal %160 {approx = true} : vector<10x1xf32> -> vector<10x1xf32>
    %162 = vector.broadcast %161 : vector<10x1xf32> to vector<10x10xf32>
    %163 = arith.mulf %158, %162 : vector<10x10xf32>
    %164 = arith.truncf %163 : vector<10x10xf32> to vector<10x10xbf16>
    %cst_42 = arith.constant dense<0.000000e+00> : vector<10x128xf32>
    %165 = tpu.matmul %164, %152, %cst_42 {dimension_numbers = #tpu.dot_dimension_numbers<[1], [0], [0], [1], [0, 0, 1, 1], [], []>} : vector<10x10xbf16>, vector<10x128xbf16>, vector<10x128xf32> -> vector<10x128xf32>
    %166 = tpu.concatenate %32, %51, %70, %89, %108, %127, %146, %165 in 1 : vector<10x128xf32>, vector<10x128xf32>, vector<10x128xf32>, vector<10x128xf32>, vector<10x128xf32>, vector<10x128xf32>, vector<10x128xf32>, vector<10x128xf32> -> vector<10x1024xf32>
    %167 = arith.truncf %166 : vector<10x1024xf32> to vector<10x1024xbf16>
    %c0_43 = arith.constant 0 : index
    %c0_44 = arith.constant 0 : index
    %c0_45 = arith.constant 0 : index
    %168 = vector.load %arg5[%c0_43, %c0_44, %c0_45] : memref<1x1024x128xbf16, #tpu.memory_space<vmem>>, vector<1x1024x128xbf16>
    %169 = vector.shape_cast %168 : vector<1x1024x128xbf16> to vector<1024x128xbf16>
    %cst_46 = arith.constant dense<0.000000e+00> : vector<10x128xf32>
    %170 = tpu.matmul %167, %169, %cst_46 {dimension_numbers = #tpu.dot_dimension_numbers<[1], [0], [0], [1], [0, 0, 1, 1], [], []>} : vector<10x1024xbf16>, vector<1024x128xbf16>, vector<10x128xf32> -> vector<10x128xf32>
    %171 = vector.extract_strided_slice %5 {offsets = [0, 0], sizes = [1, 128], strides = [1, 1]} : vector<8x128xf32> to vector<1x128xf32>
    %172 = vector.broadcast %171 : vector<1x128xf32> to vector<10x128xf32>
    %173 = arith.addf %170, %172 : vector<10x128xf32>
    %174 = arith.addf %3, %173 : vector<10x128xf32>
    %175 = vector.extract_strided_slice %5 {offsets = [1, 0], sizes = [1, 128], strides = [1, 1]} : vector<8x128xf32> to vector<1x128xf32>
    %176 = vector.extract_strided_slice %5 {offsets = [2, 0], sizes = [1, 128], strides = [1, 1]} : vector<8x128xf32> to vector<1x128xf32>
    %cst_47 = arith.constant dense<0.000000e+00> : vector<10xf32>
    %177 = vector.multi_reduction <add>, %174, %cst_47 [1] : vector<10x128xf32> to vector<10xf32>
    %178 = vector.shape_cast %177 : vector<10xf32> to vector<10x1xf32>
    %cst_48 = arith.constant 3.125000e-02 : f32
    %179 = vector.broadcast %cst_48 : f32 to vector<10x1xf32>
    %180 = arith.mulf %178, %179 : vector<10x1xf32>
    %181 = arith.mulf %174, %174 : vector<10x128xf32>
    %cst_49 = arith.constant dense<0.000000e+00> : vector<10xf32>
    %182 = vector.multi_reduction <add>, %181, %cst_49 [1] : vector<10x128xf32> to vector<10xf32>
    %183 = vector.shape_cast %182 : vector<10xf32> to vector<10x1xf32>
    %cst_50 = arith.constant 3.125000e-02 : f32
    %184 = vector.broadcast %cst_50 : f32 to vector<10x1xf32>
    %185 = arith.mulf %183, %184 : vector<10x1xf32>
    %186 = arith.mulf %180, %180 : vector<10x1xf32>
    %187 = arith.subf %185, %186 : vector<10x1xf32>
    %188 = vector.broadcast %180 : vector<10x1xf32> to vector<10x128xf32>
    %189 = arith.subf %174, %188 : vector<10x128xf32>
    %cst_51 = arith.constant 9.99999974E-6 : f32
    %190 = vector.broadcast %cst_51 : f32 to vector<10x1xf32>
    %191 = arith.addf %187, %190 : vector<10x1xf32>
    %192 = math.rsqrt %191 : vector<10x1xf32>
    %193 = vector.broadcast %192 : vector<10x1xf32> to vector<10x128xf32>
    %194 = arith.mulf %189, %193 : vector<10x128xf32>
    %195 = vector.broadcast %175 : vector<1x128xf32> to vector<10x128xf32>
    %196 = arith.mulf %194, %195 : vector<10x128xf32>
    %197 = vector.broadcast %176 : vector<1x128xf32> to vector<10x128xf32>
    %198 = arith.addf %196, %197 : vector<10x128xf32>
    %199 = arith.truncf %198 : vector<10x128xf32> to vector<10x128xbf16>
    %c0_52 = arith.constant 0 : index
    %c0_53 = arith.constant 0 : index
    %c0_54 = arith.constant 0 : index
    %200 = vector.load %arg6[%c0_52, %c0_53, %c0_54] : memref<1x128x128xbf16, #tpu.memory_space<vmem>>, vector<1x128x128xbf16>
    %201 = vector.shape_cast %200 : vector<1x128x128xbf16> to vector<128x128xbf16>
    %cst_55 = arith.constant dense<0.000000e+00> : vector<10x128xf32>
    %202 = tpu.matmul %199, %201, %cst_55 {dimension_numbers = #tpu.dot_dimension_numbers<[1], [0], [0], [1], [0, 0, 1, 1], [], []>} : vector<10x128xbf16>, vector<128x128xbf16>, vector<10x128xf32> -> vector<10x128xf32>
    %203 = vector.extract_strided_slice %5 {offsets = [3, 0], sizes = [1, 128], strides = [1, 1]} : vector<8x128xf32> to vector<1x128xf32>
    %204 = vector.broadcast %203 : vector<1x128xf32> to vector<10x128xf32>
    %205 = arith.addf %202, %204 : vector<10x128xf32>
    %cst_56 = arith.constant 0.000000e+00 : f32
    %206 = vector.broadcast %cst_56 : f32 to vector<10x128xf32>
    %207 = arith.maximumf %205, %206 : vector<10x128xf32>
    %208 = arith.truncf %207 : vector<10x128xf32> to vector<10x128xbf16>
    %c0_57 = arith.constant 0 : index
    %c0_58 = arith.constant 0 : index
    %c0_59 = arith.constant 0 : index
    %209 = vector.load %arg7[%c0_57, %c0_58, %c0_59] : memref<1x128x128xbf16, #tpu.memory_space<vmem>>, vector<1x128x128xbf16>
    %210 = vector.shape_cast %209 : vector<1x128x128xbf16> to vector<128x128xbf16>
    %cst_60 = arith.constant dense<0.000000e+00> : vector<10x128xf32>
    %211 = tpu.matmul %208, %210, %cst_60 {dimension_numbers = #tpu.dot_dimension_numbers<[1], [0], [0], [1], [0, 0, 1, 1], [], []>} : vector<10x128xbf16>, vector<128x128xbf16>, vector<10x128xf32> -> vector<10x128xf32>
    %212 = vector.extract_strided_slice %5 {offsets = [4, 0], sizes = [1, 128], strides = [1, 1]} : vector<8x128xf32> to vector<1x128xf32>
    %213 = vector.broadcast %212 : vector<1x128xf32> to vector<10x128xf32>
    %214 = arith.addf %211, %213 : vector<10x128xf32>
    %215 = arith.addf %198, %214 : vector<10x128xf32>
    %216 = vector.extract_strided_slice %5 {offsets = [5, 0], sizes = [1, 128], strides = [1, 1]} : vector<8x128xf32> to vector<1x128xf32>
    %217 = vector.extract_strided_slice %5 {offsets = [6, 0], sizes = [1, 128], strides = [1, 1]} : vector<8x128xf32> to vector<1x128xf32>
    %cst_61 = arith.constant dense<0.000000e+00> : vector<10xf32>
    %218 = vector.multi_reduction <add>, %215, %cst_61 [1] : vector<10x128xf32> to vector<10xf32>
    %219 = vector.shape_cast %218 : vector<10xf32> to vector<10x1xf32>
    %cst_62 = arith.constant 3.125000e-02 : f32
    %220 = vector.broadcast %cst_62 : f32 to vector<10x1xf32>
    %221 = arith.mulf %219, %220 : vector<10x1xf32>
    %222 = arith.mulf %215, %215 : vector<10x128xf32>
    %cst_63 = arith.constant dense<0.000000e+00> : vector<10xf32>
    %223 = vector.multi_reduction <add>, %222, %cst_63 [1] : vector<10x128xf32> to vector<10xf32>
    %224 = vector.shape_cast %223 : vector<10xf32> to vector<10x1xf32>
    %cst_64 = arith.constant 3.125000e-02 : f32
    %225 = vector.broadcast %cst_64 : f32 to vector<10x1xf32>
    %226 = arith.mulf %224, %225 : vector<10x1xf32>
    %227 = arith.mulf %221, %221 : vector<10x1xf32>
    %228 = arith.subf %226, %227 : vector<10x1xf32>
    %229 = vector.broadcast %221 : vector<10x1xf32> to vector<10x128xf32>
    %230 = arith.subf %215, %229 : vector<10x128xf32>
    %cst_65 = arith.constant 9.99999974E-6 : f32
    %231 = vector.broadcast %cst_65 : f32 to vector<10x1xf32>
    %232 = arith.addf %228, %231 : vector<10x1xf32>
    %233 = math.rsqrt %232 : vector<10x1xf32>
    %234 = vector.broadcast %233 : vector<10x1xf32> to vector<10x128xf32>
    %235 = arith.mulf %230, %234 : vector<10x128xf32>
    %236 = vector.broadcast %216 : vector<1x128xf32> to vector<10x128xf32>
    %237 = arith.mulf %235, %236 : vector<10x128xf32>
    %238 = vector.broadcast %217 : vector<1x128xf32> to vector<10x128xf32>
    %239 = arith.addf %237, %238 : vector<10x128xf32>
    %c0_66 = arith.constant 0 : index
    %c0_67 = arith.constant 0 : index
    %240 = vector.load %arg10[%c0_66, %c0_67] : memref<10x128xf32, #tpu.memory_space<vmem>>, vector<10x128xf32>
    tpu.vector_store %arg10[%c0_66, %c0_67], %239 {strides = array<i32>} : memref<10x128xf32, #tpu.memory_space<vmem>>, vector<10x128xf32>,
    %c1_i32 = arith.constant 1 : i32
    %241 = arith.cmpi eq, %arg1, %c1_i32 : i32
    %242 = arith.extui %241 : i1 to i32
    %c0_i32_68 = arith.constant 0 : i32
    %243 = arith.cmpi ne, %242, %c0_i32_68 : i32
    scf.if %243 {
      %c0_69 = arith.constant 0 : index
      %c0_70 = arith.constant 0 : index
      %c0_71 = arith.constant 0 : index
      %244 = vector.load %arg9[%c0_69, %c0_70, %c0_71] : memref<1x10x128xf32, #tpu.memory_space<vmem>>, vector<1x10x128xf32>
      %245 = vector.shape_cast %244 : vector<1x10x128xf32> to vector<10x128xf32>
      %246 = vector.shape_cast %239 : vector<10x128xf32> to vector<1x10x128xf32>
      tpu.vector_store %arg9[%c0_69, %c0_70, %c0_71], %246 {strides = array<i32>} : memref<1x10x128xf32, #tpu.memory_space<vmem>>, vector<1x10x128xf32>,
    } else {
    }
    return
  }
  func.func @transform_0(%arg0: i32, %arg1: i32) -> (i32, i32, i32) {
    %c0_i32 = arith.constant 0 : i32
    %c0_i32_0 = arith.constant 0 : i32
    %c0_i32_1 = arith.constant 0 : i32
    return %arg0, %c0_i32, %c0_i32_0 : i32, i32, i32
  }
  func.func @transform_1(%arg0: i32, %arg1: i32) -> (i32, i32, i32) {
    %c0_i32 = arith.constant 0 : i32
    %c0_i32_0 = arith.constant 0 : i32
    %c0_i32_1 = arith.constant 0 : i32
    return %arg1, %c0_i32, %c0_i32_0 : i32, i32, i32
  }
  func.func @transform_2(%arg0: i32, %arg1: i32) -> (i32, i32, i32) {
    %c0_i32 = arith.constant 0 : i32
    %c0_i32_0 = arith.constant 0 : i32
    %c0_i32_1 = arith.constant 0 : i32
    return %arg1, %c0_i32, %c0_i32_0 : i32, i32, i32
  }
  func.func @transform_3(%arg0: i32, %arg1: i32) -> (i32, i32, i32) {
    %c0_i32 = arith.constant 0 : i32
    %c0_i32_0 = arith.constant 0 : i32
    %c0_i32_1 = arith.constant 0 : i32
    return %arg1, %c0_i32, %c0_i32_0 : i32, i32, i32
  }
  func.func @transform_4(%arg0: i32, %arg1: i32) -> (i32, i32, i32) {
    %c0_i32 = arith.constant 0 : i32
    %c0_i32_0 = arith.constant 0 : i32
    %c0_i32_1 = arith.constant 0 : i32
    return %arg1, %c0_i32, %c0_i32_0 : i32, i32, i32
  }
  func.func @transform_5(%arg0: i32, %arg1: i32) -> (i32, i32, i32) {
    %c0_i32 = arith.constant 0 : i32
    %c0_i32_0 = arith.constant 0 : i32
    %c0_i32_1 = arith.constant 0 : i32
    return %arg1, %c0_i32, %c0_i32_0 : i32, i32, i32
  }
  func.func @transform_6(%arg0: i32, %arg1: i32) -> (i32, i32, i32) {
    %c0_i32 = arith.constant 0 : i32
    %c0_i32_0 = arith.constant 0 : i32
    %c0_i32_1 = arith.constant 0 : i32
    return %arg1, %c0_i32, %c0_i32_0 : i32, i32, i32
  }
  func.func @transform_7(%arg0: i32, %arg1: i32) -> (i32, i32, i32) {
    %c0_i32 = arith.constant 0 : i32
    %c0_i32_0 = arith.constant 0 : i32
    %c0_i32_1 = arith.constant 0 : i32
    return %arg0, %c0_i32, %c0_i32_0 : i32, i32, i32
  }
}

module attributes {stable_mosaic.version = 11 : i64} {
  func.func @_decoder_stack_kernel(%arg0: i32, %arg1: i32, %arg2: memref<1x8x128xf32, #tpu.memory_space<vmem>>, %arg3: memref<1x10x128xf32, #tpu.memory_space<vmem>>, %arg4: memref<8x8xf32, #tpu.memory_space<vmem>>, %arg5: memref<1x128x3072xbf16, #tpu.memory_space<vmem>>, %arg6: memref<1x1x3072xf32, #tpu.memory_space<vmem>>, %arg7: memref<1x1024x128xbf16, #tpu.memory_space<vmem>>, %arg8: memref<1x128x1024xbf16, #tpu.memory_space<vmem>>, %arg9: memref<1x1x1024xf32, #tpu.memory_space<vmem>>, %arg10: memref<1x128x2048xbf16, #tpu.memory_space<vmem>>, %arg11: memref<1x1x2048xf32, #tpu.memory_space<vmem>>, %arg12: memref<1x1024x128xbf16, #tpu.memory_space<vmem>>, %arg13: memref<1x128x128xbf16, #tpu.memory_space<vmem>>, %arg14: memref<1x128x128xbf16, #tpu.memory_space<vmem>>, %arg15: memref<1x16x128xf32, #tpu.memory_space<vmem>>, %arg16: memref<128x128xbf16, #tpu.memory_space<vmem>>, %arg17: memref<1x128xf32, #tpu.memory_space<vmem>>, %arg18: memref<1x8x128xf32, #tpu.memory_space<vmem>>, %arg19: memref<8x128xf32, #tpu.memory_space<vmem>>) attributes {dimension_semantics = [#tpu.dimension_semantics<parallel>, #tpu.dimension_semantics<arbitrary>], iteration_bounds = array<i64: 2, 2>, scalar_prefetch = 0 : i64, scratch_operands = 1 : i64, tpu.core_type = #tpu.core_type<tc>, window_params = [{transform_indices = @transform_0, window_bounds = array<i64: 1, 8, 128>}, {transform_indices = @transform_1, window_bounds = array<i64: 1, 10, 128>}, {pipeline_mode = #tpu.pipeline_mode<synchronous>, transform_indices = @transform_2, window_bounds = array<i64: 8, 8>}, {transform_indices = @transform_3, window_bounds = array<i64: 1, 128, 3072>}, {transform_indices = @transform_4, window_bounds = array<i64: 1, 1, 3072>}, {transform_indices = @transform_5, window_bounds = array<i64: 1, 1024, 128>}, {transform_indices = @transform_6, window_bounds = array<i64: 1, 128, 1024>}, {transform_indices = @transform_7, window_bounds = array<i64: 1, 1, 1024>}, {transform_indices = @transform_8, window_bounds = array<i64: 1, 128, 2048>}, {transform_indices = @transform_9, window_bounds = array<i64: 1, 1, 2048>}, {transform_indices = @transform_10, window_bounds = array<i64: 1, 1024, 128>}, {transform_indices = @transform_11, window_bounds = array<i64: 1, 128, 128>}, {transform_indices = @transform_12, window_bounds = array<i64: 1, 128, 128>}, {transform_indices = @transform_13, window_bounds = array<i64: 1, 16, 128>}, {pipeline_mode = #tpu.pipeline_mode<synchronous>, transform_indices = @transform_14, window_bounds = array<i64: 128, 128>}, {pipeline_mode = #tpu.pipeline_mode<synchronous>, transform_indices = @transform_15, window_bounds = array<i64: 1, 128>}, {transform_indices = @transform_16, window_bounds = array<i64: 1, 8, 128>}]} {
    %c0_i32 = arith.constant 0 : i32
    %0 = arith.cmpi eq, %arg1, %c0_i32 : i32
    %1 = arith.extui %0 : i1 to i32
    %c0_i32_0 = arith.constant 0 : i32
    %2 = arith.cmpi ne, %1, %c0_i32_0 : i32
    scf.if %2 {
      %c0_129 = arith.constant 0 : index
      %c0_130 = arith.constant 0 : index
      %c0_131 = arith.constant 0 : index
      %456 = vector.load %arg2[%c0_129, %c0_130, %c0_131] : memref<1x8x128xf32, #tpu.memory_space<vmem>>, vector<1x8x128xf32>
      %457 = vector.shape_cast %456 : vector<1x8x128xf32> to vector<8x128xf32>
      %c0_132 = arith.constant 0 : index
      %c0_133 = arith.constant 0 : index
      %458 = vector.load %arg19[%c0_132, %c0_133] : memref<8x128xf32, #tpu.memory_space<vmem>>, vector<8x128xf32>
      tpu.vector_store %arg19[%c0_132, %c0_133], %457 {strides = array<i32>} : memref<8x128xf32, #tpu.memory_space<vmem>>, vector<8x128xf32>,
    } else {
    }
    %c0 = arith.constant 0 : index
    %c0_1 = arith.constant 0 : index
    %3 = vector.load %arg19[%c0, %c0_1] : memref<8x128xf32, #tpu.memory_space<vmem>>, vector<8x128xf32>
    %c0_2 = arith.constant 0 : index
    %c0_3 = arith.constant 0 : index
    %c0_4 = arith.constant 0 : index
    %4 = vector.load %arg3[%c0_2, %c0_3, %c0_4] : memref<1x10x128xf32, #tpu.memory_space<vmem>>, vector<1x10x128xf32>
    %5 = vector.shape_cast %4 : vector<1x10x128xf32> to vector<10x128xf32>
    %c0_5 = arith.constant 0 : index
    %c0_6 = arith.constant 0 : index
    %6 = vector.load %arg4[%c0_5, %c0_6] : memref<8x8xf32, #tpu.memory_space<vmem>>, vector<8x8xf32>
    %c0_7 = arith.constant 0 : index
    %c0_8 = arith.constant 0 : index
    %c0_9 = arith.constant 0 : index
    %7 = vector.load %arg15[%c0_7, %c0_8, %c0_9] : memref<1x16x128xf32, #tpu.memory_space<vmem>>, vector<1x16x128xf32>
    %8 = vector.shape_cast %7 : vector<1x16x128xf32> to vector<16x128xf32>
    %9 = arith.truncf %3 : vector<8x128xf32> to vector<8x128xbf16>
    %c0_10 = arith.constant 0 : index
    %c0_11 = arith.constant 0 : index
    %c0_12 = arith.constant 0 : index
    %10 = vector.load %arg5[%c0_10, %c0_11, %c0_12] : memref<1x128x3072xbf16, #tpu.memory_space<vmem>>, vector<1x128x3072xbf16>
    %11 = vector.shape_cast %10 : vector<1x128x3072xbf16> to vector<128x3072xbf16>
    %cst = arith.constant dense<0.000000e+00> : vector<8x3072xf32>
    %12 = tpu.matmul %9, %11, %cst {dimension_numbers = #tpu.dot_dimension_numbers<[1], [0], [0], [1], [0, 0, 1, 1], [], []>} : vector<8x128xbf16>, vector<128x3072xbf16>, vector<8x3072xf32> -> vector<8x3072xf32>
    %c0_13 = arith.constant 0 : index
    %c0_14 = arith.constant 0 : index
    %c0_15 = arith.constant 0 : index
    %13 = vector.load %arg6[%c0_13, %c0_14, %c0_15] : memref<1x1x3072xf32, #tpu.memory_space<vmem>>, vector<1x1x3072xf32>
    %14 = vector.shape_cast %13 : vector<1x1x3072xf32> to vector<1x3072xf32>
    %15 = vector.broadcast %14 : vector<1x3072xf32> to vector<8x3072xf32>
    %16 = arith.addf %12, %15 : vector<8x3072xf32>
    %17 = vector.extract_strided_slice %16 {offsets = [0, 0], sizes = [8, 128], strides = [1, 1]} : vector<8x3072xf32> to vector<8x128xf32>
    %18 = arith.truncf %17 : vector<8x128xf32> to vector<8x128xbf16>
    %19 = vector.extract_strided_slice %16 {offsets = [0, 1024], sizes = [8, 128], strides = [1, 1]} : vector<8x3072xf32> to vector<8x128xf32>
    %20 = arith.truncf %19 : vector<8x128xf32> to vector<8x128xbf16>
    %21 = vector.extract_strided_slice %16 {offsets = [0, 2048], sizes = [8, 128], strides = [1, 1]} : vector<8x3072xf32> to vector<8x128xf32>
    %22 = arith.truncf %21 : vector<8x128xf32> to vector<8x128xbf16>
    %cst_16 = arith.constant dense<0.000000e+00> : vector<8x8xf32>
    %23 = tpu.matmul %18, %20, %cst_16 {dimension_numbers = #tpu.dot_dimension_numbers<[1], [1], [0], [0], [0, 0, 1, 0], [], []>} : vector<8x128xbf16>, vector<8x128xbf16>, vector<8x8xf32> -> vector<8x8xf32>
    %24 = arith.addf %23, %6 : vector<8x8xf32>
    %cst_17 = arith.constant dense<0xFF800000> : vector<8xf32>
    %25 = vector.multi_reduction <maximumf>, %24, %cst_17 [1] : vector<8x8xf32> to vector<8xf32>
    %26 = vector.shape_cast %25 : vector<8xf32> to vector<8x1xf32>
    %27 = vector.broadcast %26 : vector<8x1xf32> to vector<8x8xf32>
    %28 = arith.subf %24, %27 : vector<8x8xf32>
    %29 = math.exp %28 : vector<8x8xf32>
    %cst_18 = arith.constant dense<0.000000e+00> : vector<8xf32>
    %30 = vector.multi_reduction <add>, %29, %cst_18 [1] : vector<8x8xf32> to vector<8xf32>
    %31 = vector.shape_cast %30 : vector<8xf32> to vector<8x1xf32>
    %32 = tpu.reciprocal %31 {approx = true} : vector<8x1xf32> -> vector<8x1xf32>
    %33 = vector.broadcast %32 : vector<8x1xf32> to vector<8x8xf32>
    %34 = arith.mulf %29, %33 : vector<8x8xf32>
    %35 = arith.truncf %34 : vector<8x8xf32> to vector<8x8xbf16>
    %cst_19 = arith.constant dense<0.000000e+00> : vector<8x128xf32>
    %36 = tpu.matmul %35, %22, %cst_19 {dimension_numbers = #tpu.dot_dimension_numbers<[1], [0], [0], [1], [0, 0, 1, 1], [], []>} : vector<8x8xbf16>, vector<8x128xbf16>, vector<8x128xf32> -> vector<8x128xf32>
    %37 = vector.extract_strided_slice %16 {offsets = [0, 128], sizes = [8, 128], strides = [1, 1]} : vector<8x3072xf32> to vector<8x128xf32>
    %38 = arith.truncf %37 : vector<8x128xf32> to vector<8x128xbf16>
    %39 = vector.extract_strided_slice %16 {offsets = [0, 1152], sizes = [8, 128], strides = [1, 1]} : vector<8x3072xf32> to vector<8x128xf32>
    %40 = arith.truncf %39 : vector<8x128xf32> to vector<8x128xbf16>
    %41 = vector.extract_strided_slice %16 {offsets = [0, 2176], sizes = [8, 128], strides = [1, 1]} : vector<8x3072xf32> to vector<8x128xf32>
    %42 = arith.truncf %41 : vector<8x128xf32> to vector<8x128xbf16>
    %cst_20 = arith.constant dense<0.000000e+00> : vector<8x8xf32>
    %43 = tpu.matmul %38, %40, %cst_20 {dimension_numbers = #tpu.dot_dimension_numbers<[1], [1], [0], [0], [0, 0, 1, 0], [], []>} : vector<8x128xbf16>, vector<8x128xbf16>, vector<8x8xf32> -> vector<8x8xf32>
    %44 = arith.addf %43, %6 : vector<8x8xf32>
    %cst_21 = arith.constant dense<0xFF800000> : vector<8xf32>
    %45 = vector.multi_reduction <maximumf>, %44, %cst_21 [1] : vector<8x8xf32> to vector<8xf32>
    %46 = vector.shape_cast %45 : vector<8xf32> to vector<8x1xf32>
    %47 = vector.broadcast %46 : vector<8x1xf32> to vector<8x8xf32>
    %48 = arith.subf %44, %47 : vector<8x8xf32>
    %49 = math.exp %48 : vector<8x8xf32>
    %cst_22 = arith.constant dense<0.000000e+00> : vector<8xf32>
    %50 = vector.multi_reduction <add>, %49, %cst_22 [1] : vector<8x8xf32> to vector<8xf32>
    %51 = vector.shape_cast %50 : vector<8xf32> to vector<8x1xf32>
    %52 = tpu.reciprocal %51 {approx = true} : vector<8x1xf32> -> vector<8x1xf32>
    %53 = vector.broadcast %52 : vector<8x1xf32> to vector<8x8xf32>
    %54 = arith.mulf %49, %53 : vector<8x8xf32>
    %55 = arith.truncf %54 : vector<8x8xf32> to vector<8x8xbf16>
    %cst_23 = arith.constant dense<0.000000e+00> : vector<8x128xf32>
    %56 = tpu.matmul %55, %42, %cst_23 {dimension_numbers = #tpu.dot_dimension_numbers<[1], [0], [0], [1], [0, 0, 1, 1], [], []>} : vector<8x8xbf16>, vector<8x128xbf16>, vector<8x128xf32> -> vector<8x128xf32>
    %57 = vector.extract_strided_slice %16 {offsets = [0, 256], sizes = [8, 128], strides = [1, 1]} : vector<8x3072xf32> to vector<8x128xf32>
    %58 = arith.truncf %57 : vector<8x128xf32> to vector<8x128xbf16>
    %59 = vector.extract_strided_slice %16 {offsets = [0, 1280], sizes = [8, 128], strides = [1, 1]} : vector<8x3072xf32> to vector<8x128xf32>
    %60 = arith.truncf %59 : vector<8x128xf32> to vector<8x128xbf16>
    %61 = vector.extract_strided_slice %16 {offsets = [0, 2304], sizes = [8, 128], strides = [1, 1]} : vector<8x3072xf32> to vector<8x128xf32>
    %62 = arith.truncf %61 : vector<8x128xf32> to vector<8x128xbf16>
    %cst_24 = arith.constant dense<0.000000e+00> : vector<8x8xf32>
    %63 = tpu.matmul %58, %60, %cst_24 {dimension_numbers = #tpu.dot_dimension_numbers<[1], [1], [0], [0], [0, 0, 1, 0], [], []>} : vector<8x128xbf16>, vector<8x128xbf16>, vector<8x8xf32> -> vector<8x8xf32>
    %64 = arith.addf %63, %6 : vector<8x8xf32>
    %cst_25 = arith.constant dense<0xFF800000> : vector<8xf32>
    %65 = vector.multi_reduction <maximumf>, %64, %cst_25 [1] : vector<8x8xf32> to vector<8xf32>
    %66 = vector.shape_cast %65 : vector<8xf32> to vector<8x1xf32>
    %67 = vector.broadcast %66 : vector<8x1xf32> to vector<8x8xf32>
    %68 = arith.subf %64, %67 : vector<8x8xf32>
    %69 = math.exp %68 : vector<8x8xf32>
    %cst_26 = arith.constant dense<0.000000e+00> : vector<8xf32>
    %70 = vector.multi_reduction <add>, %69, %cst_26 [1] : vector<8x8xf32> to vector<8xf32>
    %71 = vector.shape_cast %70 : vector<8xf32> to vector<8x1xf32>
    %72 = tpu.reciprocal %71 {approx = true} : vector<8x1xf32> -> vector<8x1xf32>
    %73 = vector.broadcast %72 : vector<8x1xf32> to vector<8x8xf32>
    %74 = arith.mulf %69, %73 : vector<8x8xf32>
    %75 = arith.truncf %74 : vector<8x8xf32> to vector<8x8xbf16>
    %cst_27 = arith.constant dense<0.000000e+00> : vector<8x128xf32>
    %76 = tpu.matmul %75, %62, %cst_27 {dimension_numbers = #tpu.dot_dimension_numbers<[1], [0], [0], [1], [0, 0, 1, 1], [], []>} : vector<8x8xbf16>, vector<8x128xbf16>, vector<8x128xf32> -> vector<8x128xf32>
    %77 = vector.extract_strided_slice %16 {offsets = [0, 384], sizes = [8, 128], strides = [1, 1]} : vector<8x3072xf32> to vector<8x128xf32>
    %78 = arith.truncf %77 : vector<8x128xf32> to vector<8x128xbf16>
    %79 = vector.extract_strided_slice %16 {offsets = [0, 1408], sizes = [8, 128], strides = [1, 1]} : vector<8x3072xf32> to vector<8x128xf32>
    %80 = arith.truncf %79 : vector<8x128xf32> to vector<8x128xbf16>
    %81 = vector.extract_strided_slice %16 {offsets = [0, 2432], sizes = [8, 128], strides = [1, 1]} : vector<8x3072xf32> to vector<8x128xf32>
    %82 = arith.truncf %81 : vector<8x128xf32> to vector<8x128xbf16>
    %cst_28 = arith.constant dense<0.000000e+00> : vector<8x8xf32>
    %83 = tpu.matmul %78, %80, %cst_28 {dimension_numbers = #tpu.dot_dimension_numbers<[1], [1], [0], [0], [0, 0, 1, 0], [], []>} : vector<8x128xbf16>, vector<8x128xbf16>, vector<8x8xf32> -> vector<8x8xf32>
    %84 = arith.addf %83, %6 : vector<8x8xf32>
    %cst_29 = arith.constant dense<0xFF800000> : vector<8xf32>
    %85 = vector.multi_reduction <maximumf>, %84, %cst_29 [1] : vector<8x8xf32> to vector<8xf32>
    %86 = vector.shape_cast %85 : vector<8xf32> to vector<8x1xf32>
    %87 = vector.broadcast %86 : vector<8x1xf32> to vector<8x8xf32>
    %88 = arith.subf %84, %87 : vector<8x8xf32>
    %89 = math.exp %88 : vector<8x8xf32>
    %cst_30 = arith.constant dense<0.000000e+00> : vector<8xf32>
    %90 = vector.multi_reduction <add>, %89, %cst_30 [1] : vector<8x8xf32> to vector<8xf32>
    %91 = vector.shape_cast %90 : vector<8xf32> to vector<8x1xf32>
    %92 = tpu.reciprocal %91 {approx = true} : vector<8x1xf32> -> vector<8x1xf32>
    %93 = vector.broadcast %92 : vector<8x1xf32> to vector<8x8xf32>
    %94 = arith.mulf %89, %93 : vector<8x8xf32>
    %95 = arith.truncf %94 : vector<8x8xf32> to vector<8x8xbf16>
    %cst_31 = arith.constant dense<0.000000e+00> : vector<8x128xf32>
    %96 = tpu.matmul %95, %82, %cst_31 {dimension_numbers = #tpu.dot_dimension_numbers<[1], [0], [0], [1], [0, 0, 1, 1], [], []>} : vector<8x8xbf16>, vector<8x128xbf16>, vector<8x128xf32> -> vector<8x128xf32>
    %97 = vector.extract_strided_slice %16 {offsets = [0, 512], sizes = [8, 128], strides = [1, 1]} : vector<8x3072xf32> to vector<8x128xf32>
    %98 = arith.truncf %97 : vector<8x128xf32> to vector<8x128xbf16>
    %99 = vector.extract_strided_slice %16 {offsets = [0, 1536], sizes = [8, 128], strides = [1, 1]} : vector<8x3072xf32> to vector<8x128xf32>
    %100 = arith.truncf %99 : vector<8x128xf32> to vector<8x128xbf16>
    %101 = vector.extract_strided_slice %16 {offsets = [0, 2560], sizes = [8, 128], strides = [1, 1]} : vector<8x3072xf32> to vector<8x128xf32>
    %102 = arith.truncf %101 : vector<8x128xf32> to vector<8x128xbf16>
    %cst_32 = arith.constant dense<0.000000e+00> : vector<8x8xf32>
    %103 = tpu.matmul %98, %100, %cst_32 {dimension_numbers = #tpu.dot_dimension_numbers<[1], [1], [0], [0], [0, 0, 1, 0], [], []>} : vector<8x128xbf16>, vector<8x128xbf16>, vector<8x8xf32> -> vector<8x8xf32>
    %104 = arith.addf %103, %6 : vector<8x8xf32>
    %cst_33 = arith.constant dense<0xFF800000> : vector<8xf32>
    %105 = vector.multi_reduction <maximumf>, %104, %cst_33 [1] : vector<8x8xf32> to vector<8xf32>
    %106 = vector.shape_cast %105 : vector<8xf32> to vector<8x1xf32>
    %107 = vector.broadcast %106 : vector<8x1xf32> to vector<8x8xf32>
    %108 = arith.subf %104, %107 : vector<8x8xf32>
    %109 = math.exp %108 : vector<8x8xf32>
    %cst_34 = arith.constant dense<0.000000e+00> : vector<8xf32>
    %110 = vector.multi_reduction <add>, %109, %cst_34 [1] : vector<8x8xf32> to vector<8xf32>
    %111 = vector.shape_cast %110 : vector<8xf32> to vector<8x1xf32>
    %112 = tpu.reciprocal %111 {approx = true} : vector<8x1xf32> -> vector<8x1xf32>
    %113 = vector.broadcast %112 : vector<8x1xf32> to vector<8x8xf32>
    %114 = arith.mulf %109, %113 : vector<8x8xf32>
    %115 = arith.truncf %114 : vector<8x8xf32> to vector<8x8xbf16>
    %cst_35 = arith.constant dense<0.000000e+00> : vector<8x128xf32>
    %116 = tpu.matmul %115, %102, %cst_35 {dimension_numbers = #tpu.dot_dimension_numbers<[1], [0], [0], [1], [0, 0, 1, 1], [], []>} : vector<8x8xbf16>, vector<8x128xbf16>, vector<8x128xf32> -> vector<8x128xf32>
    %117 = vector.extract_strided_slice %16 {offsets = [0, 640], sizes = [8, 128], strides = [1, 1]} : vector<8x3072xf32> to vector<8x128xf32>
    %118 = arith.truncf %117 : vector<8x128xf32> to vector<8x128xbf16>
    %119 = vector.extract_strided_slice %16 {offsets = [0, 1664], sizes = [8, 128], strides = [1, 1]} : vector<8x3072xf32> to vector<8x128xf32>
    %120 = arith.truncf %119 : vector<8x128xf32> to vector<8x128xbf16>
    %121 = vector.extract_strided_slice %16 {offsets = [0, 2688], sizes = [8, 128], strides = [1, 1]} : vector<8x3072xf32> to vector<8x128xf32>
    %122 = arith.truncf %121 : vector<8x128xf32> to vector<8x128xbf16>
    %cst_36 = arith.constant dense<0.000000e+00> : vector<8x8xf32>
    %123 = tpu.matmul %118, %120, %cst_36 {dimension_numbers = #tpu.dot_dimension_numbers<[1], [1], [0], [0], [0, 0, 1, 0], [], []>} : vector<8x128xbf16>, vector<8x128xbf16>, vector<8x8xf32> -> vector<8x8xf32>
    %124 = arith.addf %123, %6 : vector<8x8xf32>
    %cst_37 = arith.constant dense<0xFF800000> : vector<8xf32>
    %125 = vector.multi_reduction <maximumf>, %124, %cst_37 [1] : vector<8x8xf32> to vector<8xf32>
    %126 = vector.shape_cast %125 : vector<8xf32> to vector<8x1xf32>
    %127 = vector.broadcast %126 : vector<8x1xf32> to vector<8x8xf32>
    %128 = arith.subf %124, %127 : vector<8x8xf32>
    %129 = math.exp %128 : vector<8x8xf32>
    %cst_38 = arith.constant dense<0.000000e+00> : vector<8xf32>
    %130 = vector.multi_reduction <add>, %129, %cst_38 [1] : vector<8x8xf32> to vector<8xf32>
    %131 = vector.shape_cast %130 : vector<8xf32> to vector<8x1xf32>
    %132 = tpu.reciprocal %131 {approx = true} : vector<8x1xf32> -> vector<8x1xf32>
    %133 = vector.broadcast %132 : vector<8x1xf32> to vector<8x8xf32>
    %134 = arith.mulf %129, %133 : vector<8x8xf32>
    %135 = arith.truncf %134 : vector<8x8xf32> to vector<8x8xbf16>
    %cst_39 = arith.constant dense<0.000000e+00> : vector<8x128xf32>
    %136 = tpu.matmul %135, %122, %cst_39 {dimension_numbers = #tpu.dot_dimension_numbers<[1], [0], [0], [1], [0, 0, 1, 1], [], []>} : vector<8x8xbf16>, vector<8x128xbf16>, vector<8x128xf32> -> vector<8x128xf32>
    %137 = vector.extract_strided_slice %16 {offsets = [0, 768], sizes = [8, 128], strides = [1, 1]} : vector<8x3072xf32> to vector<8x128xf32>
    %138 = arith.truncf %137 : vector<8x128xf32> to vector<8x128xbf16>
    %139 = vector.extract_strided_slice %16 {offsets = [0, 1792], sizes = [8, 128], strides = [1, 1]} : vector<8x3072xf32> to vector<8x128xf32>
    %140 = arith.truncf %139 : vector<8x128xf32> to vector<8x128xbf16>
    %141 = vector.extract_strided_slice %16 {offsets = [0, 2816], sizes = [8, 128], strides = [1, 1]} : vector<8x3072xf32> to vector<8x128xf32>
    %142 = arith.truncf %141 : vector<8x128xf32> to vector<8x128xbf16>
    %cst_40 = arith.constant dense<0.000000e+00> : vector<8x8xf32>
    %143 = tpu.matmul %138, %140, %cst_40 {dimension_numbers = #tpu.dot_dimension_numbers<[1], [1], [0], [0], [0, 0, 1, 0], [], []>} : vector<8x128xbf16>, vector<8x128xbf16>, vector<8x8xf32> -> vector<8x8xf32>
    %144 = arith.addf %143, %6 : vector<8x8xf32>
    %cst_41 = arith.constant dense<0xFF800000> : vector<8xf32>
    %145 = vector.multi_reduction <maximumf>, %144, %cst_41 [1] : vector<8x8xf32> to vector<8xf32>
    %146 = vector.shape_cast %145 : vector<8xf32> to vector<8x1xf32>
    %147 = vector.broadcast %146 : vector<8x1xf32> to vector<8x8xf32>
    %148 = arith.subf %144, %147 : vector<8x8xf32>
    %149 = math.exp %148 : vector<8x8xf32>
    %cst_42 = arith.constant dense<0.000000e+00> : vector<8xf32>
    %150 = vector.multi_reduction <add>, %149, %cst_42 [1] : vector<8x8xf32> to vector<8xf32>
    %151 = vector.shape_cast %150 : vector<8xf32> to vector<8x1xf32>
    %152 = tpu.reciprocal %151 {approx = true} : vector<8x1xf32> -> vector<8x1xf32>
    %153 = vector.broadcast %152 : vector<8x1xf32> to vector<8x8xf32>
    %154 = arith.mulf %149, %153 : vector<8x8xf32>
    %155 = arith.truncf %154 : vector<8x8xf32> to vector<8x8xbf16>
    %cst_43 = arith.constant dense<0.000000e+00> : vector<8x128xf32>
    %156 = tpu.matmul %155, %142, %cst_43 {dimension_numbers = #tpu.dot_dimension_numbers<[1], [0], [0], [1], [0, 0, 1, 1], [], []>} : vector<8x8xbf16>, vector<8x128xbf16>, vector<8x128xf32> -> vector<8x128xf32>
    %157 = vector.extract_strided_slice %16 {offsets = [0, 896], sizes = [8, 128], strides = [1, 1]} : vector<8x3072xf32> to vector<8x128xf32>
    %158 = arith.truncf %157 : vector<8x128xf32> to vector<8x128xbf16>
    %159 = vector.extract_strided_slice %16 {offsets = [0, 1920], sizes = [8, 128], strides = [1, 1]} : vector<8x3072xf32> to vector<8x128xf32>
    %160 = arith.truncf %159 : vector<8x128xf32> to vector<8x128xbf16>
    %161 = vector.extract_strided_slice %16 {offsets = [0, 2944], sizes = [8, 128], strides = [1, 1]} : vector<8x3072xf32> to vector<8x128xf32>
    %162 = arith.truncf %161 : vector<8x128xf32> to vector<8x128xbf16>
    %cst_44 = arith.constant dense<0.000000e+00> : vector<8x8xf32>
    %163 = tpu.matmul %158, %160, %cst_44 {dimension_numbers = #tpu.dot_dimension_numbers<[1], [1], [0], [0], [0, 0, 1, 0], [], []>} : vector<8x128xbf16>, vector<8x128xbf16>, vector<8x8xf32> -> vector<8x8xf32>
    %164 = arith.addf %163, %6 : vector<8x8xf32>
    %cst_45 = arith.constant dense<0xFF800000> : vector<8xf32>
    %165 = vector.multi_reduction <maximumf>, %164, %cst_45 [1] : vector<8x8xf32> to vector<8xf32>
    %166 = vector.shape_cast %165 : vector<8xf32> to vector<8x1xf32>
    %167 = vector.broadcast %166 : vector<8x1xf32> to vector<8x8xf32>
    %168 = arith.subf %164, %167 : vector<8x8xf32>
    %169 = math.exp %168 : vector<8x8xf32>
    %cst_46 = arith.constant dense<0.000000e+00> : vector<8xf32>
    %170 = vector.multi_reduction <add>, %169, %cst_46 [1] : vector<8x8xf32> to vector<8xf32>
    %171 = vector.shape_cast %170 : vector<8xf32> to vector<8x1xf32>
    %172 = tpu.reciprocal %171 {approx = true} : vector<8x1xf32> -> vector<8x1xf32>
    %173 = vector.broadcast %172 : vector<8x1xf32> to vector<8x8xf32>
    %174 = arith.mulf %169, %173 : vector<8x8xf32>
    %175 = arith.truncf %174 : vector<8x8xf32> to vector<8x8xbf16>
    %cst_47 = arith.constant dense<0.000000e+00> : vector<8x128xf32>
    %176 = tpu.matmul %175, %162, %cst_47 {dimension_numbers = #tpu.dot_dimension_numbers<[1], [0], [0], [1], [0, 0, 1, 1], [], []>} : vector<8x8xbf16>, vector<8x128xbf16>, vector<8x128xf32> -> vector<8x128xf32>
    %177 = tpu.concatenate %36, %56, %76, %96, %116, %136, %156, %176 in 1 : vector<8x128xf32>, vector<8x128xf32>, vector<8x128xf32>, vector<8x128xf32>, vector<8x128xf32>, vector<8x128xf32>, vector<8x128xf32>, vector<8x128xf32> -> vector<8x1024xf32>
    %178 = arith.truncf %177 : vector<8x1024xf32> to vector<8x1024xbf16>
    %c0_48 = arith.constant 0 : index
    %c0_49 = arith.constant 0 : index
    %c0_50 = arith.constant 0 : index
    %179 = vector.load %arg7[%c0_48, %c0_49, %c0_50] : memref<1x1024x128xbf16, #tpu.memory_space<vmem>>, vector<1x1024x128xbf16>
    %180 = vector.shape_cast %179 : vector<1x1024x128xbf16> to vector<1024x128xbf16>
    %cst_51 = arith.constant dense<0.000000e+00> : vector<8x128xf32>
    %181 = tpu.matmul %178, %180, %cst_51 {dimension_numbers = #tpu.dot_dimension_numbers<[1], [0], [0], [1], [0, 0, 1, 1], [], []>} : vector<8x1024xbf16>, vector<1024x128xbf16>, vector<8x128xf32> -> vector<8x128xf32>
    %182 = vector.extract_strided_slice %8 {offsets = [0, 0], sizes = [1, 128], strides = [1, 1]} : vector<16x128xf32> to vector<1x128xf32>
    %183 = vector.broadcast %182 : vector<1x128xf32> to vector<8x128xf32>
    %184 = arith.addf %181, %183 : vector<8x128xf32>
    %185 = arith.addf %3, %184 : vector<8x128xf32>
    %186 = vector.extract_strided_slice %8 {offsets = [1, 0], sizes = [1, 128], strides = [1, 1]} : vector<16x128xf32> to vector<1x128xf32>
    %187 = vector.extract_strided_slice %8 {offsets = [2, 0], sizes = [1, 128], strides = [1, 1]} : vector<16x128xf32> to vector<1x128xf32>
    %cst_52 = arith.constant dense<0.000000e+00> : vector<8xf32>
    %188 = vector.multi_reduction <add>, %185, %cst_52 [1] : vector<8x128xf32> to vector<8xf32>
    %189 = vector.shape_cast %188 : vector<8xf32> to vector<8x1xf32>
    %cst_53 = arith.constant 3.125000e-02 : f32
    %190 = vector.broadcast %cst_53 : f32 to vector<8x1xf32>
    %191 = arith.mulf %189, %190 : vector<8x1xf32>
    %192 = arith.mulf %185, %185 : vector<8x128xf32>
    %cst_54 = arith.constant dense<0.000000e+00> : vector<8xf32>
    %193 = vector.multi_reduction <add>, %192, %cst_54 [1] : vector<8x128xf32> to vector<8xf32>
    %194 = vector.shape_cast %193 : vector<8xf32> to vector<8x1xf32>
    %cst_55 = arith.constant 3.125000e-02 : f32
    %195 = vector.broadcast %cst_55 : f32 to vector<8x1xf32>
    %196 = arith.mulf %194, %195 : vector<8x1xf32>
    %197 = arith.mulf %191, %191 : vector<8x1xf32>
    %198 = arith.subf %196, %197 : vector<8x1xf32>
    %199 = vector.broadcast %191 : vector<8x1xf32> to vector<8x128xf32>
    %200 = arith.subf %185, %199 : vector<8x128xf32>
    %cst_56 = arith.constant 9.99999974E-6 : f32
    %201 = vector.broadcast %cst_56 : f32 to vector<8x1xf32>
    %202 = arith.addf %198, %201 : vector<8x1xf32>
    %203 = math.rsqrt %202 : vector<8x1xf32>
    %204 = vector.broadcast %203 : vector<8x1xf32> to vector<8x128xf32>
    %205 = arith.mulf %200, %204 : vector<8x128xf32>
    %206 = vector.broadcast %186 : vector<1x128xf32> to vector<8x128xf32>
    %207 = arith.mulf %205, %206 : vector<8x128xf32>
    %208 = vector.broadcast %187 : vector<1x128xf32> to vector<8x128xf32>
    %209 = arith.addf %207, %208 : vector<8x128xf32>
    %210 = arith.truncf %184 : vector<8x128xf32> to vector<8x128xbf16>
    %c0_57 = arith.constant 0 : index
    %c0_58 = arith.constant 0 : index
    %c0_59 = arith.constant 0 : index
    %211 = vector.load %arg8[%c0_57, %c0_58, %c0_59] : memref<1x128x1024xbf16, #tpu.memory_space<vmem>>, vector<1x128x1024xbf16>
    %212 = vector.shape_cast %211 : vector<1x128x1024xbf16> to vector<128x1024xbf16>
    %cst_60 = arith.constant dense<0.000000e+00> : vector<8x1024xf32>
    %213 = tpu.matmul %210, %212, %cst_60 {dimension_numbers = #tpu.dot_dimension_numbers<[1], [0], [0], [1], [0, 0, 1, 1], [], []>} : vector<8x128xbf16>, vector<128x1024xbf16>, vector<8x1024xf32> -> vector<8x1024xf32>
    %c0_61 = arith.constant 0 : index
    %c0_62 = arith.constant 0 : index
    %c0_63 = arith.constant 0 : index
    %214 = vector.load %arg9[%c0_61, %c0_62, %c0_63] : memref<1x1x1024xf32, #tpu.memory_space<vmem>>, vector<1x1x1024xf32>
    %215 = vector.shape_cast %214 : vector<1x1x1024xf32> to vector<1x1024xf32>
    %216 = vector.broadcast %215 : vector<1x1024xf32> to vector<8x1024xf32>
    %217 = arith.addf %213, %216 : vector<8x1024xf32>
    %218 = arith.truncf %5 : vector<10x128xf32> to vector<10x128xbf16>
    %c0_64 = arith.constant 0 : index
    %c0_65 = arith.constant 0 : index
    %c0_66 = arith.constant 0 : index
    %219 = vector.load %arg10[%c0_64, %c0_65, %c0_66] : memref<1x128x2048xbf16, #tpu.memory_space<vmem>>, vector<1x128x2048xbf16>
    %220 = vector.shape_cast %219 : vector<1x128x2048xbf16> to vector<128x2048xbf16>
    %cst_67 = arith.constant dense<0.000000e+00> : vector<10x2048xf32>
    %221 = tpu.matmul %218, %220, %cst_67 {dimension_numbers = #tpu.dot_dimension_numbers<[1], [0], [0], [1], [0, 0, 1, 1], [], []>} : vector<10x128xbf16>, vector<128x2048xbf16>, vector<10x2048xf32> -> vector<10x2048xf32>
    %c0_68 = arith.constant 0 : index
    %c0_69 = arith.constant 0 : index
    %c0_70 = arith.constant 0 : index
    %222 = vector.load %arg11[%c0_68, %c0_69, %c0_70] : memref<1x1x2048xf32, #tpu.memory_space<vmem>>, vector<1x1x2048xf32>
    %223 = vector.shape_cast %222 : vector<1x1x2048xf32> to vector<1x2048xf32>
    %224 = vector.broadcast %223 : vector<1x2048xf32> to vector<10x2048xf32>
    %225 = arith.addf %221, %224 : vector<10x2048xf32>
    %226 = vector.extract_strided_slice %217 {offsets = [0, 0], sizes = [8, 128], strides = [1, 1]} : vector<8x1024xf32> to vector<8x128xf32>
    %227 = arith.truncf %226 : vector<8x128xf32> to vector<8x128xbf16>
    %228 = vector.extract_strided_slice %225 {offsets = [0, 0], sizes = [10, 128], strides = [1, 1]} : vector<10x2048xf32> to vector<10x128xf32>
    %229 = arith.truncf %228 : vector<10x128xf32> to vector<10x128xbf16>
    %230 = vector.extract_strided_slice %225 {offsets = [0, 1024], sizes = [10, 128], strides = [1, 1]} : vector<10x2048xf32> to vector<10x128xf32>
    %231 = arith.truncf %230 : vector<10x128xf32> to vector<10x128xbf16>
    %cst_71 = arith.constant dense<0.000000e+00> : vector<8x10xf32>
    %232 = tpu.matmul %227, %229, %cst_71 {dimension_numbers = #tpu.dot_dimension_numbers<[1], [1], [0], [0], [0, 0, 1, 0], [], []>} : vector<8x128xbf16>, vector<10x128xbf16>, vector<8x10xf32> -> vector<8x10xf32>
    %cst_72 = arith.constant dense<0xFF800000> : vector<8xf32>
    %233 = vector.multi_reduction <maximumf>, %232, %cst_72 [1] : vector<8x10xf32> to vector<8xf32>
    %234 = vector.shape_cast %233 : vector<8xf32> to vector<8x1xf32>
    %235 = vector.broadcast %234 : vector<8x1xf32> to vector<8x10xf32>
    %236 = arith.subf %232, %235 : vector<8x10xf32>
    %237 = math.exp %236 : vector<8x10xf32>
    %cst_73 = arith.constant dense<0.000000e+00> : vector<8xf32>
    %238 = vector.multi_reduction <add>, %237, %cst_73 [1] : vector<8x10xf32> to vector<8xf32>
    %239 = vector.shape_cast %238 : vector<8xf32> to vector<8x1xf32>
    %240 = tpu.reciprocal %239 {approx = true} : vector<8x1xf32> -> vector<8x1xf32>
    %241 = vector.broadcast %240 : vector<8x1xf32> to vector<8x10xf32>
    %242 = arith.mulf %237, %241 : vector<8x10xf32>
    %243 = arith.truncf %242 : vector<8x10xf32> to vector<8x10xbf16>
    %cst_74 = arith.constant dense<0.000000e+00> : vector<8x128xf32>
    %244 = tpu.matmul %243, %231, %cst_74 {dimension_numbers = #tpu.dot_dimension_numbers<[1], [0], [0], [1], [0, 0, 1, 1], [], []>} : vector<8x10xbf16>, vector<10x128xbf16>, vector<8x128xf32> -> vector<8x128xf32>
    %245 = vector.extract_strided_slice %217 {offsets = [0, 128], sizes = [8, 128], strides = [1, 1]} : vector<8x1024xf32> to vector<8x128xf32>
    %246 = arith.truncf %245 : vector<8x128xf32> to vector<8x128xbf16>
    %247 = vector.extract_strided_slice %225 {offsets = [0, 128], sizes = [10, 128], strides = [1, 1]} : vector<10x2048xf32> to vector<10x128xf32>
    %248 = arith.truncf %247 : vector<10x128xf32> to vector<10x128xbf16>
    %249 = vector.extract_strided_slice %225 {offsets = [0, 1152], sizes = [10, 128], strides = [1, 1]} : vector<10x2048xf32> to vector<10x128xf32>
    %250 = arith.truncf %249 : vector<10x128xf32> to vector<10x128xbf16>
    %cst_75 = arith.constant dense<0.000000e+00> : vector<8x10xf32>
    %251 = tpu.matmul %246, %248, %cst_75 {dimension_numbers = #tpu.dot_dimension_numbers<[1], [1], [0], [0], [0, 0, 1, 0], [], []>} : vector<8x128xbf16>, vector<10x128xbf16>, vector<8x10xf32> -> vector<8x10xf32>
    %cst_76 = arith.constant dense<0xFF800000> : vector<8xf32>
    %252 = vector.multi_reduction <maximumf>, %251, %cst_76 [1] : vector<8x10xf32> to vector<8xf32>
    %253 = vector.shape_cast %252 : vector<8xf32> to vector<8x1xf32>
    %254 = vector.broadcast %253 : vector<8x1xf32> to vector<8x10xf32>
    %255 = arith.subf %251, %254 : vector<8x10xf32>
    %256 = math.exp %255 : vector<8x10xf32>
    %cst_77 = arith.constant dense<0.000000e+00> : vector<8xf32>
    %257 = vector.multi_reduction <add>, %256, %cst_77 [1] : vector<8x10xf32> to vector<8xf32>
    %258 = vector.shape_cast %257 : vector<8xf32> to vector<8x1xf32>
    %259 = tpu.reciprocal %258 {approx = true} : vector<8x1xf32> -> vector<8x1xf32>
    %260 = vector.broadcast %259 : vector<8x1xf32> to vector<8x10xf32>
    %261 = arith.mulf %256, %260 : vector<8x10xf32>
    %262 = arith.truncf %261 : vector<8x10xf32> to vector<8x10xbf16>
    %cst_78 = arith.constant dense<0.000000e+00> : vector<8x128xf32>
    %263 = tpu.matmul %262, %250, %cst_78 {dimension_numbers = #tpu.dot_dimension_numbers<[1], [0], [0], [1], [0, 0, 1, 1], [], []>} : vector<8x10xbf16>, vector<10x128xbf16>, vector<8x128xf32> -> vector<8x128xf32>
    %264 = vector.extract_strided_slice %217 {offsets = [0, 256], sizes = [8, 128], strides = [1, 1]} : vector<8x1024xf32> to vector<8x128xf32>
    %265 = arith.truncf %264 : vector<8x128xf32> to vector<8x128xbf16>
    %266 = vector.extract_strided_slice %225 {offsets = [0, 256], sizes = [10, 128], strides = [1, 1]} : vector<10x2048xf32> to vector<10x128xf32>
    %267 = arith.truncf %266 : vector<10x128xf32> to vector<10x128xbf16>
    %268 = vector.extract_strided_slice %225 {offsets = [0, 1280], sizes = [10, 128], strides = [1, 1]} : vector<10x2048xf32> to vector<10x128xf32>
    %269 = arith.truncf %268 : vector<10x128xf32> to vector<10x128xbf16>
    %cst_79 = arith.constant dense<0.000000e+00> : vector<8x10xf32>
    %270 = tpu.matmul %265, %267, %cst_79 {dimension_numbers = #tpu.dot_dimension_numbers<[1], [1], [0], [0], [0, 0, 1, 0], [], []>} : vector<8x128xbf16>, vector<10x128xbf16>, vector<8x10xf32> -> vector<8x10xf32>
    %cst_80 = arith.constant dense<0xFF800000> : vector<8xf32>
    %271 = vector.multi_reduction <maximumf>, %270, %cst_80 [1] : vector<8x10xf32> to vector<8xf32>
    %272 = vector.shape_cast %271 : vector<8xf32> to vector<8x1xf32>
    %273 = vector.broadcast %272 : vector<8x1xf32> to vector<8x10xf32>
    %274 = arith.subf %270, %273 : vector<8x10xf32>
    %275 = math.exp %274 : vector<8x10xf32>
    %cst_81 = arith.constant dense<0.000000e+00> : vector<8xf32>
    %276 = vector.multi_reduction <add>, %275, %cst_81 [1] : vector<8x10xf32> to vector<8xf32>
    %277 = vector.shape_cast %276 : vector<8xf32> to vector<8x1xf32>
    %278 = tpu.reciprocal %277 {approx = true} : vector<8x1xf32> -> vector<8x1xf32>
    %279 = vector.broadcast %278 : vector<8x1xf32> to vector<8x10xf32>
    %280 = arith.mulf %275, %279 : vector<8x10xf32>
    %281 = arith.truncf %280 : vector<8x10xf32> to vector<8x10xbf16>
    %cst_82 = arith.constant dense<0.000000e+00> : vector<8x128xf32>
    %282 = tpu.matmul %281, %269, %cst_82 {dimension_numbers = #tpu.dot_dimension_numbers<[1], [0], [0], [1], [0, 0, 1, 1], [], []>} : vector<8x10xbf16>, vector<10x128xbf16>, vector<8x128xf32> -> vector<8x128xf32>
    %283 = vector.extract_strided_slice %217 {offsets = [0, 384], sizes = [8, 128], strides = [1, 1]} : vector<8x1024xf32> to vector<8x128xf32>
    %284 = arith.truncf %283 : vector<8x128xf32> to vector<8x128xbf16>
    %285 = vector.extract_strided_slice %225 {offsets = [0, 384], sizes = [10, 128], strides = [1, 1]} : vector<10x2048xf32> to vector<10x128xf32>
    %286 = arith.truncf %285 : vector<10x128xf32> to vector<10x128xbf16>
    %287 = vector.extract_strided_slice %225 {offsets = [0, 1408], sizes = [10, 128], strides = [1, 1]} : vector<10x2048xf32> to vector<10x128xf32>
    %288 = arith.truncf %287 : vector<10x128xf32> to vector<10x128xbf16>
    %cst_83 = arith.constant dense<0.000000e+00> : vector<8x10xf32>
    %289 = tpu.matmul %284, %286, %cst_83 {dimension_numbers = #tpu.dot_dimension_numbers<[1], [1], [0], [0], [0, 0, 1, 0], [], []>} : vector<8x128xbf16>, vector<10x128xbf16>, vector<8x10xf32> -> vector<8x10xf32>
    %cst_84 = arith.constant dense<0xFF800000> : vector<8xf32>
    %290 = vector.multi_reduction <maximumf>, %289, %cst_84 [1] : vector<8x10xf32> to vector<8xf32>
    %291 = vector.shape_cast %290 : vector<8xf32> to vector<8x1xf32>
    %292 = vector.broadcast %291 : vector<8x1xf32> to vector<8x10xf32>
    %293 = arith.subf %289, %292 : vector<8x10xf32>
    %294 = math.exp %293 : vector<8x10xf32>
    %cst_85 = arith.constant dense<0.000000e+00> : vector<8xf32>
    %295 = vector.multi_reduction <add>, %294, %cst_85 [1] : vector<8x10xf32> to vector<8xf32>
    %296 = vector.shape_cast %295 : vector<8xf32> to vector<8x1xf32>
    %297 = tpu.reciprocal %296 {approx = true} : vector<8x1xf32> -> vector<8x1xf32>
    %298 = vector.broadcast %297 : vector<8x1xf32> to vector<8x10xf32>
    %299 = arith.mulf %294, %298 : vector<8x10xf32>
    %300 = arith.truncf %299 : vector<8x10xf32> to vector<8x10xbf16>
    %cst_86 = arith.constant dense<0.000000e+00> : vector<8x128xf32>
    %301 = tpu.matmul %300, %288, %cst_86 {dimension_numbers = #tpu.dot_dimension_numbers<[1], [0], [0], [1], [0, 0, 1, 1], [], []>} : vector<8x10xbf16>, vector<10x128xbf16>, vector<8x128xf32> -> vector<8x128xf32>
    %302 = vector.extract_strided_slice %217 {offsets = [0, 512], sizes = [8, 128], strides = [1, 1]} : vector<8x1024xf32> to vector<8x128xf32>
    %303 = arith.truncf %302 : vector<8x128xf32> to vector<8x128xbf16>
    %304 = vector.extract_strided_slice %225 {offsets = [0, 512], sizes = [10, 128], strides = [1, 1]} : vector<10x2048xf32> to vector<10x128xf32>
    %305 = arith.truncf %304 : vector<10x128xf32> to vector<10x128xbf16>
    %306 = vector.extract_strided_slice %225 {offsets = [0, 1536], sizes = [10, 128], strides = [1, 1]} : vector<10x2048xf32> to vector<10x128xf32>
    %307 = arith.truncf %306 : vector<10x128xf32> to vector<10x128xbf16>
    %cst_87 = arith.constant dense<0.000000e+00> : vector<8x10xf32>
    %308 = tpu.matmul %303, %305, %cst_87 {dimension_numbers = #tpu.dot_dimension_numbers<[1], [1], [0], [0], [0, 0, 1, 0], [], []>} : vector<8x128xbf16>, vector<10x128xbf16>, vector<8x10xf32> -> vector<8x10xf32>
    %cst_88 = arith.constant dense<0xFF800000> : vector<8xf32>
    %309 = vector.multi_reduction <maximumf>, %308, %cst_88 [1] : vector<8x10xf32> to vector<8xf32>
    %310 = vector.shape_cast %309 : vector<8xf32> to vector<8x1xf32>
    %311 = vector.broadcast %310 : vector<8x1xf32> to vector<8x10xf32>
    %312 = arith.subf %308, %311 : vector<8x10xf32>
    %313 = math.exp %312 : vector<8x10xf32>
    %cst_89 = arith.constant dense<0.000000e+00> : vector<8xf32>
    %314 = vector.multi_reduction <add>, %313, %cst_89 [1] : vector<8x10xf32> to vector<8xf32>
    %315 = vector.shape_cast %314 : vector<8xf32> to vector<8x1xf32>
    %316 = tpu.reciprocal %315 {approx = true} : vector<8x1xf32> -> vector<8x1xf32>
    %317 = vector.broadcast %316 : vector<8x1xf32> to vector<8x10xf32>
    %318 = arith.mulf %313, %317 : vector<8x10xf32>
    %319 = arith.truncf %318 : vector<8x10xf32> to vector<8x10xbf16>
    %cst_90 = arith.constant dense<0.000000e+00> : vector<8x128xf32>
    %320 = tpu.matmul %319, %307, %cst_90 {dimension_numbers = #tpu.dot_dimension_numbers<[1], [0], [0], [1], [0, 0, 1, 1], [], []>} : vector<8x10xbf16>, vector<10x128xbf16>, vector<8x128xf32> -> vector<8x128xf32>
    %321 = vector.extract_strided_slice %217 {offsets = [0, 640], sizes = [8, 128], strides = [1, 1]} : vector<8x1024xf32> to vector<8x128xf32>
    %322 = arith.truncf %321 : vector<8x128xf32> to vector<8x128xbf16>
    %323 = vector.extract_strided_slice %225 {offsets = [0, 640], sizes = [10, 128], strides = [1, 1]} : vector<10x2048xf32> to vector<10x128xf32>
    %324 = arith.truncf %323 : vector<10x128xf32> to vector<10x128xbf16>
    %325 = vector.extract_strided_slice %225 {offsets = [0, 1664], sizes = [10, 128], strides = [1, 1]} : vector<10x2048xf32> to vector<10x128xf32>
    %326 = arith.truncf %325 : vector<10x128xf32> to vector<10x128xbf16>
    %cst_91 = arith.constant dense<0.000000e+00> : vector<8x10xf32>
    %327 = tpu.matmul %322, %324, %cst_91 {dimension_numbers = #tpu.dot_dimension_numbers<[1], [1], [0], [0], [0, 0, 1, 0], [], []>} : vector<8x128xbf16>, vector<10x128xbf16>, vector<8x10xf32> -> vector<8x10xf32>
    %cst_92 = arith.constant dense<0xFF800000> : vector<8xf32>
    %328 = vector.multi_reduction <maximumf>, %327, %cst_92 [1] : vector<8x10xf32> to vector<8xf32>
    %329 = vector.shape_cast %328 : vector<8xf32> to vector<8x1xf32>
    %330 = vector.broadcast %329 : vector<8x1xf32> to vector<8x10xf32>
    %331 = arith.subf %327, %330 : vector<8x10xf32>
    %332 = math.exp %331 : vector<8x10xf32>
    %cst_93 = arith.constant dense<0.000000e+00> : vector<8xf32>
    %333 = vector.multi_reduction <add>, %332, %cst_93 [1] : vector<8x10xf32> to vector<8xf32>
    %334 = vector.shape_cast %333 : vector<8xf32> to vector<8x1xf32>
    %335 = tpu.reciprocal %334 {approx = true} : vector<8x1xf32> -> vector<8x1xf32>
    %336 = vector.broadcast %335 : vector<8x1xf32> to vector<8x10xf32>
    %337 = arith.mulf %332, %336 : vector<8x10xf32>
    %338 = arith.truncf %337 : vector<8x10xf32> to vector<8x10xbf16>
    %cst_94 = arith.constant dense<0.000000e+00> : vector<8x128xf32>
    %339 = tpu.matmul %338, %326, %cst_94 {dimension_numbers = #tpu.dot_dimension_numbers<[1], [0], [0], [1], [0, 0, 1, 1], [], []>} : vector<8x10xbf16>, vector<10x128xbf16>, vector<8x128xf32> -> vector<8x128xf32>
    %340 = vector.extract_strided_slice %217 {offsets = [0, 768], sizes = [8, 128], strides = [1, 1]} : vector<8x1024xf32> to vector<8x128xf32>
    %341 = arith.truncf %340 : vector<8x128xf32> to vector<8x128xbf16>
    %342 = vector.extract_strided_slice %225 {offsets = [0, 768], sizes = [10, 128], strides = [1, 1]} : vector<10x2048xf32> to vector<10x128xf32>
    %343 = arith.truncf %342 : vector<10x128xf32> to vector<10x128xbf16>
    %344 = vector.extract_strided_slice %225 {offsets = [0, 1792], sizes = [10, 128], strides = [1, 1]} : vector<10x2048xf32> to vector<10x128xf32>
    %345 = arith.truncf %344 : vector<10x128xf32> to vector<10x128xbf16>
    %cst_95 = arith.constant dense<0.000000e+00> : vector<8x10xf32>
    %346 = tpu.matmul %341, %343, %cst_95 {dimension_numbers = #tpu.dot_dimension_numbers<[1], [1], [0], [0], [0, 0, 1, 0], [], []>} : vector<8x128xbf16>, vector<10x128xbf16>, vector<8x10xf32> -> vector<8x10xf32>
    %cst_96 = arith.constant dense<0xFF800000> : vector<8xf32>
    %347 = vector.multi_reduction <maximumf>, %346, %cst_96 [1] : vector<8x10xf32> to vector<8xf32>
    %348 = vector.shape_cast %347 : vector<8xf32> to vector<8x1xf32>
    %349 = vector.broadcast %348 : vector<8x1xf32> to vector<8x10xf32>
    %350 = arith.subf %346, %349 : vector<8x10xf32>
    %351 = math.exp %350 : vector<8x10xf32>
    %cst_97 = arith.constant dense<0.000000e+00> : vector<8xf32>
    %352 = vector.multi_reduction <add>, %351, %cst_97 [1] : vector<8x10xf32> to vector<8xf32>
    %353 = vector.shape_cast %352 : vector<8xf32> to vector<8x1xf32>
    %354 = tpu.reciprocal %353 {approx = true} : vector<8x1xf32> -> vector<8x1xf32>
    %355 = vector.broadcast %354 : vector<8x1xf32> to vector<8x10xf32>
    %356 = arith.mulf %351, %355 : vector<8x10xf32>
    %357 = arith.truncf %356 : vector<8x10xf32> to vector<8x10xbf16>
    %cst_98 = arith.constant dense<0.000000e+00> : vector<8x128xf32>
    %358 = tpu.matmul %357, %345, %cst_98 {dimension_numbers = #tpu.dot_dimension_numbers<[1], [0], [0], [1], [0, 0, 1, 1], [], []>} : vector<8x10xbf16>, vector<10x128xbf16>, vector<8x128xf32> -> vector<8x128xf32>
    %359 = vector.extract_strided_slice %217 {offsets = [0, 896], sizes = [8, 128], strides = [1, 1]} : vector<8x1024xf32> to vector<8x128xf32>
    %360 = arith.truncf %359 : vector<8x128xf32> to vector<8x128xbf16>
    %361 = vector.extract_strided_slice %225 {offsets = [0, 896], sizes = [10, 128], strides = [1, 1]} : vector<10x2048xf32> to vector<10x128xf32>
    %362 = arith.truncf %361 : vector<10x128xf32> to vector<10x128xbf16>
    %363 = vector.extract_strided_slice %225 {offsets = [0, 1920], sizes = [10, 128], strides = [1, 1]} : vector<10x2048xf32> to vector<10x128xf32>
    %364 = arith.truncf %363 : vector<10x128xf32> to vector<10x128xbf16>
    %cst_99 = arith.constant dense<0.000000e+00> : vector<8x10xf32>
    %365 = tpu.matmul %360, %362, %cst_99 {dimension_numbers = #tpu.dot_dimension_numbers<[1], [1], [0], [0], [0, 0, 1, 0], [], []>} : vector<8x128xbf16>, vector<10x128xbf16>, vector<8x10xf32> -> vector<8x10xf32>
    %cst_100 = arith.constant dense<0xFF800000> : vector<8xf32>
    %366 = vector.multi_reduction <maximumf>, %365, %cst_100 [1] : vector<8x10xf32> to vector<8xf32>
    %367 = vector.shape_cast %366 : vector<8xf32> to vector<8x1xf32>
    %368 = vector.broadcast %367 : vector<8x1xf32> to vector<8x10xf32>
    %369 = arith.subf %365, %368 : vector<8x10xf32>
    %370 = math.exp %369 : vector<8x10xf32>
    %cst_101 = arith.constant dense<0.000000e+00> : vector<8xf32>
    %371 = vector.multi_reduction <add>, %370, %cst_101 [1] : vector<8x10xf32> to vector<8xf32>
    %372 = vector.shape_cast %371 : vector<8xf32> to vector<8x1xf32>
    %373 = tpu.reciprocal %372 {approx = true} : vector<8x1xf32> -> vector<8x1xf32>
    %374 = vector.broadcast %373 : vector<8x1xf32> to vector<8x10xf32>
    %375 = arith.mulf %370, %374 : vector<8x10xf32>
    %376 = arith.truncf %375 : vector<8x10xf32> to vector<8x10xbf16>
    %cst_102 = arith.constant dense<0.000000e+00> : vector<8x128xf32>
    %377 = tpu.matmul %376, %364, %cst_102 {dimension_numbers = #tpu.dot_dimension_numbers<[1], [0], [0], [1], [0, 0, 1, 1], [], []>} : vector<8x10xbf16>, vector<10x128xbf16>, vector<8x128xf32> -> vector<8x128xf32>
    %378 = tpu.concatenate %244, %263, %282, %301, %320, %339, %358, %377 in 1 : vector<8x128xf32>, vector<8x128xf32>, vector<8x128xf32>, vector<8x128xf32>, vector<8x128xf32>, vector<8x128xf32>, vector<8x128xf32>, vector<8x128xf32> -> vector<8x1024xf32>
    %379 = arith.truncf %378 : vector<8x1024xf32> to vector<8x1024xbf16>
    %c0_103 = arith.constant 0 : index
    %c0_104 = arith.constant 0 : index
    %c0_105 = arith.constant 0 : index
    %380 = vector.load %arg12[%c0_103, %c0_104, %c0_105] : memref<1x1024x128xbf16, #tpu.memory_space<vmem>>, vector<1x1024x128xbf16>
    %381 = vector.shape_cast %380 : vector<1x1024x128xbf16> to vector<1024x128xbf16>
    %cst_106 = arith.constant dense<0.000000e+00> : vector<8x128xf32>
    %382 = tpu.matmul %379, %381, %cst_106 {dimension_numbers = #tpu.dot_dimension_numbers<[1], [0], [0], [1], [0, 0, 1, 1], [], []>} : vector<8x1024xbf16>, vector<1024x128xbf16>, vector<8x128xf32> -> vector<8x128xf32>
    %383 = vector.extract_strided_slice %8 {offsets = [3, 0], sizes = [1, 128], strides = [1, 1]} : vector<16x128xf32> to vector<1x128xf32>
    %384 = vector.broadcast %383 : vector<1x128xf32> to vector<8x128xf32>
    %385 = arith.addf %382, %384 : vector<8x128xf32>
    %386 = arith.addf %209, %385 : vector<8x128xf32>
    %387 = vector.extract_strided_slice %8 {offsets = [4, 0], sizes = [1, 128], strides = [1, 1]} : vector<16x128xf32> to vector<1x128xf32>
    %388 = vector.extract_strided_slice %8 {offsets = [5, 0], sizes = [1, 128], strides = [1, 1]} : vector<16x128xf32> to vector<1x128xf32>
    %cst_107 = arith.constant dense<0.000000e+00> : vector<8xf32>
    %389 = vector.multi_reduction <add>, %386, %cst_107 [1] : vector<8x128xf32> to vector<8xf32>
    %390 = vector.shape_cast %389 : vector<8xf32> to vector<8x1xf32>
    %cst_108 = arith.constant 3.125000e-02 : f32
    %391 = vector.broadcast %cst_108 : f32 to vector<8x1xf32>
    %392 = arith.mulf %390, %391 : vector<8x1xf32>
    %393 = arith.mulf %386, %386 : vector<8x128xf32>
    %cst_109 = arith.constant dense<0.000000e+00> : vector<8xf32>
    %394 = vector.multi_reduction <add>, %393, %cst_109 [1] : vector<8x128xf32> to vector<8xf32>
    %395 = vector.shape_cast %394 : vector<8xf32> to vector<8x1xf32>
    %cst_110 = arith.constant 3.125000e-02 : f32
    %396 = vector.broadcast %cst_110 : f32 to vector<8x1xf32>
    %397 = arith.mulf %395, %396 : vector<8x1xf32>
    %398 = arith.mulf %392, %392 : vector<8x1xf32>
    %399 = arith.subf %397, %398 : vector<8x1xf32>
    %400 = vector.broadcast %392 : vector<8x1xf32> to vector<8x128xf32>
    %401 = arith.subf %386, %400 : vector<8x128xf32>
    %cst_111 = arith.constant 9.99999974E-6 : f32
    %402 = vector.broadcast %cst_111 : f32 to vector<8x1xf32>
    %403 = arith.addf %399, %402 : vector<8x1xf32>
    %404 = math.rsqrt %403 : vector<8x1xf32>
    %405 = vector.broadcast %404 : vector<8x1xf32> to vector<8x128xf32>
    %406 = arith.mulf %401, %405 : vector<8x128xf32>
    %407 = vector.broadcast %387 : vector<1x128xf32> to vector<8x128xf32>
    %408 = arith.mulf %406, %407 : vector<8x128xf32>
    %409 = vector.broadcast %388 : vector<1x128xf32> to vector<8x128xf32>
    %410 = arith.addf %408, %409 : vector<8x128xf32>
    %411 = arith.truncf %410 : vector<8x128xf32> to vector<8x128xbf16>
    %c0_112 = arith.constant 0 : index
    %c0_113 = arith.constant 0 : index
    %c0_114 = arith.constant 0 : index
    %412 = vector.load %arg13[%c0_112, %c0_113, %c0_114] : memref<1x128x128xbf16, #tpu.memory_space<vmem>>, vector<1x128x128xbf16>
    %413 = vector.shape_cast %412 : vector<1x128x128xbf16> to vector<128x128xbf16>
    %cst_115 = arith.constant dense<0.000000e+00> : vector<8x128xf32>
    %414 = tpu.matmul %411, %413, %cst_115 {dimension_numbers = #tpu.dot_dimension_numbers<[1], [0], [0], [1], [0, 0, 1, 1], [], []>} : vector<8x128xbf16>, vector<128x128xbf16>, vector<8x128xf32> -> vector<8x128xf32>
    %415 = vector.extract_strided_slice %8 {offsets = [6, 0], sizes = [1, 128], strides = [1, 1]} : vector<16x128xf32> to vector<1x128xf32>
    %416 = vector.broadcast %415 : vector<1x128xf32> to vector<8x128xf32>
    %417 = arith.addf %414, %416 : vector<8x128xf32>
    %cst_116 = arith.constant 0.000000e+00 : f32
    %418 = vector.broadcast %cst_116 : f32 to vector<8x128xf32>
    %419 = arith.maximumf %417, %418 : vector<8x128xf32>
    %420 = arith.truncf %419 : vector<8x128xf32> to vector<8x128xbf16>
    %c0_117 = arith.constant 0 : index
    %c0_118 = arith.constant 0 : index
    %c0_119 = arith.constant 0 : index
    %421 = vector.load %arg14[%c0_117, %c0_118, %c0_119] : memref<1x128x128xbf16, #tpu.memory_space<vmem>>, vector<1x128x128xbf16>
    %422 = vector.shape_cast %421 : vector<1x128x128xbf16> to vector<128x128xbf16>
    %cst_120 = arith.constant dense<0.000000e+00> : vector<8x128xf32>
    %423 = tpu.matmul %420, %422, %cst_120 {dimension_numbers = #tpu.dot_dimension_numbers<[1], [0], [0], [1], [0, 0, 1, 1], [], []>} : vector<8x128xbf16>, vector<128x128xbf16>, vector<8x128xf32> -> vector<8x128xf32>
    %424 = vector.extract_strided_slice %8 {offsets = [7, 0], sizes = [1, 128], strides = [1, 1]} : vector<16x128xf32> to vector<1x128xf32>
    %425 = vector.broadcast %424 : vector<1x128xf32> to vector<8x128xf32>
    %426 = arith.addf %423, %425 : vector<8x128xf32>
    %427 = arith.addf %410, %426 : vector<8x128xf32>
    %428 = vector.extract_strided_slice %8 {offsets = [8, 0], sizes = [1, 128], strides = [1, 1]} : vector<16x128xf32> to vector<1x128xf32>
    %429 = vector.extract_strided_slice %8 {offsets = [9, 0], sizes = [1, 128], strides = [1, 1]} : vector<16x128xf32> to vector<1x128xf32>
    %cst_121 = arith.constant dense<0.000000e+00> : vector<8xf32>
    %430 = vector.multi_reduction <add>, %427, %cst_121 [1] : vector<8x128xf32> to vector<8xf32>
    %431 = vector.shape_cast %430 : vector<8xf32> to vector<8x1xf32>
    %cst_122 = arith.constant 3.125000e-02 : f32
    %432 = vector.broadcast %cst_122 : f32 to vector<8x1xf32>
    %433 = arith.mulf %431, %432 : vector<8x1xf32>
    %434 = arith.mulf %427, %427 : vector<8x128xf32>
    %cst_123 = arith.constant dense<0.000000e+00> : vector<8xf32>
    %435 = vector.multi_reduction <add>, %434, %cst_123 [1] : vector<8x128xf32> to vector<8xf32>
    %436 = vector.shape_cast %435 : vector<8xf32> to vector<8x1xf32>
    %cst_124 = arith.constant 3.125000e-02 : f32
    %437 = vector.broadcast %cst_124 : f32 to vector<8x1xf32>
    %438 = arith.mulf %436, %437 : vector<8x1xf32>
    %439 = arith.mulf %433, %433 : vector<8x1xf32>
    %440 = arith.subf %438, %439 : vector<8x1xf32>
    %441 = vector.broadcast %433 : vector<8x1xf32> to vector<8x128xf32>
    %442 = arith.subf %427, %441 : vector<8x128xf32>
    %cst_125 = arith.constant 9.99999974E-6 : f32
    %443 = vector.broadcast %cst_125 : f32 to vector<8x1xf32>
    %444 = arith.addf %440, %443 : vector<8x1xf32>
    %445 = math.rsqrt %444 : vector<8x1xf32>
    %446 = vector.broadcast %445 : vector<8x1xf32> to vector<8x128xf32>
    %447 = arith.mulf %442, %446 : vector<8x128xf32>
    %448 = vector.broadcast %428 : vector<1x128xf32> to vector<8x128xf32>
    %449 = arith.mulf %447, %448 : vector<8x128xf32>
    %450 = vector.broadcast %429 : vector<1x128xf32> to vector<8x128xf32>
    %451 = arith.addf %449, %450 : vector<8x128xf32>
    %c0_126 = arith.constant 0 : index
    %c0_127 = arith.constant 0 : index
    %452 = vector.load %arg19[%c0_126, %c0_127] : memref<8x128xf32, #tpu.memory_space<vmem>>, vector<8x128xf32>
    tpu.vector_store %arg19[%c0_126, %c0_127], %451 {strides = array<i32>} : memref<8x128xf32, #tpu.memory_space<vmem>>, vector<8x128xf32>,
    %c1_i32 = arith.constant 1 : i32
    %453 = arith.cmpi eq, %arg1, %c1_i32 : i32
    %454 = arith.extui %453 : i1 to i32
    %c0_i32_128 = arith.constant 0 : i32
    %455 = arith.cmpi ne, %454, %c0_i32_128 : i32
    scf.if %455 {
      %456 = arith.truncf %451 : vector<8x128xf32> to vector<8x128xbf16>
      %c0_129 = arith.constant 0 : index
      %c0_130 = arith.constant 0 : index
      %457 = vector.load %arg16[%c0_129, %c0_130] : memref<128x128xbf16, #tpu.memory_space<vmem>>, vector<128x128xbf16>
      %cst_131 = arith.constant dense<0.000000e+00> : vector<8x128xf32>
      %458 = tpu.matmul %456, %457, %cst_131 {dimension_numbers = #tpu.dot_dimension_numbers<[1], [0], [0], [1], [0, 0, 1, 1], [], []>} : vector<8x128xbf16>, vector<128x128xbf16>, vector<8x128xf32> -> vector<8x128xf32>
      %c0_132 = arith.constant 0 : index
      %c0_133 = arith.constant 0 : index
      %459 = vector.load %arg17[%c0_132, %c0_133] : memref<1x128xf32, #tpu.memory_space<vmem>>, vector<1x128xf32>
      %460 = vector.broadcast %459 : vector<1x128xf32> to vector<8x128xf32>
      %461 = arith.addf %458, %460 : vector<8x128xf32>
      %c0_134 = arith.constant 0 : index
      %c0_135 = arith.constant 0 : index
      %c0_136 = arith.constant 0 : index
      %462 = vector.load %arg18[%c0_134, %c0_135, %c0_136] : memref<1x8x128xf32, #tpu.memory_space<vmem>>, vector<1x8x128xf32>
      %463 = vector.shape_cast %462 : vector<1x8x128xf32> to vector<8x128xf32>
      %464 = vector.shape_cast %461 : vector<8x128xf32> to vector<1x8x128xf32>
      tpu.vector_store %arg18[%c0_134, %c0_135, %c0_136], %464 {strides = array<i32>} : memref<1x8x128xf32, #tpu.memory_space<vmem>>, vector<1x8x128xf32>,
    } else {
    }
    return
  }
  func.func @transform_0(%arg0: i32, %arg1: i32) -> (i32, i32, i32) {
    %c0_i32 = arith.constant 0 : i32
    %c0_i32_0 = arith.constant 0 : i32
    %c0_i32_1 = arith.constant 0 : i32
    return %arg0, %c0_i32, %c0_i32_0 : i32, i32, i32
  }
  func.func @transform_1(%arg0: i32, %arg1: i32) -> (i32, i32, i32) {
    %c0_i32 = arith.constant 0 : i32
    %c0_i32_0 = arith.constant 0 : i32
    %c0_i32_1 = arith.constant 0 : i32
    return %arg0, %c0_i32, %c0_i32_0 : i32, i32, i32
  }
  func.func @transform_2(%arg0: i32, %arg1: i32) -> (i32, i32) {
    %c0_i32 = arith.constant 0 : i32
    %c0_i32_0 = arith.constant 0 : i32
    %c0_i32_1 = arith.constant 0 : i32
    return %c0_i32, %c0_i32_0 : i32, i32
  }
  func.func @transform_3(%arg0: i32, %arg1: i32) -> (i32, i32, i32) {
    %c0_i32 = arith.constant 0 : i32
    %c0_i32_0 = arith.constant 0 : i32
    %c0_i32_1 = arith.constant 0 : i32
    return %arg1, %c0_i32, %c0_i32_0 : i32, i32, i32
  }
  func.func @transform_4(%arg0: i32, %arg1: i32) -> (i32, i32, i32) {
    %c0_i32 = arith.constant 0 : i32
    %c0_i32_0 = arith.constant 0 : i32
    %c0_i32_1 = arith.constant 0 : i32
    return %arg1, %c0_i32, %c0_i32_0 : i32, i32, i32
  }
  func.func @transform_5(%arg0: i32, %arg1: i32) -> (i32, i32, i32) {
    %c0_i32 = arith.constant 0 : i32
    %c0_i32_0 = arith.constant 0 : i32
    %c0_i32_1 = arith.constant 0 : i32
    return %arg1, %c0_i32, %c0_i32_0 : i32, i32, i32
  }
  func.func @transform_6(%arg0: i32, %arg1: i32) -> (i32, i32, i32) {
    %c0_i32 = arith.constant 0 : i32
    %c0_i32_0 = arith.constant 0 : i32
    %c0_i32_1 = arith.constant 0 : i32
    return %arg1, %c0_i32, %c0_i32_0 : i32, i32, i32
  }
  func.func @transform_7(%arg0: i32, %arg1: i32) -> (i32, i32, i32) {
    %c0_i32 = arith.constant 0 : i32
    %c0_i32_0 = arith.constant 0 : i32
    %c0_i32_1 = arith.constant 0 : i32
    return %arg1, %c0_i32, %c0_i32_0 : i32, i32, i32
  }
  func.func @transform_8(%arg0: i32, %arg1: i32) -> (i32, i32, i32) {
    %c0_i32 = arith.constant 0 : i32
    %c0_i32_0 = arith.constant 0 : i32
    %c0_i32_1 = arith.constant 0 : i32
    return %arg1, %c0_i32, %c0_i32_0 : i32, i32, i32
  }
  func.func @transform_9(%arg0: i32, %arg1: i32) -> (i32, i32, i32) {
    %c0_i32 = arith.constant 0 : i32
    %c0_i32_0 = arith.constant 0 : i32
    %c0_i32_1 = arith.constant 0 : i32
    return %arg1, %c0_i32, %c0_i32_0 : i32, i32, i32
  }
  func.func @transform_10(%arg0: i32, %arg1: i32) -> (i32, i32, i32) {
    %c0_i32 = arith.constant 0 : i32
    %c0_i32_0 = arith.constant 0 : i32
    %c0_i32_1 = arith.constant 0 : i32
    return %arg1, %c0_i32, %c0_i32_0 : i32, i32, i32
  }
  func.func @transform_11(%arg0: i32, %arg1: i32) -> (i32, i32, i32) {
    %c0_i32 = arith.constant 0 : i32
    %c0_i32_0 = arith.constant 0 : i32
    %c0_i32_1 = arith.constant 0 : i32
    return %arg1, %c0_i32, %c0_i32_0 : i32, i32, i32
  }
  func.func @transform_12(%arg0: i32, %arg1: i32) -> (i32, i32, i32) {
    %c0_i32 = arith.constant 0 : i32
    %c0_i32_0 = arith.constant 0 : i32
    %c0_i32_1 = arith.constant 0 : i32
    return %arg1, %c0_i32, %c0_i32_0 : i32, i32, i32
  }
  func.func @transform_13(%arg0: i32, %arg1: i32) -> (i32, i32, i32) {
    %c0_i32 = arith.constant 0 : i32
    %c0_i32_0 = arith.constant 0 : i32
    %c0_i32_1 = arith.constant 0 : i32
    return %arg1, %c0_i32, %c0_i32_0 : i32, i32, i32
  }
  func.func @transform_14(%arg0: i32, %arg1: i32) -> (i32, i32) {
    %c0_i32 = arith.constant 0 : i32
    %c0_i32_0 = arith.constant 0 : i32
    %c0_i32_1 = arith.constant 0 : i32
    return %c0_i32, %c0_i32_0 : i32, i32
  }
  func.func @transform_15(%arg0: i32, %arg1: i32) -> (i32, i32) {
    %c0_i32 = arith.constant 0 : i32
    %c0_i32_0 = arith.constant 0 : i32
    %c0_i32_1 = arith.constant 0 : i32
    return %c0_i32, %c0_i32_0 : i32, i32
  }
  func.func @transform_16(%arg0: i32, %arg1: i32) -> (i32, i32, i32) {
    %c0_i32 = arith.constant 0 : i32
    %c0_i32_0 = arith.constant 0 : i32
    %c0_i32_1 = arith.constant 0 : i32
    return %arg0, %c0_i32, %c0_i32_0 : i32, i32, i32
  }
}

</mosaic_0001>

<bundles_post_ra>
// kernel: transformer_forward.2
= control target key start
LH: loop header
LB: loop body
LE: loop exit
PB: predicated region body
PF: predicated region fallthrough
CT: control target
= control target key end

     0   :  { %s6757_s0 = inlined_call_operand.vmem [shape: f32[2,10,128], index: 0, kind: input, shape index: {}]   ;;  %s6758_s1 = inlined_call_operand.hbm [shape: bf16[2,128,3072], index: 1, kind: input, shape index: {}]   ;;  %s6759_s2 = inlined_call_operand.hbm [shape: f32[2,1,3072], index: 2, kind: input, shape index: {}]   ;;  %s6760_s3 = inlined_call_operand.hbm [shape: bf16[2,1024,128], index: 3, kind: input, shape index: {}]   ;;  %s6761_s4 = inlined_call_operand.hbm [shape: bf16[2,128,128], index: 4, kind: input, shape index: {}]   ;;  %s6762_s5 = inlined_call_operand.hbm [shape: bf16[2,128,128], index: 5, kind: input, shape index: {}]   ;;  %s6763_s6 = inlined_call_operand.hbm [shape: f32[2,8,128], index: 6, kind: input, shape index: {}]   ;;  %s6764_s7 = inlined_call_operand.vmem [shape: f32[2,10,128], index: 7, kind: output, shape index: {}]  }
   0x1   :  { %6774 = sst [smem:[#allocation24_spill]] %s6757_s0 }
   0x2   :  { %6775 = sst [smem:[#allocation25_spill]] %s6759_s2 }
   0x3   :  { %6776 = sst [smem:[#allocation26_spill]] %s6761_s4 }
   0x4   :  { %6777 = sst [smem:[#allocation27_spill]] %s6764_s7 }
   0x5   :  { %12 = vsyncpa [#allocation4], 0 }
   0x6   :  { %14 = vsyncpa [#allocation4 + $0x1], 0 }
   0x7   :  { %15 = vsyncpa [#allocation6], 0 }
   0x8   :  { %17 = vsyncpa [#allocation6 + $0x1], 0 }
   0x9   :  { %18 = vsyncpa [#allocation9], 0 }
   0xa   :  { %20 = vsyncpa [#allocation9 + $0x1], 0 }
   0xb   :  { %21 = vsyncpa [#allocation12], 0 }
   0xc   :  { %23 = vsyncpa [#allocation12 + $0x1], 0  ;;  %s5609_s24 = smov 0   ;;  %s5611_s25 = smov 0  }
   0xd   :  { %s5613_s26 = smov 0   ;;  %s5615_s27 = smov 0  }
   0xe   :  { %s5617_s28 = smov 0   ;;  %s5619_s29 = smov 0  }
   0xf   :  { %s5621_s30 = smov 0   ;;  %s5623_s8 = smov 0  }
  0x10 LB: > { %6778 = sst [smem:[#allocation17_spill]] %s5534_s26  ;;  %s6765_s9 = sadd.s32 4294967295, %s5554_s8   ;;  %s5554_s8 = sphi %s5623_s8, %s29_s8   ;;  %s5550_s30 = sphi %s5621_s30, %s6808_s30   ;;  %s5546_s29 = sphi %s5619_s29, %s6812_s29   ;;  %s5542_s28 = sphi %s5617_s28, %s6806_s28   ;;  %s5538_s27 = sphi %s5615_s27, %s6811_s27   ;;  %s5534_s26 = sphi %s5613_s26, %s6805_s26   ;;  %s5530_s25 = sphi %s5611_s25, %s6810_s25   ;;  %s5526_s24 = sphi %s5609_s24, %s6809_s24  }
  0x11   : > { %6779 = sst [smem:[#allocation18_spill]] %s5538_s27  ;;  %s38_s10 = sadd.s32 1, %s5546_s29 }
  0x12   : > { %6780 = sst [smem:[#allocation19_spill]] %s5542_s28  ;;  %p39_p0 = scmp.ge.s32.totalorder %s38_s10, 2 }
  0x13   : > { %6781 = sst [smem:[#allocation20_spill]] %s5550_s30  ;;  %s41_s11 = sadd.s32 1, %s5550_s30 }
  0x14   : > { %s74_s12 = sadd.s32 1, %s5534_s26  ;;  %p81_p1 = scmp.ne.s32.totalorder %s5534_s26, %s5530_s25 }
  0x15   : > { %s6814_s10 = smov (%p39_p0, %s38_s10), 0  ;;  %s6816_s11 = smov (!%p39_p0, %s41_s11), %s5550_s30 }
  0x16   : > { %6782 = sst [smem:[#allocation21_spill]] %s6814_s10  ;;  %s71_s13 = ssub.s32 %s5546_s29, %s6814_s10 }
  0x17   : > { %p82_p2 = scmp.eq.s32.totalorder %s5554_s8, 0  ;;  %p43_p3 = scmp.ge.s32.totalorder %s6816_s11, 2 }
  0x18   : > { %p72_p4 = scmp.eq.s32.totalorder %s71_s13, 0  ;;  %p87_p6 = scmp.ne.s32.totalorder %s5530_s25, %s5526_s24 }
  0x19   : > { %p83_p5 = por %p82_p2, %p81_p1  ;;  %s6818_s11 = smov (%p43_p3, %s6816_s11), 0 }
  0x1a   : > { %6783 = sst [smem:[#allocation22_spill]] %s6818_s11  ;;  %p88_p7 = scmp.eq.s32.totalorder %s6765_s9, 0 }
  0x1b   : > { %s5663_s14 = scalar_select %p72_p4, %s5534_s26, %s74_s12  }
  0x1c   : > { %p5070_p8 = scmp.lt.s32.totalorder %s5554_s8, 4  ;;  %s5669_s15 = sand.u32 1, %s5534_s26  }
  0x1d   : > { %6784 = sst [smem:[#allocation23_spill]] %s5663_s14  ;;  %p5671_p9 = por %p88_p7, %p87_p6 }
  0x1e   : > { %s6766_s17 = sand.u32 1, %s5554_s8   ;;  %p5676_p10 = pnand %p5070_p8, %p83_p5 }
  0x1f   : > { %s6785_s16 = scalar_select %p5671_p9, 1, 0 }
  0x20   : > { %s6786_s18 = scalar_select %p5676_p10, 1, 0 }
  0x21   : > { %s5035_s19 = smul.u32 24, %s5669_s15  ;;  %s6787_s2 = sld [smem:[#allocation25_spill]] }
  0x22   : > { %s5036_s20 = smul.u32 384, %s5546_s29  ;;  %s5693_s13 = scalar_lea.sflag [#allocation6], %s6766_s17 }
  0x23   : > { %s300_s24 = scalar_lea.vmem [#allocation5], %s5035_s19  ;;  %p5699_p0 = pneg %p5676_p10 }
  0x24   : > { %s308_s12 = sshll.u32 %s300_s24, 4  ;;  %s5688_s12 = int_to_ptr.vmem [resolvable:$true] %s308_s12 }
  0x27   : > { %s5686_s23 = scalar_lea.hbm %s6787_s2, %s5036_s20  ;;  %s5301_s21 = scalar_lea.hbm %s6787_s2, 768 }
  0x28   : > { %s5296_s9 = scalar_lea.hbm %s5686_s23, 384  ;;  %p5302_p3 = scmp.lt.u32.totalorder %s5686_s23, %s6787_s2 }
  0x29   : > { %p5297_p13 = scmp.ne.s32.totalorder %s5686_s23, %s5296_s9  ;;  %p5303_p4 = scmp.lt.u32.totalorder %s5301_s21, %s5296_s9 }
  0x2a   : > { %p5305_p6 = scmp.lt.u32.totalorder %s5296_s9, %s5686_s23 }
  0x2b   : > { %p5299_p1 = pnand %p5699_p0, %p5297_p13  ;;  %p5304_p5 = por %p5303_p4, %p5302_p3 }
  0x2d   : > { %p5300_p2 = pneg %p5299_p1  ;;  %p5306_p7 = por %p5305_p6, %p5304_p5 }
  0x2f   : > { %p5307_p8 = pnand %p5306_p7, %p5300_p2 }
  0x31   : > { %5310 = shalt.err (!%p5307_p8)
}
  0x32   : > { %s5311_s17 = scalar_lea.vmem %s5688_s12, 384  ;;  %s5556_s20 = smov [#allocation5]  }
  0x33   : > { %p5312_p13 = scmp.ne.s32.totalorder %s5688_s12, %s5311_s17  ;;  %s5316_s19 = sshll.u32 %s5556_s20, 4  ;;  %s5317_s19 = int_to_ptr.vmem [resolvable:$false] %s5316_s19 }
  0x34   : > { %s5318_s22 = scalar_lea.vmem %s5317_s19, 768  ;;  %p5319_p12 = scmp.lt.s32.totalorder %s5688_s12, %s5317_s19 }
  0x35   : > { %p5314_p1 = pnand %p5312_p13, %p5699_p0  ;;  %p5320_p9 = scmp.lt.s32.totalorder %s5318_s22, %s5311_s17 }
  0x37   : > { %p5315_p11 = pneg %p5314_p1  ;;  %p5321_p3 = por %p5320_p9, %p5319_p12 }
  0x39   : > { %p5322_p4 = pnand %p5321_p3, %p5315_p11 }
  0x3b   : > { %5325 = shalt.err (!%p5322_p4)
}
  0x3c   : > { %5057 = dma.hbm_to_vmem [thread:$0]  (!%p5676_p10), %s5686_s23, 384, %s5688_s12, %s5693_s13  }
  0x3d   : > { %p6789_p2 = scmp.lt.s32.totalorder %s5554_s8, 5  ;;  %p6790_p5 = scmp.ge.s32.totalorder %s5554_s8, 1 }
  0x3e   : > { %s4453_s17 = sshll.u32 %s5669_s15, 6  ;;  %s6769_s21 = sshll.u32 %s5546_s29, 10 }
  0x3f   : > { %p5727_p6 = pnand %p6790_p5, %p6789_p2  ;;  %s6792_s4 = sld [smem:[#allocation26_spill]] }
  0x40   : > { %s340_s23 = scalar_lea.vmem [#allocation8], %s4453_s17  ;;  %s6793_s22 = sand.u32 1, %s5554_s8  }
  0x41   : > { %s6791_s9 = scalar_select %p5727_p6, 1, 0 }
  0x42   : > { %s347_s12 = sshll.u32 %s340_s23, 4  ;;  %s5746_s2 = scalar_lea.sflag [#allocation9], %s6793_s22  ;;  %s5742_s12 = int_to_ptr.vmem [resolvable:$true] %s347_s12 }
  0x45   : > { %s5738_s19 = scalar_lea.hbm %s6792_s4, %s6769_s21  ;;  %s5331_s21 = scalar_lea.hbm %s6792_s4, 2048 }
  0x46   : > { %s5326_s10 = scalar_lea.hbm %s5738_s19, 1024  ;;  %p5332_p7 = scmp.lt.u32.totalorder %s5738_s19, %s6792_s4 }
  0x47   : > { %p5327_p9 = scmp.ne.s32.totalorder %s5738_s19, %s5326_s10  ;;  %p5333_p8 = scmp.lt.u32.totalorder %s5331_s21, %s5326_s10 }
  0x48   : > { %p5335_p1 = scmp.lt.u32.totalorder %s5326_s10, %s5738_s19 }
  0x49   : > { %p5329_p11 = pnand %p5327_p9, %p5699_p0  ;;  %p5334_p13 = por %p5333_p8, %p5332_p7 }
  0x4b   : > { %p5330_p12 = pneg %p5329_p11  ;;  %p5336_p3 = por %p5335_p1, %p5334_p13 }
  0x4d   : > { %p5337_p4 = pnand %p5336_p3, %p5330_p12 }
  0x4f   : > { %5340 = shalt.err (!%p5337_p4)
}
  0x50   : > { %s5341_s23 = scalar_lea.vmem %s5742_s12, 1024  ;;  %s5557_s22 = smov [#allocation8]  }
  0x51   : > { %p5342_p2 = scmp.ne.s32.totalorder %s5742_s12, %s5341_s23  ;;  %s5346_s24 = sshll.u32 %s5557_s22, 4  ;;  %s5347_s24 = int_to_ptr.vmem [resolvable:$false] %s5346_s24 }
  0x52   : > { %s5348_s30 = scalar_lea.vmem %s5347_s24, 2048  ;;  %p5349_p11 = scmp.lt.s32.totalorder %s5742_s12, %s5347_s24 }
  0x53   : > { %p5344_p5 = pnand %p5342_p2, %p5699_p0  ;;  %p5350_p6 = scmp.lt.s32.totalorder %s5348_s30, %s5341_s23 }
  0x55   : > { %p5345_p9 = pneg %p5344_p5  ;;  %p5351_p7 = por %p5350_p6, %p5349_p11 }
  0x57   : > { %p5352_p8 = pnand %p5351_p7, %p5345_p9 }
  0x59   : > { %5355 = shalt.err (!%p5352_p8)
}
  0x5a   : > { %s5558_s10 = smov 64   ;;  %s5559_s14 = smov 4  }
  0x5b   : > { %5063 = dma.hbm_to_vmem [thread:$0]  (!%p5676_p10), %s5738_s19, 1024, %s5742_s12, %s5746_s2, %s5558_s10, %s5558_s10, %s5559_s14  }
  0x5c   : > { %s6794_s21 = sshll.u32 %s5546_s29, 10  ;;  %s361_s24 = scalar_lea.vmem [#allocation10], %s4453_s17 }
  0x5d   : > { %s5778_s22 = scalar_lea.hbm %s6762_s5, %s6794_s21  ;;  %s368_s30 = sshll.u32 %s361_s24, 4  ;;  %s5782_s30 = int_to_ptr.vmem [resolvable:$true] %s368_s30 }
  0x5e   : > { %s5033_s4 = smul.u32 1536, %s5669_s15  ;;  %s4450_s27 = sshll.u32 %s5669_s15, 9 }
  0x5f   : > { %s5034_s26 = smul.u32 24576, %s5546_s29  ;;  %s276_s17 = scalar_lea.sflag [#allocation4], %s5669_s15 }
  0x60   : > { %s279_s19 = scalar_lea.vmem [#allocation3], %s5033_s4  ;;  %s5361_s0 = scalar_lea.hbm %s6758_s1, 49152 }
  0x61   : > { %s5790_s28 = scalar_lea.hbm %s6758_s1, %s5034_s26  ;;  %s286_s12 = sshll.u32 %s279_s19, 4  ;;  %s5792_s12 = int_to_ptr.vmem [resolvable:$true] %s286_s12 }
  0x62   : > { %s5356_s21 = scalar_lea.hbm %s5790_s28, 24576  ;;  %p5362_p1 = scmp.lt.u32.totalorder %s5790_s28, %s6758_s1 }
  0x63   : > { %p5357_p6 = scmp.ne.s32.totalorder %s5790_s28, %s5356_s21  ;;  %p5363_p3 = scmp.lt.u32.totalorder %s5361_s0, %s5356_s21 }
  0x64   : > { %p5365_p2 = scmp.lt.u32.totalorder %s5356_s21, %s5790_s28 }
  0x65   : > { %p5359_p12 = pnand %p5357_p6, %p5699_p0  ;;  %p5364_p4 = por %p5363_p3, %p5362_p1 }
  0x67   : > { %p5360_p13 = pneg %p5359_p12  ;;  %p5366_p5 = por %p5365_p2, %p5364_p4 }
  0x69   : > { %p5367_p9 = pnand %p5366_p5, %p5360_p13 }
  0x6b   : > { %5370 = shalt.err (!%p5367_p9)
}
  0x6c   : > { %s5371_s4 = scalar_lea.vmem %s5792_s12, 24576  ;;  %s5560_s24 = smov [#allocation3]  }
  0x6d   : > { %p5372_p11 = scmp.ne.s32.totalorder %s5792_s12, %s5371_s4  ;;  %s5376_s19 = sshll.u32 %s5560_s24, 4  ;;  %s5377_s19 = int_to_ptr.vmem [resolvable:$false] %s5376_s19 }
  0x6e   : > { %s5378_s20 = scalar_lea.vmem %s5377_s19, 49152  ;;  %p5379_p6 = scmp.lt.s32.totalorder %s5792_s12, %s5377_s19 }
  0x6f   : > { %p5374_p7 = pnand %p5372_p11, %p5699_p0  ;;  %p5380_p12 = scmp.lt.s32.totalorder %s5378_s20, %s5371_s4 }
  0x71   : > { %p5375_p8 = pneg %p5374_p7  ;;  %p5381_p1 = por %p5380_p12, %p5379_p6 }
  0x73   : > { %p5382_p3 = pnand %p5381_p1, %p5375_p8 }
  0x75   : > { %5385 = shalt.err (!%p5382_p3)
}
  0x76   : > { %s5561_s21 = smov 1536   ;;  %s5562_s23 = smov 96  }
  0x77   : > { %5054 = dma.hbm_to_vmem [thread:$0]  (!%p5676_p10), %s5790_s28, 24576, %s5792_s12, %s276_s17, %s5561_s21, %s5561_s21, %s5562_s23  }
  0x78   : > { %s4754_s0 = sshll.u32 %s5546_s29, 13  ;;  %s319_s7 = scalar_lea.vmem [#allocation7], %s4450_s27 }
  0x79   : > { %s326_s26 = sshll.u32 %s319_s7, 4  ;;  %s5824_s19 = scalar_lea.hbm %s6760_s3, %s4754_s0  ;;  %s5826_s26 = int_to_ptr.vmem [resolvable:$true] %s326_s26 }
  0x7a   : > { %s5386_s20 = scalar_lea.hbm %s5824_s19, 8192  ;;  %s5391_s27 = scalar_lea.hbm %s6760_s3, 16384 }
  0x7b   : > { %p5387_p13 = scmp.ne.s32.totalorder %s5824_s19, %s5386_s20  ;;  %p5392_p5 = scmp.lt.u32.totalorder %s5824_s19, %s6760_s3 }
  0x7c   : > { %p5393_p9 = scmp.lt.u32.totalorder %s5391_s27, %s5386_s20  ;;  %p5395_p7 = scmp.lt.u32.totalorder %s5386_s20, %s5824_s19 }
  0x7d   : > { %p5389_p4 = pnand %p5387_p13, %p5699_p0 }
  0x7e   : > { %p5394_p11 = por %p5393_p9, %p5392_p5 }
  0x7f   : > { %p5390_p2 = pneg %p5389_p4 }
  0x80   : > { %p5396_p8 = por %p5395_p7, %p5394_p11 }
  0x82   : > { %p5397_p6 = pnand %p5396_p8, %p5390_p2 }
  0x84   : > { %5400 = shalt.err (!%p5397_p6)
}
  0x85   : > { %s5401_s23 = scalar_lea.vmem %s5826_s26, 8192  ;;  %s5563_s0 = smov [#allocation7]  }
  0x86   : > { %p5402_p12 = scmp.ne.s32.totalorder %s5826_s26, %s5401_s23  ;;  %s5406_s7 = sshll.u32 %s5563_s0, 4  ;;  %s5407_s7 = int_to_ptr.vmem [resolvable:$false] %s5406_s7 }
  0x87   : > { %s5408_s4 = scalar_lea.vmem %s5407_s7, 16384  ;;  %p5409_p13 = scmp.lt.s32.totalorder %s5826_s26, %s5407_s7 }
  0x88   : > { %p5404_p1 = pnand %p5402_p12, %p5699_p0  ;;  %p5410_p4 = scmp.lt.s32.totalorder %s5408_s4, %s5401_s23 }
  0x8a   : > { %p5405_p3 = pneg %p5404_p1  ;;  %p5411_p5 = por %p5410_p4, %p5409_p13 }
  0x8c   : > { %p5412_p9 = pnand %p5411_p5, %p5405_p3 }
  0x8e   : > { %5415 = shalt.err (!%p5412_p9)
}
  0x8f   : > { %5060 = dma.hbm_to_vmem [thread:$0]  (!%p5676_p10), %s5824_s19, 8192, %s5826_s26, %s5693_s13, %s5558_s10, %s5558_s10, %s5559_s14  }
  0x90   : > { %s5416_s24 = scalar_lea.hbm %s5778_s22, 1024  ;;  %s5421_s12 = scalar_lea.hbm %s6762_s5, 2048 }
  0x91   : > { %p5417_p2 = scmp.ne.s32.totalorder %s5778_s22, %s5416_s24  ;;  %p5422_p8 = scmp.lt.u32.totalorder %s5778_s22, %s6762_s5 }
  0x92   : > { %p5423_p6 = scmp.lt.u32.totalorder %s5421_s12, %s5416_s24  ;;  %p5425_p1 = scmp.lt.u32.totalorder %s5416_s24, %s5778_s22 }
  0x93   : > { %p5419_p11 = pnand %p5417_p2, %p5699_p0 }
  0x94   : > { %p5424_p12 = por %p5423_p6, %p5422_p8 }
  0x95   : > { %p5420_p7 = pneg %p5419_p11 }
  0x96   : > { %p5426_p3 = por %p5425_p1, %p5424_p12 }
  0x98   : > { %p5427_p13 = pnand %p5426_p3, %p5420_p7 }
  0x9a   : > { %5430 = shalt.err (!%p5427_p13)
}
  0x9b   : > { %s5431_s13 = scalar_lea.vmem %s5782_s30, 1024  ;;  %s5564_s26 = smov [#allocation10]  }
  0x9c   : > { %p5432_p4 = scmp.ne.s32.totalorder %s5782_s30, %s5431_s13  ;;  %s5436_s19 = sshll.u32 %s5564_s26, 4  ;;  %s5437_s19 = int_to_ptr.vmem [resolvable:$false] %s5436_s19 }
  0x9d   : > { %s5438_s21 = scalar_lea.vmem %s5437_s19, 2048  ;;  %p5439_p2 = scmp.lt.s32.totalorder %s5782_s30, %s5437_s19 }
  0x9e   : > { %p5434_p5 = pnand %p5432_p4, %p5699_p0  ;;  %p5440_p11 = scmp.lt.s32.totalorder %s5438_s21, %s5431_s13 }
  0xa0   : > { %p5435_p9 = pneg %p5434_p5  ;;  %p5441_p8 = por %p5440_p11, %p5439_p2 }
  0xa2   : > { %p5442_p6 = pnand %p5441_p8, %p5435_p9 }
  0xa4   : > { %5445 = shalt.err (!%p5442_p6)
}
  0xa5   : > { %5066 = dma.hbm_to_vmem [thread:$0]  (!%p5676_p10), %s5778_s22, 1024, %s5782_s30, %s5746_s2, %s5558_s10, %s5558_s10, %s5559_s14  }
  0xa6   : > { %s4459_s23 = sshll.u32 %s5669_s15, 3  ;;  %s4460_s0 = sshll.u32 %s5546_s29, 7 }
  0xa7   : > { %s5883_s24 = scalar_lea.hbm %s6763_s6, %s4460_s0  ;;  %s382_s20 = scalar_lea.vmem [#allocation11], %s4459_s23 }
  0xa8   : > { %s389_s28 = sshll.u32 %s382_s20, 4  ;;  %s379_s12 = scalar_lea.sflag [#allocation12], %s5669_s15  ;;  %s390_s28 = int_to_ptr.vmem [resolvable:$true] %s389_s28 }
  0xa9   : > { %s5446_s27 = scalar_lea.hbm %s5883_s24, 128  ;;  %s5451_s14 = scalar_lea.hbm %s6763_s6, 256 }
  0xaa   : > { %p5447_p7 = scmp.ne.s32.totalorder %s5883_s24, %s5446_s27  ;;  %p5452_p3 = scmp.lt.u32.totalorder %s5883_s24, %s6763_s6 }
  0xab   : > { %p5453_p13 = scmp.lt.u32.totalorder %s5451_s14, %s5446_s27  ;;  %p5455_p5 = scmp.lt.u32.totalorder %s5446_s27, %s5883_s24 }
  0xac   : > { %p5449_p12 = pnand %p5447_p7, %p5699_p0 }
  0xad   : > { %p5454_p4 = por %p5453_p13, %p5452_p3 }
  0xae   : > { %p5450_p1 = pneg %p5449_p12 }
  0xaf   : > { %p5456_p9 = por %p5455_p5, %p5454_p4 }
  0xb1   : > { %p5457_p2 = pnand %p5456_p9, %p5450_p1 }
  0xb3   : > { %5460 = shalt.err (!%p5457_p2)
}
  0xb4   : > { %s5461_s15 = scalar_lea.vmem %s390_s28, 128  ;;  %s5565_s17 = smov [#allocation11]  }
  0xb5   : > { %p5462_p11 = scmp.ne.s32.totalorder %s390_s28, %s5461_s15  ;;  %s5466_s13 = sshll.u32 %s5565_s17, 4  ;;  %s5467_s13 = int_to_ptr.vmem [resolvable:$false] %s5466_s13 }
  0xb6   : > { %s5468_s26 = scalar_lea.vmem %s5467_s13, 256  ;;  %p5469_p7 = scmp.lt.s32.totalorder %s390_s28, %s5467_s13 }
  0xb7   : > { %p5464_p8 = pnand %p5462_p11, %p5699_p0  ;;  %p5470_p12 = scmp.lt.s32.totalorder %s5468_s26, %s5461_s15 }
  0xb9   : > { %p5465_p6 = pneg %p5464_p8  ;;  %p5471_p10 = por %p5470_p12, %p5469_p7 }
  0xbb   : > { %p5472_p3 = pnand %p5471_p10, %p5465_p6 }
  0xbd   : > { %5475 = shalt.err (!%p5472_p3)
}
  0xbe   : > { %p6795_p13 = scmp.ne.s32.totalorder %s6786_s18, 0  ;;  %p6796_p1 = scmp.ne.s32.totalorder %s6791_s9, 0 }
  0xbf   : > { %s400_s11 = sand.u32 (!%p6796_p1), 1, %s5530_s25   ;;  %p6797_p0 = scmp.ne.s32.totalorder (!%p6796_p1), %s6785_s16, 0 }
  0xc0   : > { %5069 = dma.hbm_to_vmem [thread:$0]  (!%p6795_p13), %s5883_s24, 128, %s390_s28, %s379_s12  }
  0xc1   : > { %398 = sbr.rel (%p6796_p1) target bundleno = 2360 (0x938), region = 48  ;;  %s401_s21 = scalar_lea.sflag (!%p6796_p1), [#allocation4], %s400_s11 }
  0xc2   : > { %s5037_s19 = smul.u32 (!%p6796_p1), 1536, %s400_s11 }
  0xc4   : > { %s5906_s23 = scalar_lea.vmem (!%p6796_p1), [#allocation3], %s5037_s19 }
  0xc8   : > { %5509 = dma.done.wait (%p6797_p0), %s401_s21, 24576  }
  0xc9   : > { %5511 = vsyncadd (%p6797_p0), %s401_s21, 4294942720  ;;  %s6798_s0 = sadd.s32 4294967295, %s5554_s8   ;;  %s5038_s7 = smul.u32 24, %s400_s11 }
  0xca   : > { %s409_s18 = sand.u32 1, %s6798_s0  }
  0xcb   : > { %s410_s4 = scalar_lea.sflag [#allocation6], %s409_s18  ;;  %s5914_s9 = scalar_lea.vmem [#allocation5], %s5038_s7 }
  0xcc   : > { %5513 = dma.done.wait (%p6797_p0), %s410_s4, 8576  }
  0xcd   : > { %5515 = vsyncadd (%p6797_p0), %s410_s4, 4294958720  ;;  %s4462_s24 = sshll.u32 %s400_s11, 9  ;;  %s4463_s20 = sshll.u32 %s400_s11, 6 }
  0xce   : > { %s5920_s28 = scalar_lea.vmem [#allocation7], %s4462_s24  ;;  %s428_s12 = scalar_lea.sflag [#allocation9], %s409_s18 }
  0xcf   : > { %s5922_s27 = scalar_lea.vmem [#allocation8], %s4463_s20 }
  0xd0   : > { %5517 = dma.done.wait (%p6797_p0), %s428_s12, 2048  }
  0xd1   : > { %5519 = vsyncadd (%p6797_p0), %s428_s12, 4294965248  ;;  %s4465_s2 = sshll.u32 %s400_s11, 3  ;;  %s5928_s10 = scalar_lea.vmem [#allocation10], %s4463_s20 }
  0xd2   : > { %s446_s14 = scalar_lea.sflag [#allocation12], %s400_s11  ;;  %s5930_s22 = scalar_lea.vmem [#allocation11], %s4465_s2 }
  0xd3   : > { %5521 = dma.done.wait (%p6797_p0), %s446_s14, 128  }
  0xd4   : > { %5523 = vsyncadd (%p6797_p0), %s446_s14, 4294967168  ;;  %s6799_s30 = sld [smem:[#allocation19_spill]]  ;;  %s6800_s26 = sld [smem:[#allocation24_spill]] }
  0xd5   : > { %s6801_s18 = sld [smem:[#allocation27_spill]]  ;;  %s6802_s7 = sld [smem:[#allocation18_spill]] }
  0xda   : > { %p510_p10 = scmp.lt.s32.totalorder %s6799_s30, 1 }
  0xdb   : > { %p4470_p4 = scmp.ne.s32.totalorder %s6802_s7, 0 }
  0xdc   : > { %s6820_s30 = smov (!%p510_p10, %s6799_s30), 1 }
  0xdd   : > { %s4757_s15 = sshll.u32 %s6820_s30, 4  ;;  %524 = sbr.rel (%p4470_p4) target bundleno = 228 (0xe4), region = 76 }
  0xde   : > { %s514_s19 = scalar_lea.vmem %s6800_s26, %s4757_s15  ;;  %s5944_s11 = scalar_lea.vmem %s6801_s18, %s4757_s15 }
  0xdf   : > { %v525_v0 = vld [vmem:[%s514_s19] sm:$0xff] (!%p4470_p4)  ;;  %v526_v1 = vld [vmem:[%s514_s19 + $0x8] sm:$0x3] (!%p4470_p4) }
  0xe0   : > { %527 = vst [vmem:[#allocation2] sm:$0xff] (!%p4470_p4), %v525_v0  ;;  %528 = vst [vmem:[#allocation2 + $0x8] sm:$0x3] (!%p4470_p4), %v526_v1 }
  0xe4 PF: > { %v533_v2 = vld [vmem:[%s5906_s23] sm:$0xff]  ;;  %v5566_v8 = vmov 0   ;;  %v534_v12 = vld [vmem:[%s5906_s23 + $0x8] sm:$0xff]  ;;  %v535_v63 = vld [vmem:[%s5906_s23 + $0x10] sm:$0xff]  ;;  %vm5568_vm0 = vmmov 0   ;;  %vm2399_vm1 = vcmask 1044480  }
  0xe5   : > { %v545_v3 = vld [vmem:[%s5906_s23 + $0x60] sm:$0xff]  ;;  %1843 = vmatprep.mubr.bf16.mxu0 %v5566_v8  ;;  %1886 = vmatprep.mubr.bf16.mxu1 %v5566_v8  ;;  %v546_v13 = vld [vmem:[%s5906_s23 + $0x68] sm:$0xff]  ;;  %v547_v0 = vld [vmem:[%s5906_s23 + $0x70] sm:$0xff]  ;;  %vm2371_vm2 = vcmask 80896   ;;  %vm2375_vm3 = vcmask 74752   ;;  %vm3934_vm4 = vcmask 1041408  }
  0xe6   : > { %v557_v4 = vld [vmem:[%s5906_s23 + $0xc0] sm:$0xff]  ;;  %v4472_v5 = vcombine.high %v533_v2, %v545_v3  ;;  %v4471_v6 = vcombine.low %v533_v2, %v545_v3  ;;  %v4474_v15 = vcombine.high %v534_v12, %v546_v13  ;;  %v4473_v16 = vcombine.low %v534_v12, %v546_v13  ;;  %v558_v17 = vld [vmem:[%s5906_s23 + $0xc8] sm:$0xff]  ;;  %s6803_s16 = sld [smem:[#allocation18_spill]] }
  0xe7   : > { %v569_v7 = vld [vmem:[%s5906_s23 + $0x120] sm:$0xff]  ;;  %v570_v18 = vld [vmem:[%s5906_s23 + $0x128] sm:$0xff]  ;;  %v529_v3 = vld [vmem:[#allocation2] sm:$0xff] }
  0xe8   : > { %v4496_v9 = vcombine.high %v557_v4, %v569_v7  ;;  %v581_v10 = vld [vmem:[%s5906_s23 + $0x180] sm:$0xff]  ;;  %1811 = vmatprep.subr.bf16.mxu0 %v4472_v5  ;;  %v4495_v14 = vcombine.low %v557_v4, %v569_v7  ;;  %v4498_v20 = vcombine.high %v558_v17, %v570_v18  ;;  %v582_v21 = vld [vmem:[%s5906_s23 + $0x188] sm:$0xff]  ;;  %1854 = vmatprep.subr.bf16.mxu1 %v4474_v15  ;;  %v530_v4 = vld [vmem:[#allocation2 + $0x8] sm:$0x3] }
  0xe9   : > { %v593_v11 = vld [vmem:[%s5906_s23 + $0x1e0] sm:$0xff]  ;;  %1812 = vmatpush1.bf16.msra.mxu0 %v4471_v6  ;;  %v594_v22 = vld [vmem:[%s5906_s23 + $0x1e8] sm:$0xff]  ;;  %1855 = vmatpush1.bf16.msra.mxu1 %v4473_v16  ;;  %v4497_v25 = vcombine.low %v558_v17, %v570_v18  ;;  %v4476_v6 = vcombine.high %v535_v63, %v547_v0  ;;  %v536_v7 = vld [vmem:[%s5906_s23 + $0x18] sm:$0xff]  ;;  %v5987_v12 = vpack.c.bf16 %v530_v4, %v529_v3 }
  0xea   : > { %1813 = vmatprep.subr.bf16.mxu0 %v4496_v9  ;;  %v4520_v19 = vcombine.high %v581_v10, %v593_v11  ;;  %v605_v23 = vld [vmem:[%s5906_s23 + $0x240] sm:$0xff]  ;;  %v4519_v26 = vcombine.low %v581_v10, %v593_v11  ;;  %1856 = vmatprep.subr.bf16.mxu1 %v4498_v20  ;;  %v4522_v27 = vcombine.high %v582_v21, %v594_v22  ;;  %v606_v29 = vld [vmem:[%s5906_s23 + $0x248] sm:$0xff]  ;;  %v548_v9 = vld [vmem:[%s5906_s23 + $0x78] sm:$0xff] }
  0xeb   : > { %v617_v24 = vld [vmem:[%s5906_s23 + $0x2a0] sm:$0xff]  ;;  %v618_v30 = vld [vmem:[%s5906_s23 + $0x2a8] sm:$0xff]  ;;  %v4521_v33 = vcombine.low %v582_v21, %v594_v22  ;;  %v559_v10 = vld [vmem:[%s5906_s23 + $0xd0] sm:$0xff]  ;;  %v4478_v15 = vcombine.high %v536_v7, %v548_v9  ;;  %v4477_v21 = vcombine.low %v536_v7, %v548_v9 }
  0xec   : > { %v4544_v28 = vcombine.high %v605_v23, %v617_v24  ;;  %v629_v31 = vld [vmem:[%s5906_s23 + $0x300] sm:$0xff]  ;;  %v4543_v34 = vcombine.low %v605_v23, %v617_v24  ;;  %v4546_v35 = vcombine.high %v606_v29, %v618_v30  ;;  %v630_v37 = vld [vmem:[%s5906_s23 + $0x308] sm:$0xff]  ;;  %v4545_v41 = vcombine.low %v606_v29, %v618_v30  ;;  %v571_v11 = vld [vmem:[%s5906_s23 + $0x130] sm:$0xff]  ;;  %p4751_p5 = scmp.ne.s32.totalorder %s6803_s16, 1 }
  0xed   : > { %1814 = vmatpush1.bf16.msra.mxu0 %v4495_v14  ;;  %v641_v32 = vld [vmem:[%s5906_s23 + $0x360] sm:$0xff]  ;;  %1857 = vmatpush1.bf16.msra.mxu1 %v4497_v25  ;;  %v642_v38 = vld [vmem:[%s5906_s23 + $0x368] sm:$0xff]  ;;  %v4475_v14 = vcombine.low %v535_v63, %v547_v0  ;;  %v4500_v16 = vcombine.high %v559_v10, %v571_v11  ;;  %v560_v17 = vld [vmem:[%s5906_s23 + $0xd8] sm:$0xff]  ;;  %v4499_v22 = vcombine.low %v559_v10, %v571_v11 }
  0xee   : > { %1815 = vmatprep.subr.bf16.mxu0 %v4520_v19  ;;  %1858 = vmatprep.subr.bf16.mxu1 %v4522_v27  ;;  %v4568_v36 = vcombine.high %v629_v31, %v641_v32  ;;  %v653_v39 = vld [vmem:[%s5906_s23 + $0x3c0] sm:$0xff]  ;;  %v4567_v42 = vcombine.low %v629_v31, %v641_v32  ;;  %v4570_v43 = vcombine.high %v630_v37, %v642_v38  ;;  %v654_v45 = vld [vmem:[%s5906_s23 + $0x3c8] sm:$0xff]  ;;  %v572_v18 = vld [vmem:[%s5906_s23 + $0x138] sm:$0xff] }
  0xef   : > { %v665_v40 = vld [vmem:[%s5906_s23 + $0x420] sm:$0xff]  ;;  %v666_v46 = vld [vmem:[%s5906_s23 + $0x428] sm:$0xff]  ;;  %v4569_v49 = vcombine.low %v630_v37, %v642_v38  ;;  %v583_v19 = vld [vmem:[%s5906_s23 + $0x190] sm:$0xff]  ;;  %v4502_v23 = vcombine.high %v560_v17, %v572_v18  ;;  %v4501_v29 = vcombine.low %v560_v17, %v572_v18 }
  0xf0   : > { %v4592_v44 = vcombine.high %v653_v39, %v665_v40  ;;  %v677_v47 = vld [vmem:[%s5906_s23 + $0x480] sm:$0xff]  ;;  %v4591_v50 = vcombine.low %v653_v39, %v665_v40  ;;  %v4594_v51 = vcombine.high %v654_v45, %v666_v46  ;;  %v678_v53 = vld [vmem:[%s5906_s23 + $0x488] sm:$0xff]  ;;  %v4593_v57 = vcombine.low %v654_v45, %v666_v46  ;;  %v595_v20 = vld [vmem:[%s5906_s23 + $0x1f0] sm:$0xff] }
  0xf1   : > { %1816 = vmatpush1.bf16.msra.mxu0 %v4519_v26  ;;  %1859 = vmatpush1.bf16.msra.mxu1 %v4521_v33  ;;  %v689_v48 = vld [vmem:[%s5906_s23 + $0x4e0] sm:$0xff]  ;;  %v690_v54 = vld [vmem:[%s5906_s23 + $0x4e8] sm:$0xff]  ;;  %v4524_v24 = vcombine.high %v583_v19, %v595_v20  ;;  %v584_v25 = vld [vmem:[%s5906_s23 + $0x198] sm:$0xff]  ;;  %v4523_v30 = vcombine.low %v583_v19, %v595_v20 }
  0xf2   : > { %1817 = vmatprep.subr.bf16.mxu0 %v4544_v28  ;;  %1860 = vmatprep.subr.bf16.mxu1 %v4546_v35  ;;  %v4616_v52 = vcombine.high %v677_v47, %v689_v48  ;;  %v701_v55 = vld [vmem:[%s5906_s23 + $0x540] sm:$0xff]  ;;  %v4615_v58 = vcombine.low %v677_v47, %v689_v48  ;;  %v4618_v59 = vcombine.high %v678_v53, %v690_v54  ;;  %v702_v61 = vld [vmem:[%s5906_s23 + $0x548] sm:$0xff]  ;;  %v596_v26 = vld [vmem:[%s5906_s23 + $0x1f8] sm:$0xff] }
  0xf3   : > { %v713_v56 = vld [vmem:[%s5906_s23 + $0x5a0] sm:$0xff]  ;;  %v714_v62 = vld [vmem:[%s5906_s23 + $0x5a8] sm:$0xff]  ;;  %v4617_v1 = vcombine.low %v678_v53, %v690_v54  ;;  %v607_v27 = vld [vmem:[%s5906_s23 + $0x250] sm:$0xff]  ;;  %v4526_v31 = vcombine.high %v584_v25, %v596_v26  ;;  %v4525_v37 = vcombine.low %v584_v25, %v596_v26 }
  0xf4   : > { %v4640_v60 = vcombine.high %v701_v55, %v713_v56  ;;  %v4639_v2 = vcombine.low %v701_v55, %v713_v56  ;;  %v4642_v5 = vcombine.high %v702_v61, %v714_v62  ;;  %v4641_v13 = vcombine.low %v702_v61, %v714_v62  ;;  %v619_v28 = vld [vmem:[%s5906_s23 + $0x2b0] sm:$0xff]  ;;  %v608_v33 = vld [vmem:[%s5906_s23 + $0x258] sm:$0xff]  ;;  %v550_v7 = vld [vmem:[%s5906_s23 + $0x88] sm:$0xff] }
  0xf5   : > { %1818 = vmatpush1.bf16.msra.mxu0 %v4543_v34  ;;  %1861 = vmatpush1.bf16.msra.mxu1 %v4545_v41  ;;  %v4548_v32 = vcombine.high %v607_v27, %v619_v28  ;;  %v620_v34 = vld [vmem:[%s5906_s23 + $0x2b8] sm:$0xff]  ;;  %v631_v35 = vld [vmem:[%s5906_s23 + $0x310] sm:$0xff]  ;;  %v4547_v39 = vcombine.low %v607_v27, %v619_v28  ;;  %v561_v10 = vld [vmem:[%s5906_s23 + $0xe0] sm:$0xff] }
  0xf6   : > { %1819 = vmatprep.subr.bf16.mxu0 %v4568_v36  ;;  %1862 = vmatprep.subr.bf16.mxu1 %v4570_v43  ;;  %v643_v36 = vld [vmem:[%s5906_s23 + $0x370] sm:$0xff]  ;;  %v632_v38 = vld [vmem:[%s5906_s23 + $0x318] sm:$0xff]  ;;  %v4549_v45 = vcombine.low %v608_v33, %v620_v34  ;;  %v573_v11 = vld [vmem:[%s5906_s23 + $0x140] sm:$0xff] }
  0xf7   : > { %v655_v40 = vld [vmem:[%s5906_s23 + $0x3d0] sm:$0xff]  ;;  %v644_v43 = vld [vmem:[%s5906_s23 + $0x378] sm:$0xff]  ;;  %v4571_v48 = vcombine.low %v631_v35, %v643_v36  ;;  %v574_v17 = vld [vmem:[%s5906_s23 + $0x148] sm:$0xff]  ;;  %v4503_v26 = vcombine.low %v561_v10, %v573_v11 }
  0xf8   : > { %v667_v41 = vld [vmem:[%s5906_s23 + $0x430] sm:$0xff]  ;;  %v656_v46 = vld [vmem:[%s5906_s23 + $0x3d8] sm:$0xff]  ;;  %v4573_v53 = vcombine.low %v632_v38, %v644_v43  ;;  %v585_v19 = vld [vmem:[%s5906_s23 + $0x1a0] sm:$0xff] }
  0xf9   : > { %1820 = vmatpush1.bf16.msra.mxu0 %v4567_v42  ;;  %1863 = vmatpush1.bf16.msra.mxu1 %v4569_v49  ;;  %v4550_v42 = vcombine.high %v608_v33, %v620_v34  ;;  %v668_v47 = vld [vmem:[%s5906_s23 + $0x438] sm:$0xff]  ;;  %v679_v49 = vld [vmem:[%s5906_s23 + $0x490] sm:$0xff]  ;;  %v4595_v56 = vcombine.low %v655_v40, %v667_v41  ;;  %v597_v20 = vld [vmem:[%s5906_s23 + $0x200] sm:$0xff] }
  0xfa   : > { %1821 = vmatprep.subr.bf16.mxu0 %v4592_v44  ;;  %1864 = vmatprep.subr.bf16.mxu1 %v4594_v51  ;;  %v4572_v44 = vcombine.high %v631_v35, %v643_v36  ;;  %v4574_v51 = vcombine.high %v632_v38, %v644_v43  ;;  %v680_v54 = vld [vmem:[%s5906_s23 + $0x498] sm:$0xff]  ;;  %v4597_v61 = vcombine.low %v656_v46, %v668_v47  ;;  %v598_v25 = vld [vmem:[%s5906_s23 + $0x208] sm:$0xff]  ;;  %v609_v27 = vld [vmem:[%s5906_s23 + $0x260] sm:$0xff] }
  0xfb   : > { %v692_v55 = vld [vmem:[%s5906_s23 + $0x4f8] sm:$0xff]  ;;  %v621_v28 = vld [vmem:[%s5906_s23 + $0x2c0] sm:$0xff]  ;;  %v622_v33 = vld [vmem:[%s5906_s23 + $0x2c8] sm:$0xff]  ;;  %v4527_v34 = vcombine.low %v585_v19, %v597_v20 }
  0xfc   : > { %v704_v62 = vld [vmem:[%s5906_s23 + $0x558] sm:$0xff]  ;;  %v4622_v3 = vcombine.high %v680_v54, %v692_v55  ;;  %v633_v35 = vld [vmem:[%s5906_s23 + $0x320] sm:$0xff]  ;;  %v4552_v38 = vcombine.high %v609_v27, %v621_v28 }
  0xfd   : > { %1822 = vmatpush1.bf16.msra.mxu0 %v4591_v50  ;;  %1865 = vmatpush1.bf16.msra.mxu1 %v4593_v57  ;;  %v691_v50 = vld [vmem:[%s5906_s23 + $0x4f0] sm:$0xff]  ;;  %v716_v63 = vld [vmem:[%s5906_s23 + $0x5b8] sm:$0xff]  ;;  %v645_v36 = vld [vmem:[%s5906_s23 + $0x380] sm:$0xff] }
  0xfe   : > { %1823 = vmatprep.subr.bf16.mxu0 %v4616_v52  ;;  %1866 = vmatprep.subr.bf16.mxu1 %v4618_v59  ;;  %v4596_v52 = vcombine.high %v655_v40, %v667_v41  ;;  %v703_v57 = vld [vmem:[%s5906_s23 + $0x550] sm:$0xff]  ;;  %v4598_v59 = vcombine.high %v656_v46, %v668_v47  ;;  %v4619_v0 = vcombine.low %v679_v49, %v691_v50  ;;  %v634_v40 = vld [vmem:[%s5906_s23 + $0x328] sm:$0xff]  ;;  %v657_v43 = vld [vmem:[%s5906_s23 + $0x3e0] sm:$0xff] }
  0xff   : > { %v646_v41 = vld [vmem:[%s5906_s23 + $0x388] sm:$0xff]  ;;  %v4576_v46 = vcombine.high %v633_v35, %v645_v36 }
 0x101   : > { %1824 = vmatpush1.bf16.msra.mxu0 %v4615_v58  ;;  %1867 = vmatpush1.bf16.msra.mxu1 %v4617_v1  ;;  %v715_v58 = vld [vmem:[%s5906_s23 + $0x5b0] sm:$0xff]  ;;  %v537_v1 = vld [vmem:[%s5906_s23 + $0x20] sm:$0xff] }
 0x102   : > { %1825 = vmatprep.subr.bf16.mxu0 %v4640_v60  ;;  %1868 = vmatprep.subr.bf16.mxu1 %v4642_v5  ;;  %v4620_v60 = vcombine.high %v679_v49, %v691_v50  ;;  %v4644_v4 = vcombine.high %v703_v57, %v715_v58  ;;  %v4621_v5 = vcombine.low %v680_v54, %v692_v55  ;;  %v670_v49 = vld [vmem:[%s5906_s23 + $0x448] sm:$0xff] }
 0x103   : > { %v4643_v9 = vcombine.low %v703_v57, %v715_v58  ;;  %v4575_v50 = vcombine.low %v633_v35, %v645_v36  ;;  %v4577_v55 = vcombine.low %v634_v40, %v646_v41  ;;  %v694_v57 = vld [vmem:[%s5906_s23 + $0x508] sm:$0xff] }
 0x105   : > { %1826 = vmatpush1.bf16.msra.mxu0 %v4639_v2  ;;  %1869 = vmatpush1.bf16.msra.mxu1 %v4641_v13  ;;  %v549_v2 = vld [vmem:[%s5906_s23 + $0x80] sm:$0xff]  ;;  %v4646_v13 = vcombine.high %v704_v62, %v716_v63 }
 0x106   : > { %1897 = vmatprep.subr.bf16.mxu0 %v4476_v6  ;;  %1940 = vmatprep.subr.bf16.mxu1 %v4478_v15  ;;  %v538_v6 = vld [vmem:[%s5906_s23 + $0x28] sm:$0xff]  ;;  %v4645_v15 = vcombine.low %v704_v62, %v716_v63  ;;  %v4479_v18 = vcombine.low %v537_v1, %v549_v2 }
 0x108   : > { %1844 = vmatmul.mubr.bf16.vlgmr.msra.gmra.mrb[0].mxu0 %v5987_v12  ;;  %1887 = vmatmul.mubr.bf16.vlgmr.msra.gmra.mrb[0].mxu1 %v5987_v12 }
 0x109   : > { %1898 = vmatpush1.bf16.msra.mxu0 %v4475_v14  ;;  %1929 = vmatprep.mubr.bf16.mxu0 %v5566_v8  ;;  %v4480_v14 = vcombine.high %v537_v1, %v549_v2  ;;  %v718_v1 = vld [vmem:[%s5906_s23 + $0x5c8] sm:$0xff] }
 0x10a   : > { %1899 = vmatprep.subr.bf16.mxu0 %v4500_v16  ;;  %1941 = vmatpush1.bf16.msra.mxu1 %v4477_v21  ;;  %v562_v16 = vld [vmem:[%s5906_s23 + $0xe8] sm:$0xff]  ;;  %v4482_v21 = vcombine.high %v538_v6, %v550_v7 }
 0x10b   : > { %1972 = vmatprep.mubr.bf16.mxu1 %v5566_v8  ;;  %1942 = vmatprep.subr.bf16.mxu1 %v4502_v23  ;;  %v4481_v23 = vcombine.low %v538_v6, %v550_v7 }
 0x10d   : > { %1900 = vmatpush1.bf16.msra.mxu0 %v4499_v22  ;;  %v4504_v22 = vcombine.high %v561_v10, %v573_v11  ;;  %v552_v10 = vld [vmem:[%s5906_s23 + $0x98] sm:$0xff] }
 0x10e   : > { %1901 = vmatprep.subr.bf16.mxu0 %v4524_v24  ;;  %1943 = vmatpush1.bf16.msra.mxu1 %v4501_v29  ;;  %v586_v24 = vld [vmem:[%s5906_s23 + $0x1a8] sm:$0xff]  ;;  %v4506_v29 = vcombine.high %v562_v16, %v574_v17 }
 0x10f   : > { %1944 = vmatprep.subr.bf16.mxu1 %v4526_v31  ;;  %v4505_v31 = vcombine.low %v562_v16, %v574_v17 }
 0x111   : > { %1902 = vmatpush1.bf16.msra.mxu0 %v4523_v30  ;;  %v4528_v30 = vcombine.high %v585_v19, %v597_v20 }
 0x112   : > { %1903 = vmatprep.subr.bf16.mxu0 %v4548_v32  ;;  %1945 = vmatpush1.bf16.msra.mxu1 %v4525_v37  ;;  %v610_v32 = vld [vmem:[%s5906_s23 + $0x268] sm:$0xff]  ;;  %v4530_v37 = vcombine.high %v586_v24, %v598_v25 }
 0x113   : > { %1946 = vmatprep.subr.bf16.mxu1 %v4550_v42  ;;  %v4551_v42 = vcombine.low %v609_v27, %v621_v28  ;;  %v4553_v47 = vcombine.low %v610_v32, %v622_v33 }
 0x115   : > { %1904 = vmatpush1.bf16.msra.mxu0 %v4547_v39  ;;  %v4529_v39 = vcombine.low %v586_v24, %v598_v25  ;;  %v599_v24 = vld [vmem:[%s5906_s23 + $0x210] sm:$0xff] }
 0x116   : > { %1905 = vmatprep.subr.bf16.mxu0 %v4572_v44  ;;  %1947 = vmatpush1.bf16.msra.mxu1 %v4549_v45  ;;  %v669_v44 = vld [vmem:[%s5906_s23 + $0x440] sm:$0xff]  ;;  %v4554_v45 = vcombine.high %v610_v32, %v622_v33  ;;  %v623_v32 = vld [vmem:[%s5906_s23 + $0x2d0] sm:$0xff] }
 0x117   : > { %1948 = vmatprep.subr.bf16.mxu1 %v4574_v51  ;;  %v681_v51 = vld [vmem:[%s5906_s23 + $0x4a0] sm:$0xff]  ;;  %v4600_v54 = vcombine.high %v657_v43, %v669_v44  ;;  %v4599_v58 = vcombine.low %v657_v43, %v669_v44 }
 0x119   : > { %1906 = vmatpush1.bf16.msra.mxu0 %v4571_v48  ;;  %v658_v48 = vld [vmem:[%s5906_s23 + $0x3e8] sm:$0xff] }
 0x11a   : > { %1907 = vmatprep.subr.bf16.mxu0 %v4596_v52  ;;  %1949 = vmatpush1.bf16.msra.mxu1 %v4573_v53  ;;  %v693_v52 = vld [vmem:[%s5906_s23 + $0x500] sm:$0xff]  ;;  %v4578_v53 = vcombine.high %v634_v40, %v646_v41  ;;  %v4601_v63 = vcombine.low %v658_v48, %v670_v49  ;;  %v647_v40 = vld [vmem:[%s5906_s23 + $0x390] sm:$0xff] }
 0x11b   : > { %1950 = vmatprep.subr.bf16.mxu1 %v4598_v59  ;;  %v705_v59 = vld [vmem:[%s5906_s23 + $0x560] sm:$0xff]  ;;  %v4624_v62 = vcombine.high %v681_v51, %v693_v52  ;;  %v4623_v2 = vcombine.low %v681_v51, %v693_v52 }
 0x11d   : > { %1908 = vmatpush1.bf16.msra.mxu0 %v4595_v56  ;;  %v682_v56 = vld [vmem:[%s5906_s23 + $0x4a8] sm:$0xff] }
 0x11e   : > { %1909 = vmatprep.subr.bf16.mxu0 %v4620_v60  ;;  %1951 = vmatpush1.bf16.msra.mxu1 %v4597_v61  ;;  %v717_v60 = vld [vmem:[%s5906_s23 + $0x5c0] sm:$0xff]  ;;  %v4602_v61 = vcombine.high %v658_v48, %v670_v49  ;;  %v4625_v7 = vcombine.low %v682_v56, %v694_v57  ;;  %v671_v48 = vld [vmem:[%s5906_s23 + $0x450] sm:$0xff] }
 0x11f   : > { %1952 = vmatprep.subr.bf16.mxu1 %v4622_v3  ;;  %v539_v3 = vld [vmem:[%s5906_s23 + $0x30] sm:$0xff]  ;;  %v4648_v6 = vcombine.high %v705_v59, %v717_v60  ;;  %v4647_v11 = vcombine.low %v705_v59, %v717_v60 }
 0x121   : > { %1910 = vmatpush1.bf16.msra.mxu0 %v4619_v0  ;;  %v706_v0 = vld [vmem:[%s5906_s23 + $0x568] sm:$0xff] }
 0x122   : > { %1911 = vmatprep.subr.bf16.mxu0 %v4644_v4  ;;  %1953 = vmatpush1.bf16.msra.mxu1 %v4621_v5  ;;  %v551_v4 = vld [vmem:[%s5906_s23 + $0x90] sm:$0xff]  ;;  %v4626_v5 = vcombine.high %v682_v56, %v694_v57  ;;  %v4649_v17 = vcombine.low %v706_v0, %v718_v1 }
 0x123   : > { %1954 = vmatprep.subr.bf16.mxu1 %v4646_v13  ;;  %v563_v13 = vld [vmem:[%s5906_s23 + $0xf0] sm:$0xff]  ;;  %v4484_v16 = vcombine.high %v539_v3, %v551_v4  ;;  %v4483_v19 = vcombine.low %v539_v3, %v551_v4 }
 0x124   : > { %v695_v56 = vld [vmem:[%s5906_s23 + $0x510] sm:$0xff] }
 0x125   : > { %1912 = vmatpush1.bf16.msra.mxu0 %v4643_v9  ;;  %v540_v9 = vld [vmem:[%s5906_s23 + $0x38] sm:$0xff] }
 0x126   : > { %1983 = vmatprep.subr.bf16.mxu0 %v4480_v14  ;;  %1955 = vmatpush1.bf16.msra.mxu1 %v4645_v15  ;;  %v575_v14 = vld [vmem:[%s5906_s23 + $0x150] sm:$0xff]  ;;  %v4650_v15 = vcombine.high %v706_v0, %v718_v1  ;;  %v4486_v20 = vcombine.high %v540_v9, %v552_v10  ;;  %v4485_v25 = vcombine.low %v540_v9, %v552_v10  ;;  %v553_v9 = vld [vmem:[%s5906_s23 + $0xa0] sm:$0xff] }
 0x127   : > { %2026 = vmatprep.subr.bf16.mxu1 %v4482_v21  ;;  %v4508_v21 = vcombine.high %v563_v13, %v575_v14  ;;  %v719_v0 = vld [vmem:[%s5906_s23 + $0x5d0] sm:$0xff] }
 0x128   : > { %1930 = vmatmul.mubr.bf16.vlgmr.msra.gmra.mrb[4].mxu0 %v5987_v12 }
 0x129   : > { %1984 = vmatpush1.bf16.msra.mxu0 %v4479_v18  ;;  %2015 = vmatprep.mubr.bf16.mxu0 %v5566_v8  ;;  %v564_v18 = vld [vmem:[%s5906_s23 + $0xf8] sm:$0xff] }
 0x12a   : > { %1985 = vmatprep.subr.bf16.mxu0 %v4504_v22  ;;  %1973 = vmatmul.mubr.bf16.vlgmr.msra.gmra.mrb[4].mxu1 %v5987_v12  ;;  %v576_v22 = vld [vmem:[%s5906_s23 + $0x158] sm:$0xff] }
 0x12b   : > { %2027 = vmatpush1.bf16.msra.mxu1 %v4481_v23  ;;  %2058 = vmatprep.mubr.bf16.mxu1 %v5566_v8  ;;  %v587_v23 = vld [vmem:[%s5906_s23 + $0x1b0] sm:$0xff]  ;;  %v4510_v27 = vcombine.high %v564_v18, %v576_v22  ;;  %v4509_v33 = vcombine.low %v564_v18, %v576_v22 }
 0x12c   : > { %2028 = vmatprep.subr.bf16.mxu1 %v4506_v29  ;;  %v4532_v28 = vcombine.high %v587_v23, %v599_v24  ;;  %v588_v29 = vld [vmem:[%s5906_s23 + $0x1b8] sm:$0xff] }
 0x12d   : > { %1986 = vmatpush1.bf16.msra.mxu0 %v4503_v26  ;;  %v4507_v26 = vcombine.low %v563_v13, %v575_v14 }
 0x12e   : > { %1987 = vmatprep.subr.bf16.mxu0 %v4528_v30  ;;  %v600_v30 = vld [vmem:[%s5906_s23 + $0x218] sm:$0xff] }
 0x12f   : > { %2029 = vmatpush1.bf16.msra.mxu1 %v4505_v31  ;;  %v611_v31 = vld [vmem:[%s5906_s23 + $0x270] sm:$0xff]  ;;  %v4534_v35 = vcombine.high %v588_v29, %v600_v30  ;;  %v4533_v41 = vcombine.low %v588_v29, %v600_v30  ;;  %v649_v29 = vld [vmem:[%s5906_s23 + $0x3a0] sm:$0xff] }
 0x130   : > { %2030 = vmatprep.subr.bf16.mxu1 %v4530_v37  ;;  %v4556_v36 = vcombine.high %v611_v31, %v623_v32  ;;  %v612_v37 = vld [vmem:[%s5906_s23 + $0x278] sm:$0xff] }
 0x131   : > { %1988 = vmatpush1.bf16.msra.mxu0 %v4527_v34  ;;  %v4531_v34 = vcombine.low %v587_v23, %v599_v24  ;;  %v613_v24 = vld [vmem:[%s5906_s23 + $0x280] sm:$0xff] }
 0x132   : > { %1989 = vmatprep.subr.bf16.mxu0 %v4552_v38  ;;  %v624_v38 = vld [vmem:[%s5906_s23 + $0x2d8] sm:$0xff] }
 0x133   : > { %2031 = vmatpush1.bf16.msra.mxu1 %v4529_v39  ;;  %v635_v39 = vld [vmem:[%s5906_s23 + $0x330] sm:$0xff]  ;;  %v4558_v43 = vcombine.high %v612_v37, %v624_v38  ;;  %v4557_v49 = vcombine.low %v612_v37, %v624_v38  ;;  %v697_v37 = vld [vmem:[%s5906_s23 + $0x520] sm:$0xff] }
 0x134   : > { %2032 = vmatprep.subr.bf16.mxu1 %v4554_v45  ;;  %v4580_v44 = vcombine.high %v635_v39, %v647_v40  ;;  %v636_v45 = vld [vmem:[%s5906_s23 + $0x338] sm:$0xff] }
 0x135   : > { %1990 = vmatpush1.bf16.msra.mxu0 %v4551_v42  ;;  %v4555_v42 = vcombine.low %v611_v31, %v623_v32  ;;  %v661_v32 = vld [vmem:[%s5906_s23 + $0x400] sm:$0xff] }
 0x136   : > { %1991 = vmatprep.subr.bf16.mxu0 %v4576_v46  ;;  %v648_v46 = vld [vmem:[%s5906_s23 + $0x398] sm:$0xff] }
 0x137   : > { %2033 = vmatpush1.bf16.msra.mxu1 %v4553_v47  ;;  %v659_v47 = vld [vmem:[%s5906_s23 + $0x3f0] sm:$0xff]  ;;  %v4582_v51 = vcombine.high %v636_v45, %v648_v46  ;;  %v4581_v57 = vcombine.low %v636_v45, %v648_v46 }
 0x138   : > { %2034 = vmatprep.subr.bf16.mxu1 %v4578_v53  ;;  %v4604_v52 = vcombine.high %v659_v47, %v671_v48  ;;  %v660_v53 = vld [vmem:[%s5906_s23 + $0x3f8] sm:$0xff]  ;;  %v555_v45 = vld [vmem:[%s5906_s23 + $0xb0] sm:$0xff] }
 0x139   : > { %1992 = vmatpush1.bf16.msra.mxu0 %v4575_v50  ;;  %v4579_v50 = vcombine.low %v635_v39, %v647_v40  ;;  %v709_v40 = vld [vmem:[%s5906_s23 + $0x580] sm:$0xff] }
 0x13a   : > { %1993 = vmatprep.subr.bf16.mxu0 %v4600_v54  ;;  %v672_v54 = vld [vmem:[%s5906_s23 + $0x458] sm:$0xff] }
 0x13b   : > { %2035 = vmatpush1.bf16.msra.mxu1 %v4577_v55  ;;  %v683_v55 = vld [vmem:[%s5906_s23 + $0x4b0] sm:$0xff]  ;;  %v4606_v59 = vcombine.high %v660_v53, %v672_v54  ;;  %v4605_v1 = vcombine.low %v660_v53, %v672_v54 }
 0x13c   : > { %2036 = vmatprep.subr.bf16.mxu1 %v4602_v61  ;;  %v4628_v60 = vcombine.high %v683_v55, %v695_v56  ;;  %v684_v61 = vld [vmem:[%s5906_s23 + $0x4b8] sm:$0xff]  ;;  %v603_v53 = vld [vmem:[%s5906_s23 + $0x230] sm:$0xff] }
 0x13d   : > { %1994 = vmatpush1.bf16.msra.mxu0 %v4599_v58  ;;  %v4603_v58 = vcombine.low %v659_v47, %v671_v48  ;;  %v567_v48 = vld [vmem:[%s5906_s23 + $0x110] sm:$0xff] }
 0x13e   : > { %1995 = vmatprep.subr.bf16.mxu0 %v4624_v62  ;;  %v696_v62 = vld [vmem:[%s5906_s23 + $0x518] sm:$0xff] }
 0x13f   : > { %2037 = vmatpush1.bf16.msra.mxu1 %v4601_v63  ;;  %v707_v63 = vld [vmem:[%s5906_s23 + $0x570] sm:$0xff]  ;;  %v4630_v3 = vcombine.high %v684_v61, %v696_v62  ;;  %v4629_v10 = vcombine.low %v684_v61, %v696_v62 }
 0x140   : > { %2038 = vmatprep.subr.bf16.mxu1 %v4626_v5  ;;  %v4652_v4 = vcombine.high %v707_v63, %v719_v0  ;;  %v708_v5 = vld [vmem:[%s5906_s23 + $0x578] sm:$0xff]  ;;  %v651_v61 = vld [vmem:[%s5906_s23 + $0x3b0] sm:$0xff] }
 0x141   : > { %1996 = vmatpush1.bf16.msra.mxu0 %v4623_v2  ;;  %v4627_v2 = vcombine.low %v683_v55, %v695_v56  ;;  %v615_v56 = vld [vmem:[%s5906_s23 + $0x290] sm:$0xff] }
 0x142   : > { %1997 = vmatprep.subr.bf16.mxu0 %v4648_v6  ;;  %v720_v6 = vld [vmem:[%s5906_s23 + $0x5d8] sm:$0xff] }
 0x143   : > { %2039 = vmatpush1.bf16.msra.mxu1 %v4625_v7  ;;  %v541_v7 = vld [vmem:[%s5906_s23 + $0x40] sm:$0xff]  ;;  %v4654_v13 = vcombine.high %v708_v5, %v720_v6 }
 0x144   : > { %2040 = vmatprep.subr.bf16.mxu1 %v4650_v15  ;;  %v4488_v14 = vcombine.high %v541_v7, %v553_v9  ;;  %v565_v15 = vld [vmem:[%s5906_s23 + $0x100] sm:$0xff]  ;;  %v4487_v18 = vcombine.low %v541_v7, %v553_v9  ;;  %v711_v9 = vld [vmem:[%s5906_s23 + $0x590] sm:$0xff] }
 0x145   : > { %1998 = vmatpush1.bf16.msra.mxu0 %v4647_v11  ;;  %v4651_v11 = vcombine.low %v707_v63, %v719_v0  ;;  %v663_v0 = vld [vmem:[%s5906_s23 + $0x410] sm:$0xff] }
 0x146   : > { %2069 = vmatprep.subr.bf16.mxu0 %v4484_v16  ;;  %v577_v16 = vld [vmem:[%s5906_s23 + $0x160] sm:$0xff] }
 0x147   : > { %2041 = vmatpush1.bf16.msra.mxu1 %v4649_v17  ;;  %v4653_v17 = vcombine.low %v708_v5, %v720_v6  ;;  %v4511_v22 = vcombine.low %v565_v15, %v577_v16  ;;  %v699_v5 = vld [vmem:[%s5906_s23 + $0x530] sm:$0xff] }
 0x148   : > { %2016 = vmatmul.mubr.bf16.vlgmr.msra.gmra.mrb[8].mxu0 %v5987_v12  ;;  %2112 = vmatprep.subr.bf16.mxu1 %v4486_v20  ;;  %v589_v20 = vld [vmem:[%s5906_s23 + $0x1c0] sm:$0xff] }
 0x149   : > { %2070 = vmatpush1.bf16.msra.mxu0 %v4483_v19  ;;  %2101 = vmatprep.mubr.bf16.mxu0 %v5566_v8  ;;  %v4512_v19 = vcombine.high %v565_v15, %v577_v16  ;;  %v5567_v15 = vmov 0.0   ;;  %v731_v16 = vlaneseq }
 0x14a   : > { %2071 = vmatprep.subr.bf16.mxu0 %v4508_v21  ;;  %2059 = vmatmul.mubr.bf16.vlgmr.msra.gmra.mrb[8].mxu1 %v5987_v12  ;;  %v601_v21 = vld [vmem:[%s5906_s23 + $0x220] sm:$0xff] }
 0x14b   : > { %2113 = vmatpush1.bf16.msra.mxu1 %v4485_v25  ;;  %2144 = vmatprep.mubr.bf16.mxu1 %v5566_v8  ;;  %v4536_v23 = vcombine.high %v589_v20, %v601_v21  ;;  %v625_v25 = vld [vmem:[%s5906_s23 + $0x2e0] sm:$0xff] }
 0x14c   : > { %2114 = vmatprep.subr.bf16.mxu1 %v4510_v27  ;;  %v4560_v27 = vcombine.high %v613_v24, %v625_v25  ;;  %v4559_v30 = vcombine.low %v613_v24, %v625_v25 }
 0x14d   : > { %2072 = vmatpush1.bf16.msra.mxu0 %v4507_v26  ;;  %v4535_v26 = vcombine.low %v589_v20, %v601_v21 }
 0x14e   : > { %2073 = vmatprep.subr.bf16.mxu0 %v4532_v28  ;;  %v637_v28 = vld [vmem:[%s5906_s23 + $0x340] sm:$0xff] }
 0x14f   : > { %2115 = vmatpush1.bf16.msra.mxu1 %v4509_v33  ;;  %v4584_v31 = vcombine.high %v637_v28, %v649_v29  ;;  %v673_v33 = vld [vmem:[%s5906_s23 + $0x460] sm:$0xff] }
 0x150   : > { %2116 = vmatprep.subr.bf16.mxu1 %v4534_v35  ;;  %v4608_v35 = vcombine.high %v661_v32, %v673_v33  ;;  %v4607_v38 = vcombine.low %v661_v32, %v673_v33 }
 0x151   : > { %2074 = vmatpush1.bf16.msra.mxu0 %v4531_v34  ;;  %v4583_v34 = vcombine.low %v637_v28, %v649_v29 }
 0x152   : > { %2075 = vmatprep.subr.bf16.mxu0 %v4556_v36  ;;  %v685_v36 = vld [vmem:[%s5906_s23 + $0x4c0] sm:$0xff] }
 0x153   : > { %2117 = vmatpush1.bf16.msra.mxu1 %v4533_v41  ;;  %v4632_v39 = vcombine.high %v685_v36, %v697_v37  ;;  %v721_v41 = vld [vmem:[%s5906_s23 + $0x5e0] sm:$0xff] }
 0x154   : > { %2118 = vmatprep.subr.bf16.mxu1 %v4558_v43  ;;  %v4656_v43 = vcombine.high %v709_v40, %v721_v41  ;;  %v4655_v46 = vcombine.low %v709_v40, %v721_v41 }
 0x155   : > { %2076 = vmatpush1.bf16.msra.mxu0 %v4555_v42  ;;  %v4631_v42 = vcombine.low %v685_v36, %v697_v37 }
 0x156   : > { %2077 = vmatprep.subr.bf16.mxu0 %v4580_v44  ;;  %v543_v44 = vld [vmem:[%s5906_s23 + $0x50] sm:$0xff] }
 0x157   : > { %2119 = vmatpush1.bf16.msra.mxu1 %v4557_v49  ;;  %v4492_v47 = vcombine.high %v543_v44, %v555_v45  ;;  %v579_v49 = vld [vmem:[%s5906_s23 + $0x170] sm:$0xff] }
 0x158   : > { %2120 = vmatprep.subr.bf16.mxu1 %v4582_v51  ;;  %v4516_v51 = vcombine.high %v567_v48, %v579_v49  ;;  %v4515_v54 = vcombine.low %v567_v48, %v579_v49 }
 0x159   : > { %2078 = vmatpush1.bf16.msra.mxu0 %v4579_v50  ;;  %v4491_v50 = vcombine.low %v543_v44, %v555_v45  ;;  %v542_v44 = vld [vmem:[%s5906_s23 + $0x48] sm:$0xff] }
 0x15a   : > { %2079 = vmatprep.subr.bf16.mxu0 %v4604_v52  ;;  %v591_v52 = vld [vmem:[%s5906_s23 + $0x1d0] sm:$0xff]  ;;  %v554_v45 = vld [vmem:[%s5906_s23 + $0xa8] sm:$0xff] }
 0x15b   : > { %2121 = vmatpush1.bf16.msra.mxu1 %v4581_v57  ;;  %v4540_v55 = vcombine.high %v591_v52, %v603_v53  ;;  %v627_v57 = vld [vmem:[%s5906_s23 + $0x2f0] sm:$0xff]  ;;  %v4489_v48 = vcombine.low %v542_v44, %v554_v45  ;;  %v4490_v49 = vcombine.high %v542_v44, %v554_v45 }
 0x15c   : > { %2122 = vmatprep.subr.bf16.mxu1 %v4606_v59  ;;  %v4564_v59 = vcombine.high %v615_v56, %v627_v57  ;;  %v4563_v62 = vcombine.low %v615_v56, %v627_v57 }
 0x15d   : > { %2080 = vmatpush1.bf16.msra.mxu0 %v4603_v58  ;;  %v4539_v58 = vcombine.low %v591_v52, %v603_v53  ;;  %v590_v53 = vld [vmem:[%s5906_s23 + $0x1c8] sm:$0xff] }
 0x15e   : > { %2081 = vmatprep.subr.bf16.mxu0 %v4628_v60  ;;  %v639_v60 = vld [vmem:[%s5906_s23 + $0x350] sm:$0xff] }
 0x15f   : > { %2123 = vmatpush1.bf16.msra.mxu1 %v4605_v1  ;;  %v4588_v63 = vcombine.high %v639_v60, %v651_v61  ;;  %v675_v1 = vld [vmem:[%s5906_s23 + $0x470] sm:$0xff] }
 0x160   : > { %2124 = vmatprep.subr.bf16.mxu1 %v4630_v3  ;;  %v4612_v3 = vcombine.high %v663_v0, %v675_v1  ;;  %v4611_v6 = vcombine.low %v663_v0, %v675_v1 }
 0x161   : > { %2082 = vmatpush1.bf16.msra.mxu0 %v4627_v2  ;;  %v4587_v2 = vcombine.low %v639_v60, %v651_v61 }
 0x162   : > { %2083 = vmatprep.subr.bf16.mxu0 %v4652_v4  ;;  %v687_v4 = vld [vmem:[%s5906_s23 + $0x4d0] sm:$0xff] }
 0x163   : > { %2125 = vmatpush1.bf16.msra.mxu1 %v4629_v10  ;;  %v4636_v7 = vcombine.high %v687_v4, %v699_v5  ;;  %v723_v10 = vld [vmem:[%s5906_s23 + $0x5f0] sm:$0xff] }
 0x164   : > { %2126 = vmatprep.subr.bf16.mxu1 %v4654_v13  ;;  %v4660_v13 = vcombine.high %v711_v9, %v723_v10 }
 0x165   : > { %2084 = vmatpush1.bf16.msra.mxu0 %v4651_v11  ;;  %v4635_v11 = vcombine.low %v687_v4, %v699_v5 }
 0x166   : > { %2155 = vmatprep.subr.bf16.mxu0 %v4488_v14  ;;  %v4659_v14 = vcombine.low %v711_v9, %v723_v10 }
 0x167   : > { %2127 = vmatpush1.bf16.msra.mxu1 %v4653_v17  ;;  %v6133_v17 = vshrl.u32 %v731_v16, 7  ;;  %v710_v16 = vld [vmem:[%s5906_s23 + $0x588] sm:$0xff] }
 0x168   : > { %2102 = vmatmul.mubr.bf16.vlgmr.msra.gmra.mrb[12].mxu0 %v5987_v12  ;;  %2198 = vmatprep.subr.bf16.mxu1 %v4490_v49 }
 0x169   : > { %2156 = vmatpush1.bf16.msra.mxu0 %v4487_v18  ;;  %2187 = vmatprep.mubr.bf16.mxu0 %v5566_v8  ;;  %v6136_v18 = vsub.s32 0, %v6133_v17  ;;  %v6142_v20 = vsub.s32 1, %v6133_v17  ;;  %v6145_v21 = vsub.s32 2, %v6133_v17  ;;  %v6197_v9 = vsub.s32 4, %v6133_v17 }
 0x16a   : > { %2157 = vmatprep.subr.bf16.mxu0 %v4512_v19  ;;  %2145 = vmatmul.mubr.bf16.vlgmr.msra.gmra.mrb[12].mxu1 %v5987_v12  ;;  %v6139_v19 = vld [vmem:[%s5914_s9] sm:$0xff] }
 0x16b   : > { %2230 = vmatprep.mubr.bf16.mxu1 %v5566_v8  ;;  %v738_v25 = vrot.slane %v6139_v19, %v6142_v20  ;;  %2199 = vmatpush1.bf16.msra.mxu1 %v4489_v48 }
 0x16d   : > { %2158 = vmatpush1.bf16.msra.mxu0 %v4511_v22  ;;  %v734_v22 = vrot.slane %v6139_v19, %v6136_v18 }
 0x16e   : > { %2159 = vmatprep.subr.bf16.mxu0 %v4536_v23  ;;  %v6150_v23 = vsub.s32 3, %v6133_v17 }
 0x170   : > { %v746_v29 = vrot.slane %v6139_v19, %v6150_v23 }
 0x171   : > { %2160 = vmatpush1.bf16.msra.mxu0 %v4535_v26  ;;  %v742_v26 = vrot.slane %v6139_v19, %v6145_v21 }
 0x172   : > { %2161 = vmatprep.subr.bf16.mxu0 %v4560_v27 }
 0x175   : > { %2162 = vmatpush1.bf16.msra.mxu0 %v4559_v30 }
 0x176   : > { %2163 = vmatprep.subr.bf16.mxu0 %v4584_v31 }
 0x179   : > { %2164 = vmatpush1.bf16.msra.mxu0 %v4583_v34 }
 0x17a   : > { %2165 = vmatprep.subr.bf16.mxu0 %v4608_v35 }
 0x17d   : > { %2166 = vmatpush1.bf16.msra.mxu0 %v4607_v38 }
 0x17e   : > { %2167 = vmatprep.subr.bf16.mxu0 %v4632_v39 }
 0x181   : > { %2168 = vmatpush1.bf16.msra.mxu0 %v4631_v42 }
 0x182   : > { %2169 = vmatprep.subr.bf16.mxu0 %v4656_v43 }
 0x185   : > { %2170 = vmatpush1.bf16.msra.mxu0 %v4655_v46  ;;  %v566_v46 = vld [vmem:[%s5906_s23 + $0x108] sm:$0xff] }
 0x186   : > { %2241 = vmatprep.subr.bf16.mxu0 %v4492_v47 }
 0x188   : > { %2188 = vmatmul.mubr.bf16.vlgmr.msra.gmra.mrb[16].mxu0 %v5987_v12 }
 0x189   : > { %2242 = vmatpush1.bf16.msra.mxu0 %v4491_v50  ;;  %2273 = vmatprep.mubr.bf16.mxu0 %v5566_v8  ;;  %v578_v50 = vld [vmem:[%s5906_s23 + $0x168] sm:$0xff] }
 0x18a   : > { %2243 = vmatprep.subr.bf16.mxu0 %v4516_v51  ;;  %v4514_v52 = vcombine.high %v566_v46, %v578_v50  ;;  %v4513_v56 = vcombine.low %v566_v46, %v578_v50 }
 0x18c   : > { %2200 = vmatprep.subr.bf16.mxu1 %v4514_v52 }
 0x18d   : > { %2244 = vmatpush1.bf16.msra.mxu0 %v4515_v54  ;;  %v602_v54 = vld [vmem:[%s5906_s23 + $0x228] sm:$0xff]  ;;  %2201 = vmatpush1.bf16.msra.mxu1 %v4513_v56 }
 0x18e   : > { %2245 = vmatprep.subr.bf16.mxu0 %v4540_v55  ;;  %v4538_v57 = vcombine.high %v590_v53, %v602_v54  ;;  %v4537_v60 = vcombine.low %v590_v53, %v602_v54 }
 0x190   : > { %2202 = vmatprep.subr.bf16.mxu1 %v4538_v57  ;;  %v568_v57 = vld [vmem:[%s5906_s23 + $0x118] sm:$0xff] }
 0x191   : > { %2246 = vmatpush1.bf16.msra.mxu0 %v4539_v58  ;;  %v614_v58 = vld [vmem:[%s5906_s23 + $0x288] sm:$0xff]  ;;  %2203 = vmatpush1.bf16.msra.mxu1 %v4537_v60 }
 0x192   : > { %2247 = vmatprep.subr.bf16.mxu0 %v4564_v59  ;;  %v626_v59 = vld [vmem:[%s5906_s23 + $0x2e8] sm:$0xff] }
 0x193   : > { %v4562_v61 = vcombine.high %v614_v58, %v626_v59  ;;  %v4561_v0 = vcombine.low %v614_v58, %v626_v59 }
 0x195   : > { %2248 = vmatpush1.bf16.msra.mxu0 %v4563_v62  ;;  %v638_v62 = vld [vmem:[%s5906_s23 + $0x348] sm:$0xff]  ;;  %2204 = vmatprep.subr.bf16.mxu1 %v4562_v61 }
 0x196   : > { %2249 = vmatprep.subr.bf16.mxu0 %v4588_v63  ;;  %v650_v63 = vld [vmem:[%s5906_s23 + $0x3a8] sm:$0xff]  ;;  %2205 = vmatpush1.bf16.msra.mxu1 %v4561_v0 }
 0x197   : > { %v4586_v1 = vcombine.high %v638_v62, %v650_v63  ;;  %v4585_v4 = vcombine.low %v638_v62, %v650_v63 }
 0x199   : > { %2250 = vmatpush1.bf16.msra.mxu0 %v4587_v2  ;;  %v662_v2 = vld [vmem:[%s5906_s23 + $0x408] sm:$0xff]  ;;  %2206 = vmatprep.subr.bf16.mxu1 %v4586_v1 }
 0x19a   : > { %2251 = vmatprep.subr.bf16.mxu0 %v4612_v3  ;;  %v674_v3 = vld [vmem:[%s5906_s23 + $0x468] sm:$0xff]  ;;  %2207 = vmatpush1.bf16.msra.mxu1 %v4585_v4  ;;  %v592_v4 = vld [vmem:[%s5906_s23 + $0x1d8] sm:$0xff] }
 0x19b   : > { %v4610_v5 = vcombine.high %v662_v2, %v674_v3  ;;  %v4609_v10 = vcombine.low %v662_v2, %v674_v3 }
 0x19d   : > { %2252 = vmatpush1.bf16.msra.mxu0 %v4611_v6  ;;  %v686_v6 = vld [vmem:[%s5906_s23 + $0x4c8] sm:$0xff]  ;;  %2208 = vmatprep.subr.bf16.mxu1 %v4610_v5  ;;  %v604_v5 = vld [vmem:[%s5906_s23 + $0x238] sm:$0xff] }
 0x19e   : > { %2253 = vmatprep.subr.bf16.mxu0 %v4636_v7  ;;  %v698_v7 = vld [vmem:[%s5906_s23 + $0x528] sm:$0xff]  ;;  %2209 = vmatpush1.bf16.msra.mxu1 %v4609_v10  ;;  %v4542_v10 = vcombine.high %v592_v4, %v604_v5 }
 0x1a1   : > { %2254 = vmatpush1.bf16.msra.mxu0 %v4635_v11  ;;  %v4634_v11 = vcombine.high %v686_v6, %v698_v7 }
 0x1a2   : > { %2255 = vmatprep.subr.bf16.mxu0 %v4660_v13  ;;  %v6200_v13 = vsub.s32 5, %v6133_v17 }
 0x1a3   : > { %2210 = vmatprep.subr.bf16.mxu1 %v4634_v11  ;;  %v616_v11 = vld [vmem:[%s5906_s23 + $0x298] sm:$0xff] }
 0x1a5   : > { %2256 = vmatpush1.bf16.msra.mxu0 %v4659_v14  ;;  %v6203_v14 = vsub.s32 6, %v6133_v17 }
 0x1a6   : > { %4897 = vmatprep.subr.bf16.mxu0 %v5567_v15 }
 0x1a8   : > { %2274 = vmatmul.mubr.bf16.vlgmr.msra.gmra.mrb[20].mxu0 %v5987_v12 }
 0x1a9   : > { %4899 = vmatprep.mubr.msk.bf16.mxu0 %vm5568_vm0, %v5567_v15 }
 0x1db   : > { %v1845_v24 = vpop.f32.mrb[0].mxu0  ;;  %v1888_v33 = vpop.f32.mrb[0].mxu1 }
 0x1dc   : > { %v6156_v27 = vadd.f32 %v1845_v24, %v734_v22  ;;  %v1847_v28 = vpop.f32.mrb[1].mxu0  ;;  %v6166_v36 = vadd.f32 %v1888_v33, %v742_v26  ;;  %v1890_v37 = vpop.f32.mrb[1].mxu1  ;;  %v750_v24 = vrot.slane %v6139_v19, %v6197_v9  ;;  %v544_v33 = vld [vmem:[%s5906_s23 + $0x58] sm:$0xff] }
 0x1dd   : > { %v1849_v30 = vpop.f32.mrb[2].mxu0  ;;  %v6162_v34 = vadd.f32 %v1847_v28, %v738_v25  ;;  %v6170_v39 = vadd.f32 %v1890_v37, %v746_v29  ;;  %v1892_v40 = vpop.f32.mrb[2].mxu1  ;;  %v556_v37 = vld [vmem:[%s5906_s23 + $0xb8] sm:$0xff] }
 0x1de   : > { %v6160_v31 = vadd.f32 %v1849_v30, %v734_v22  ;;  %v1851_v32 = vpop.f32.mrb[3].mxu0  ;;  %v6174_v42 = vadd.f32 %v1892_v40, %v742_v26  ;;  %v1894_v43 = vpop.f32.mrb[3].mxu1  ;;  %v722_v22 = vld [vmem:[%s5906_s23 + $0x5e8] sm:$0xff]  ;;  %v4633_v26 = vcombine.low %v686_v6, %v698_v7  ;;  %v754_v30 = vrot.slane %v6139_v19, %v6200_v13 }
 0x1df   : > { %v6164_v35 = vadd.f32 %v1851_v32, %v738_v25  ;;  %v6179_v47 = vadd.f32 %v1894_v43, %v746_v29  ;;  %v6210_v25 = vsub.s32 7, %v6133_v17  ;;  %v4658_v28 = vcombine.high %v710_v16, %v722_v22 }
 0x1e0   : > { %v2327_v38 = vpack.c.bf16 %v6160_v31, %v6156_v27  ;;  %v2558_v51 = vpack.c.bf16 %v6174_v42, %v6166_v36  ;;  %v758_v32 = vrot.slane %v6139_v19, %v6203_v14  ;;  %2211 = vmatpush1.bf16.msra.mxu1 %v4633_v26  ;;  %v4657_v45 = vcombine.low %v710_v16, %v722_v22  ;;  %v628_v16 = vld [vmem:[%s5906_s23 + $0x2f8] sm:$0xff] }
 0x1e1   : > { %v2444_v41 = vpack.c.bf16 %v6164_v35, %v6162_v34  ;;  %v2672_v55 = vpack.c.bf16 %v6179_v47, %v6170_v39  ;;  %v762_v17 = vrot.slane %v6139_v19, %v6210_v25  ;;  %2212 = vmatprep.subr.bf16.mxu1 %v4658_v28  ;;  %v4494_v50 = vcombine.high %v544_v33, %v556_v37  ;;  %v580_v19 = vld [vmem:[%s5906_s23 + $0x178] sm:$0xff]  ;;  %v6311_v39 = vld [vmem:[%s5914_s9 + $0x10] sm:$0xff] }
 0x1e2   : > { %v4493_v0 = vcombine.low %v544_v33, %v556_v37  ;;  %v4518_v2 = vcombine.high %v568_v57, %v580_v19  ;;  %v4517_v7 = vcombine.low %v568_v57, %v580_v19  ;;  %v4541_v22 = vcombine.low %v592_v4, %v604_v5  ;;  %v640_v26 = vld [vmem:[%s5906_s23 + $0x358] sm:$0xff] }
 0x1e3   : > { %v652_v28 = vld [vmem:[%s5906_s23 + $0x3b8] sm:$0xff]  ;;  %v798_v47 = vrot.slane %v6311_v39, %v6136_v18 }
 0x1e4   : > { %2213 = vmatpush1.bf16.msra.mxu1 %v4657_v45  ;;  %v4589_v33 = vcombine.low %v640_v26, %v652_v28 }
 0x1e5   : > { %2284 = vmatprep.subr.bf16.mxu1 %v4494_v50  ;;  %v724_v50 = vld [vmem:[%s5906_s23 + $0x5f8] sm:$0xff] }
 0x1e7   : > { %2231 = vmatmul.mubr.bf16.vlgmr.msra.gmra.mrb[16].mxu1 %v5987_v12 }
 0x1e8   : > { %2285 = vmatpush1.bf16.msra.mxu1 %v4493_v0  ;;  %2316 = vmatprep.mubr.bf16.mxu1 %v5566_v8  ;;  %v4590_v8 = vcombine.high %v640_v26, %v652_v28 }
 0x1e9   : > { %2286 = vmatprep.subr.bf16.mxu1 %v4518_v2 }
 0x1ec   : > { %2287 = vmatpush1.bf16.msra.mxu1 %v4517_v7 }
 0x1ed   : > { %2288 = vmatprep.subr.bf16.mxu1 %v4542_v10 }
 0x1f0   : > { %2289 = vmatpush1.bf16.msra.mxu1 %v4541_v22 }
 0x1fb   : > { %v1931_v29 = vpop.f32.mrb[4].mxu0 }
 0x1fc   : > { %v6218_v40 = vadd.f32 %v1931_v29, %v750_v24  ;;  %v1933_v43 = vpop.f32.mrb[5].mxu0  ;;  %v4565_v29 = vcombine.low %v616_v11, %v628_v16 }
 0x1fd   : > { %v1935_v44 = vpop.f32.mrb[6].mxu0  ;;  %v1974_v49 = vpop.f32.mrb[4].mxu1  ;;  %v6224_v52 = vadd.f32 %v1933_v43, %v754_v30  ;;  %v688_v43 = vld [vmem:[%s5906_s23 + $0x4d8] sm:$0xff] }
 0x1fe   : > { %v6222_v46 = vadd.f32 %v1935_v44, %v750_v24  ;;  %v1937_v48 = vpop.f32.mrb[7].mxu0  ;;  %v6228_v54 = vadd.f32 %v1974_v49, %v758_v32  ;;  %v1976_v56 = vpop.f32.mrb[5].mxu1  ;;  %v4566_v24 = vcombine.high %v616_v11, %v628_v16  ;;  %v712_v49 = vld [vmem:[%s5906_s23 + $0x598] sm:$0xff] }
 0x1ff   : > { %v6226_v53 = vadd.f32 %v1937_v48, %v754_v30  ;;  %v6234_v59 = vadd.f32 %v1976_v56, %v762_v17  ;;  %v1978_v60 = vpop.f32.mrb[6].mxu1  ;;  %v664_v30 = vld [vmem:[%s5906_s23 + $0x418] sm:$0xff]  ;;  %v726_v48 = vld [vmem:[%s5914_s9 + $0x8] sm:$0xff]  ;;  %v4662_v19 = vcombine.high %v712_v49, %v724_v50  ;;  %v4661_v7 = vcombine.low %v712_v49, %v724_v50 }
 0x200   : > { %v2786_v58 = vpack.c.bf16 %v6222_v46, %v6218_v40  ;;  %v6238_v62 = vadd.f32 %v1978_v60, %v758_v32  ;;  %v1980_v63 = vpop.f32.mrb[7].mxu1  ;;  %2290 = vmatprep.subr.bf16.mxu1 %v4566_v24  ;;  %v676_v32 = vld [vmem:[%s5906_s23 + $0x478] sm:$0xff]  ;;  %v766_v57 = vrot.slane %v726_v48, %v6136_v18  ;;  %v774_v0 = vrot.slane %v726_v48, %v6145_v21 }
 0x201   : > { %v2900_v61 = vpack.c.bf16 %v6226_v53, %v6224_v52  ;;  %v6240_v1 = vadd.f32 %v1980_v63, %v762_v17  ;;  %2291 = vmatpush1.bf16.msra.mxu1 %v4565_v29  ;;  %v4614_v37 = vcombine.high %v664_v30, %v676_v32  ;;  %v700_v17 = vld [vmem:[%s5906_s23 + $0x538] sm:$0xff]  ;;  %v4613_v44 = vcombine.low %v664_v30, %v676_v32 }
 0x202   : > { %v3014_v3 = vpack.c.bf16 %v6238_v62, %v6228_v54  ;;  %2292 = vmatprep.subr.bf16.mxu1 %v4590_v8  ;;  %v4638_v45 = vcombine.high %v688_v43, %v700_v17  ;;  %v4637_v56 = vcombine.low %v688_v43, %v700_v17  ;;  %v770_v63 = vrot.slane %v726_v48, %v6142_v20 }
 0x203   : > { %v3128_v6 = vpack.c.bf16 %v6240_v1, %v6234_v59  ;;  %v778_v4 = vrot.slane %v726_v48, %v6150_v23  ;;  %v786_v27 = vrot.slane %v726_v48, %v6200_v13  ;;  %v790_v34 = vrot.slane %v726_v48, %v6203_v14 }
 0x205   : > { %2293 = vmatpush1.bf16.msra.mxu1 %v4589_v33 }
 0x206   : > { %2294 = vmatprep.subr.bf16.mxu1 %v4614_v37 }
 0x209   : > { %2295 = vmatpush1.bf16.msra.mxu1 %v4613_v44 }
 0x20a   : > { %2296 = vmatprep.subr.bf16.mxu1 %v4638_v45 }
 0x20d   : > { %2297 = vmatpush1.bf16.msra.mxu1 %v4637_v56 }
 0x20e   : > { %2298 = vmatprep.subr.bf16.mxu1 %v4662_v19 }
 0x211   : > { %2299 = vmatpush1.bf16.msra.mxu1 %v4661_v7 }
 0x212   : > { %4903 = vmatprep.subr.bf16.mxu1 %v5567_v15 }
 0x214   : > { %2317 = vmatmul.mubr.bf16.vlgmr.msra.gmra.mrb[20].mxu1 %v5987_v12  ;;  %v782_v12 = vrot.slane %v726_v48, %v6197_v9 }
 0x215   : > { %4905 = vmatprep.mubr.msk.bf16.mxu1 %vm5568_vm0, %v5567_v15 }
 0x21b   : > { %v2017_v60 = vpop.f32.mrb[8].mxu0 }
 0x21c   : > { %v2019_v2 = vpop.f32.mrb[9].mxu0  ;;  %v2018_v10 = vadd.f32 %v2017_v60, %v766_v57 }
 0x21d   : > { %v2021_v5 = vpop.f32.mrb[10].mxu0  ;;  %v2060_v22 = vpop.f32.mrb[8].mxu1  ;;  %v2020_v24 = vadd.f32 %v2019_v2, %v770_v63 }
 0x21e   : > { %v2022_v11 = vadd.f32 %v2021_v5, %v766_v57  ;;  %v2023_v16 = vpop.f32.mrb[11].mxu0  ;;  %v2061_v28 = vadd.f32 %v2060_v22, %v774_v0  ;;  %v2062_v29 = vpop.f32.mrb[9].mxu1  ;;  %v814_v22 = vrot.slane %v6311_v39, %v6197_v9 }
 0x21f   : > { %v2024_v26 = vadd.f32 %v2023_v16, %v770_v63  ;;  %v2063_v30 = vadd.f32 %v2062_v29, %v778_v4  ;;  %v2064_v32 = vpop.f32.mrb[10].mxu1 }
 0x220   : > { %v2328_v8 = vpack.c.bf16 %v2022_v11, %v2018_v10  ;;  %v2065_v37 = vadd.f32 %v2064_v32, %v774_v0  ;;  %v2066_v43 = vpop.f32.mrb[11].mxu1 }
 0x221   : > { %v2445_v33 = vpack.c.bf16 %v2024_v26, %v2020_v24  ;;  %v2067_v17 = vadd.f32 %v2066_v43, %v778_v4  ;;  %v818_v24 = vrot.slane %v6311_v39, %v6200_v13 }
 0x222   : > { %4898 = vmatpush3.bf16.xpose.msra.mxu0 %v2328_v8  ;;  %v2559_v44 = vpack.c.bf16 %v2065_v37, %v2061_v28 }
 0x223   : > { %4909 = vmatprep.subr.bf16.mxu0 %v5567_v15  ;;  %v2673_v45 = vpack.c.bf16 %v2067_v17, %v2063_v30 }
 0x229   : > { %4900 = vmatmul.mubr.bf16.vlgmr.msra.gmra.mrb[24].mxu0 %v2327_v38 }
 0x22a   : > { %4910 = vmatpush3.bf16.xpose.msra.mxu0 %v2445_v33  ;;  %4911 = vmatprep.mubr.msk.bf16.mxu0 %vm5568_vm0, %v5567_v15 }
 0x22b   : > { %4921 = vmatprep.subr.bf16.mxu0 %v5567_v15 }
 0x231   : > { %4912 = vmatmul.mubr.bf16.vlgmr.msra.gmra.mrb[28].mxu0 %v2444_v41  ;;  %v794_v41 = vrot.slane %v726_v48, %v6210_v25 }
 0x232   : > { %4922 = vmatpush3.bf16.xpose.msra.mxu0 %v2559_v44  ;;  %4923 = vmatprep.mubr.msk.bf16.mxu0 %vm5568_vm0, %v5567_v15 }
 0x233   : > { %4933 = vmatprep.subr.bf16.mxu0 %v5567_v15 }
 0x239   : > { %4924 = vmatmul.mubr.bf16.vlgmr.msra.gmra.mrb[32].mxu0 %v2558_v51 }
 0x23a   : > { %4934 = vmatpush3.bf16.xpose.msra.mxu0 %v2673_v45  ;;  %4935 = vmatprep.mubr.msk.bf16.mxu0 %vm5568_vm0, %v5567_v15 }
 0x23b   : > { %v2103_v31 = vpop.f32.mrb[12].mxu0  ;;  %4945 = vmatprep.subr.bf16.mxu0 %v5567_v15 }
 0x23c   : > { %v2104_v35 = vadd.f32 %v2103_v31, %v782_v12  ;;  %v2105_v38 = vpop.f32.mrb[13].mxu0 }
 0x23d   : > { %v2106_v49 = vadd.f32 %v2105_v38, %v786_v27  ;;  %v2107_v50 = vpop.f32.mrb[14].mxu0  ;;  %v2146_v42 = vpop.f32.mrb[12].mxu1 }
 0x23e   : > { %v2108_v56 = vadd.f32 %v2107_v50, %v782_v12  ;;  %v2109_v36 = vpop.f32.mrb[15].mxu0  ;;  %v2147_v57 = vadd.f32 %v2146_v42, %v790_v34  ;;  %v2148_v19 = vpop.f32.mrb[13].mxu1 }
 0x23f   : > { %v2110_v51 = vadd.f32 %v2109_v36, %v786_v27  ;;  %v2149_v63 = vadd.f32 %v2148_v19, %v794_v41  ;;  %v2150_v0 = vpop.f32.mrb[14].mxu1 }
 0x240   : > { %v2787_v60 = vpack.c.bf16 %v2108_v56, %v2104_v35  ;;  %v2151_v4 = vadd.f32 %v2150_v0, %v790_v34  ;;  %v2152_v5 = vpop.f32.mrb[15].mxu1 }
 0x241   : > { %v2901_v2 = vpack.c.bf16 %v2110_v51, %v2106_v49  ;;  %4936 = vmatmul.mubr.bf16.vlgmr.msra.gmra.mrb[36].mxu0 %v2672_v55  ;;  %v2153_v48 = vadd.f32 %v2152_v5, %v794_v41  ;;  %v802_v55 = vrot.slane %v6311_v39, %v6142_v20 }
 0x242   : > { %4946 = vmatpush3.bf16.xpose.msra.mxu0 %v2787_v60  ;;  %4947 = vmatprep.mubr.msk.bf16.mxu0 %vm5568_vm0, %v5567_v15  ;;  %v3015_v7 = vpack.c.bf16 %v2151_v4, %v2147_v57 }
 0x243   : > { %4957 = vmatprep.subr.bf16.mxu0 %v5567_v15  ;;  %v3129_v10 = vpack.c.bf16 %v2153_v48, %v2149_v63 }
 0x249   : > { %4948 = vmatmul.mubr.bf16.vlgmr.msra.gmra.mrb[40].mxu0 %v2786_v58 }
 0x24a   : > { %4958 = vmatpush3.bf16.xpose.msra.mxu0 %v2901_v2  ;;  %4959 = vmatprep.mubr.msk.bf16.mxu0 %vm5568_vm0, %v5567_v15 }
 0x24b   : > { %4969 = vmatprep.subr.bf16.mxu0 %v5567_v15 }
 0x251   : > { %4960 = vmatmul.mubr.bf16.vlgmr.msra.gmra.mrb[44].mxu0 %v2900_v61 }
 0x252   : > { %4970 = vmatpush3.bf16.xpose.msra.mxu0 %v3015_v7  ;;  %4971 = vmatprep.mubr.msk.bf16.mxu0 %vm5568_vm0, %v5567_v15 }
 0x253   : > { %4981 = vmatprep.subr.bf16.mxu0 %v5567_v15 }
 0x259   : > { %4972 = vmatmul.mubr.bf16.vlgmr.msra.gmra.mrb[48].mxu0 %v3014_v3 }
 0x25a   : > { %4982 = vmatpush3.bf16.xpose.msra.mxu0 %v3129_v10  ;;  %4983 = vmatprep.mubr.msk.bf16.mxu0 %vm5568_vm0, %v5567_v15 }
 0x25b   : > { %v2189_v40 = vpop.f32.mrb[16].mxu0 }
 0x25c   : > { %v2190_v46 = vadd.f32 %v2189_v40, %v798_v47  ;;  %v2191_v52 = vpop.f32.mrb[17].mxu0 }
 0x25d   : > { %v6322_v53 = vadd.f32 %v2191_v52, %v802_v55  ;;  %v2193_v58 = vpop.f32.mrb[18].mxu0 }
 0x25e   : > { %v2194_v61 = vadd.f32 %v2193_v58, %v798_v47  ;;  %v2195_v11 = vpop.f32.mrb[19].mxu0 }
 0x25f   : > { %v6324_v16 = vadd.f32 %v2195_v11, %v802_v55 }
 0x260   : > { %v2329_v54 = vpack.c.bf16 %v2194_v61, %v2190_v46 }
 0x261   : > { %4984 = vmatmul.mubr.bf16.vlgmr.msra.gmra.mrb[52].mxu0 %v3128_v6  ;;  %v2446_v62 = vpack.c.bf16 %v6324_v16, %v6322_v53 }
 0x262   : > { %v2401_v3 = vsel %vm2399_vm1, %v2329_v54, 0 }
 0x263   : > { %4904 = vmatpush3.bf16.msra.mxu1 %v2401_v3 }
 0x264   : > { %4915 = vmatprep.subr.bf16.mxu1 %v5567_v15 }
 0x27b   : > { %v2275_v26 = vpop.f32.mrb[20].mxu0 }
 0x27c   : > { %v6337_v28 = vadd.f32 %v2275_v26, %v814_v22  ;;  %v2277_v29 = vpop.f32.mrb[21].mxu0 }
 0x27d   : > { %v6339_v59 = vadd.f32 %v2277_v29, %v818_v24  ;;  %v2279_v1 = vpop.f32.mrb[22].mxu0 }
 0x27e   : > { %v6341_v6 = vadd.f32 %v2279_v1, %v814_v22  ;;  %v2281_v8 = vpop.f32.mrb[23].mxu0 }
 0x27f   : > { %v6343_v30 = vadd.f32 %v2281_v8, %v818_v24 }
 0x280   : > { %v2788_v32 = vpack.c.bf16 %v6341_v6, %v6337_v28 }
 0x281   : > { %v2902_v33 = vpack.c.bf16 %v6343_v30, %v6339_v59 }
 0x283   : > { %v2971_v28 = vsel %vm2399_vm1, %v2902_v33, 0 }
 0x2fc   : > { %v6349_v37 = vpop.f32.mrb[24].mxu0 }
 0x2fd   : > { %v4901_v43 = vpop.f32.mrb[25].mxu0  ;;  %v2372_v17 = vsel %vm2371_vm2, %v6349_v37, -inf }
 0x2fe   : > { %2373 = vmax.xlane.f32.xlu0 %v2372_v17  ;;  %v6353_v44 = vpop.f32.mrb[26].mxu0 }
 0x2ff   : > { %v4902_v45 = vpop.f32.mrb[27].mxu0  ;;  %v2376_v12 = vsel %vm2375_vm3, %v6353_v44, -inf }
 0x302   : > { %2377 = vmax.xlane.f32.xlu0 %v2376_v12 }
 0x304   : > { %v6357_v27 = vpop.f32.mrb[28].mxu0 }
 0x305   : > { %v4913_v31 = vpop.f32.mrb[29].mxu0  ;;  %v2488_v34 = vsel %vm2371_vm2, %v6357_v27, -inf }
 0x306   : > { %2489 = vmax.xlane.f32.xlu1 %v2488_v34  ;;  %v6361_v35 = vpop.f32.mrb[30].mxu0 }
 0x307   : > { %v4914_v38 = vpop.f32.mrb[31].mxu0  ;;  %v2491_v41 = vsel %vm2375_vm3, %v6361_v35, -inf }
 0x30a   : > { %2492 = vmax.xlane.f32.xlu1 %v2491_v41 }
 0x30c   : > { %v6365_v49 = vpop.f32.mrb[32].mxu0 }
 0x30d   : > { %v4925_v50 = vpop.f32.mrb[33].mxu0  ;;  %v2602_v56 = vsel %vm2371_vm2, %v6365_v49, -inf }
 0x30e   : > { %2603 = vmax.xlane.f32.xlu0 %v2602_v56  ;;  %v6369_v36 = vpop.f32.mrb[34].mxu0 }
 0x30f   : > { %v4926_v42 = vpop.f32.mrb[35].mxu0  ;;  %v2605_v51 = vsel %vm2375_vm3, %v6369_v36, -inf }
 0x310   : > { %2606 = vmax.xlane.f32.xlu1 %v2605_v51 }
 0x314   : > { %v6373_v57 = vpop.f32.mrb[36].mxu0 }
 0x315   : > { %v4937_v19 = vpop.f32.mrb[37].mxu0  ;;  %v2716_v60 = vsel %vm2371_vm2, %v6373_v57, -inf }
 0x316   : > { %2717 = vmax.xlane.f32.xlu0 %v2716_v60  ;;  %v6377_v63 = vpop.f32.mrb[38].mxu0 }
 0x317   : > { %v4938_v0 = vpop.f32.mrb[39].mxu0  ;;  %v2719_v2 = vsel %vm2375_vm3, %v6377_v63, -inf }
 0x318   : > { %2720 = vmax.xlane.f32.xlu1 %v2719_v2 }
 0x31c   : > { %v6381_v4 = vpop.f32.mrb[40].mxu0 }
 0x31d   : > { %v4949_v5 = vpop.f32.mrb[41].mxu0  ;;  %v2830_v48 = vsel %vm2371_vm2, %v6381_v4, -inf }
 0x31e   : > { %2831 = vmax.xlane.f32.xlu0 %v2830_v48  ;;  %v6385_v7 = vpop.f32.mrb[42].mxu0 }
 0x31f   : > { %v4950_v10 = vpop.f32.mrb[43].mxu0  ;;  %v2833_v47 = vsel %vm2375_vm3, %v6385_v7, -inf }
 0x320   : > { %2834 = vmax.xlane.f32.xlu1 %v2833_v47 }
 0x324   : > { %v6389_v55 = vpop.f32.mrb[44].mxu0 }
 0x325   : > { %v4961_v40 = vpop.f32.mrb[45].mxu0  ;;  %v2944_v46 = vsel %vm2371_vm2, %v6389_v55, -inf }
 0x326   : > { %2945 = vmax.xlane.f32.xlu0 %v2944_v46  ;;  %v6393_v52 = vpop.f32.mrb[46].mxu0 }
 0x327   : > { %v4962_v58 = vpop.f32.mrb[47].mxu0  ;;  %v2947_v61 = vsel %vm2375_vm3, %v6393_v52, -inf }
 0x328   : > { %2948 = vmax.xlane.f32.xlu1 %v2947_v61 }
 0x32c   : > { %v6397_v11 = vpop.f32.mrb[48].mxu0 }
 0x32d   : > { %v4973_v54 = vpop.f32.mrb[49].mxu0  ;;  %v3058_v3 = vsel %vm2371_vm2, %v6397_v11, -inf }
 0x32e   : > { %3059 = vmax.xlane.f32.xlu0 %v3058_v3  ;;  %v6401_v22 = vpop.f32.mrb[50].mxu0 }
 0x32f   : > { %v4974_v24 = vpop.f32.mrb[51].mxu0  ;;  %v3061_v26 = vsel %vm2375_vm3, %v6401_v22, -inf }
 0x330   : > { %3062 = vmax.xlane.f32.xlu1 %v3061_v26 }
 0x334   : > { %v6405_v29 = vpop.f32.mrb[52].mxu0 }
 0x335   : > { %v4985_v1 = vpop.f32.mrb[53].mxu0  ;;  %v3172_v8 = vsel %vm2371_vm2, %v6405_v29, -inf }
 0x336   : > { %3173 = vmax.xlane.f32.xlu0 %v3172_v8  ;;  %v6409_v43 = vpop.f32.mrb[54].mxu0 }
 0x337   : > { %v4986_v17 = vpop.f32.mrb[55].mxu0  ;;  %v3175_v45 = vsel %vm2375_vm3, %v6409_v43, -inf }
 0x338   : > { %3176 = vmax.xlane.f32.xlu1 %v3175_v45 }
 0x38b   : > { %v2374_v12 = vpop.xlane.xlu0 %2373 }
 0x38c   : > { %v2379_v31 = vsub.f32 %v6349_v37, %v2374_v12 }
 0x38e   : > { %v2381_v34 = vmul.f32 1.442695, %v2379_v31 }
 0x38f   : > { %v2378_v38 = vpop.xlane.xlu0 %2377 }
 0x390   : > { %5222 = vpow2.f32 %v2381_v34  ;;  %v2380_v41 = vsub.f32 %v6353_v44, %v2378_v38 }
 0x392   : > { %v2383_v50 = vmul.f32 1.442695, %v2380_v41 }
 0x393   : > { %v2490_v56 = vpop.xlane.xlu1 %2489 }
 0x394   : > { %5224 = vpow2.f32 %v2383_v50  ;;  %v2494_v42 = vsub.f32 %v6357_v27, %v2490_v56 }
 0x396   : > { %v2496_v51 = vmul.f32 1.442695, %v2494_v42 }
 0x397   : > { %v2493_v19 = vpop.xlane.xlu1 %2492 }
 0x398   : > { %5226 = vpow2.f32 %v2496_v51  ;;  %v2495_v60 = vsub.f32 %v6361_v35, %v2493_v19 }
 0x39a   : > { %v6417_v0 = vpop.eup %5222  ;;  %v2498_v2 = vmul.f32 1.442695, %v2495_v60 }
 0x39b   : > { %v2604_v5 = vpop.xlane.xlu0 %2603  ;;  %v2385_v37 = vsel %vm2371_vm2, %v6417_v0, 0.0 }
 0x39c   : > { %5228 = vpow2.f32 %v2498_v2  ;;  %v2608_v44 = vsub.f32 %v6365_v49, %v2604_v5  ;;  %2386 = vadd.xlane.f32.xlu0 %v2385_v37 }
 0x39d   : > { %v2607_v48 = vpop.xlane.xlu1 %2606 }
 0x39e   : > { %v6422_v10 = vpop.eup %5224  ;;  %v2610_v27 = vmul.f32 1.442695, %v2608_v44  ;;  %v2609_v47 = vsub.f32 %v6369_v36, %v2607_v48 }
 0x39f   : > { %v2388_v35 = vsel %vm2375_vm3, %v6422_v10, 0.0 }
 0x3a0   : > { %5230 = vpow2.f32 %v2610_v27  ;;  %v2612_v40 = vmul.f32 1.442695, %v2609_v47  ;;  %2389 = vadd.xlane.f32.xlu1 %v2388_v35 }
 0x3a2   : > { %v6427_v46 = vpop.eup %5226  ;;  %5232 = vpow2.f32 %v2612_v40 }
 0x3a3   : > { %v2718_v58 = vpop.xlane.xlu0 %2717  ;;  %v2500_v49 = vsel %vm2371_vm2, %v6427_v46, 0.0 }
 0x3a4   : > { %v2722_v61 = vsub.f32 %v6373_v57, %v2718_v58  ;;  %2501 = vadd.xlane.f32.xlu0 %v2500_v49  ;;  %v2232_v58 = vpop.f32.mrb[16].mxu1 }
 0x3a5   : > { %v2721_v54 = vpop.xlane.xlu1 %2720 }
 0x3a6   : > { %v6432_v3 = vpop.eup %5228  ;;  %v2724_v36 = vmul.f32 1.442695, %v2722_v61  ;;  %v2723_v24 = vsub.f32 %v6377_v63, %v2721_v54  ;;  %v2234_v61 = vpop.f32.mrb[17].mxu1  ;;  %v806_v54 = vrot.slane %v6311_v39, %v6145_v21 }
 0x3a7   : > { %v2503_v26 = vsel %vm2375_vm3, %v6432_v3, 0.0 }
 0x3a8   : > { %5234 = vpow2.f32 %v2724_v36  ;;  %v2726_v1 = vmul.f32 1.442695, %v2723_v24  ;;  %2504 = vadd.xlane.f32.xlu1 %v2503_v26  ;;  %v810_v36 = vrot.slane %v6311_v39, %v6150_v23 }
 0x3aa   : > { %v6437_v8 = vpop.eup %5230  ;;  %5236 = vpow2.f32 %v2726_v1 }
 0x3ab   : > { %v2832_v17 = vpop.xlane.xlu0 %2831  ;;  %v2614_v57 = vsel %vm2371_vm2, %v6437_v8, 0.0 }
 0x3ac   : > { %v6441_v45 = vpop.eup %5232  ;;  %v2836_v12 = vsub.f32 %v6381_v4, %v2832_v17  ;;  %2615 = vadd.xlane.f32.xlu0 %v2614_v57  ;;  %v6477_v17 = vadd.f32 %v2234_v61, %v810_v36 }
 0x3ad   : > { %v2835_v31 = vpop.xlane.xlu1 %2834  ;;  %v2617_v63 = vsel %vm2375_vm3, %v6441_v45, 0.0 }
 0x3ae   : > { %v2838_v34 = vmul.f32 1.442695, %v2836_v12  ;;  %v2837_v38 = vsub.f32 %v6385_v7, %v2835_v31  ;;  %2618 = vadd.xlane.f32.xlu1 %v2617_v63 }
 0x3b0   : > { %5238 = vpow2.f32 %v2838_v34  ;;  %v2840_v41 = vmul.f32 1.442695, %v2837_v38 }
 0x3b2   : > { %v6447_v50 = vpop.eup %5234  ;;  %5240 = vpow2.f32 %v2840_v41 }
 0x3b3   : > { %v2946_v56 = vpop.xlane.xlu0 %2945  ;;  %v2728_v42 = vsel %vm2371_vm2, %v6447_v50, 0.0 }
 0x3b4   : > { %v6451_v51 = vpop.eup %5236  ;;  %v2950_v4 = vsub.f32 %v6389_v55, %v2946_v56  ;;  %2729 = vadd.xlane.f32.xlu0 %v2728_v42 }
 0x3b5   : > { %v2949_v19 = vpop.xlane.xlu1 %2948  ;;  %v2731_v60 = vsel %vm2375_vm3, %v6451_v51, 0.0 }
 0x3b6   : > { %v2952_v7 = vmul.f32 1.442695, %v2950_v4  ;;  %v2951_v2 = vsub.f32 %v6393_v52, %v2949_v19  ;;  %2732 = vadd.xlane.f32.xlu1 %v2731_v60 }
 0x3b8   : > { %5242 = vpow2.f32 %v2952_v7  ;;  %v2954_v5 = vmul.f32 1.442695, %v2951_v2 }
 0x3ba   : > { %v6457_v37 = vpop.eup %5238  ;;  %5244 = vpow2.f32 %v2954_v5 }
 0x3bb   : > { %v3060_v44 = vpop.xlane.xlu0 %3059  ;;  %v2842_v48 = vsel %vm2371_vm2, %v6457_v37, 0.0 }
 0x3bc   : > { %v6461_v27 = vpop.eup %5240  ;;  %v3064_v55 = vsub.f32 %v6397_v11, %v3060_v44  ;;  %2843 = vadd.xlane.f32.xlu0 %v2842_v48  ;;  %v2236_v11 = vpop.f32.mrb[18].mxu1 }
 0x3bd   : > { %v3063_v47 = vpop.xlane.xlu1 %3062  ;;  %v2845_v35 = vsel %vm2375_vm3, %v6461_v27, 0.0  ;;  %v6479_v57 = vadd.f32 %v2236_v11, %v806_v54  ;;  %v2238_v12 = vpop.f32.mrb[19].mxu1 }
 0x3be   : > { %v3066_v52 = vmul.f32 1.442695, %v3064_v55  ;;  %v3065_v40 = vsub.f32 %v6401_v22, %v3063_v47  ;;  %2846 = vadd.xlane.f32.xlu1 %v2845_v35  ;;  %v6475_v22 = vadd.f32 %v2232_v58, %v806_v54  ;;  %v6484_v34 = vadd.f32 %v2238_v12, %v810_v36  ;;  %v2318_v47 = vpop.f32.mrb[20].mxu1  ;;  %v5144_v12 = vld [vmem:[%s5920_s28 + $0x48] sm:$0xff]  }
 0x3bf   : > { %v2320_v35 = vpop.f32.mrb[21].mxu1 }
 0x3c0   : > { %5246 = vpow2.f32 %v3066_v52  ;;  %v3068_v49 = vmul.f32 1.442695, %v3065_v40  ;;  %v2560_v56 = vpack.c.bf16 %v6479_v57, %v6475_v22  ;;  %v2674_v19 = vpack.c.bf16 %v6484_v34, %v6477_v17  ;;  %v2322_v58 = vpop.f32.mrb[22].mxu1 }
 0x3c1   : > { %v822_v52 = vrot.slane %v6311_v39, %v6203_v14  ;;  %v826_v40 = vrot.slane %v6311_v39, %v6210_v25  ;;  %v5142_v39 = vld [vmem:[%s5920_s28 + $0x40] sm:$0xff]   ;;  %v2857_v17 = vsel %vm2399_vm1, %v2788_v32, 0 }
 0x3c2   : > { %v6471_v24 = vpop.eup %5242  ;;  %5248 = vpow2.f32 %v3068_v49  ;;  %v2324_v49 = vpop.f32.mrb[23].mxu1  ;;  %4791 = vmatprep.subr.bf16.mxu0 %v5142_v39  ;;  %v2629_v53 = vsel %vm2399_vm1, %v2560_v56, 0 }
 0x3c3   : > { %v3174_v26 = vpop.xlane.xlu0 %3173  ;;  %v2956_v1 = vsel %vm2371_vm2, %v6471_v24, 0.0  ;;  %v6513_v61 = vadd.f32 %v2318_v47, %v822_v52  ;;  %v6515_v54 = vadd.f32 %v2320_v35, %v826_v40  ;;  %v6517_v36 = vadd.f32 %v2322_v58, %v822_v52 }
 0x3c4   : > { %v6481_v31 = vpop.eup %5244  ;;  %v3178_v63 = vsub.f32 %v6405_v29, %v3174_v26  ;;  %2957 = vadd.xlane.f32.xlu0 %v2956_v1  ;;  %v6519_v11 = vadd.f32 %v2324_v49, %v826_v40  ;;  %v5143_v1 = vld [vmem:[%s5920_s28] sm:$0xff]  }
 0x3c5   : > { %v3177_v38 = vpop.xlane.xlu1 %3176  ;;  %v2959_v41 = vsel %vm2375_vm3, %v6481_v31, 0.0  ;;  %v3016_v26 = vpack.c.bf16 %v6517_v36, %v6513_v61  ;;  %4792 = vmatpush3.bf16.msra.mxu0 %v5143_v1  ;;  %v5151_v36 = vld [vmem:[%s5920_s28 + $0xc0] sm:$0xff]  }
 0x3c6   : > { %v3180_v42 = vmul.f32 1.442695, %v3178_v63  ;;  %v3179_v4 = vsub.f32 %v6409_v43, %v3177_v38  ;;  %2960 = vadd.xlane.f32.xlu1 %v2959_v41  ;;  %v3130_v25 = vpack.c.bf16 %v6519_v11, %v6515_v54  ;;  %v5145_v63 = vld [vmem:[%s5920_s28 + $0x8] sm:$0xff]   ;;  %4793 = vmatprep.subr.bf16.mxu0 %v5144_v12  ;;  %v5146_v38 = vld [vmem:[%s5920_s28 + $0x50] sm:$0xff]   ;;  %v2515_v12 = vsel %vm2399_vm1, %v2446_v62, 0 }
 0x3c7   : > { %v5147_v41 = vld [vmem:[%s5920_s28 + $0x10] sm:$0xff]   ;;  %v3085_v59 = vsel %vm2399_vm1, %v3016_v26, 0  ;;  %v5154_v54 = vld [vmem:[%s5920_s28 + $0x68] sm:$0xff]  }
 0x3c8   : > { %5250 = vpow2.f32 %v3180_v42  ;;  %v3182_v60 = vmul.f32 1.442695, %v3179_v4  ;;  %v5148_v42 = vld [vmem:[%s5920_s28 + $0x58] sm:$0xff]   ;;  %v5155_v11 = vld [vmem:[%s5920_s28 + $0xc8] sm:$0xff]  }
 0x3c9   : > { %4794 = vmatpush3.bf16.msra.mxu0 %v5145_v63  ;;  %v5149_v4 = vld [vmem:[%s5920_s28 + $0x18] sm:$0xff]  }
 0x3ca   : > { %v6493_v29 = vpop.eup %5246  ;;  %5252 = vpow2.f32 %v3182_v60  ;;  %4795 = vmatprep.subr.bf16.mxu0 %v5146_v38  ;;  %v5150_v60 = vld [vmem:[%s5920_s28 + $0x60] sm:$0xff]  }
 0x3cb   : > { %v3070_v7 = vsel %vm2371_vm2, %v6493_v29, 0.0 }
 0x3cc   : > { %v6497_v2 = vpop.eup %5248  ;;  %3071 = vadd.xlane.f32.xlu0 %v3070_v7  ;;  %v5152_v7 = vld [vmem:[%s5920_s28 + $0x20] sm:$0xff]  }
 0x3cd   : > { %v3073_v5 = vsel %vm2375_vm3, %v6497_v2, 0.0  ;;  %4796 = vmatpush3.bf16.msra.mxu0 %v5147_v41 }
 0x3ce   : > { %3074 = vadd.xlane.f32.xlu1 %v3073_v5  ;;  %4797 = vmatprep.subr.bf16.mxu0 %v5148_v42 }
 0x3d1   : > { %4798 = vmatpush3.bf16.msra.mxu0 %v5149_v4 }
 0x3d2   : > { %v6501_v43 = vpop.eup %5250  ;;  %4799 = vmatprep.subr.bf16.mxu0 %v5150_v60 }
 0x3d3   : > { %v3184_v44 = vsel %vm2371_vm2, %v6501_v43, 0.0 }
 0x3d4   : > { %v6505_v48 = vpop.eup %5252  ;;  %3185 = vadd.xlane.f32.xlu0 %v3184_v44 }
 0x3d5   : > { %v3187_v55 = vsel %vm2375_vm3, %v6505_v48, 0.0  ;;  %4800 = vmatpush3.bf16.msra.mxu0 %v5152_v7  ;;  %v2743_v7 = vsel %vm2399_vm1, %v2674_v19, 0 }
 0x3d6   : > { %3188 = vadd.xlane.f32.xlu1 %v3187_v55  ;;  %4801 = vmatprep.subr.bf16.mxu0 %v5154_v54 }
 0x429   : > { %v2387_v5 = vpop.xlane.xlu0 %2386 }
 0x42a   : > { %5254 = vrcp.f32 %v2387_v5 }
 0x42d   : > { %v2390_v44 = vpop.xlane.xlu1 %2389 }
 0x42e   : > { %5256 = vrcp.f32 %v2390_v44 }
 0x431   : > { %v2502_v55 = vpop.xlane.xlu0 %2501 }
 0x432   : > { %5258 = vrcp.f32 %v2502_v55 }
 0x434   : > { %v5255_v35 = vpop.eup %5254 }
 0x435   : > { %v2505_v47 = vpop.xlane.xlu1 %2504  ;;  %v2393_v40 = vmul.f32 %v5255_v35, %v6417_v0 }
 0x436   : > { %5260 = vrcp.f32 %v2505_v47 }
 0x438   : > { %v5257_v52 = vpop.eup %5256 }
 0x439   : > { %v2394_v58 = vmul.f32 %v5257_v52, %v6422_v10  ;;  %v2616_v49 = vpop.xlane.xlu0 %2615 }
 0x43a   : > { %5262 = vrcp.f32 %v2616_v49 }
 0x43b   : > { %v2619_v39 = vpop.xlane.xlu1 %2618  ;;  %v2395_v1 = vpack.c.bf16 %v2394_v58, %v2393_v40 }
 0x43c   : > { %5264 = vrcp.f32 %v2619_v39  ;;  %v5259_v63 = vpop.eup %5258 }
 0x43d   : > { %4906 = vmatmul.mubr.msk.bf16.vlgmr.msra.gmra.mrb[24].mxu1 %vm2371_vm2, %v2395_v1  ;;  %v2508_v10 = vmul.f32 %v5259_v63, %v6427_v46  ;;  %v3199_v1 = vsel %vm2399_vm1, %v3130_v25, 0  ;;  %v5153_v63 = vld [vmem:[%s5920_s28 + $0x80] sm:$0xff]   ;;  %v5156_v25 = vld [vmem:[%s5920_s28 + $0x28] sm:$0xff]  }
 0x43e   : > { %4916 = vmatpush3.bf16.msra.mxu1 %v2515_v12  ;;  %4917 = vmatprep.mubr.msk.bf16.mxu1 %vm5568_vm0, %v5567_v15 }
 0x43f   : > { %4927 = vmatprep.subr.bf16.mxu1 %v5567_v15  ;;  %4802 = vmatpush3.bf16.msra.mxu0 %v5156_v25  ;;  %v5191_v25 = vld [vmem:[%s5920_s28 + $0x1d0] sm:$0xff]  }
 0x440   : > { %v5261_v0 = vpop.eup %5260 }
 0x441   : > { %v2509_v38 = vmul.f32 %v5261_v0, %v6432_v3  ;;  %v2730_v41 = vpop.xlane.xlu0 %2729 }
 0x442   : > { %5266 = vrcp.f32 %v2730_v41  ;;  %v5161_v41 = vld [vmem:[%s5920_s28 + $0x90] sm:$0xff]  }
 0x443   : > { %v2733_v42 = vpop.xlane.xlu1 %2732  ;;  %v2510_v4 = vpack.c.bf16 %v2509_v38, %v2508_v10  ;;  %v5157_v10 = vld [vmem:[%s5920_s28 + $0x88] sm:$0xff]   ;;  %v5159_v38 = vld [vmem:[%s5920_s28 + $0xd0] sm:$0xff]  }
 0x444   : > { %5268 = vrcp.f32 %v2733_v42  ;;  %v5263_v16 = vpop.eup %5262  ;;  %v5162_v42 = vld [vmem:[%s5920_s28 + $0x78] sm:$0xff]  }
 0x445   : > { %4918 = vmatmul.mubr.msk.bf16.vlgmr.msra.gmra.mrb[28].mxu1 %vm2371_vm2, %v2510_v4  ;;  %v2622_v3 = vmul.f32 %v5263_v16, %v6437_v8  ;;  %v5163_v4 = vld [vmem:[%s5920_s28 + $0xd8] sm:$0xff]  }
 0x446   : > { %v5265_v62 = vpop.eup %5264  ;;  %4928 = vmatpush3.bf16.msra.mxu1 %v2629_v53  ;;  %4929 = vmatprep.mubr.msk.bf16.mxu1 %vm5568_vm0, %v5567_v15  ;;  %v5164_v53 = vld [vmem:[%s5920_s28 + $0x38] sm:$0xff]  }
 0x447   : > { %v2623_v46 = vmul.f32 %v5265_v62, %v6441_v45  ;;  %4939 = vmatprep.subr.bf16.mxu1 %v5567_v15  ;;  %v5165_v16 = vld [vmem:[%s5920_s28 + $0x98] sm:$0xff]   ;;  %v5166_v62 = vld [vmem:[%s5920_s28 + $0xe0] sm:$0xff]  }
 0x449   : > { %v2844_v60 = vpop.xlane.xlu0 %2843  ;;  %v2624_v57 = vpack.c.bf16 %v2623_v46, %v2622_v3  ;;  %v5167_v46 = vld [vmem:[%s5920_s28 + $0x140] sm:$0xff]  }
 0x44a   : > { %5270 = vrcp.f32 %v2844_v60  ;;  %v5168_v3 = vld [vmem:[%s5920_s28 + $0xa0] sm:$0xff]   ;;  %v5170_v60 = vld [vmem:[%s5920_s28 + $0xe8] sm:$0xff]  }
 0x44b   : > { %v2847_v22 = vpop.xlane.xlu1 %2846 }
 0x44c   : > { %5272 = vrcp.f32 %v2847_v22  ;;  %v5267_v56 = vpop.eup %5266  ;;  %v5172_v22 = vld [vmem:[%s5920_s28 + $0xa8] sm:$0xff]  }
 0x44d   : > { %4930 = vmatmul.mubr.msk.bf16.vlgmr.msra.gmra.mrb[32].mxu1 %vm2371_vm2, %v2624_v57  ;;  %v2736_v45 = vmul.f32 %v5267_v56, %v6447_v50  ;;  %v5174_v57 = vld [vmem:[%s5920_s28 + $0xf0] sm:$0xff]  }
 0x44e   : > { %v5269_v5 = vpop.eup %5268  ;;  %4940 = vmatpush3.bf16.msra.mxu1 %v2743_v7  ;;  %4941 = vmatprep.mubr.msk.bf16.mxu1 %vm5568_vm0, %v5567_v15  ;;  %v5176_v56 = vld [vmem:[%s5920_s28 + $0xb0] sm:$0xff]   ;;  %v5178_v7 = vld [vmem:[%s5920_s28 + $0xf8] sm:$0xff]  }
 0x44f   : > { %v2737_v8 = vmul.f32 %v5269_v5, %v6451_v51  ;;  %4951 = vmatprep.subr.bf16.mxu1 %v5567_v15  ;;  %v5180_v5 = vld [vmem:[%s5920_s28 + $0xb8] sm:$0xff]  }
 0x451   : > { %v2958_v44 = vpop.xlane.xlu0 %2957  ;;  %v2738_v47 = vpack.c.bf16 %v2737_v8, %v2736_v45  ;;  %v5183_v8 = vld [vmem:[%s5920_s28 + $0x1c0] sm:$0xff]  }
 0x452   : > { %5274 = vrcp.f32 %v2958_v44 }
 0x453   : > { %v2961_v55 = vpop.xlane.xlu1 %2960 }
 0x454   : > { %5276 = vrcp.f32 %v2961_v55  ;;  %v5271_v35 = vpop.eup %5270 }
 0x455   : > { %4942 = vmatmul.mubr.msk.bf16.vlgmr.msra.gmra.mrb[36].mxu1 %vm2371_vm2, %v2738_v47  ;;  %v2850_v51 = vmul.f32 %v5271_v35, %v6457_v37 }
 0x456   : > { %v5273_v34 = vpop.eup %5272  ;;  %4952 = vmatpush3.bf16.msra.mxu1 %v2857_v17  ;;  %4953 = vmatprep.mubr.msk.bf16.mxu1 %vm5568_vm0, %v5567_v15 }
 0x457   : > { %v2851_v50 = vmul.f32 %v5273_v34, %v6461_v27  ;;  %4963 = vmatprep.subr.bf16.mxu1 %v5567_v15 }
 0x459   : > { %v3072_v19 = vpop.xlane.xlu0 %3071  ;;  %v2852_v40 = vpack.c.bf16 %v2851_v50, %v2850_v51 }
 0x45a   : > { %5278 = vrcp.f32 %v3072_v19 }
 0x45b   : > { %v3075_v52 = vpop.xlane.xlu1 %3074 }
 0x45c   : > { %5280 = vrcp.f32 %v3075_v52  ;;  %v5275_v58 = vpop.eup %5274  ;;  %v5169_v52 = vld [vmem:[%s5920_s28 + $0x100] sm:$0xff]  }
 0x45d   : > { %4954 = vmatmul.mubr.msk.bf16.vlgmr.msra.gmra.mrb[40].mxu1 %vm2371_vm2, %v2852_v40  ;;  %v2964_v37 = vmul.f32 %v5275_v58, %v6471_v24  ;;  %v5171_v40 = vld [vmem:[%s5920_s28 + $0x148] sm:$0xff]  }
 0x45e   : > { %v5277_v6 = vpop.eup %5276  ;;  %4964 = vmatpush3.bf16.msra.mxu1 %v2971_v28  ;;  %4965 = vmatprep.mubr.msk.bf16.mxu1 %vm5568_vm0, %v5567_v15  ;;  %v5173_v58 = vld [vmem:[%s5920_s28 + $0x108] sm:$0xff]  }
 0x45f   : > { %v2965_v32 = vmul.f32 %v5277_v6, %v6481_v31  ;;  %4975 = vmatprep.subr.bf16.mxu1 %v5567_v15  ;;  %v5175_v6 = vld [vmem:[%s5920_s28 + $0x150] sm:$0xff]  }
 0x461   : > { %v3186_v27 = vpop.xlane.xlu0 %3185  ;;  %v2966_v39 = vpack.c.bf16 %v2965_v32, %v2964_v37 }
 0x462   : > { %5282 = vrcp.f32 %v3186_v27 }
 0x463   : > { %v3189_v49 = vpop.xlane.xlu1 %3188 }
 0x464   : > { %5284 = vrcp.f32 %v3189_v49  ;;  %v5279_v30 = vpop.eup %5278 }
 0x465   : > { %4966 = vmatmul.mubr.msk.bf16.vlgmr.msra.gmra.mrb[44].mxu1 %vm2371_vm2, %v2966_v39  ;;  %v3078_v31 = vmul.f32 %v5279_v30, %v6493_v29  ;;  %v5177_v39 = vld [vmem:[%s5920_s28 + $0x110] sm:$0xff]   ;;  %v5181_v30 = vld [vmem:[%s5920_s28 + $0x118] sm:$0xff]  }
 0x466   : > { %v5281_v33 = vpop.eup %5280  ;;  %4976 = vmatpush3.bf16.msra.mxu1 %v3085_v59  ;;  %4977 = vmatprep.mubr.msk.bf16.mxu1 %vm5568_vm0, %v5567_v15  ;;  %v5179_v59 = vld [vmem:[%s5920_s28 + $0x158] sm:$0xff]  }
 0x467   : > { %v3079_v24 = vmul.f32 %v5281_v33, %v6497_v2  ;;  %4987 = vmatprep.subr.bf16.mxu1 %v5567_v15 }
 0x469   : > { %v3080_v61 = vpack.c.bf16 %v3079_v24, %v3078_v31  ;;  %v5182_v24 = vld [vmem:[%s5920_s28 + $0x160] sm:$0xff]  }
 0x46c   : > { %v5283_v26 = vpop.eup %5282 }
 0x46d   : > { %4978 = vmatmul.mubr.msk.bf16.vlgmr.msra.gmra.mrb[48].mxu1 %vm2371_vm2, %v3080_v61  ;;  %v3192_v2 = vmul.f32 %v5283_v26, %v6501_v43  ;;  %v5160_v43 = vld [vmem:[%s5920_s28 + $0x30] sm:$0xff]  }
 0x46e   : > { %v5285_v12 = vpop.eup %5284  ;;  %4988 = vmatpush3.bf16.msra.mxu1 %v3199_v1  ;;  %4989 = vmatprep.mubr.msk.bf16.mxu1 %vm5568_vm0, %v5567_v15  ;;  %v5184_v1 = vld [vmem:[%s5920_s28 + $0x120] sm:$0xff]  }
 0x46f   : > { %v3193_v29 = vmul.f32 %v5285_v12, %v6505_v48  ;;  %4813 = vmatprep.subr.bf16.mxu1 %v5151_v36  ;;  %v5158_v48 = vld [vmem:[%s5920_s28 + $0x70] sm:$0xff]   ;;  %v5185_v12 = vld [vmem:[%s5920_s28 + $0x180] sm:$0xff]  }
 0x470   : > { %4803 = vmatprep.subr.bf16.mxu0 %v5158_v48 }
 0x471   : > { %v3194_v0 = vpack.c.bf16 %v3193_v29, %v3192_v2  ;;  %4804 = vmatpush3.bf16.msra.mxu0 %v5160_v43  ;;  %v5186_v29 = vld [vmem:[%s5920_s28 + $0x168] sm:$0xff]  }
 0x472   : > { %4805 = vmatprep.subr.bf16.mxu0 %v5162_v42  ;;  %v5187_v2 = vld [vmem:[%s5920_s28 + $0x1c8] sm:$0xff]   ;;  %v5193_v42 = vld [vmem:[%s5920_s28 + $0x190] sm:$0xff]  }
 0x475   : > { %4990 = vmatmul.mubr.msk.bf16.vlgmr.msra.gmra.mrb[52].mxu1 %vm2371_vm2, %v3194_v0  ;;  %4806 = vmatpush3.bf16.msra.mxu0 %v5164_v53  ;;  %v5189_v0 = vld [vmem:[%s5920_s28 + $0x188] sm:$0xff]   ;;  %v5195_v53 = vld [vmem:[%s5920_s28 + $0x1d8] sm:$0xff]  }
 0x476   : > { %4814 = vmatpush3.bf16.msra.mxu1 %v5153_v63  ;;  %4835 = vmatprep.subr.bf16.mxu0 %v5167_v46  ;;  %v5188_v63 = vld [vmem:[%s5920_s28 + $0x128] sm:$0xff]  }
 0x477   : > { %4815 = vmatprep.subr.bf16.mxu1 %v5155_v11  ;;  %v5190_v11 = vld [vmem:[%s5920_s28 + $0x170] sm:$0xff]  }
 0x47a   : > { %4816 = vmatpush3.bf16.msra.mxu1 %v5157_v10 }
 0x47b   : > { %4817 = vmatprep.subr.bf16.mxu1 %v5159_v38 }
 0x47e   : > { %4818 = vmatpush3.bf16.msra.mxu1 %v5161_v41  ;;  %v5192_v41 = vld [vmem:[%s5920_s28 + $0x130] sm:$0xff]  }
 0x47f   : > { %4819 = vmatprep.subr.bf16.mxu1 %v5163_v4  ;;  %v5194_v4 = vld [vmem:[%s5920_s28 + $0x178] sm:$0xff]  }
 0x482   : > { %4820 = vmatpush3.bf16.msra.mxu1 %v5165_v16  ;;  %v5196_v16 = vld [vmem:[%s5920_s28 + $0x138] sm:$0xff]  }
 0x483   : > { %4821 = vmatprep.subr.bf16.mxu1 %v5166_v62  ;;  %v5197_v62 = vld [vmem:[%s5920_s28 + $0x198] sm:$0xff]  }
 0x486   : > { %4822 = vmatpush3.bf16.msra.mxu1 %v5168_v3  ;;  %v5198_v3 = vld [vmem:[%s5920_s28 + $0x1e0] sm:$0xff]  }
 0x487   : > { %4823 = vmatprep.subr.bf16.mxu1 %v5170_v60 }
 0x48a   : > { %4824 = vmatpush3.bf16.msra.mxu1 %v5172_v22 }
 0x48b   : > { %4825 = vmatprep.subr.bf16.mxu1 %v5174_v57 }
 0x48e   : > { %4826 = vmatpush3.bf16.msra.mxu1 %v5176_v56 }
 0x48f   : > { %4827 = vmatprep.subr.bf16.mxu1 %v5178_v7  ;;  %v5199_v7 = vld [vmem:[%s5920_s28 + $0x1a0] sm:$0xff]  }
 0x492   : > { %4828 = vmatpush3.bf16.msra.mxu1 %v5180_v5  ;;  %v5200_v5 = vld [vmem:[%s5920_s28 + $0x1e8] sm:$0xff]  }
 0x493   : > { %4857 = vmatprep.subr.bf16.mxu1 %v5183_v8  ;;  %v5201_v8 = vld [vmem:[%s5920_s28 + $0x1a8] sm:$0xff]  }
 0x510   : > { %v2437_v45 = vpop.f32.mrb[24].mxu1 }
 0x511   : > { %v4907_v44 = vpop.f32.mrb[25].mxu1 }
 0x512   : > { %v2440_v55 = vpop.f32.mrb[26].mxu1  ;;  %v5202_v44 = vld [vmem:[%s5920_s28 + $0x1f0] sm:$0xff]  }
 0x513   : > { %v3242_v47 = vpack.c.bf16 %v2440_v55, %v2437_v45  ;;  %v4908_v35 = vpop.f32.mrb[27].mxu1 }
 0x518   : > { %v2551_v17 = vpop.f32.mrb[28].mxu1 }
 0x519   : > { %v4919_v34 = vpop.f32.mrb[29].mxu1 }
 0x51a   : > { %v2554_v50 = vpop.f32.mrb[30].mxu1  ;;  %v5203_v34 = vld [vmem:[%s5920_s28 + $0x1b0] sm:$0xff]  }
 0x51b   : > { %v3243_v51 = vpack.c.bf16 %v2554_v50, %v2551_v17  ;;  %v4920_v19 = vpop.f32.mrb[31].mxu1  ;;  %v5204_v50 = vld [vmem:[%s5920_s28 + $0x1f8] sm:$0xff]  }
 0x51d   : > { %3798 = vmatprep.mubr.bf16.mxu0 %v3243_v51  ;;  %v5205_v51 = vld [vmem:[%s5920_s28 + $0x1b8] sm:$0xff]  }
 0x51e   : > { %3799 = vmatmul.mubr.bf16.vlgmr.msra.gmra.mrb[56].mxu0 %v3242_v47 }
 0x51f   : > { %4836 = vmatpush3.bf16.msra.mxu0 %v5169_v52 }
 0x520   : > { %v2665_v28 = vpop.f32.mrb[32].mxu1  ;;  %4837 = vmatprep.subr.bf16.mxu0 %v5171_v40 }
 0x521   : > { %v4931_v32 = vpop.f32.mrb[33].mxu1 }
 0x522   : > { %v2668_v37 = vpop.f32.mrb[34].mxu1 }
 0x523   : > { %v3244_v27 = vpack.c.bf16 %v2668_v37, %v2665_v28  ;;  %v4932_v49 = vpop.f32.mrb[35].mxu1  ;;  %4838 = vmatpush3.bf16.msra.mxu0 %v5173_v58 }
 0x524   : > { %4839 = vmatprep.subr.bf16.mxu0 %v5175_v6 }
 0x527   : > { %4840 = vmatpush3.bf16.msra.mxu0 %v5177_v39 }
 0x528   : > { %v2779_v33 = vpop.f32.mrb[36].mxu1  ;;  %4841 = vmatprep.subr.bf16.mxu0 %v5179_v59  ;;  %v6668_v59 = vld [vmem:[%s5930_s22] sm:$0xff] }
 0x529   : > { %v4943_v31 = vpop.f32.mrb[37].mxu1 }
 0x52a   : > { %v2782_v61 = vpop.f32.mrb[38].mxu1 }
 0x52b   : > { %v3245_v36 = vpack.c.bf16 %v2782_v61, %v2779_v33  ;;  %v4944_v26 = vpop.f32.mrb[39].mxu1  ;;  %4842 = vmatpush3.bf16.msra.mxu0 %v5181_v30  ;;  %v3381_v30 = vrot.slane %v6668_v59, %v6136_v18 }
 0x52c   : > { %4843 = vmatprep.subr.bf16.mxu0 %v5182_v24 }
 0x52d   : > { %3839 = vmatprep.mubr.bf16.mxu1 %v3245_v36 }
 0x52e   : > { %3840 = vmatmul.mubr.bf16.vlgmr.msra.gmra.mrb[56].mxu1 %v3244_v27 }
 0x52f   : > { %4844 = vmatpush3.bf16.msra.mxu0 %v5184_v1  ;;  %4858 = vmatpush3.bf16.msra.mxu1 %v5185_v12 }
 0x530   : > { %v2893_v54 = vpop.f32.mrb[40].mxu1  ;;  %4845 = vmatprep.subr.bf16.mxu0 %v5186_v29  ;;  %4859 = vmatprep.subr.bf16.mxu1 %v5187_v2 }
 0x531   : > { %v4955_v10 = vpop.f32.mrb[41].mxu1 }
 0x532   : > { %v2896_v48 = vpop.f32.mrb[42].mxu1 }
 0x533   : > { %v3246_v38 = vpack.c.bf16 %v2896_v48, %v2893_v54  ;;  %v4956_v43 = vpop.f32.mrb[43].mxu1  ;;  %4846 = vmatpush3.bf16.msra.mxu0 %v5188_v63  ;;  %4860 = vmatpush3.bf16.msra.mxu1 %v5189_v0 }
 0x534   : > { %4847 = vmatprep.subr.bf16.mxu0 %v5190_v11  ;;  %4861 = vmatprep.subr.bf16.mxu1 %v5191_v25 }
 0x537   : > { %4848 = vmatpush3.bf16.msra.mxu0 %v5192_v41  ;;  %4862 = vmatpush3.bf16.msra.mxu1 %v5193_v42 }
 0x538   : > { %v3007_v46 = vpop.f32.mrb[44].mxu1  ;;  %4849 = vmatprep.subr.bf16.mxu0 %v5194_v4  ;;  %4863 = vmatprep.subr.bf16.mxu1 %v5195_v53 }
 0x539   : > { %v4967_v60 = vpop.f32.mrb[45].mxu1 }
 0x53a   : > { %v3010_v22 = vpop.f32.mrb[46].mxu1  ;;  %v5295_v60 = vld [vmem:[#allocation2 + $0x8] sm:$0x3] }
 0x53b   : > { %v3247_v57 = vpack.c.bf16 %v3010_v22, %v3007_v46  ;;  %v4968_v56 = vpop.f32.mrb[47].mxu1  ;;  %4850 = vmatpush3.bf16.msra.mxu0 %v5196_v16  ;;  %4864 = vmatpush3.bf16.msra.mxu1 %v5197_v62  ;;  %v5294_v46 = vld [vmem:[#allocation2] sm:$0xff] }
 0x53c   : > { %4865 = vmatprep.subr.bf16.mxu1 %v5198_v3  ;;  %4993 = vmatprep.subr.bf16.mxu0 %v5567_v15 }
 0x53d   : > { %3880 = vmatprep.mubr.bf16.mxu0 %v3247_v57 }
 0x53e   : > { %3881 = vmatmul.mubr.bf16.vlgmr.msra.gmra.mrb[60].mxu0 %v3246_v38 }
 0x53f   : > { %4866 = vmatpush3.bf16.msra.mxu1 %v5199_v7  ;;  %5009 = vmatprep.mubr.msk.bf16.mxu0 %vm5568_vm0, %v5567_v15 }
 0x540   : > { %v3121_v45 = vpop.f32.mrb[48].mxu1  ;;  %4867 = vmatprep.subr.bf16.mxu1 %v5200_v5 }
 0x541   : > { %v4979_v55 = vpop.f32.mrb[49].mxu1 }
 0x542   : > { %v3124_v47 = vpop.f32.mrb[50].mxu1  ;;  %v5209_v55 = vld [vmem:[%s5922_s27 + $0x18] sm:$0xff]  }
 0x543   : > { %v3248_v35 = vpack.c.bf16 %v3124_v47, %v3121_v45  ;;  %v4980_v17 = vpop.f32.mrb[51].mxu1  ;;  %4868 = vmatpush3.bf16.msra.mxu1 %v5201_v8  ;;  %v5206_v8 = vld [vmem:[%s5922_s27] sm:$0xff]   ;;  %v5207_v45 = vld [vmem:[%s5922_s27 + $0x8] sm:$0xff]  }
 0x544   : > { %4869 = vmatprep.subr.bf16.mxu1 %v5202_v44  ;;  %4994 = vmatpush3.bf16.msra.mxu0 %v5206_v8  ;;  %v5208_v44 = vld [vmem:[%s5922_s27 + $0x10] sm:$0xff]   ;;  %v5210_v47 = vld [vmem:[%s5922_s27 + $0x20] sm:$0xff]  }
 0x545   : > { %4995 = vmatprep.subr.bf16.mxu0 %v5567_v15  ;;  %v5212_v17 = vld [vmem:[%s5922_s27 + $0x30] sm:$0xff]  }
 0x547   : > { %4870 = vmatpush3.bf16.msra.mxu1 %v5203_v34  ;;  %v5213_v34 = vld [vmem:[%s5922_s27 + $0x38] sm:$0xff]  }
 0x548   : > { %v3235_v19 = vpop.f32.mrb[52].mxu1  ;;  %4871 = vmatprep.subr.bf16.mxu1 %v5204_v50  ;;  %4996 = vmatpush3.bf16.msra.mxu0 %v5207_v45  ;;  %v5214_v50 = vld [vmem:[%s5928_s10] sm:$0xff]  }
 0x549   : > { %v4991_v52 = vpop.f32.mrb[53].mxu1  ;;  %4997 = vmatprep.subr.bf16.mxu0 %v5567_v15 }
 0x54a   : > { %v3238_v40 = vpop.f32.mrb[54].mxu1  ;;  %v5217_v52 = vld [vmem:[%s5928_s10 + $0x18] sm:$0xff]  }
 0x54b   : > { %v3249_v58 = vpack.c.bf16 %v3238_v40, %v3235_v19  ;;  %v4992_v28 = vpop.f32.mrb[55].mxu1  ;;  %4872 = vmatpush3.bf16.msra.mxu1 %v5205_v51  ;;  %v5215_v51 = vld [vmem:[%s5928_s10 + $0x8] sm:$0xff]   ;;  %v5216_v19 = vld [vmem:[%s5928_s10 + $0x10] sm:$0xff]   ;;  %v5218_v40 = vld [vmem:[%s5928_s10 + $0x20] sm:$0xff]  }
 0x54c   : > { %5013 = vmatprep.subr.bf16.mxu1 %v5567_v15  ;;  %4998 = vmatpush3.bf16.msra.mxu0 %v5208_v44 }
 0x54d   : > { %3921 = vmatprep.mubr.bf16.mxu1 %v3249_v58  ;;  %4999 = vmatprep.subr.bf16.mxu0 %v5567_v15  ;;  %v5219_v58 = vld [vmem:[%s5928_s10 + $0x28] sm:$0xff]  }
 0x54e   : > { %3922 = vmatmul.mubr.bf16.vlgmr.msra.gmra.mrb[60].mxu1 %v3248_v35  ;;  %v5211_v35 = vld [vmem:[%s5922_s27 + $0x28] sm:$0xff]  }
 0x54f   : > { %5029 = vmatprep.mubr.msk.bf16.mxu1 %vm5568_vm0, %v5567_v15  ;;  %5014 = vmatpush3.bf16.msra.mxu1 %v5214_v50 }
 0x550   : > { %5000 = vmatpush3.bf16.msra.mxu0 %v5209_v55  ;;  %5015 = vmatprep.subr.bf16.mxu1 %v5567_v15 }
 0x551   : > { %5001 = vmatprep.subr.bf16.mxu0 %v5567_v15 }
 0x553   : > { %5016 = vmatpush3.bf16.msra.mxu1 %v5215_v51 }
 0x554   : > { %5002 = vmatpush3.bf16.msra.mxu0 %v5210_v47  ;;  %5017 = vmatprep.subr.bf16.mxu1 %v5567_v15 }
 0x555   : > { %5003 = vmatprep.subr.bf16.mxu0 %v5567_v15 }
 0x557   : > { %5018 = vmatpush3.bf16.msra.mxu1 %v5216_v19 }
 0x558   : > { %5004 = vmatpush3.bf16.msra.mxu0 %v5211_v35  ;;  %5019 = vmatprep.subr.bf16.mxu1 %v5567_v15 }
 0x559   : > { %5005 = vmatprep.subr.bf16.mxu0 %v5567_v15 }
 0x55b   : > { %5020 = vmatpush3.bf16.msra.mxu1 %v5217_v52 }
 0x55c   : > { %5006 = vmatpush3.bf16.msra.mxu0 %v5212_v17  ;;  %5021 = vmatprep.subr.bf16.mxu1 %v5567_v15 }
 0x55d   : > { %5007 = vmatprep.subr.bf16.mxu0 %v5567_v15 }
 0x55f   : > { %5022 = vmatpush3.bf16.msra.mxu1 %v5218_v40 }
 0x560   : > { %5008 = vmatpush3.bf16.msra.mxu0 %v5213_v34  ;;  %5023 = vmatprep.subr.bf16.mxu1 %v5567_v15 }
 0x563   : > { %5024 = vmatpush3.bf16.msra.mxu1 %v5219_v58 }
 0x564   : > { %5025 = vmatprep.subr.bf16.mxu1 %v5567_v15 }
 0x5f1   : > { %v4807_v6 = vpop.f32.mrb[56].mxu0 }
 0x5f2   : > { %v4808_v32 = vpop.f32.mrb[57].mxu0 }
 0x5f3   : > { %v4809_v37 = vadd.f32 %v4808_v32, %v4807_v6  ;;  %v4810_v27 = vpop.f32.mrb[58].mxu0 }
 0x5f4   : > { %v4811_v49 = vpop.f32.mrb[59].mxu0 }
 0x5f5   : > { %v4812_v39 = vadd.f32 %v4811_v49, %v4810_v27  ;;  %v3801_v31 = vadd.f32 %v4809_v37, %v3381_v30 }
 0x5f7   : > { %v3804_v1 = vadd.f32 %v4812_v39, %v3381_v30 }
 0x601   : > { %v4829_v33 = vpop.f32.mrb[56].mxu1 }
 0x602   : > { %v4830_v24 = vpop.f32.mrb[57].mxu1 }
 0x603   : > { %v4831_v61 = vadd.f32 %v4830_v24, %v4829_v33  ;;  %v4832_v36 = vpop.f32.mrb[58].mxu1 }
 0x604   : > { %v4833_v26 = vpop.f32.mrb[59].mxu1 }
 0x605   : > { %v3842_v12 = vadd.f32 %v4831_v61, %v3801_v31  ;;  %v4834_v29 = vadd.f32 %v4833_v26, %v4832_v36 }
 0x607   : > { %v3845_v2 = vadd.f32 %v4834_v29, %v3804_v1  ;;  %v3964_v29 = vrot.slane %v6668_v59, %v6142_v20  ;;  %v3993_v20 = vrot.slane %v6668_v59, %v6150_v23 }
 0x611   : > { %v4851_v63 = vpop.f32.mrb[60].mxu0 }
 0x612   : > { %v4852_v0 = vpop.f32.mrb[61].mxu0 }
 0x613   : > { %v4853_v54 = vadd.f32 %v4852_v0, %v4851_v63  ;;  %v4854_v11 = vpop.f32.mrb[62].mxu0 }
 0x614   : > { %v4855_v25 = vpop.f32.mrb[63].mxu0 }
 0x615   : > { %v3883_v10 = vadd.f32 %v4853_v54, %v3842_v12  ;;  %v4856_v48 = vadd.f32 %v4855_v25, %v4854_v11  ;;  %v3970_v25 = vrot.slane %v6668_v59, %v6145_v21 }
 0x617   : > { %v3886_v38 = vadd.f32 %v4856_v48, %v3845_v2 }
 0x621   : > { %v4873_v43 = vpop.f32.mrb[60].mxu1 }
 0x622   : > { %v4874_v18 = vpop.f32.mrb[61].mxu1 }
 0x623   : > { %v4875_v41 = vadd.f32 %v4874_v18, %v4873_v43  ;;  %v4876_v42 = vpop.f32.mrb[62].mxu1  ;;  %v5220_v18 = vld [vmem:[%s5928_s10 + $0x30] sm:$0xff]  }
 0x624   : > { %v4877_v4 = vpop.f32.mrb[63].mxu1  ;;  %5026 = vmatpush3.bf16.msra.mxu1 %v5220_v18 }
 0x625   : > { %v3924_v53 = vadd.f32 %v4875_v41, %v3883_v10  ;;  %v4878_v16 = vadd.f32 %v4877_v4, %v4876_v42  ;;  %5027 = vmatprep.subr.bf16.mxu1 %v5567_v15  ;;  %v5221_v41 = vld [vmem:[%s5928_s10 + $0x38] sm:$0xff]  }
 0x627   : > { %v3927_v62 = vadd.f32 %v4878_v16, %v3886_v38  ;;  %v6672_v3 = vadd.f32 %v5294_v46, %v3924_v53 }
 0x628   : > { %5028 = vmatpush3.bf16.msra.mxu1 %v5221_v41 }
 0x629   : > { %v6674_v22 = vadd.f32 %v5295_v60, %v3927_v62  ;;  %3932 = vadd.xlane.f32.xlu0 %v6672_v3  ;;  %v3940_v56 = vmul.f32 %v6672_v3, %v6672_v3 }
 0x62b   : > { %v3935_v57 = vsel %vm3934_vm4, %v6674_v22, 0.0  ;;  %v3941_v7 = vmul.f32 %v6674_v22, %v6674_v22 }
 0x62c   : > { %3936 = vadd.xlane.f32.xlu1 %v3935_v57 }
 0x62d   : > { %3942 = vadd.xlane.f32.xlu0 %v3940_v56  ;;  %v3944_v5 = vsel %vm3934_vm4, %v3941_v7, 0.0 }
 0x630   : > { %3945 = vadd.xlane.f32.xlu1 %v3944_v5 }
 0x6b6   : > { %v3933_v28 = vpop.xlane.xlu0 %3932 }
 0x6b7   : > { %v3938_v6 = vmul.f32 0.03125, %v3933_v28 }
 0x6b9   : > { %v3937_v32 = vpop.xlane.xlu1 %3936  ;;  %v3949_v49 = vmul.f32 %v3938_v6, %v3938_v6  ;;  %v3953_v1 = vsub.f32 %v6672_v3, %v3938_v6 }
 0x6ba   : > { %v3939_v37 = vmul.f32 0.03125, %v3937_v32  ;;  %v3943_v27 = vpop.xlane.xlu0 %3942 }
 0x6bb   : > { %v3947_v39 = vmul.f32 0.03125, %v3943_v27 }
 0x6bc   : > { %v3950_v24 = vmul.f32 %v3939_v37, %v3939_v37  ;;  %v3954_v63 = vsub.f32 %v6674_v22, %v3939_v37  ;;  %v4105_v22 = vrot.slane %v6668_v59, %v6197_v9 }
 0x6bd   : > { %v3951_v30 = vsub.f32 %v3947_v39, %v3949_v49  ;;  %v3946_v33 = vpop.xlane.xlu1 %3945  ;;  %v4228_v39 = vrot.slane %v6668_v59, %v6200_v13 }
 0x6be   : > { %v3948_v31 = vmul.f32 0.03125, %v3946_v33  ;;  %v4234_v33 = vrot.slane %v6668_v59, %v6203_v14 }
 0x6bf   : > { %v3955_v61 = vadd.f32 1e-05, %v3951_v30 }
 0x6c0   : > { %v3952_v36 = vsub.f32 %v3948_v31, %v3950_v24 }
 0x6c1   : > { %5286 = vrsqrt.f32 %v3955_v61 }
 0x6c2   : > { %v3956_v26 = vadd.f32 1e-05, %v3952_v36 }
 0x6c4   : > { %5288 = vrsqrt.f32 %v3956_v26 }
 0x6cb   : > { %v5287_v12 = vpop.eup %5286 }
 0x6cc   : > { %v3959_v2 = vmul.f32 %v5287_v12, %v3953_v1 }
 0x6ce   : > { %v5289_v0 = vpop.eup %5288  ;;  %v3965_v11 = vmul.f32 %v3964_v29, %v3959_v2 }
 0x6cf   : > { %v3960_v54 = vmul.f32 %v5289_v0, %v3954_v63 }
 0x6d0   : > { %v3971_v48 = vadd.f32 %v3970_v25, %v3965_v11 }
 0x6d1   : > { %v3966_v10 = vmul.f32 %v3964_v29, %v3960_v54 }
 0x6d3   : > { %v3972_v38 = vadd.f32 %v3970_v25, %v3966_v10 }
 0x6d5   : > { %v3973_v43 = vpack.c.bf16 %v3972_v38, %v3971_v48 }
 0x6d7   : > { %5010 = vmatmul.mubr.bf16.vlgmr.msra.gmra.mrb[64].mxu0 %v3973_v43 }
 0x7aa   : > { %v4076_v42 = vpop.f32.mrb[64].mxu0 }
 0x7ab   : > { %v4077_v4 = vadd.f32 %v4076_v42, %v3993_v20  ;;  %v5011_v53 = vpop.f32.mrb[65].mxu0 }
 0x7ac   : > { %v4079_v16 = vpop.f32.mrb[66].mxu0 }
 0x7ad   : > { %v4080_v62 = vadd.f32 %v4079_v16, %v3993_v20  ;;  %v5012_v21 = vpop.f32.mrb[67].mxu0  ;;  %v4083_v46 = vmax.f32 %v4077_v4, 0.0 }
 0x7af   : > { %v4084_v3 = vmax.f32 %v4080_v62, 0.0 }
 0x7b1   : > { %v4085_v60 = vpack.c.bf16 %v4084_v3, %v4083_v46 }
 0x7b3   : > { %5030 = vmatmul.mubr.bf16.vlgmr.msra.gmra.mrb[64].mxu1 %v4085_v60 }
 0x886   : > { %v4188_v57 = vpop.f32.mrb[64].mxu1 }
 0x887   : > { %v4189_v15 = vadd.f32 %v4188_v57, %v4105_v22  ;;  %v5031_v56 = vpop.f32.mrb[65].mxu1 }
 0x888   : > { %v4191_v7 = vpop.f32.mrb[66].mxu1 }
 0x889   : > { %v4195_v5 = vadd.f32 %v4189_v15, %v3971_v48  ;;  %v4192_v8 = vadd.f32 %v4191_v7, %v4105_v22  ;;  %v5032_v23 = vpop.f32.mrb[67].mxu1 }
 0x88b   : > { %v4196_v45 = vadd.f32 %v4192_v8, %v3972_v38  ;;  %4197 = vadd.xlane.f32.xlu0 %v4195_v5  ;;  %v4204_v55 = vmul.f32 %v4195_v5, %v4195_v5 }
 0x88d   : > { %v4199_v44 = vsel %vm3934_vm4, %v4196_v45, 0.0  ;;  %v4205_v47 = vmul.f32 %v4196_v45, %v4196_v45 }
 0x88e   : > { %4200 = vadd.xlane.f32.xlu1 %v4199_v44 }
 0x88f   : > { %4206 = vadd.xlane.f32.xlu0 %v4204_v55  ;;  %v4208_v35 = vsel %vm3934_vm4, %v4205_v47, 0.0 }
 0x892   : > { %4209 = vadd.xlane.f32.xlu1 %v4208_v35 }
 0x918   : > { %v4198_v17 = vpop.xlane.xlu0 %4197 }
 0x919   : > { %v4202_v9 = vmul.f32 0.03125, %v4198_v17 }
 0x91b   : > { %v4201_v34 = vpop.xlane.xlu1 %4200  ;;  %v4213_v19 = vmul.f32 %v4202_v9, %v4202_v9  ;;  %v4217_v49 = vsub.f32 %v4195_v5, %v4202_v9 }
 0x91c   : > { %v4203_v50 = vmul.f32 0.03125, %v4201_v34  ;;  %v4207_v51 = vpop.xlane.xlu0 %4206 }
 0x91d   : > { %v4211_v52 = vmul.f32 0.03125, %v4207_v51 }
 0x91e   : > { %v4214_v28 = vmul.f32 %v4203_v50, %v4203_v50  ;;  %v4218_v31 = vsub.f32 %v4196_v45, %v4203_v50 }
 0x91f   : > { %v4215_v40 = vsub.f32 %v4211_v52, %v4213_v19  ;;  %v4210_v58 = vpop.xlane.xlu1 %4209 }
 0x920   : > { %v4212_v6 = vmul.f32 0.03125, %v4210_v58 }
 0x921   : > { %v4219_v32 = vadd.f32 1e-05, %v4215_v40 }
 0x922   : > { %v4216_v37 = vsub.f32 %v4212_v6, %v4214_v28 }
 0x923   : > { %5290 = vrsqrt.f32 %v4219_v32 }
 0x924   : > { %v4220_v27 = vadd.f32 1e-05, %v4216_v37 }
 0x926   : > { %5292 = vrsqrt.f32 %v4220_v27 }
 0x92d   : > { %v5291_v30 = vpop.eup %5290 }
 0x92e   : > { %v4223_v24 = vmul.f32 %v5291_v30, %v4217_v49 }
 0x930   : > { %v5293_v61 = vpop.eup %5292  ;;  %v4229_v36 = vmul.f32 %v4228_v39, %v4223_v24 }
 0x931   : > { %v4224_v26 = vmul.f32 %v5293_v61, %v4218_v31  ;;  %4242 = sbr.rel (%p4751_p5) target bundleno = 2360 (0x938), region = 80 }
 0x932   : > { %v4235_v1 = vadd.f32 %v4234_v33, %v4229_v36 }
 0x933   : > { %v4230_v12 = vmul.f32 %v4228_v39, %v4224_v26 }
 0x934   : > { %4237 = vst [vmem:[#allocation2] sm:$0xff] %v4235_v1  ;;  %4243 = vst [vmem:[%s5944_s11] sm:$0xff] (!%p4751_p5), %v4235_v1 }
 0x935   : > { %v4236_v29 = vadd.f32 %v4234_v33, %v4230_v12 }
 0x937   : > { %4238 = vst [vmem:[#allocation2 + $0x8] sm:$0x3] %v4236_v29  ;;  %4244 = vst [vmem:[%s5944_s11 + $0x8] sm:$0x3] (!%p4751_p5), %v4236_v29 }
 0x938 PF: > { %s29_s8 = sadd.s32 1, %s5554_s8   ;;  %s6804_s23 = sld [smem:[#allocation17_spill]] }
 0x939   : > { %p26_p9 = scmp.ge.s32.totalorder %s29_s8, 6   ;;  %s6805_s26 = sld [smem:[#allocation23_spill]] }
 0x93a   : > { %s6806_s28 = sld [smem:[#allocation20_spill]]  ;;  %s6807_s4 = sld [smem:[#allocation21_spill]] }
 0x93b   : > { %s6808_s30 = sld [smem:[#allocation22_spill]]  ;;  %s6809_s24 = smov %s5530_s25 }
 0x93c   : > { %s6811_s27 = smov %s5546_s29  ;;  %28 = sbr.rel (!%p26_p9) target bundleno = 16 (0x10), region = 160 }
 0x93e   : > { %s6810_s25 = smov %s6804_s23 }
 0x940   : > { %s6812_s29 = smov %s6807_s4 }
 0x943   :  { %4266 = vsyncpa [#allocation4], 1 }
 0x944   :  { %4268 = vsyncpa [#allocation4 + $0x1], 1 }
 0x945   :  { %4269 = vsyncpa [#allocation6], 1 }
 0x946   :  { %4271 = vsyncpa [#allocation6 + $0x1], 1 }
 0x947   :  { %4272 = vsyncpa [#allocation9], 1 }
 0x948   :  { %4274 = vsyncpa [#allocation9 + $0x1], 1 }
 0x949   :  { %4275 = vsyncpa [#allocation12], 1 }
 0x94a   :  { %4277 = vsyncpa [#allocation12 + $0x1], 1 }

// kernel: transformer_forward.3
= control target key start
LH: loop header
LB: loop body
LE: loop exit
PB: predicated region body
PF: predicated region fallthrough
CT: control target
= control target key end

     0   :  { %s11784_s0 = inlined_call_operand.vmem [shape: f32[2,8,128], index: 0, kind: input, shape index: {}]   ;;  %s11785_s1 = inlined_call_operand.vmem [shape: f32[2,10,128], index: 1, kind: input, shape index: {}]   ;;  %s11786_s2 = inlined_call_operand.vmem [shape: f32[8,8], index: 2, kind: input, shape index: {}]   ;;  %s11787_s3 = inlined_call_operand.vmem [shape: bf16[2,128,3072], index: 3, kind: input, shape index: {}]   ;;  %s11788_s4 = inlined_call_operand.hbm [shape: f32[2,1,3072], index: 4, kind: input, shape index: {}]   ;;  %s11789_s5 = inlined_call_operand.hbm [shape: bf16[2,1024,128], index: 5, kind: input, shape index: {}]   ;;  %s11790_s6 = inlined_call_operand.hbm [shape: bf16[2,128,1024], index: 6, kind: input, shape index: {}]   ;;  %s11791_s7 = inlined_call_operand.hbm [shape: f32[2,1,1024], index: 7, kind: input, shape index: {}]   ;;  %s11792_s8 = inlined_call_operand.vmem [shape: bf16[2,128,2048], index: 8, kind: input, shape index: {}]   ;;  %s11793_s9 = inlined_call_operand.hbm [shape: f32[2,1,2048], index: 9, kind: input, shape index: {}]   ;;  %s11794_s10 = inlined_call_operand.hbm [shape: bf16[2,1024,128], index: 10, kind: input, shape index: {}]   ;;  %s11795_s11 = inlined_call_operand.vmem [shape: bf16[2,128,128], index: 11, kind: input, shape index: {}]   ;;  %s11796_s12 = inlined_call_operand.vmem [shape: bf16[2,128,128], index: 12, kind: input, shape index: {}]   ;;  %s11797_s13 = inlined_call_operand.hbm [shape: f32[2,16,128], index: 13, kind: input, shape index: {}]   ;;  %s11798_s14 = inlined_call_operand.vmem [shape: bf16[128,128], index: 14, kind: input, shape index: {}]   ;;  %s11799_s15 = inlined_call_operand.vmem [shape: f32[1,128], index: 15, kind: input, shape index: {}]   ;;  %s11800_s16 = inlined_call_operand.hbm [shape: f32[2,8,128], index: 16, kind: output, shape index: {}]  }
   0x1   :  { %11829 = sst [smem:[#allocation38_spill]] %s11784_s0 }
   0x2   :  { %11830 = sst [smem:[#allocation39_spill]] %s11785_s1 }
   0x3   :  { %11831 = sst [smem:[#allocation40_spill]] %s11786_s2 }
   0x4   :  { %11832 = sst [smem:[#allocation41_spill]] %s11787_s3 }
   0x5   :  { %11833 = sst [smem:[#allocation42_spill]] %s11788_s4 }
   0x6   :  { %11834 = sst [smem:[#allocation43_spill]] %s11789_s5 }
   0x7   :  { %11835 = sst [smem:[#allocation44_spill]] %s11790_s6 }
   0x8   :  { %11836 = sst [smem:[#allocation45_spill]] %s11791_s7 }
   0x9   :  { %11837 = sst [smem:[#allocation46_spill]] %s11792_s8 }
   0xa   :  { %11838 = sst [smem:[#allocation47_spill]] %s11793_s9 }
   0xb   :  { %11839 = sst [smem:[#allocation48_spill]] %s11794_s10 }
   0xc   :  { %11840 = sst [smem:[#allocation49_spill]] %s11795_s11 }
   0xd   :  { %11841 = sst [smem:[#allocation50_spill]] %s11796_s12 }
   0xe   :  { %11842 = sst [smem:[#allocation51_spill]] %s11797_s13 }
   0xf   :  { %11843 = sst [smem:[#allocation52_spill]] %s11798_s14 }
  0x10   :  { %11844 = sst [smem:[#allocation53_spill]] %s11799_s15 }
  0x11   :  { %11845 = sst [smem:[#allocation54_spill]] %s11800_s16 }
  0x12   :  { %21 = vsyncpa [#allocation4], 0 }
  0x13   :  { %23 = vsyncpa [#allocation4 + $0x1], 0 }
  0x14   :  { %24 = vsyncpa [#allocation7], 0 }
  0x15   :  { %26 = vsyncpa [#allocation7 + $0x1], 0 }
  0x16   :  { %27 = vsyncpa [#allocation10], 0 }
  0x17   :  { %29 = vsyncpa [#allocation10 + $0x1], 0 }
  0x18   :  { %30 = vsyncpa [#allocation13], 0 }
  0x19   :  { %32 = vsyncpa [#allocation13 + $0x1], 0 }
  0x1a   :  { %33 = vsyncpa [#allocation5], 0 }
  0x1b   :  { %35 = vsyncpa [#allocation5 + $0x1], 0  ;;  %s10109_s21 = smov 0   ;;  %s10111_s22 = smov 0  }
  0x1c   :  { %s10113_s23 = smov 0   ;;  %s10115_s24 = smov 0  }
  0x1d   :  { %s10117_s25 = smov 0   ;;  %s10119_s26 = smov 0  }
  0x1e   :  { %s10121_s27 = smov 0   ;;  %s10123_s28 = smov 0  }
  0x1f   :  { %s10125_s29 = smov 0   ;;  %s10127_s30 = smov 0  }
  0x20   :  { %s10129_s0 = smov 0  }
  0x21 LB: > { %11846 = sst [smem:[#allocation21_spill]] %s9963_s21  ;;  %s10163_s17 = sadd.s32 4294967295, %s10003_s0   ;;  %s10003_s0 = sphi %s10129_s0, %s41_s0   ;;  %s9999_s30 = sphi %s10127_s30, %s11920_s30   ;;  %s9995_s29 = sphi %s10125_s29, %s11919_s29   ;;  %s9991_s28 = sphi %s10123_s28, %s11918_s28   ;;  %s9987_s27 = sphi %s10121_s27, %s11917_s27   ;;  %s9983_s26 = sphi %s10119_s26, %s11916_s26   ;;  %s9979_s25 = sphi %s10117_s25, %s11915_s25   ;;  %s9975_s24 = sphi %s10115_s24, %s11914_s24   ;;  %s9971_s23 = sphi %s10113_s23, %s11913_s23   ;;  %s9967_s22 = sphi %s10111_s22, %s11912_s22   ;;  %s9963_s21 = sphi %s10109_s21, %s11911_s21  }
  0x22   : > { %11847 = sst [smem:[#allocation22_spill]] %s9967_s22  ;;  %s8160_s18 = sadd.s32 4294967294, %s10003_s0  }
  0x23   : > { %11848 = sst [smem:[#allocation23_spill]] %s9971_s23  ;;  %s50_s19 = sadd.s32 1, %s9995_s29 }
  0x24   : > { %11849 = sst [smem:[#allocation24_spill]] %s9979_s25  ;;  %s53_s20 = sadd.s32 1, %s9999_s30 }
  0x25   : > { %11850 = sst [smem:[#allocation25_spill]] %s9983_s26  ;;  %p51_p0 = scmp.ge.s32.totalorder %s50_s19, 2 }
  0x26   : > { %11851 = sst [smem:[#allocation26_spill]] %s9987_s27  ;;  %s159_s16 = sadd.s32 1, %s9983_s26 }
  0x27   : > { %11852 = sst [smem:[#allocation27_spill]] %s9991_s28  ;;  %p166_p1 = scmp.ne.s32.totalorder %s9983_s26, %s9979_s25 }
  0x28   : > { %11853 = sst [smem:[#allocation28_spill]] %s9995_s29  ;;  %p167_p2 = scmp.eq.s32.totalorder %s10003_s0, 0 }
  0x29   : > { %11854 = sst [smem:[#allocation29_spill]] %s9999_s30  ;;  %s11922_s19 = smov (%p51_p0, %s50_s19), 0 }
  0x2a   : > { %11855 = sst [smem:[#allocation30_spill]] %s10003_s0  ;;  %s11924_s20 = smov (!%p51_p0, %s53_s20), %s9999_s30 }
  0x2b   : > { %11856 = sst [smem:[#allocation31_spill]] %s11922_s19  ;;  %s156_s15 = ssub.s32 %s9995_s29, %s11922_s19 }
  0x2c   : > { %p10177_p3 = por %p167_p2, %p166_p1  ;;  %p55_p4 = scmp.ge.s32.totalorder %s11924_s20, 2 }
  0x2d   : > { %p157_p5 = scmp.eq.s32.totalorder %s156_s15, 0  ;;  %p172_p6 = scmp.ne.s32.totalorder %s9979_s25, %s9975_s24 }
  0x2e   : > { %p173_p7 = scmp.eq.s32.totalorder %s10163_s17, 0  ;;  %s11926_s20 = smov (%p55_p4, %s11924_s20), 0 }
  0x2f   : > { %11858 = sst [smem:[#allocation32_spill]] %s11926_s20  ;;  %s458_s12 = ssub.s32 %s9999_s30, %s11926_s20 }
  0x30   : > { %s10186_s2 = scalar_select %p157_p5, %s9983_s26, %s159_s16  }
  0x31   : > { %p10188_p8 = por %p173_p7, %p172_p6  ;;  %p459_p9 = scmp.eq.s32.totalorder %s458_s12, 0 }
  0x32   : > { %11859 = sst [smem:[#allocation33_spill]] %s10186_s2  ;;  %s461_s11 = sadd.s32 1, %s9971_s23 }
  0x33   : > { %s11860_s19 = scalar_select %p10188_p8, 1, 0 }
  0x34   : > { %p471_p10 = scmp.ne.s32.totalorder %s9971_s23, %s9967_s22  ;;  %p472_p11 = scmp.eq.s32.totalorder %s10163_s17, 3 }
  0x35   : > { %s10199_s15 = scalar_select %p459_p9, %s9971_s23, %s461_s11  }
  0x36   : > { %p10201_p12 = por %p472_p11, %p471_p10  ;;  %p477_p13 = scmp.ne.s32.totalorder %s9967_s22, %s9963_s21 }
  0x37   : > { %11861 = sst [smem:[#allocation34_spill]] %s10199_s15  ;;  %p478_p0 = scmp.eq.s32.totalorder %s8160_s18, 3 }
  0x38   : > { %s11862_s24 = scalar_select %p10201_p12, 1, 0 }
  0x39   : > { %p9334_p1 = scmp.lt.s32.totalorder %s10003_s0, 4  ;;  %s10209_s16 = sand.u32 1, %s9983_s26  }
  0x3a   : > { %11863 = sst [smem:[#allocation35_spill]] %s11862_s24  ;;  %p10211_p2 = por %p478_p0, %p477_p13 }
  0x3b   : > { %s10216_s12 = sand.u32 1, %s10003_s0   ;;  %p10220_p4 = pnand %p9334_p1, %p10177_p3 }
  0x3c   : > { %s11864_s2 = scalar_select %p10211_p2, 1, 0 }
  0x3d   : > { %s11866_s11 = scalar_select %p10220_p4, 1, 0 }
  0x3e   : > { %11865 = sst [smem:[#allocation36_spill]] %s11864_s2  ;;  %s10225_s20 = sshll.u32 %s10209_s16, 9 }
  0x3f   : > { %s10228_s18 = sshll.u32 %s9995_s29, 13  ;;  %s11867_s5 = sld [smem:[#allocation43_spill]] }
  0x40   : > { %s553_s14 = scalar_lea.vmem [#allocation6], %s10225_s20  ;;  %p10245_p6 = pneg %p10220_p4 }
  0x41   : > { %s560_s23 = sshll.u32 %s553_s14, 4  ;;  %s10237_s23 = int_to_ptr.vmem [resolvable:$true] %s560_s23 }
  0x45   : > { %s10234_s15 = scalar_lea.hbm %s11867_s5, %s10228_s18  ;;  %s9664_s3 = scalar_lea.hbm %s11867_s5, 16384 }
  0x46   : > { %s9659_s21 = scalar_lea.hbm %s10234_s15, 8192  ;;  %p9665_p10 = scmp.lt.u32.totalorder %s10234_s15, %s11867_s5 }
  0x47   : > { %p9660_p5 = scmp.ne.s32.totalorder %s10234_s15, %s9659_s21  ;;  %p9666_p11 = scmp.lt.u32.totalorder %s9664_s3, %s9659_s21 }
  0x48   : > { %p9668_p0 = scmp.lt.u32.totalorder %s9659_s21, %s10234_s15 }
  0x49   : > { %p9662_p7 = pnand %p10245_p6, %p9660_p5  ;;  %p9667_p13 = por %p9666_p11, %p9665_p10 }
  0x4b   : > { %p9663_p9 = pneg %p9662_p7  ;;  %p9669_p1 = por %p9668_p0, %p9667_p13 }
  0x4d   : > { %p9670_p3 = pnand %p9669_p1, %p9663_p9 }
  0x4f   : > { %9673 = shalt.err (!%p9670_p3)
}
  0x50   : > { %s9674_s2 = scalar_lea.vmem %s10237_s23, 8192  ;;  %s10005_s26 = smov [#allocation6]  }
  0x51   : > { %p9675_p5 = scmp.ne.s32.totalorder %s10237_s23, %s9674_s2  ;;  %s9679_s30 = sshll.u32 %s10005_s26, 4  ;;  %s9680_s30 = int_to_ptr.vmem [resolvable:$false] %s9679_s30 }
  0x52   : > { %s9681_s8 = scalar_lea.vmem %s9680_s30, 16384  ;;  %p9682_p12 = scmp.lt.s32.totalorder %s10237_s23, %s9680_s30 }
  0x53   : > { %p9677_p7 = pnand %p9675_p5, %p10245_p6  ;;  %p9683_p8 = scmp.lt.s32.totalorder %s9681_s8, %s9674_s2 }
  0x55   : > { %p9678_p2 = pneg %p9677_p7  ;;  %p9684_p10 = por %p9683_p8, %p9682_p12 }
  0x57   : > { %p9685_p11 = pnand %p9684_p10, %p9678_p2 }
  0x59   : > { %9688 = shalt.err (!%p9685_p11)
}
  0x5a   : > { %s11816_s3 = smov 64   ;;  %s11817_s21 = smov 4  }
  0x5b   : > { %s11869_s2 = scalar_lea.sflag [#allocation7], %s10216_s12  ;;  %p693_p8 = scmp.lt.s32.totalorder %s10003_s0, 5 }
  0x5c   : > { %9314 = dma.hbm_to_vmem [thread:$0]  (!%p10220_p4), %s10234_s15, 8192, %s10237_s23, %s11869_s2, %s11816_s3, %s11816_s3, %s11817_s21  }
  0x5d   : > { %s8170_s14 = sshll.u32 %s10209_s16, 3  ;;  %s8761_s26 = sshll.u32 %s9995_s29, 7 }
  0x5e   : > { %p11870_p12 = scmp.ge.s32.totalorder %s10003_s0, 1  ;;  %s11872_s7 = sld [smem:[#allocation45_spill]] }
  0x5f   : > { %s595_s27 = scalar_lea.vmem [#allocation9], %s8170_s14  ;;  %s11820_s23 = scalar_lea.sflag [#allocation10], %s10216_s12 }
  0x60   : > { %p10278_p2 = pnand %p11870_p12, %p693_p8  ;;  %s603_s28 = sshll.u32 %s595_s27, 4  ;;  %s604_s28 = int_to_ptr.vmem [resolvable:$true] %s603_s28 }
  0x62   : > { %s11871_s30 = scalar_select %p10278_p2, 1, 0 }
  0x64   : > { %s10285_s1 = scalar_lea.hbm %s11872_s7, %s8761_s26  ;;  %s9694_s21 = scalar_lea.hbm %s11872_s7, 256 }
  0x65   : > { %s9689_s15 = scalar_lea.hbm %s10285_s1, 128  ;;  %p9695_p0 = scmp.lt.u32.totalorder %s10285_s1, %s11872_s7 }
  0x66   : > { %p9690_p3 = scmp.ne.s32.totalorder %s10285_s1, %s9689_s15  ;;  %p9696_p1 = scmp.lt.u32.totalorder %s9694_s21, %s9689_s15 }
  0x67   : > { %p9698_p7 = scmp.lt.u32.totalorder %s9689_s15, %s10285_s1 }
  0x68   : > { %p9692_p9 = pnand %p9690_p3, %p10245_p6  ;;  %p9697_p5 = por %p9696_p1, %p9695_p0 }
  0x6a   : > { %p9693_p13 = pneg %p9692_p9  ;;  %p9699_p10 = por %p9698_p7, %p9697_p5 }
  0x6c   : > { %p9700_p11 = pnand %p9699_p10, %p9693_p13 }
  0x6e   : > { %9703 = shalt.err (!%p9700_p11)
}
  0x6f   : > { %s9704_s27 = scalar_lea.vmem %s604_s28, 128  ;;  %s10008_s14 = smov [#allocation9]  }
  0x70   : > { %p9705_p8 = scmp.ne.s32.totalorder %s604_s28, %s9704_s27  ;;  %s9709_s8 = sshll.u32 %s10008_s14, 4  ;;  %s9710_s8 = int_to_ptr.vmem [resolvable:$false] %s9709_s8 }
  0x71   : > { %s9711_s3 = scalar_lea.vmem %s9710_s8, 256  ;;  %p9712_p9 = scmp.lt.s32.totalorder %s604_s28, %s9710_s8 }
  0x72   : > { %p9707_p12 = pnand %p9705_p8, %p10245_p6  ;;  %p9713_p2 = scmp.lt.s32.totalorder %s9711_s3, %s9704_s27 }
  0x74   : > { %p9708_p3 = pneg %p9707_p12  ;;  %p9714_p4 = por %p9713_p2, %p9712_p9 }
  0x76   : > { %p9715_p0 = pnand %p9714_p4, %p9708_p3 }
  0x78   : > { %9718 = shalt.err (!%p9715_p0)
}
  0x79   : > { %p11873_p1 = scmp.ne.s32.totalorder %s11866_s11, 0  ;;  %s11874_s10 = sld [smem:[#allocation48_spill]] }
  0x7a   : > { %s641_s5 = scalar_lea.vmem [#allocation12], %s10225_s20  ;;  %s638_s27 = scalar_lea.sflag [#allocation13], %s10216_s12 }
  0x7b   : > { %9320 = dma.hbm_to_vmem [thread:$0]  (!%p11873_p1), %s10285_s1, 128, %s604_s28, %s11820_s23  }
  0x7c   : > { %s648_s26 = sshll.u32 %s641_s5, 4  ;;  %s10314_s26 = int_to_ptr.vmem [resolvable:$true] %s648_s26 }
  0x7f   : > { %s10311_s2 = scalar_lea.hbm %s11874_s10, %s10228_s18  ;;  %s9724_s8 = scalar_lea.hbm %s11874_s10, 16384 }
  0x80   : > { %s9719_s14 = scalar_lea.hbm %s10311_s2, 8192  ;;  %p9725_p5 = scmp.lt.u32.totalorder %s10311_s2, %s11874_s10 }
  0x81   : > { %p9720_p4 = scmp.ne.s32.totalorder %s10311_s2, %s9719_s14  ;;  %p9726_p7 = scmp.lt.u32.totalorder %s9724_s8, %s9719_s14 }
  0x82   : > { %p9728_p11 = scmp.lt.u32.totalorder %s9719_s14, %s10311_s2 }
  0x83   : > { %p9722_p2 = pnand %p9720_p4, %p10245_p6  ;;  %p9727_p10 = por %p9726_p7, %p9725_p5 }
  0x85   : > { %p9723_p13 = pneg %p9722_p2  ;;  %p9729_p8 = por %p9728_p11, %p9727_p10 }
  0x87   : > { %p9730_p12 = pnand %p9729_p8, %p9723_p13 }
  0x89   : > { %9733 = shalt.err (!%p9730_p12)
}
  0x8a   : > { %s9734_s15 = scalar_lea.vmem %s10314_s26, 8192  ;;  %s10009_s5 = smov [#allocation12]  }
  0x8b   : > { %p9735_p3 = scmp.ne.s32.totalorder %s10314_s26, %s9734_s15  ;;  %s9739_s1 = sshll.u32 %s10009_s5, 4  ;;  %s9740_s1 = int_to_ptr.vmem [resolvable:$false] %s9739_s1 }
  0x8c   : > { %s9741_s28 = scalar_lea.vmem %s9740_s1, 16384  ;;  %p9742_p4 = scmp.lt.s32.totalorder %s10314_s26, %s9740_s1 }
  0x8d   : > { %p9737_p9 = pnand %p9735_p3, %p10245_p6  ;;  %p9743_p2 = scmp.lt.s32.totalorder %s9741_s28, %s9734_s15 }
  0x8f   : > { %p9738_p0 = pneg %p9737_p9  ;;  %p9744_p5 = por %p9743_p2, %p9742_p4 }
  0x91   : > { %p9745_p7 = pnand %p9744_p5, %p9738_p0 }
  0x93   : > { %9748 = shalt.err (!%p9745_p7)
}
  0x94   : > { %s11875_s14 = smov 4   ;;  %s11876_s8 = smov 64  }
  0x95   : > { %9326 = dma.hbm_to_vmem [thread:$0]  (!%p11873_p1), %s10311_s2, 8192, %s10314_s26, %s638_s27, %s11876_s8, %s11876_s8, %s11875_s14  }
  0x96   : > { %s9288_s3 = smul.u32 24, %s10209_s16  ;;  %s11877_s6 = sld [smem:[#allocation44_spill]] }
  0x97   : > { %s9289_s21 = smul.u32 384, %s9995_s29  ;;  %s11878_s4 = sld [smem:[#allocation42_spill]] }
  0x98   : > { %s534_s10 = scalar_lea.vmem [#allocation3], %s9288_s3  ;;  %s574_s2 = scalar_lea.vmem [#allocation8], %s10225_s20 }
  0x99   : > { %s542_s0 = sshll.u32 %s534_s10, 4  ;;  %s10359_s26 = sshll.u32 %s574_s2, 4  ;;  %s10356_s0 = int_to_ptr.vmem [resolvable:$true] %s542_s0  ;;  %s10384_s26 = int_to_ptr.vmem [resolvable:$true] %s10359_s26 }
  0x9a   : > { %s531_s14 = scalar_lea.sflag [#allocation4], %s10209_s16 }
  0x9c   : > { %s10349_s1 = scalar_lea.hbm %s11877_s6, %s10228_s18 }
  0x9d   : > { %s10354_s7 = scalar_lea.hbm %s11878_s4, %s9289_s21  ;;  %s9754_s21 = scalar_lea.hbm %s11878_s4, 768 }
  0x9e   : > { %s9749_s8 = scalar_lea.hbm %s10354_s7, 384  ;;  %p9755_p8 = scmp.lt.u32.totalorder %s10354_s7, %s11878_s4 }
  0x9f   : > { %p9750_p13 = scmp.ne.s32.totalorder %s10354_s7, %s9749_s8  ;;  %p9756_p12 = scmp.lt.u32.totalorder %s9754_s21, %s9749_s8 }
  0xa0   : > { %p9758_p9 = scmp.lt.u32.totalorder %s9749_s8, %s10354_s7 }
  0xa1   : > { %p9752_p10 = pnand %p9750_p13, %p10245_p6  ;;  %p9757_p3 = por %p9756_p12, %p9755_p8 }
  0xa3   : > { %p9753_p11 = pneg %p9752_p10  ;;  %p9759_p0 = por %p9758_p9, %p9757_p3 }
  0xa5   : > { %p9760_p4 = pnand %p9759_p0, %p9753_p11 }
  0xa7   : > { %9763 = shalt.err (!%p9760_p4)
}
  0xa8   : > { %s9764_s10 = scalar_lea.vmem %s10356_s0, 384  ;;  %s10010_s20 = smov [#allocation3]  }
  0xa9   : > { %p9765_p2 = scmp.ne.s32.totalorder %s10356_s0, %s9764_s10  ;;  %s9769_s3 = sshll.u32 %s10010_s20, 4  ;;  %s9770_s3 = int_to_ptr.vmem [resolvable:$false] %s9769_s3 }
  0xaa   : > { %s9771_s28 = scalar_lea.vmem %s9770_s3, 768  ;;  %p9772_p13 = scmp.lt.s32.totalorder %s10356_s0, %s9770_s3 }
  0xab   : > { %p9767_p5 = pnand %p9765_p2, %p10245_p6  ;;  %p9773_p10 = scmp.lt.s32.totalorder %s9771_s28, %s9764_s10 }
  0xad   : > { %p9768_p7 = pneg %p9767_p5  ;;  %p9774_p8 = por %p9773_p10, %p9772_p13 }
  0xaf   : > { %p9775_p12 = pnand %p9774_p8, %p9768_p7 }
  0xb1   : > { %9778 = shalt.err (!%p9775_p12)
}
  0xb2   : > { %9311 = dma.hbm_to_vmem [thread:$0]  (!%p11873_p1), %s10354_s7, 384, %s10356_s0, %s531_s14  }
  0xb3   : > { %s8173_s2 = sshll.u32 %s10209_s16, 4  ;;  %s9779_s8 = scalar_lea.hbm %s10349_s1, 8192 }
  0xb4   : > { %p9780_p11 = scmp.ne.s32.totalorder %s10349_s1, %s9779_s8  ;;  %s9784_s21 = scalar_lea.hbm %s11877_s6, 16384 }
  0xb5   : > { %p9785_p0 = scmp.lt.u32.totalorder %s10349_s1, %s11877_s6  ;;  %p9786_p4 = scmp.lt.u32.totalorder %s9784_s21, %s9779_s8 }
  0xb6   : > { %p9782_p3 = pnand %p9780_p11, %p10245_p6  ;;  %p9788_p5 = scmp.lt.u32.totalorder %s9779_s8, %s10349_s1 }
  0xb7   : > { %p9787_p2 = por %p9786_p4, %p9785_p0 }
  0xb8   : > { %p9783_p9 = pneg %p9782_p3 }
  0xb9   : > { %p9789_p7 = por %p9788_p5, %p9787_p2 }
  0xbb   : > { %p9790_p13 = pnand %p9789_p7, %p9783_p9 }
  0xbd   : > { %9793 = shalt.err (!%p9790_p13)
}
  0xbe   : > { %s9794_s7 = scalar_lea.vmem %s10384_s26, 8192  ;;  %s10011_s0 = smov [#allocation8]  }
  0xbf   : > { %p9795_p10 = scmp.ne.s32.totalorder %s10384_s26, %s9794_s7  ;;  %s9799_s14 = sshll.u32 %s10011_s0, 4  ;;  %s9800_s14 = int_to_ptr.vmem [resolvable:$false] %s9799_s14 }
  0xc0   : > { %s9801_s10 = scalar_lea.vmem %s9800_s14, 16384  ;;  %p9802_p11 = scmp.lt.s32.totalorder %s10384_s26, %s9800_s14 }
  0xc1   : > { %p9797_p8 = pnand %p9795_p10, %p10245_p6  ;;  %p9803_p3 = scmp.lt.s32.totalorder %s9801_s10, %s9794_s7 }
  0xc3   : > { %p9798_p12 = pneg %p9797_p8  ;;  %p9804_p0 = por %p9803_p3, %p9802_p11 }
  0xc5   : > { %p9805_p4 = pnand %p9804_p0, %p9798_p12 }
  0xc7   : > { %9808 = shalt.err (!%p9805_p4)
}
  0xc8   : > { %s10012_s20 = smov 512   ;;  %s10013_s3 = smov 32  }
  0xc9   : > { %s11879_s28 = scalar_lea.sflag [#allocation7], %s10216_s12  ;;  %s8762_s8 = sshll.u32 %s9995_s29, 8 }
  0xca   : > { %9317 = dma.hbm_to_vmem [thread:$0]  (!%p11873_p1), %s10349_s1, 8192, %s10384_s26, %s11879_s28, %s10012_s20, %s10012_s20, %s10013_s3  }
  0xcb   : > { %s11880_s9 = sld [smem:[#allocation47_spill]]  ;;  %s622_s15 = scalar_lea.vmem [#allocation11], %s8173_s2 }
  0xcc   : > { %s630_s5 = sshll.u32 %s622_s15, 4  ;;  %s631_s5 = int_to_ptr.vmem [resolvable:$true] %s630_s5 }
  0xd1   : > { %s10416_s21 = scalar_lea.hbm %s11880_s9, %s8762_s8  ;;  %s9814_s0 = scalar_lea.hbm %s11880_s9, 512 }
  0xd2   : > { %s9809_s7 = scalar_lea.hbm %s10416_s21, 256  ;;  %p9815_p7 = scmp.lt.u32.totalorder %s10416_s21, %s11880_s9 }
  0xd3   : > { %p9810_p9 = scmp.ne.s32.totalorder %s10416_s21, %s9809_s7  ;;  %p9816_p13 = scmp.lt.u32.totalorder %s9814_s0, %s9809_s7 }
  0xd4   : > { %p9818_p8 = scmp.lt.u32.totalorder %s9809_s7, %s10416_s21 }
  0xd5   : > { %p9812_p2 = pnand %p9810_p9, %p10245_p6  ;;  %p9817_p10 = por %p9816_p13, %p9815_p7 }
  0xd7   : > { %p9813_p5 = pneg %p9812_p2  ;;  %p9819_p12 = por %p9818_p8, %p9817_p10 }
  0xd9   : > { %p9820_p11 = pnand %p9819_p12, %p9813_p5 }
  0xdb   : > { %9823 = shalt.err (!%p9820_p11)
}
  0xdc   : > { %s9824_s20 = scalar_lea.vmem %s631_s5, 256  ;;  %s10014_s3 = smov [#allocation11]  }
  0xdd   : > { %p9825_p3 = scmp.ne.s32.totalorder %s631_s5, %s9824_s20  ;;  %s9829_s28 = sshll.u32 %s10014_s3, 4  ;;  %s9830_s28 = int_to_ptr.vmem [resolvable:$false] %s9829_s28 }
  0xde   : > { %s9831_s18 = scalar_lea.vmem %s9830_s28, 512  ;;  %p9832_p9 = scmp.lt.s32.totalorder %s631_s5, %s9830_s28 }
  0xdf   : > { %p9827_p0 = pnand %p9825_p3, %p10245_p6  ;;  %p9833_p2 = scmp.lt.s32.totalorder %s9831_s18, %s9824_s20 }
  0xe1   : > { %p9828_p4 = pneg %p9827_p0  ;;  %p9834_p1 = por %p9833_p2, %p9832_p9 }
  0xe3   : > { %p9835_p7 = pnand %p9834_p1, %p9828_p4 }
  0xe5   : > { %9838 = shalt.err (!%p9835_p7)
}
  0xe6   : > { %p11881_p13 = scmp.ne.s32.totalorder %s11866_s11, 0  ;;  %s11882_s23 = scalar_lea.sflag [#allocation10], %s10216_s12 }
  0xe7   : > { %s11883_s13 = sld [smem:[#allocation51_spill]]  ;;  %s678_s26 = scalar_lea.vmem [#allocation14], %s8173_s2 }
  0xe8   : > { %9323 = dma.hbm_to_vmem [thread:$0]  (!%p11881_p13), %s10416_s21, 256, %s631_s5, %s11882_s23  }
  0xe9   : > { %s685_s0 = sshll.u32 %s678_s26, 4  ;;  %s10448_s0 = int_to_ptr.vmem [resolvable:$true] %s685_s0 }
  0xed   : > { %s10444_s1 = scalar_lea.hbm %s11883_s13, %s8762_s8  ;;  %s9844_s10 = scalar_lea.hbm %s11883_s13, 512 }
  0xee   : > { %s9839_s14 = scalar_lea.hbm %s10444_s1, 256  ;;  %p9845_p8 = scmp.lt.u32.totalorder %s10444_s1, %s11883_s13 }
  0xef   : > { %p9840_p1 = scmp.ne.s32.totalorder %s10444_s1, %s9839_s14  ;;  %p9846_p12 = scmp.lt.u32.totalorder %s9844_s10, %s9839_s14 }
  0xf0   : > { %p9848_p3 = scmp.lt.u32.totalorder %s9839_s14, %s10444_s1 }
  0xf1   : > { %p9842_p5 = pnand %p9840_p1, %p10245_p6  ;;  %p9847_p11 = por %p9846_p12, %p9845_p8 }
  0xf3   : > { %p9843_p10 = pneg %p9842_p5  ;;  %p9849_p0 = por %p9848_p3, %p9847_p11 }
  0xf5   : > { %p9850_p4 = pnand %p9849_p0, %p9843_p10 }
  0xf7   : > { %9853 = shalt.err (!%p9850_p4)
}
  0xf8   : > { %s9854_s16 = scalar_lea.vmem %s10448_s0, 256  ;;  %s10015_s2 = smov [#allocation14]  }
  0xf9   : > { %p9855_p9 = scmp.ne.s32.totalorder %s10448_s0, %s9854_s16  ;;  %s9859_s3 = sshll.u32 %s10015_s2, 4  ;;  %s9860_s3 = int_to_ptr.vmem [resolvable:$false] %s9859_s3 }
  0xfa   : > { %s9861_s28 = scalar_lea.vmem %s9860_s3, 512  ;;  %p9862_p1 = scmp.lt.s32.totalorder %s10448_s0, %s9860_s3 }
  0xfb   : > { %p9857_p2 = pnand %p9855_p9, %p10245_p6  ;;  %p9863_p5 = scmp.lt.s32.totalorder %s9861_s28, %s9854_s16 }
  0xfd   : > { %p9858_p7 = pneg %p9857_p2  ;;  %p9864_p8 = por %p9863_p5, %p9862_p1 }
  0xff   : > { %p9865_p12 = pnand %p9864_p8, %p9858_p7 }
 0x101   : > { %9868 = shalt.err (!%p9865_p12)
}
 0x102   : > { %s10016_s18 = smov 128   ;;  %s10017_s23 = smov 8  }
 0x103   : > { %9329 = dma.hbm_to_vmem [thread:$0]  (!%p11881_p13), %s10444_s1, 256, %s10448_s0, %s638_s27, %s10016_s18, %s10016_s18, %s10017_s23  }
 0x104   : > { %p11884_p6 = scmp.ne.s32.totalorder %s11871_s30, 0 }
 0x106   : > { %697 = sbr.rel (%p11884_p6) target bundleno = 3972 (0xf84), region = 84 }
 0x10d   : > { %s10476_s24 = sand.u32 1, %s9979_s25   ;;  %p11885_p10 = scmp.ne.s32.totalorder %s11860_s19, 0 }
 0x10e   : > { %s9290_s15 = smul.u32 24, %s10476_s24  ;;  %s700_s7 = scalar_lea.sflag [#allocation4], %s10476_s24 }
 0x110   : > { %s10480_s26 = scalar_lea.vmem [#allocation3], %s9290_s15 }
 0x111   : > { %9942 = dma.done.wait (%p11885_p10), %s700_s7, 384  }
 0x112   : > { %9944 = vsyncadd (%p11885_p10), %s700_s7, 4294966912  ;;  %s708_s12 = sand.u32 1, %s10163_s17   ;;  %s8183_s11 = sshll.u32 %s10476_s24, 9 }
 0x113   : > { %s709_s30 = scalar_lea.sflag [#allocation7], %s708_s12  ;;  %s10488_s27 = scalar_lea.vmem [#allocation6], %s8183_s11 }
 0x114   : > { %9946 = dma.done.wait (%p11885_p10), %s709_s30, 16384  }
 0x115   : > { %9948 = vsyncadd (%p11885_p10), %s709_s30, 4294950912  ;;  %s8185_s1 = sshll.u32 %s10476_s24, 3  ;;  %s10495_s0 = scalar_lea.vmem [#allocation8], %s8183_s11 }
 0x116   : > { %s727_s14 = scalar_lea.sflag [#allocation10], %s708_s12  ;;  %s10497_s21 = scalar_lea.vmem [#allocation9], %s8185_s1 }
 0x117   : > { %9950 = dma.done.wait (%p11885_p10), %s727_s14, 384  }
 0x118   : > { %9952 = vsyncadd (%p11885_p10), %s727_s14, 4294966912  ;;  %s8186_s17 = sshll.u32 %s10476_s24, 4  ;;  %s745_s10 = scalar_lea.sflag [#allocation13], %s708_s12 }
 0x119   : > { %s10504_s5 = scalar_lea.vmem [#allocation11], %s8186_s17  ;;  %s10506_s8 = scalar_lea.vmem [#allocation12], %s8183_s11 }
 0x11a   : > { %11886 = sst [smem:[#allocation37_spill]] %s10506_s8 }
 0x11b   : > { %9954 = dma.done.wait (%p11885_p10), %s745_s10, 8448  }
 0x11c   : > { %9956 = vsyncadd (%p11885_p10), %s745_s10, 4294958848  ;;  %s11887_s20 = sld [smem:[#allocation27_spill]]  ;;  %s11888_s16 = sld [smem:[#allocation26_spill]] }
 0x11d   : > { %s11824_s2 = sand.u32 1, %s9967_s22   ;;  %s11889_s15 = sld [smem:[#allocation38_spill]] }
 0x11e   : > { %s10515_s3 = sshll.u32 %s11824_s2, 3  ;;  %s11890_s30 = sld [smem:[#allocation39_spill]] }
 0x11f   : > { %s11891_s6 = sld [smem:[#allocation46_spill]]  ;;  %s11893_s19 = sld [smem:[#allocation49_spill]] }
 0x120   : > { %s11894_s11 = sld [smem:[#allocation50_spill]]  ;;  %s10549_s8 = scalar_lea.vmem [#allocation14], %s8186_s17 }
 0x121   : > { %s864_s4 = scalar_lea.vmem [#allocation15], %s10515_s3 }
 0x122   : > { %p865_p13 = scmp.lt.s32.totalorder %s11887_s20, 1  ;;  %p874_p11 = scmp.lt.s32.totalorder %s11888_s16, 1 }
 0x123   : > { %p8200_p3 = scmp.ne.s32.totalorder %s11888_s16, 0 }
 0x124   : > { %s11928_s20 = smov (!%p865_p13, %s11887_s20), 1 }
 0x125   : > { %s875_s28 = scalar_select %p874_p11, %s11888_s16, 1 }
 0x126   : > { %s8190_s18 = sshll.u32 %s11928_s20, 3  ;;  %s8765_s23 = sshll.u32 %s11928_s20, 4 }
 0x127   : > { %s868_s7 = scalar_lea.vmem %s11889_s15, %s8190_s18  ;;  %s10527_s1 = scalar_lea.vmem %s11890_s30, %s8765_s23 }
 0x128   : > { %s9291_s14 = smul.u32 1536, %s875_s28  ;;  %s8766_s10 = sshll.u32 %s875_s28, 10  ;;  %v899_v0 = vld [vmem:[%s868_s7] sm:$0xff] (!%p8200_p3) }
 0x129   : > { %s10532_s9 = scalar_lea.vmem %s11891_s6, %s8766_s10  ;;  %s8767_s13 = sshll.u32 %s875_s28, 6  ;;  %900 = vst [vmem:[#allocation2] sm:$0xff] (!%p8200_p3), %v899_v0 }
 0x12a   : > { %s11892_s20 = sld [smem:[#allocation41_spill]]  ;;  %s10542_s15 = scalar_lea.vmem %s11893_s19, %s8767_s13 }
 0x12b   : > { %s10547_s30 = scalar_lea.vmem %s11894_s11, %s8767_s13  ;;  %898 = sbr.rel (%p8200_p3) target bundleno = 306 (0x132), region = 116 }
 0x130   : > { %s10537_s22 = scalar_lea.vmem %s11892_s20, %s9291_s14 }
 0x132 PF: > { %v908_v1 = vld [vmem:[%s10537_s22] sm:$0xff]  ;;  %v10018_v7 = vmov 0   ;;  %v909_v11 = vld [vmem:[%s10537_s22 + $0x8] sm:$0xff]  ;;  %v910_v62 = vld [vmem:[%s10537_s22 + $0x10] sm:$0xff]  ;;  %vm10020_vm0 = vmmov 0   ;;  %vm2737_vm1 = vcmask 1043456  }
 0x133   : > { %v920_v2 = vld [vmem:[%s10537_s22 + $0x60] sm:$0xff]  ;;  %2218 = vmatprep.mubr.bf16.mxu0 %v10018_v7  ;;  %2259 = vmatprep.mubr.bf16.mxu1 %v10018_v7  ;;  %v921_v12 = vld [vmem:[%s10537_s22 + $0x68] sm:$0xff]  ;;  %v922_v63 = vld [vmem:[%s10537_s22 + $0x70] sm:$0xff]  ;;  %vm2721_vm2 = vcmask 64512   ;;  %vm6043_vm3 = vcmask 1044480   ;;  %vm6027_vm4 = vcmask 80896  }
 0x134   : > { %v932_v3 = vld [vmem:[%s10537_s22 + $0xc0] sm:$0xff]  ;;  %v8202_v4 = vcombine.high %v908_v1, %v920_v2  ;;  %v8201_v5 = vcombine.low %v908_v1, %v920_v2  ;;  %v8204_v14 = vcombine.high %v909_v11, %v921_v12  ;;  %v8203_v15 = vcombine.low %v909_v11, %v921_v12  ;;  %v933_v16 = vld [vmem:[%s10537_s22 + $0xc8] sm:$0xff]  ;;  %s11897_s25 = sld [smem:[#allocation26_spill]] }
 0x135   : > { %v944_v6 = vld [vmem:[%s10537_s22 + $0x120] sm:$0xff]  ;;  %v945_v17 = vld [vmem:[%s10537_s22 + $0x128] sm:$0xff]  ;;  %v8205_v12 = vcombine.low %v910_v62, %v922_v63 }
 0x136   : > { %v8226_v8 = vcombine.high %v932_v3, %v944_v6  ;;  %v956_v9 = vld [vmem:[%s10537_s22 + $0x180] sm:$0xff]  ;;  %2186 = vmatprep.subr.bf16.mxu0 %v8202_v4  ;;  %v8225_v13 = vcombine.low %v932_v3, %v944_v6  ;;  %v8228_v19 = vcombine.high %v933_v16, %v945_v17  ;;  %v957_v20 = vld [vmem:[%s10537_s22 + $0x188] sm:$0xff]  ;;  %2227 = vmatprep.subr.bf16.mxu1 %v8204_v14  ;;  %v923_v6 = vld [vmem:[%s10537_s22 + $0x78] sm:$0xff] }
 0x137   : > { %v968_v10 = vld [vmem:[%s10537_s22 + $0x1e0] sm:$0xff]  ;;  %2187 = vmatpush1.bf16.msra.mxu0 %v8201_v5  ;;  %v969_v21 = vld [vmem:[%s10537_s22 + $0x1e8] sm:$0xff]  ;;  %2228 = vmatpush1.bf16.msra.mxu1 %v8203_v15  ;;  %v8227_v24 = vcombine.low %v933_v16, %v945_v17  ;;  %v8206_v4 = vcombine.high %v910_v62, %v922_v63  ;;  %v911_v5 = vld [vmem:[%s10537_s22 + $0x18] sm:$0xff] }
 0x138   : > { %2188 = vmatprep.subr.bf16.mxu0 %v8226_v8  ;;  %v8250_v18 = vcombine.high %v956_v9, %v968_v10  ;;  %v980_v22 = vld [vmem:[%s10537_s22 + $0x240] sm:$0xff]  ;;  %v8249_v25 = vcombine.low %v956_v9, %v968_v10  ;;  %2229 = vmatprep.subr.bf16.mxu1 %v8228_v19  ;;  %v8252_v26 = vcombine.high %v957_v20, %v969_v21  ;;  %v981_v28 = vld [vmem:[%s10537_s22 + $0x248] sm:$0xff]  ;;  %v934_v8 = vld [vmem:[%s10537_s22 + $0xd0] sm:$0xff] }
 0x139   : > { %v992_v23 = vld [vmem:[%s10537_s22 + $0x2a0] sm:$0xff]  ;;  %v993_v29 = vld [vmem:[%s10537_s22 + $0x2a8] sm:$0xff]  ;;  %v8251_v32 = vcombine.low %v957_v20, %v969_v21  ;;  %v946_v9 = vld [vmem:[%s10537_s22 + $0x130] sm:$0xff]  ;;  %v8207_v19 = vcombine.low %v911_v5, %v923_v6 }
 0x13a   : > { %v8274_v27 = vcombine.high %v980_v22, %v992_v23  ;;  %v1004_v30 = vld [vmem:[%s10537_s22 + $0x300] sm:$0xff]  ;;  %v8273_v33 = vcombine.low %v980_v22, %v992_v23  ;;  %v8276_v34 = vcombine.high %v981_v28, %v993_v29  ;;  %v1005_v36 = vld [vmem:[%s10537_s22 + $0x308] sm:$0xff]  ;;  %v8275_v40 = vcombine.low %v981_v28, %v993_v29  ;;  %v935_v15 = vld [vmem:[%s10537_s22 + $0xd8] sm:$0xff]  ;;  %p8745_p0 = scmp.ne.s32.totalorder %s11897_s25, 1 }
 0x13b   : > { %2189 = vmatpush1.bf16.msra.mxu0 %v8225_v13  ;;  %v1016_v31 = vld [vmem:[%s10537_s22 + $0x360] sm:$0xff]  ;;  %2230 = vmatpush1.bf16.msra.mxu1 %v8227_v24  ;;  %v1017_v37 = vld [vmem:[%s10537_s22 + $0x368] sm:$0xff]  ;;  %v8208_v13 = vcombine.high %v911_v5, %v923_v6  ;;  %v8230_v14 = vcombine.high %v934_v8, %v946_v9  ;;  %v947_v16 = vld [vmem:[%s10537_s22 + $0x138] sm:$0xff]  ;;  %v8229_v20 = vcombine.low %v934_v8, %v946_v9  ;;  %vm10022_vm5 = vmmov (!%p8745_p0), 0   ;;  %s11900_s23 = sld [smem:[#allocation53_spill]] (!%p8745_p0) }
 0x13c   : > { %2190 = vmatprep.subr.bf16.mxu0 %v8250_v18  ;;  %2231 = vmatprep.subr.bf16.mxu1 %v8252_v26  ;;  %v8298_v35 = vcombine.high %v1004_v30, %v1016_v31  ;;  %v1028_v38 = vld [vmem:[%s10537_s22 + $0x3c0] sm:$0xff]  ;;  %v8297_v41 = vcombine.low %v1004_v30, %v1016_v31  ;;  %v8300_v42 = vcombine.high %v1005_v36, %v1017_v37  ;;  %v1029_v44 = vld [vmem:[%s10537_s22 + $0x3c8] sm:$0xff]  ;;  %v958_v17 = vld [vmem:[%s10537_s22 + $0x190] sm:$0xff] }
 0x13d   : > { %v1040_v39 = vld [vmem:[%s10537_s22 + $0x420] sm:$0xff]  ;;  %v1041_v45 = vld [vmem:[%s10537_s22 + $0x428] sm:$0xff]  ;;  %v8299_v48 = vcombine.low %v1005_v36, %v1017_v37  ;;  %v970_v18 = vld [vmem:[%s10537_s22 + $0x1f0] sm:$0xff]  ;;  %v8232_v21 = vcombine.high %v935_v15, %v947_v16 }
 0x13e   : > { %v8322_v43 = vcombine.high %v1028_v38, %v1040_v39  ;;  %v1052_v46 = vld [vmem:[%s10537_s22 + $0x480] sm:$0xff]  ;;  %v8321_v49 = vcombine.low %v1028_v38, %v1040_v39  ;;  %v8324_v50 = vcombine.high %v1029_v44, %v1041_v45  ;;  %v1053_v52 = vld [vmem:[%s10537_s22 + $0x488] sm:$0xff]  ;;  %v8323_v56 = vcombine.low %v1029_v44, %v1041_v45  ;;  %v959_v23 = vld [vmem:[%s10537_s22 + $0x198] sm:$0xff] }
 0x13f   : > { %2191 = vmatpush1.bf16.msra.mxu0 %v8249_v25  ;;  %2232 = vmatpush1.bf16.msra.mxu1 %v8251_v32  ;;  %v1064_v47 = vld [vmem:[%s10537_s22 + $0x4e0] sm:$0xff]  ;;  %v1065_v53 = vld [vmem:[%s10537_s22 + $0x4e8] sm:$0xff]  ;;  %v8254_v22 = vcombine.high %v958_v17, %v970_v18  ;;  %v971_v24 = vld [vmem:[%s10537_s22 + $0x1f8] sm:$0xff]  ;;  %v8253_v28 = vcombine.low %v958_v17, %v970_v18 }
 0x140   : > { %2192 = vmatprep.subr.bf16.mxu0 %v8274_v27  ;;  %2233 = vmatprep.subr.bf16.mxu1 %v8276_v34  ;;  %v8346_v51 = vcombine.high %v1052_v46, %v1064_v47  ;;  %v1076_v54 = vld [vmem:[%s10537_s22 + $0x540] sm:$0xff]  ;;  %v8345_v57 = vcombine.low %v1052_v46, %v1064_v47  ;;  %v8348_v58 = vcombine.high %v1053_v52, %v1065_v53  ;;  %v1077_v60 = vld [vmem:[%s10537_s22 + $0x548] sm:$0xff]  ;;  %v982_v25 = vld [vmem:[%s10537_s22 + $0x250] sm:$0xff] }
 0x141   : > { %v1088_v55 = vld [vmem:[%s10537_s22 + $0x5a0] sm:$0xff]  ;;  %v1089_v61 = vld [vmem:[%s10537_s22 + $0x5a8] sm:$0xff]  ;;  %v8347_v0 = vcombine.low %v1053_v52, %v1065_v53  ;;  %v994_v26 = vld [vmem:[%s10537_s22 + $0x2b0] sm:$0xff]  ;;  %v8231_v27 = vcombine.low %v935_v15, %v947_v16  ;;  %v8256_v29 = vcombine.high %v959_v23, %v971_v24 }
 0x142   : > { %v8370_v59 = vcombine.high %v1076_v54, %v1088_v55  ;;  %v8369_v1 = vcombine.low %v1076_v54, %v1088_v55  ;;  %v901_v2 = vld [vmem:[#allocation2] sm:$0xff]  ;;  %v8372_v3 = vcombine.high %v1077_v60, %v1089_v61  ;;  %v8371_v11 = vcombine.low %v1077_v60, %v1089_v61  ;;  %v983_v31 = vld [vmem:[%s10537_s22 + $0x258] sm:$0xff]  ;;  %v1018_v34 = vld [vmem:[%s10537_s22 + $0x370] sm:$0xff] }
 0x143   : > { %2193 = vmatpush1.bf16.msra.mxu0 %v8273_v33  ;;  %2234 = vmatpush1.bf16.msra.mxu1 %v8275_v40  ;;  %v10593_v10 = vpack.c.bf16 %v901_v2, %v901_v2  ;;  %v8278_v30 = vcombine.high %v982_v25, %v994_v26  ;;  %v995_v32 = vld [vmem:[%s10537_s22 + $0x2b8] sm:$0xff]  ;;  %v1006_v33 = vld [vmem:[%s10537_s22 + $0x310] sm:$0xff]  ;;  %v8277_v38 = vcombine.low %v982_v25, %v994_v26  ;;  %v912_v63 = vld [vmem:[%s10537_s22 + $0x20] sm:$0xff] }
 0x144   : > { %2194 = vmatprep.subr.bf16.mxu0 %v8298_v35  ;;  %2235 = vmatprep.subr.bf16.mxu1 %v8300_v42  ;;  %v8255_v35 = vcombine.low %v959_v23, %v971_v24  ;;  %v1007_v36 = vld [vmem:[%s10537_s22 + $0x318] sm:$0xff]  ;;  %v1030_v39 = vld [vmem:[%s10537_s22 + $0x3d0] sm:$0xff]  ;;  %v8302_v42 = vcombine.high %v1006_v33, %v1018_v34  ;;  %v8301_v46 = vcombine.low %v1006_v33, %v1018_v34  ;;  %v925_v5 = vld [vmem:[%s10537_s22 + $0x88] sm:$0xff] }
 0x145   : > { %v1019_v37 = vld [vmem:[%s10537_s22 + $0x378] sm:$0xff]  ;;  %v1042_v40 = vld [vmem:[%s10537_s22 + $0x430] sm:$0xff]  ;;  %v936_v8 = vld [vmem:[%s10537_s22 + $0xe0] sm:$0xff] }
 0x146   : > { %v1031_v44 = vld [vmem:[%s10537_s22 + $0x3d8] sm:$0xff]  ;;  %v1054_v47 = vld [vmem:[%s10537_s22 + $0x490] sm:$0xff]  ;;  %v8325_v54 = vcombine.low %v1030_v39, %v1042_v40  ;;  %v948_v9 = vld [vmem:[%s10537_s22 + $0x140] sm:$0xff] }
 0x147   : > { %2195 = vmatpush1.bf16.msra.mxu0 %v8297_v41  ;;  %2236 = vmatpush1.bf16.msra.mxu1 %v8299_v48  ;;  %v8280_v41 = vcombine.high %v983_v31, %v995_v32  ;;  %v1043_v45 = vld [vmem:[%s10537_s22 + $0x438] sm:$0xff]  ;;  %v1066_v48 = vld [vmem:[%s10537_s22 + $0x4f0] sm:$0xff]  ;;  %v949_v15 = vld [vmem:[%s10537_s22 + $0x148] sm:$0xff]  ;;  %v8233_v24 = vcombine.low %v936_v8, %v948_v9 }
 0x148   : > { %2196 = vmatprep.subr.bf16.mxu0 %v8322_v43  ;;  %2237 = vmatprep.subr.bf16.mxu1 %v8324_v50  ;;  %v8279_v43 = vcombine.low %v983_v31, %v995_v32  ;;  %v8326_v50 = vcombine.high %v1030_v39, %v1042_v40  ;;  %v1055_v52 = vld [vmem:[%s10537_s22 + $0x498] sm:$0xff]  ;;  %v1078_v55 = vld [vmem:[%s10537_s22 + $0x550] sm:$0xff]  ;;  %v8349_v62 = vcombine.low %v1054_v47, %v1066_v48  ;;  %v960_v17 = vld [vmem:[%s10537_s22 + $0x1a0] sm:$0xff] }
 0x149   : > { %v1067_v53 = vld [vmem:[%s10537_s22 + $0x4f8] sm:$0xff]  ;;  %v972_v18 = vld [vmem:[%s10537_s22 + $0x200] sm:$0xff]  ;;  %v973_v23 = vld [vmem:[%s10537_s22 + $0x208] sm:$0xff] }
 0x14a   : > { %v1079_v60 = vld [vmem:[%s10537_s22 + $0x558] sm:$0xff]  ;;  %v984_v25 = vld [vmem:[%s10537_s22 + $0x260] sm:$0xff]  ;;  %v997_v31 = vld [vmem:[%s10537_s22 + $0x2c8] sm:$0xff]  ;;  %v8257_v32 = vcombine.low %v960_v17, %v972_v18 }
 0x14b   : > { %2197 = vmatpush1.bf16.msra.mxu0 %v8321_v49  ;;  %2238 = vmatpush1.bf16.msra.mxu1 %v8323_v56  ;;  %v8304_v49 = vcombine.high %v1007_v36, %v1019_v37  ;;  %v1090_v56 = vld [vmem:[%s10537_s22 + $0x5b0] sm:$0xff]  ;;  %v1091_v61 = vld [vmem:[%s10537_s22 + $0x5b8] sm:$0xff]  ;;  %v996_v26 = vld [vmem:[%s10537_s22 + $0x2c0] sm:$0xff] }
 0x14c   : > { %2198 = vmatprep.subr.bf16.mxu0 %v8346_v51  ;;  %2239 = vmatprep.subr.bf16.mxu1 %v8348_v58  ;;  %v8303_v51 = vcombine.low %v1007_v36, %v1019_v37  ;;  %v8350_v58 = vcombine.high %v1054_v47, %v1066_v48  ;;  %v8374_v2 = vcombine.high %v1078_v55, %v1090_v56  ;;  %v1008_v33 = vld [vmem:[%s10537_s22 + $0x320] sm:$0xff]  ;;  %v1021_v39 = vld [vmem:[%s10537_s22 + $0x388] sm:$0xff] }
 0x14d   : > { %v8373_v6 = vcombine.low %v1078_v55, %v1090_v56  ;;  %v1020_v34 = vld [vmem:[%s10537_s22 + $0x380] sm:$0xff]  ;;  %v8282_v36 = vcombine.high %v984_v25, %v996_v26  ;;  %v8281_v40 = vcombine.low %v984_v25, %v996_v26  ;;  %v1045_v47 = vld [vmem:[%s10537_s22 + $0x448] sm:$0xff]  ;;  %v975_v25 = vld [vmem:[%s10537_s22 + $0x218] sm:$0xff] }
 0x14e   : > { %v8305_v48 = vcombine.low %v1008_v33, %v1020_v34  ;;  %v1069_v55 = vld [vmem:[%s10537_s22 + $0x508] sm:$0xff] }
 0x14f   : > { %2199 = vmatpush1.bf16.msra.mxu0 %v8345_v57  ;;  %2240 = vmatpush1.bf16.msra.mxu1 %v8347_v0  ;;  %v8328_v57 = vcombine.high %v1031_v44, %v1043_v45  ;;  %v924_v0 = vld [vmem:[%s10537_s22 + $0x80] sm:$0xff] }
 0x150   : > { %2200 = vmatprep.subr.bf16.mxu0 %v8370_v59  ;;  %2241 = vmatprep.subr.bf16.mxu1 %v8372_v3  ;;  %v8327_v59 = vcombine.low %v1031_v44, %v1043_v45  ;;  %v8351_v3 = vcombine.low %v1055_v52, %v1067_v53  ;;  %v8209_v16 = vcombine.low %v912_v63, %v924_v0 }
 0x151   : > { %v8306_v44 = vcombine.high %v1008_v33, %v1020_v34  ;;  %v999_v33 = vld [vmem:[%s10537_s22 + $0x2d8] sm:$0xff] }
 0x153   : > { %2201 = vmatpush1.bf16.msra.mxu0 %v8369_v1  ;;  %2242 = vmatpush1.bf16.msra.mxu1 %v8371_v11  ;;  %v8352_v1 = vcombine.high %v1055_v52, %v1067_v53  ;;  %v8376_v11 = vcombine.high %v1079_v60, %v1091_v61 }
 0x154   : > { %2268 = vmatprep.subr.bf16.mxu0 %v8206_v4  ;;  %2309 = vmatprep.subr.bf16.mxu1 %v8208_v13  ;;  %v913_v4 = vld [vmem:[%s10537_s22 + $0x28] sm:$0xff]  ;;  %v8375_v13 = vcombine.low %v1079_v60, %v1091_v61 }
 0x156   : > { %2219 = vmatmul.mubr.bf16.vlgmr.msra.gmra.mrb[0].mxu0 %v10593_v10  ;;  %2260 = vmatmul.mubr.bf16.vlgmr.msra.gmra.mrb[0].mxu1 %v10593_v10 }
 0x157   : > { %2269 = vmatpush1.bf16.msra.mxu0 %v8205_v12  ;;  %2300 = vmatprep.mubr.bf16.mxu0 %v10018_v7  ;;  %v8210_v12 = vcombine.high %v912_v63, %v924_v0  ;;  %v1093_v63 = vld [vmem:[%s10537_s22 + $0x5c8] sm:$0xff] }
 0x158   : > { %2270 = vmatprep.subr.bf16.mxu0 %v8230_v14  ;;  %2310 = vmatpush1.bf16.msra.mxu1 %v8207_v19  ;;  %v937_v14 = vld [vmem:[%s10537_s22 + $0xe8] sm:$0xff]  ;;  %v8212_v19 = vcombine.high %v913_v4, %v925_v5 }
 0x159   : > { %2341 = vmatprep.mubr.bf16.mxu1 %v10018_v7  ;;  %2311 = vmatprep.subr.bf16.mxu1 %v8232_v21  ;;  %v8211_v21 = vcombine.low %v913_v4, %v925_v5 }
 0x15b   : > { %2271 = vmatpush1.bf16.msra.mxu0 %v8229_v20  ;;  %v8234_v20 = vcombine.high %v936_v8, %v948_v9  ;;  %v927_v8 = vld [vmem:[%s10537_s22 + $0x98] sm:$0xff] }
 0x15c   : > { %2272 = vmatprep.subr.bf16.mxu0 %v8254_v22  ;;  %2312 = vmatpush1.bf16.msra.mxu1 %v8231_v27  ;;  %v961_v22 = vld [vmem:[%s10537_s22 + $0x1a8] sm:$0xff]  ;;  %v8236_v27 = vcombine.high %v937_v14, %v949_v15 }
 0x15d   : > { %2313 = vmatprep.subr.bf16.mxu1 %v8256_v29  ;;  %v8235_v29 = vcombine.low %v937_v14, %v949_v15  ;;  %v8259_v37 = vcombine.low %v961_v22, %v973_v23 }
 0x15f   : > { %2273 = vmatpush1.bf16.msra.mxu0 %v8253_v28  ;;  %v8258_v28 = vcombine.high %v960_v17, %v972_v18  ;;  %v951_v17 = vld [vmem:[%s10537_s22 + $0x158] sm:$0xff] }
 0x160   : > { %2274 = vmatprep.subr.bf16.mxu0 %v8278_v30  ;;  %2314 = vmatpush1.bf16.msra.mxu1 %v8255_v35  ;;  %v985_v30 = vld [vmem:[%s10537_s22 + $0x268] sm:$0xff]  ;;  %v8260_v35 = vcombine.high %v961_v22, %v973_v23 }
 0x161   : > { %2315 = vmatprep.subr.bf16.mxu1 %v8280_v41  ;;  %v1032_v41 = vld [vmem:[%s10537_s22 + $0x3e0] sm:$0xff]  ;;  %v8283_v45 = vcombine.low %v985_v30, %v997_v31 }
 0x163   : > { %2275 = vmatpush1.bf16.msra.mxu0 %v8277_v38  ;;  %v1009_v38 = vld [vmem:[%s10537_s22 + $0x328] sm:$0xff] }
 0x164   : > { %2276 = vmatprep.subr.bf16.mxu0 %v8302_v42  ;;  %2316 = vmatpush1.bf16.msra.mxu1 %v8279_v43  ;;  %v1044_v42 = vld [vmem:[%s10537_s22 + $0x440] sm:$0xff]  ;;  %v8284_v43 = vcombine.high %v985_v30, %v997_v31  ;;  %v8307_v53 = vcombine.low %v1009_v38, %v1021_v39 }
 0x165   : > { %2317 = vmatprep.subr.bf16.mxu1 %v8304_v49  ;;  %v1056_v49 = vld [vmem:[%s10537_s22 + $0x4a0] sm:$0xff]  ;;  %v8330_v52 = vcombine.high %v1032_v41, %v1044_v42  ;;  %v8329_v56 = vcombine.low %v1032_v41, %v1044_v42  ;;  %v1023_v41 = vld [vmem:[%s10537_s22 + $0x398] sm:$0xff] }
 0x167   : > { %2277 = vmatpush1.bf16.msra.mxu0 %v8301_v46  ;;  %v1033_v46 = vld [vmem:[%s10537_s22 + $0x3e8] sm:$0xff] }
 0x168   : > { %2278 = vmatprep.subr.bf16.mxu0 %v8326_v50  ;;  %2318 = vmatpush1.bf16.msra.mxu1 %v8303_v51  ;;  %v1068_v50 = vld [vmem:[%s10537_s22 + $0x500] sm:$0xff]  ;;  %v8308_v51 = vcombine.high %v1009_v38, %v1021_v39  ;;  %v8331_v61 = vcombine.low %v1033_v46, %v1045_v47 }
 0x169   : > { %2319 = vmatprep.subr.bf16.mxu1 %v8328_v57  ;;  %v1080_v57 = vld [vmem:[%s10537_s22 + $0x560] sm:$0xff]  ;;  %v8354_v60 = vcombine.high %v1056_v49, %v1068_v50  ;;  %v8353_v0 = vcombine.low %v1056_v49, %v1068_v50  ;;  %v1047_v49 = vld [vmem:[%s10537_s22 + $0x458] sm:$0xff] }
 0x16b   : > { %2279 = vmatpush1.bf16.msra.mxu0 %v8325_v54  ;;  %v1057_v54 = vld [vmem:[%s10537_s22 + $0x4a8] sm:$0xff] }
 0x16c   : > { %2280 = vmatprep.subr.bf16.mxu0 %v8350_v58  ;;  %2320 = vmatpush1.bf16.msra.mxu1 %v8327_v59  ;;  %v1092_v58 = vld [vmem:[%s10537_s22 + $0x5c0] sm:$0xff]  ;;  %v8332_v59 = vcombine.high %v1033_v46, %v1045_v47  ;;  %v8355_v5 = vcombine.low %v1057_v54, %v1069_v55 }
 0x16d   : > { %2321 = vmatprep.subr.bf16.mxu1 %v8352_v1  ;;  %v914_v1 = vld [vmem:[%s10537_s22 + $0x30] sm:$0xff]  ;;  %v8378_v4 = vcombine.high %v1080_v57, %v1092_v58  ;;  %v8377_v9 = vcombine.low %v1080_v57, %v1092_v58 }
 0x16e   : > { %v1082_v57 = vld [vmem:[%s10537_s22 + $0x570] sm:$0xff] }
 0x16f   : > { %2281 = vmatpush1.bf16.msra.mxu0 %v8349_v62  ;;  %v1081_v62 = vld [vmem:[%s10537_s22 + $0x568] sm:$0xff]  ;;  %v1094_v58 = vld [vmem:[%s10537_s22 + $0x5d0] sm:$0xff] }
 0x170   : > { %2282 = vmatprep.subr.bf16.mxu0 %v8374_v2  ;;  %2322 = vmatpush1.bf16.msra.mxu1 %v8351_v3  ;;  %v926_v2 = vld [vmem:[%s10537_s22 + $0x90] sm:$0xff]  ;;  %v8356_v3 = vcombine.high %v1057_v54, %v1069_v55  ;;  %v8379_v15 = vcombine.low %v1081_v62, %v1093_v63 }
 0x171   : > { %2323 = vmatprep.subr.bf16.mxu1 %v8376_v11  ;;  %v938_v11 = vld [vmem:[%s10537_s22 + $0xf0] sm:$0xff]  ;;  %v8214_v14 = vcombine.high %v914_v1, %v926_v2  ;;  %v8213_v18 = vcombine.low %v914_v1, %v926_v2  ;;  %v1083_v2 = vld [vmem:[%s10537_s22 + $0x578] sm:$0xff] }
 0x173   : > { %2283 = vmatpush1.bf16.msra.mxu0 %v8373_v6  ;;  %v915_v6 = vld [vmem:[%s10537_s22 + $0x38] sm:$0xff] }
 0x174   : > { %2350 = vmatprep.subr.bf16.mxu0 %v8210_v12  ;;  %2324 = vmatpush1.bf16.msra.mxu1 %v8375_v13  ;;  %v950_v12 = vld [vmem:[%s10537_s22 + $0x150] sm:$0xff]  ;;  %v8380_v13 = vcombine.high %v1081_v62, %v1093_v63  ;;  %v8215_v23 = vcombine.low %v915_v6, %v927_v8 }
 0x175   : > { %2391 = vmatprep.subr.bf16.mxu1 %v8212_v19  ;;  %v962_v19 = vld [vmem:[%s10537_s22 + $0x1b0] sm:$0xff]  ;;  %v8238_v22 = vcombine.high %v938_v11, %v950_v12  ;;  %v8237_v26 = vcombine.low %v938_v11, %v950_v12 }
 0x176   : > { %2301 = vmatmul.mubr.bf16.vlgmr.msra.gmra.mrb[4].mxu0 %v10593_v10 }
 0x177   : > { %2351 = vmatpush1.bf16.msra.mxu0 %v8209_v16  ;;  %2382 = vmatprep.mubr.bf16.mxu0 %v10018_v7  ;;  %v939_v16 = vld [vmem:[%s10537_s22 + $0xf8] sm:$0xff] }
 0x178   : > { %2352 = vmatprep.subr.bf16.mxu0 %v8234_v20  ;;  %2342 = vmatmul.mubr.bf16.vlgmr.msra.gmra.mrb[4].mxu1 %v10593_v10  ;;  %v974_v20 = vld [vmem:[%s10537_s22 + $0x210] sm:$0xff]  ;;  %v8239_v31 = vcombine.low %v939_v16, %v951_v17 }
 0x179   : > { %2392 = vmatpush1.bf16.msra.mxu1 %v8211_v21  ;;  %2423 = vmatprep.mubr.bf16.mxu1 %v10018_v7  ;;  %v8216_v21 = vcombine.high %v915_v6, %v927_v8  ;;  %v8262_v30 = vcombine.high %v962_v19, %v974_v20  ;;  %v8261_v34 = vcombine.low %v962_v19, %v974_v20  ;;  %v928_v6 = vld [vmem:[%s10537_s22 + $0xa0] sm:$0xff] }
 0x17a   : > { %2393 = vmatprep.subr.bf16.mxu1 %v8236_v27  ;;  %v986_v27 = vld [vmem:[%s10537_s22 + $0x270] sm:$0xff] }
 0x17b   : > { %2353 = vmatpush1.bf16.msra.mxu0 %v8233_v24  ;;  %v963_v24 = vld [vmem:[%s10537_s22 + $0x1b8] sm:$0xff] }
 0x17c   : > { %2354 = vmatprep.subr.bf16.mxu0 %v8258_v28  ;;  %v998_v28 = vld [vmem:[%s10537_s22 + $0x2d0] sm:$0xff]  ;;  %v8263_v39 = vcombine.low %v963_v24, %v975_v25 }
 0x17d   : > { %2394 = vmatpush1.bf16.msra.mxu1 %v8235_v29  ;;  %v8240_v29 = vcombine.high %v939_v16, %v951_v17  ;;  %v8286_v38 = vcombine.high %v986_v27, %v998_v28  ;;  %v8285_v42 = vcombine.low %v986_v27, %v998_v28  ;;  %v964_v17 = vld [vmem:[%s10537_s22 + $0x1c0] sm:$0xff] }
 0x17e   : > { %2395 = vmatprep.subr.bf16.mxu1 %v8260_v35  ;;  %v1010_v35 = vld [vmem:[%s10537_s22 + $0x330] sm:$0xff] }
 0x17f   : > { %2355 = vmatpush1.bf16.msra.mxu0 %v8257_v32  ;;  %v987_v32 = vld [vmem:[%s10537_s22 + $0x278] sm:$0xff] }
 0x180   : > { %2356 = vmatprep.subr.bf16.mxu0 %v8282_v36  ;;  %v1022_v36 = vld [vmem:[%s10537_s22 + $0x390] sm:$0xff]  ;;  %v8287_v47 = vcombine.low %v987_v32, %v999_v33 }
 0x181   : > { %2396 = vmatpush1.bf16.msra.mxu1 %v8259_v37  ;;  %v8264_v37 = vcombine.high %v963_v24, %v975_v25  ;;  %v8310_v46 = vcombine.high %v1010_v35, %v1022_v36  ;;  %v8309_v50 = vcombine.low %v1010_v35, %v1022_v36  ;;  %v1012_v25 = vld [vmem:[%s10537_s22 + $0x340] sm:$0xff] }
 0x182   : > { %2397 = vmatprep.subr.bf16.mxu1 %v8284_v43  ;;  %v1034_v43 = vld [vmem:[%s10537_s22 + $0x3f0] sm:$0xff]  ;;  %v1072_v35 = vld [vmem:[%s10537_s22 + $0x520] sm:$0xff] }
 0x183   : > { %2357 = vmatpush1.bf16.msra.mxu0 %v8281_v40  ;;  %v1011_v40 = vld [vmem:[%s10537_s22 + $0x338] sm:$0xff] }
 0x184   : > { %2358 = vmatprep.subr.bf16.mxu0 %v8306_v44  ;;  %v1046_v44 = vld [vmem:[%s10537_s22 + $0x450] sm:$0xff]  ;;  %v8311_v55 = vcombine.low %v1011_v40, %v1023_v41 }
 0x185   : > { %2398 = vmatpush1.bf16.msra.mxu1 %v8283_v45  ;;  %v8288_v45 = vcombine.high %v987_v32, %v999_v33  ;;  %v8334_v54 = vcombine.high %v1034_v43, %v1046_v44 }
 0x186   : > { %2399 = vmatprep.subr.bf16.mxu1 %v8308_v51  ;;  %v1058_v51 = vld [vmem:[%s10537_s22 + $0x4b0] sm:$0xff] }
 0x187   : > { %2359 = vmatpush1.bf16.msra.mxu0 %v8305_v48  ;;  %v1035_v48 = vld [vmem:[%s10537_s22 + $0x3f8] sm:$0xff] }
 0x188   : > { %2360 = vmatprep.subr.bf16.mxu0 %v8330_v52  ;;  %v1070_v52 = vld [vmem:[%s10537_s22 + $0x510] sm:$0xff]  ;;  %v8335_v63 = vcombine.low %v1035_v48, %v1047_v49 }
 0x189   : > { %2400 = vmatpush1.bf16.msra.mxu1 %v8307_v53  ;;  %v8312_v53 = vcombine.high %v1011_v40, %v1023_v41  ;;  %v8358_v62 = vcombine.high %v1058_v51, %v1070_v52 }
 0x18a   : > { %2401 = vmatprep.subr.bf16.mxu1 %v8332_v59  ;;  %v8336_v59 = vcombine.high %v1035_v48, %v1047_v49 }
 0x18b   : > { %2361 = vmatpush1.bf16.msra.mxu0 %v8329_v56  ;;  %v8333_v56 = vcombine.low %v1034_v43, %v1046_v44  ;;  %v930_v43 = vld [vmem:[%s10537_s22 + $0xb0] sm:$0xff] }
 0x18c   : > { %2362 = vmatprep.subr.bf16.mxu0 %v8354_v60  ;;  %v1059_v60 = vld [vmem:[%s10537_s22 + $0x4b8] sm:$0xff] }
 0x18d   : > { %2402 = vmatpush1.bf16.msra.mxu1 %v8331_v61  ;;  %v1071_v61 = vld [vmem:[%s10537_s22 + $0x518] sm:$0xff] }
 0x18e   : > { %2403 = vmatprep.subr.bf16.mxu1 %v8356_v3  ;;  %v8360_v1 = vcombine.high %v1059_v60, %v1071_v61  ;;  %v1095_v3 = vld [vmem:[%s10537_s22 + $0x5d8] sm:$0xff]  ;;  %v8359_v8 = vcombine.low %v1059_v60, %v1071_v61 }
 0x18f   : > { %2363 = vmatpush1.bf16.msra.mxu0 %v8353_v0  ;;  %v8357_v0 = vcombine.low %v1058_v51, %v1070_v52  ;;  %v8384_v11 = vcombine.high %v1083_v2, %v1095_v3  ;;  %v978_v51 = vld [vmem:[%s10537_s22 + $0x230] sm:$0xff] }
 0x190   : > { %2364 = vmatprep.subr.bf16.mxu0 %v8378_v4  ;;  %v8382_v4 = vcombine.high %v1082_v57, %v1094_v58 }
 0x191   : > { %2404 = vmatpush1.bf16.msra.mxu1 %v8355_v5  ;;  %v916_v5 = vld [vmem:[%s10537_s22 + $0x40] sm:$0xff] }
 0x192   : > { %2405 = vmatprep.subr.bf16.mxu1 %v8380_v13  ;;  %v8218_v12 = vcombine.high %v916_v5, %v928_v6  ;;  %v940_v13 = vld [vmem:[%s10537_s22 + $0x100] sm:$0xff]  ;;  %v8217_v16 = vcombine.low %v916_v5, %v928_v6  ;;  %v1086_v6 = vld [vmem:[%s10537_s22 + $0x590] sm:$0xff] }
 0x193   : > { %2365 = vmatpush1.bf16.msra.mxu0 %v8377_v9  ;;  %v8381_v9 = vcombine.low %v1082_v57, %v1094_v58  ;;  %v1014_v58 = vld [vmem:[%s10537_s22 + $0x350] sm:$0xff] }
 0x194   : > { %2432 = vmatprep.subr.bf16.mxu0 %v8214_v14  ;;  %v952_v14 = vld [vmem:[%s10537_s22 + $0x160] sm:$0xff] }
 0x195   : > { %2406 = vmatpush1.bf16.msra.mxu1 %v8379_v15  ;;  %v8383_v15 = vcombine.low %v1083_v2, %v1095_v3  ;;  %v8242_v19 = vcombine.high %v940_v13, %v952_v14  ;;  %v8241_v20 = vcombine.low %v940_v13, %v952_v14  ;;  %v1062_v2 = vld [vmem:[%s10537_s22 + $0x4d0] sm:$0xff]  ;;  %v10019_v13 = vmov 0.0  }
 0x196   : > { %2383 = vmatmul.mubr.bf16.vlgmr.msra.gmra.mrb[8].mxu0 %v10593_v10  ;;  %2473 = vmatprep.subr.bf16.mxu1 %v8216_v21  ;;  %v988_v21 = vld [vmem:[%s10537_s22 + $0x280] sm:$0xff]  ;;  %v1074_v3 = vld [vmem:[%s10537_s22 + $0x530] sm:$0xff] }
 0x197   : > { %2433 = vmatpush1.bf16.msra.mxu0 %v8213_v18  ;;  %2464 = vmatprep.mubr.bf16.mxu0 %v10018_v7  ;;  %v976_v18 = vld [vmem:[%s10537_s22 + $0x220] sm:$0xff]  ;;  %v8366_v5 = vcombine.high %v1062_v2, %v1074_v3 }
 0x198   : > { %2434 = vmatprep.subr.bf16.mxu0 %v8238_v22  ;;  %2424 = vmatmul.mubr.bf16.vlgmr.msra.gmra.mrb[8].mxu1 %v10593_v10  ;;  %v1000_v22 = vld [vmem:[%s10537_s22 + $0x2e0] sm:$0xff]  ;;  %v8265_v24 = vcombine.low %v964_v17, %v976_v18 }
 0x199   : > { %2474 = vmatpush1.bf16.msra.mxu1 %v8215_v23  ;;  %2505 = vmatprep.mubr.bf16.mxu1 %v10018_v7  ;;  %v8266_v23 = vcombine.high %v964_v17, %v976_v18  ;;  %v8290_v27 = vcombine.high %v988_v21, %v1000_v22  ;;  %v8289_v28 = vcombine.low %v988_v21, %v1000_v22  ;;  %v929_v21 = vld [vmem:[%s10537_s22 + $0xa8] sm:$0xff] }
 0x19a   : > { %2475 = vmatprep.subr.bf16.mxu1 %v8240_v29  ;;  %v1036_v29 = vld [vmem:[%s10537_s22 + $0x400] sm:$0xff]  ;;  %v941_v22 = vld [vmem:[%s10537_s22 + $0x108] sm:$0xff] }
 0x19b   : > { %2435 = vmatpush1.bf16.msra.mxu0 %v8237_v26  ;;  %v1024_v26 = vld [vmem:[%s10537_s22 + $0x3a0] sm:$0xff] }
 0x19c   : > { %2436 = vmatprep.subr.bf16.mxu0 %v8262_v30  ;;  %v1048_v30 = vld [vmem:[%s10537_s22 + $0x460] sm:$0xff]  ;;  %v8313_v32 = vcombine.low %v1012_v25, %v1024_v26 }
 0x19d   : > { %2476 = vmatpush1.bf16.msra.mxu1 %v8239_v31  ;;  %v8314_v31 = vcombine.high %v1012_v25, %v1024_v26  ;;  %v8338_v33 = vcombine.high %v1036_v29, %v1048_v30  ;;  %v8337_v36 = vcombine.low %v1036_v29, %v1048_v30  ;;  %v953_v26 = vld [vmem:[%s10537_s22 + $0x168] sm:$0xff] }
 0x19e   : > { %2477 = vmatprep.subr.bf16.mxu1 %v8264_v37  ;;  %v965_v29 = vld [vmem:[%s10537_s22 + $0x1c8] sm:$0xff] }
 0x19f   : > { %2437 = vmatpush1.bf16.msra.mxu0 %v8261_v34  ;;  %v1060_v34 = vld [vmem:[%s10537_s22 + $0x4c0] sm:$0xff]  ;;  %v977_v30 = vld [vmem:[%s10537_s22 + $0x228] sm:$0xff] }
 0x1a0   : > { %2438 = vmatprep.subr.bf16.mxu0 %v8286_v38  ;;  %v8362_v37 = vcombine.high %v1060_v34, %v1072_v35  ;;  %v1084_v38 = vld [vmem:[%s10537_s22 + $0x580] sm:$0xff]  ;;  %v8361_v40 = vcombine.low %v1060_v34, %v1072_v35  ;;  %v1001_v34 = vld [vmem:[%s10537_s22 + $0x2e8] sm:$0xff]  ;;  %v8267_v35 = vcombine.low %v965_v29, %v977_v30 }
 0x1a1   : > { %2478 = vmatpush1.bf16.msra.mxu1 %v8263_v39  ;;  %v1096_v39 = vld [vmem:[%s10537_s22 + $0x5e0] sm:$0xff] }
 0x1a2   : > { %2479 = vmatprep.subr.bf16.mxu1 %v8288_v45  ;;  %v8386_v41 = vcombine.high %v1084_v38, %v1096_v39  ;;  %v8385_v44 = vcombine.low %v1084_v38, %v1096_v39  ;;  %v1025_v38 = vld [vmem:[%s10537_s22 + $0x3a8] sm:$0xff] }
 0x1a3   : > { %2439 = vmatpush1.bf16.msra.mxu0 %v8285_v42  ;;  %v918_v42 = vld [vmem:[%s10537_s22 + $0x50] sm:$0xff] }
 0x1a4   : > { %2440 = vmatprep.subr.bf16.mxu0 %v8310_v46  ;;  %v8222_v45 = vcombine.high %v918_v42, %v930_v43  ;;  %v942_v46 = vld [vmem:[%s10537_s22 + $0x110] sm:$0xff]  ;;  %v8221_v48 = vcombine.low %v918_v42, %v930_v43  ;;  %v1049_v42 = vld [vmem:[%s10537_s22 + $0x468] sm:$0xff] }
 0x1a5   : > { %2480 = vmatpush1.bf16.msra.mxu1 %v8287_v47  ;;  %v954_v47 = vld [vmem:[%s10537_s22 + $0x170] sm:$0xff] }
 0x1a6   : > { %2481 = vmatprep.subr.bf16.mxu1 %v8312_v53  ;;  %v8246_v49 = vcombine.high %v942_v46, %v954_v47  ;;  %v8245_v52 = vcombine.low %v942_v46, %v954_v47  ;;  %v1073_v46 = vld [vmem:[%s10537_s22 + $0x528] sm:$0xff] }
 0x1a7   : > { %2441 = vmatpush1.bf16.msra.mxu0 %v8309_v50  ;;  %v966_v50 = vld [vmem:[%s10537_s22 + $0x1d0] sm:$0xff] }
 0x1a8   : > { %2442 = vmatprep.subr.bf16.mxu0 %v8334_v54  ;;  %v8270_v53 = vcombine.high %v966_v50, %v978_v51  ;;  %v990_v54 = vld [vmem:[%s10537_s22 + $0x290] sm:$0xff] }
 0x1a9   : > { %2482 = vmatpush1.bf16.msra.mxu1 %v8311_v55  ;;  %v1002_v55 = vld [vmem:[%s10537_s22 + $0x2f0] sm:$0xff] }
 0x1aa   : > { %2483 = vmatprep.subr.bf16.mxu1 %v8336_v59  ;;  %v8294_v57 = vcombine.high %v990_v54, %v1002_v55  ;;  %v1026_v59 = vld [vmem:[%s10537_s22 + $0x3b0] sm:$0xff]  ;;  %v8293_v60 = vcombine.low %v990_v54, %v1002_v55  ;;  %v931_v54 = vld [vmem:[%s10537_s22 + $0xb8] sm:$0xff] }
 0x1ab   : > { %2443 = vmatpush1.bf16.msra.mxu0 %v8333_v56  ;;  %v8269_v56 = vcombine.low %v966_v50, %v978_v51  ;;  %v8318_v61 = vcombine.high %v1014_v58, %v1026_v59  ;;  %v1097_v50 = vld [vmem:[%s10537_s22 + $0x5e8] sm:$0xff] }
 0x1ac   : > { %2444 = vmatprep.subr.bf16.mxu0 %v8358_v62  ;;  %v1038_v62 = vld [vmem:[%s10537_s22 + $0x410] sm:$0xff] }
 0x1ad   : > { %2484 = vmatpush1.bf16.msra.mxu1 %v8335_v63  ;;  %v1050_v63 = vld [vmem:[%s10537_s22 + $0x470] sm:$0xff] }
 0x1ae   : > { %2485 = vmatprep.subr.bf16.mxu1 %v8360_v1  ;;  %v8342_v1 = vcombine.high %v1038_v62, %v1050_v63 }
 0x1af   : > { %2445 = vmatpush1.bf16.msra.mxu0 %v8357_v0  ;;  %v8317_v0 = vcombine.low %v1014_v58, %v1026_v59 }
 0x1b0   : > { %2446 = vmatprep.subr.bf16.mxu0 %v8382_v4  ;;  %v8341_v4 = vcombine.low %v1038_v62, %v1050_v63 }
 0x1b1   : > { %2486 = vmatpush1.bf16.msra.mxu1 %v8359_v8  ;;  %v1098_v8 = vld [vmem:[%s10537_s22 + $0x5f0] sm:$0xff] }
 0x1b2   : > { %2487 = vmatprep.subr.bf16.mxu1 %v8384_v11  ;;  %v8390_v11 = vcombine.high %v1086_v6, %v1098_v8 }
 0x1b3   : > { %2447 = vmatpush1.bf16.msra.mxu0 %v8381_v9  ;;  %v8365_v9 = vcombine.low %v1062_v2, %v1074_v3 }
 0x1b4   : > { %2514 = vmatprep.subr.bf16.mxu0 %v8218_v12  ;;  %v8389_v12 = vcombine.low %v1086_v6, %v1098_v8  ;;  %v979_v6 = vld [vmem:[%s10537_s22 + $0x238] sm:$0xff] }
 0x1b5   : > { %2488 = vmatpush1.bf16.msra.mxu1 %v8383_v15 }
 0x1b6   : > { %2465 = vmatmul.mubr.bf16.vlgmr.msra.gmra.mrb[12].mxu0 %v10593_v10 }
 0x1b7   : > { %2515 = vmatpush1.bf16.msra.mxu0 %v8217_v16  ;;  %2546 = vmatprep.mubr.bf16.mxu0 %v10018_v7 }
 0x1b8   : > { %2516 = vmatprep.subr.bf16.mxu0 %v8242_v19  ;;  %2506 = vmatmul.mubr.bf16.vlgmr.msra.gmra.mrb[12].mxu1 %v10593_v10 }
 0x1b9   : > { %2587 = vmatprep.mubr.bf16.mxu1 %v10018_v7 }
 0x1bb   : > { %2517 = vmatpush1.bf16.msra.mxu0 %v8241_v20  ;;  %v917_v20 = vld [vmem:[%s10537_s22 + $0x48] sm:$0xff] }
 0x1bc   : > { %2518 = vmatprep.subr.bf16.mxu0 %v8266_v23  ;;  %v8220_v25 = vcombine.high %v917_v20, %v929_v21 }
 0x1be   : > { %2555 = vmatprep.subr.bf16.mxu1 %v8220_v25  ;;  %v1051_v25 = vld [vmem:[%s10537_s22 + $0x478] sm:$0xff] }
 0x1bf   : > { %2519 = vmatpush1.bf16.msra.mxu0 %v8265_v24  ;;  %v8219_v24 = vcombine.low %v917_v20, %v929_v21  ;;  %v1015_v20 = vld [vmem:[%s10537_s22 + $0x358] sm:$0xff] }
 0x1c0   : > { %2520 = vmatprep.subr.bf16.mxu0 %v8290_v27  ;;  %v1027_v21 = vld [vmem:[%s10537_s22 + $0x3b8] sm:$0xff] }
 0x1c1   : > { %2556 = vmatpush1.bf16.msra.mxu1 %v8219_v24  ;;  %v1039_v24 = vld [vmem:[%s10537_s22 + $0x418] sm:$0xff] }
 0x1c3   : > { %2521 = vmatpush1.bf16.msra.mxu0 %v8289_v28  ;;  %v8244_v28 = vcombine.high %v941_v22, %v953_v26 }
 0x1c4   : > { %2522 = vmatprep.subr.bf16.mxu0 %v8314_v31  ;;  %v8243_v31 = vcombine.low %v941_v22, %v953_v26  ;;  %v1106_v26 = vlaneseq }
 0x1c5   : > { %2557 = vmatprep.subr.bf16.mxu1 %v8244_v28  ;;  %v8344_v28 = vcombine.high %v1039_v24, %v1051_v25 }
 0x1c6   : > { %2558 = vmatpush1.bf16.msra.mxu1 %v8243_v31  ;;  %v10787_v31 = vshrl.u32 %v1106_v26, 7 }
 0x1c7   : > { %2523 = vmatpush1.bf16.msra.mxu0 %v8313_v32  ;;  %v8268_v32 = vcombine.high %v965_v29, %v977_v30  ;;  %v1063_v29 = vld [vmem:[%s10537_s22 + $0x4d8] sm:$0xff] }
 0x1c8   : > { %2524 = vmatprep.subr.bf16.mxu0 %v8338_v33  ;;  %v989_v33 = vld [vmem:[%s10537_s22 + $0x288] sm:$0xff]  ;;  %v1075_v30 = vld [vmem:[%s10537_s22 + $0x538] sm:$0xff] }
 0x1c9   : > { %2559 = vmatprep.subr.bf16.mxu1 %v8268_v32  ;;  %v8291_v39 = vcombine.low %v989_v33, %v1001_v34  ;;  %v8343_v32 = vcombine.low %v1039_v24, %v1051_v25 }
 0x1ca   : > { %2560 = vmatpush1.bf16.msra.mxu1 %v8267_v35  ;;  %v1087_v35 = vld [vmem:[%s10537_s22 + $0x598] sm:$0xff] }
 0x1cb   : > { %2525 = vmatpush1.bf16.msra.mxu0 %v8337_v36  ;;  %v8292_v36 = vcombine.high %v989_v33, %v1001_v34  ;;  %v8368_v33 = vcombine.high %v1063_v29, %v1075_v30  ;;  %v10790_v34 = vld [vmem:[%s10480_s26 + $0x8] sm:$0xff] }
 0x1cc   : > { %2526 = vmatprep.subr.bf16.mxu0 %v8362_v37  ;;  %v1013_v37 = vld [vmem:[%s10537_s22 + $0x348] sm:$0xff] }
 0x1cd   : > { %2561 = vmatprep.subr.bf16.mxu1 %v8292_v36  ;;  %v8315_v43 = vcombine.low %v1013_v37, %v1025_v38  ;;  %v1099_v36 = vld [vmem:[%s10537_s22 + $0x5f8] sm:$0xff] }
 0x1ce   : > { %2562 = vmatpush1.bf16.msra.mxu1 %v8291_v39 }
 0x1cf   : > { %2527 = vmatpush1.bf16.msra.mxu0 %v8361_v40  ;;  %v8316_v40 = vcombine.high %v1013_v37, %v1025_v38  ;;  %v10795_v37 = vsub.s32 0, %v10787_v31  ;;  %v8367_v38 = vcombine.low %v1063_v29, %v1075_v30 }
 0x1d0   : > { %2528 = vmatprep.subr.bf16.mxu0 %v8386_v41  ;;  %v1037_v41 = vld [vmem:[%s10537_s22 + $0x408] sm:$0xff] }
 0x1d1   : > { %2563 = vmatprep.subr.bf16.mxu1 %v8316_v40  ;;  %v8339_v47 = vcombine.low %v1037_v41, %v1049_v42  ;;  %v1141_v39 = vrot.slane %v10790_v34, %v10795_v37  ;;  %v8392_v40 = vcombine.high %v1087_v35, %v1099_v36 }
 0x1d2   : > { %2564 = vmatpush1.bf16.msra.mxu1 %v8315_v43  ;;  %v8391_v43 = vcombine.low %v1087_v35, %v1099_v36 }
 0x1d3   : > { %2529 = vmatpush1.bf16.msra.mxu0 %v8385_v44  ;;  %v8340_v44 = vcombine.high %v1037_v41, %v1049_v42  ;;  %v10800_v41 = vld [vmem:[%s10480_s26] sm:$0xff] }
 0x1d4   : > { %2596 = vmatprep.subr.bf16.mxu0 %v8222_v45  ;;  %v1061_v45 = vld [vmem:[%s10537_s22 + $0x4c8] sm:$0xff] }
 0x1d5   : > { %2565 = vmatprep.subr.bf16.mxu1 %v8340_v44  ;;  %v8363_v51 = vcombine.low %v1061_v45, %v1073_v46  ;;  %v10803_v44 = vsub.s32 1, %v10787_v31 }
 0x1d6   : > { %2547 = vmatmul.mubr.bf16.vlgmr.msra.gmra.mrb[16].mxu0 %v10593_v10  ;;  %2566 = vmatpush1.bf16.msra.mxu1 %v8339_v47  ;;  %v1109_v47 = vrot.slane %v10800_v41, %v10795_v37 }
 0x1d7   : > { %2597 = vmatpush1.bf16.msra.mxu0 %v8221_v48  ;;  %2628 = vmatprep.mubr.bf16.mxu0 %v10018_v7  ;;  %v8364_v48 = vcombine.high %v1061_v45, %v1073_v46 }
 0x1d8   : > { %2598 = vmatprep.subr.bf16.mxu0 %v8246_v49  ;;  %v1085_v49 = vld [vmem:[%s10537_s22 + $0x588] sm:$0xff] }
 0x1d9   : > { %2567 = vmatprep.subr.bf16.mxu1 %v8364_v48 }
 0x1da   : > { %2568 = vmatpush1.bf16.msra.mxu1 %v8363_v51 }
 0x1db   : > { %2599 = vmatpush1.bf16.msra.mxu0 %v8245_v52  ;;  %v8388_v52 = vcombine.high %v1085_v49, %v1097_v50 }
 0x1dc   : > { %2600 = vmatprep.subr.bf16.mxu0 %v8270_v53  ;;  %v919_v53 = vld [vmem:[%s10537_s22 + $0x58] sm:$0xff] }
 0x1dd   : > { %2569 = vmatprep.subr.bf16.mxu1 %v8388_v52  ;;  %v8224_v58 = vcombine.high %v919_v53, %v931_v54 }
 0x1df   : > { %2601 = vmatpush1.bf16.msra.mxu0 %v8269_v56  ;;  %v8387_v56 = vcombine.low %v1085_v49, %v1097_v50  ;;  %v1145_v50 = vrot.slane %v10790_v34, %v10803_v44 }
 0x1e0   : > { %2602 = vmatprep.subr.bf16.mxu0 %v8294_v57 }
 0x1e1   : > { %2570 = vmatpush1.bf16.msra.mxu1 %v8387_v56 }
 0x1e2   : > { %2637 = vmatprep.subr.bf16.mxu1 %v8224_v58 }
 0x1e3   : > { %2603 = vmatpush1.bf16.msra.mxu0 %v8293_v60  ;;  %v943_v60 = vld [vmem:[%s10537_s22 + $0x118] sm:$0xff] }
 0x1e4   : > { %2604 = vmatprep.subr.bf16.mxu0 %v8318_v61  ;;  %v955_v61 = vld [vmem:[%s10537_s22 + $0x178] sm:$0xff]  ;;  %2588 = vmatmul.mubr.bf16.vlgmr.msra.gmra.mrb[16].mxu1 %v10593_v10 }
 0x1e5   : > { %v8248_v3 = vcombine.high %v943_v60, %v955_v61  ;;  %v8247_v8 = vcombine.low %v943_v60, %v955_v61  ;;  %2669 = vmatprep.mubr.bf16.mxu1 %v10018_v7 }
 0x1e7   : > { %2605 = vmatpush1.bf16.msra.mxu0 %v8317_v0 }
 0x1e8   : > { %2606 = vmatprep.subr.bf16.mxu0 %v8342_v1  ;;  %v8223_v1 = vcombine.low %v919_v53, %v931_v54 }
 0x1ea   : > { %2638 = vmatpush1.bf16.msra.mxu1 %v8223_v1  ;;  %v1113_v1 = vrot.slane %v10800_v41, %v10803_v44 }
 0x1eb   : > { %2607 = vmatpush1.bf16.msra.mxu0 %v8341_v4  ;;  %2639 = vmatprep.subr.bf16.mxu1 %v8248_v3 }
 0x1ec   : > { %2608 = vmatprep.subr.bf16.mxu0 %v8366_v5  ;;  %v967_v5 = vld [vmem:[%s10537_s22 + $0x1d8] sm:$0xff] }
 0x1ee   : > { %2640 = vmatpush1.bf16.msra.mxu1 %v8247_v8 }
 0x1ef   : > { %2609 = vmatpush1.bf16.msra.mxu0 %v8365_v9  ;;  %v8272_v9 = vcombine.high %v967_v5, %v979_v6 }
 0x1f0   : > { %2610 = vmatprep.subr.bf16.mxu0 %v8390_v11  ;;  %v991_v11 = vld [vmem:[%s10537_s22 + $0x298] sm:$0xff] }
 0x1f1   : > { %2641 = vmatprep.subr.bf16.mxu1 %v8272_v9 }
 0x1f3   : > { %2611 = vmatpush1.bf16.msra.mxu0 %v8389_v12  ;;  %v1003_v12 = vld [vmem:[%s10537_s22 + $0x2f8] sm:$0xff]  ;;  %s11895_s22 = sld [smem:[#allocation40_spill]] }
 0x1f4   : > { %9036 = vmatprep.subr.bf16.mxu0 %v10019_v13  ;;  %v8295_v22 = vcombine.low %v991_v11, %v1003_v12 }
 0x1f6   : > { %2629 = vmatmul.mubr.bf16.vlgmr.msra.gmra.mrb[20].mxu0 %v10593_v10 }
 0x1f7   : > { %9038 = vmatprep.mubr.msk.bf16.mxu0 %vm10020_vm0, %v10019_v13 }
 0x229   : > { %v10739_v14 = vpop.f32.mrb[0].mxu0  ;;  %v10743_v18 = vpop.f32.mrb[0].mxu1 }
 0x22a   : > { %v10741_v15 = vpop.f32.mrb[1].mxu0  ;;  %v10745_v19 = vpop.f32.mrb[1].mxu1  ;;  %v2221_v56 = vadd.f32 %v10739_v14, %v1109_v47  ;;  %v10871_v47 = vsub.s32 7, %v10787_v31 }
 0x22b   : > { %v2224_v16 = vpop.f32.mrb[2].mxu0  ;;  %v2265_v23 = vpop.f32.mrb[2].mxu1  ;;  %v2223_v3 = vadd.f32 %v10741_v15, %v1113_v1 }
 0x22c   : > { %v2225_v17 = vpop.f32.mrb[3].mxu0  ;;  %v2266_v27 = vpop.f32.mrb[3].mxu1  ;;  %v8271_v16 = vcombine.low %v967_v5, %v979_v6  ;;  %v8320_v23 = vcombine.high %v1015_v20, %v1027_v21 }
 0x22d   : > { %v8296_v17 = vcombine.high %v991_v11, %v1003_v12  ;;  %v8319_v27 = vcombine.low %v1015_v20, %v1027_v21  ;;  %v2781_v5 = vpack.c.bf16 %v2223_v3, %v2223_v3 }
 0x22e   : > { %2642 = vmatpush1.bf16.msra.mxu1 %v8271_v16  ;;  %v10840_v16 = vsub.s32 4, %v10787_v31 }
 0x22f   : > { %2643 = vmatprep.subr.bf16.mxu1 %v8296_v17 }
 0x230   : > { %v1157_v20 = vrot.slane %v10790_v34, %v10840_v16  ;;  %v1125_v26 = vrot.slane %v10800_v41, %v10840_v16 }
 0x232   : > { %2644 = vmatpush1.bf16.msra.mxu1 %v8295_v22  ;;  %v10849_v22 = vsub.s32 5, %v10787_v31 }
 0x233   : > { %2645 = vmatprep.subr.bf16.mxu1 %v8320_v23 }
 0x234   : > { %v1161_v29 = vrot.slane %v10790_v34, %v10849_v22 }
 0x236   : > { %2646 = vmatpush1.bf16.msra.mxu1 %v8319_v27 }
 0x237   : > { %2647 = vmatprep.subr.bf16.mxu1 %v8344_v28 }
 0x23a   : > { %2648 = vmatpush1.bf16.msra.mxu1 %v8343_v32 }
 0x23b   : > { %2649 = vmatprep.subr.bf16.mxu1 %v8368_v33 }
 0x23e   : > { %2650 = vmatpush1.bf16.msra.mxu1 %v8367_v38  ;;  %v10860_v38 = vsub.s32 6, %v10787_v31 }
 0x23f   : > { %2651 = vmatprep.subr.bf16.mxu1 %v8392_v40 }
 0x240   : > { %v1165_v40 = vrot.slane %v10790_v34, %v10860_v38 }
 0x242   : > { %2652 = vmatpush1.bf16.msra.mxu1 %v8391_v43  ;;  %v1129_v43 = vrot.slane %v10800_v41, %v10849_v22 }
 0x243   : > { %9042 = vmatprep.subr.bf16.mxu1 %v10019_v13 }
 0x245   : > { %2670 = vmatmul.mubr.bf16.vlgmr.msra.gmra.mrb[20].mxu1 %v10593_v10  ;;  %v10827_v10 = vsub.s32 3, %v10787_v31 }
 0x246   : > { %9044 = vmatprep.mubr.msk.bf16.mxu1 %vm10020_vm0, %v10019_v13 }
 0x247   : > { %v1153_v8 = vrot.slane %v10790_v34, %v10827_v10  ;;  %v1121_v12 = vrot.slane %v10800_v41, %v10827_v10 }
 0x249   : > { %v10765_v55 = vpop.f32.mrb[4].mxu0 }
 0x24a   : > { %v10767_v57 = vpop.f32.mrb[5].mxu0  ;;  %v2303_v35 = vadd.f32 %v10765_v55, %v1125_v26 }
 0x24b   : > { %v2306_v59 = vpop.f32.mrb[6].mxu0  ;;  %v10771_v63 = vpop.f32.mrb[4].mxu1  ;;  %v2305_v55 = vadd.f32 %v10767_v57, %v1129_v43 }
 0x24c   : > { %v2307_v62 = vpop.f32.mrb[7].mxu0  ;;  %v10773_v0 = vpop.f32.mrb[5].mxu1  ;;  %v10813_v59 = vsub.s32 2, %v10787_v31 }
 0x24d   : > { %v2347_v2 = vpop.f32.mrb[6].mxu1  ;;  %v2678_v62 = vpack.c.bf16 %v2221_v56, %v2221_v56 }
 0x24e   : > { %v2348_v4 = vpop.f32.mrb[7].mxu1  ;;  %v1149_v61 = vrot.slane %v10790_v34, %v10813_v59  ;;  %v1117_v6 = vrot.slane %v10800_v41, %v10813_v59 }
 0x250   : > { %v2262_v15 = vadd.f32 %v10743_v18, %v1117_v6  ;;  %v2264_v18 = vadd.f32 %v10745_v19, %v1121_v12  ;;  %v904_v6 = vld [vmem:[%s11895_s22] sm:$0xff] }
 0x252   : > { %v2882_v11 = vpack.c.bf16 %v2262_v15, %v2262_v15  ;;  %v2983_v25 = vpack.c.bf16 %v2264_v18, %v2264_v18 }
 0x269   : > { %v2384_v42 = vpop.f32.mrb[8].mxu0 }
 0x26a   : > { %v2385_v45 = vadd.f32 %v2384_v42, %v1141_v39  ;;  %v2386_v46 = vpop.f32.mrb[9].mxu0  ;;  %v3084_v42 = vpack.c.bf16 %v2303_v35, %v2303_v35 }
 0x26b   : > { %v2388_v48 = vpop.f32.mrb[10].mxu0  ;;  %v2425_v52 = vpop.f32.mrb[8].mxu1  ;;  %v2387_v60 = vadd.f32 %v2386_v46, %v1145_v50  ;;  %v1133_v50 = vrot.slane %v10800_v41, %v10860_v38 }
 0x26c   : > { %v2679_v49 = vpack.c.bf16 %v2385_v45, %v2385_v45  ;;  %v2389_v51 = vpop.f32.mrb[11].mxu0  ;;  %v2427_v53 = vpop.f32.mrb[9].mxu1  ;;  %v2426_v2 = vadd.f32 %v2425_v52, %v1149_v61 }
 0x26d   : > { %v2429_v54 = vpop.f32.mrb[10].mxu1  ;;  %v2782_v14 = vpack.c.bf16 %v2387_v60, %v2387_v60  ;;  %v2428_v9 = vadd.f32 %v2427_v53, %v1153_v8  ;;  %v1169_v51 = vrot.slane %v10790_v34, %v10871_v47  ;;  %v2344_v57 = vadd.f32 %v10771_v63, %v1133_v50 }
 0x26e   : > { %9037 = vmatpush3.bf16.xpose.msra.mxu0 %v2679_v49  ;;  %v2430_v58 = vpop.f32.mrb[11].mxu1  ;;  %v2883_v4 = vpack.c.bf16 %v2426_v2, %v2426_v2  ;;  %v3185_v49 = vpack.c.bf16 %v2305_v55, %v2305_v55  ;;  %v1137_v53 = vrot.slane %v10800_v41, %v10871_v47  ;;  %v10884_v54 = vld [vmem:[%s10480_s26 + $0x10] sm:$0xff] }
 0x26f   : > { %9048 = vmatprep.subr.bf16.mxu0 %v10019_v13  ;;  %v2984_v17 = vpack.c.bf16 %v2428_v9, %v2428_v9  ;;  %v3286_v31 = vpack.c.bf16 %v2344_v57, %v2344_v57  ;;  %v1173_v34 = vrot.slane %v10884_v54, %v10795_v37 }
 0x270   : > { %v2346_v63 = vadd.f32 %v10773_v0, %v1137_v53 }
 0x275   : > { %9039 = vmatmul.mubr.bf16.vlgmr.msra.gmra.mrb[24].mxu0 %v2678_v62  ;;  %v3387_v62 = vpack.c.bf16 %v2346_v63, %v2346_v63 }
 0x276   : > { %9049 = vmatpush3.bf16.xpose.msra.mxu0 %v2782_v14  ;;  %9050 = vmatprep.mubr.msk.bf16.mxu0 %vm10020_vm0, %v10019_v13 }
 0x277   : > { %9060 = vmatprep.subr.bf16.mxu0 %v10019_v13 }
 0x27d   : > { %9051 = vmatmul.mubr.bf16.vlgmr.msra.gmra.mrb[28].mxu0 %v2781_v5 }
 0x27e   : > { %9061 = vmatpush3.bf16.xpose.msra.mxu0 %v2883_v4  ;;  %9062 = vmatprep.mubr.msk.bf16.mxu0 %vm10020_vm0, %v10019_v13 }
 0x27f   : > { %9072 = vmatprep.subr.bf16.mxu0 %v10019_v13 }
 0x285   : > { %9063 = vmatmul.mubr.bf16.vlgmr.msra.gmra.mrb[32].mxu0 %v2882_v11 }
 0x286   : > { %9073 = vmatpush3.bf16.xpose.msra.mxu0 %v2984_v17  ;;  %9074 = vmatprep.mubr.msk.bf16.mxu0 %vm10020_vm0, %v10019_v13 }
 0x287   : > { %9084 = vmatprep.subr.bf16.mxu0 %v10019_v13 }
 0x289   : > { %v2466_v21 = vpop.f32.mrb[12].mxu0 }
 0x28a   : > { %v2467_v23 = vadd.f32 %v2466_v21, %v1157_v20  ;;  %v2468_v24 = vpop.f32.mrb[13].mxu0 }
 0x28b   : > { %v2470_v27 = vpop.f32.mrb[14].mxu0  ;;  %v2507_v32 = vpop.f32.mrb[12].mxu1  ;;  %v2469_v39 = vadd.f32 %v2468_v24, %v1161_v29 }
 0x28c   : > { %v3085_v28 = vpack.c.bf16 %v2467_v23, %v2467_v23  ;;  %v2471_v30 = vpop.f32.mrb[15].mxu0  ;;  %v2509_v19 = vpop.f32.mrb[13].mxu1  ;;  %v2508_v46 = vadd.f32 %v2507_v32, %v1165_v40 }
 0x28d   : > { %9075 = vmatmul.mubr.bf16.vlgmr.msra.gmra.mrb[36].mxu0 %v2983_v25  ;;  %v2511_v33 = vpop.f32.mrb[14].mxu1  ;;  %v3186_v45 = vpack.c.bf16 %v2469_v39, %v2469_v39  ;;  %v2510_v52 = vadd.f32 %v2509_v19, %v1169_v51 }
 0x28e   : > { %9085 = vmatpush3.bf16.xpose.msra.mxu0 %v3085_v28  ;;  %9086 = vmatprep.mubr.msk.bf16.mxu0 %vm10020_vm0, %v10019_v13  ;;  %v2512_v36 = vpop.f32.mrb[15].mxu1  ;;  %v3287_v48 = vpack.c.bf16 %v2508_v46, %v2508_v46 }
 0x28f   : > { %9096 = vmatprep.subr.bf16.mxu0 %v10019_v13  ;;  %v3388_v56 = vpack.c.bf16 %v2510_v52, %v2510_v52 }
 0x295   : > { %9087 = vmatmul.mubr.bf16.vlgmr.msra.gmra.mrb[40].mxu0 %v3084_v42 }
 0x296   : > { %9097 = vmatpush3.bf16.xpose.msra.mxu0 %v3186_v45  ;;  %9098 = vmatprep.mubr.msk.bf16.mxu0 %vm10020_vm0, %v10019_v13 }
 0x297   : > { %9108 = vmatprep.subr.bf16.mxu0 %v10019_v13 }
 0x29d   : > { %9099 = vmatmul.mubr.bf16.vlgmr.msra.gmra.mrb[44].mxu0 %v3185_v49 }
 0x29e   : > { %9109 = vmatpush3.bf16.xpose.msra.mxu0 %v3287_v48  ;;  %9110 = vmatprep.mubr.msk.bf16.mxu0 %vm10020_vm0, %v10019_v13 }
 0x29f   : > { %9120 = vmatprep.subr.bf16.mxu0 %v10019_v13 }
 0x2a5   : > { %9111 = vmatmul.mubr.bf16.vlgmr.msra.gmra.mrb[48].mxu0 %v3286_v31 }
 0x2a6   : > { %9121 = vmatpush3.bf16.xpose.msra.mxu0 %v3388_v56  ;;  %9122 = vmatprep.mubr.msk.bf16.mxu0 %vm10020_vm0, %v10019_v13 }
 0x2a9   : > { %v2548_v58 = vpop.f32.mrb[16].mxu0 }
 0x2aa   : > { %v2549_v60 = vadd.f32 %v2548_v58, %v1173_v34  ;;  %v10891_v61 = vpop.f32.mrb[17].mxu0 }
 0x2ab   : > { %v2552_v41 = vpop.f32.mrb[18].mxu0 }
 0x2ac   : > { %v2680_v1 = vpack.c.bf16 %v2549_v60, %v2549_v60  ;;  %v2553_v14 = vpop.f32.mrb[19].mxu0 }
 0x2ad   : > { %9123 = vmatmul.mubr.bf16.vlgmr.msra.gmra.mrb[52].mxu0 %v3387_v62 }
 0x2ae   : > { %v2739_v2 = vsel %vm2737_vm1, %v2680_v1, 0 }
 0x2af   : > { %9043 = vmatpush3.bf16.msra.mxu1 %v2739_v2 }
 0x2b0   : > { %9054 = vmatprep.subr.bf16.mxu1 %v10019_v13 }
 0x2c9   : > { %v10895_v3 = vpop.f32.mrb[20].mxu0 }
 0x2ca   : > { %v10897_v4 = vpop.f32.mrb[21].mxu0 }
 0x2cb   : > { %v2634_v0 = vpop.f32.mrb[22].mxu0 }
 0x2cc   : > { %v2635_v5 = vpop.f32.mrb[23].mxu0 }
 0x348   : > { %v2715_v8 = vpop.f32.mrb[24].mxu0 }
 0x349   : > { %v2716_v15 = vadd.f32 %v2715_v8, %v904_v6  ;;  %v9040_v9 = vpop.f32.mrb[25].mxu0 }
 0x34a   : > { %v2718_v11 = vpop.f32.mrb[26].mxu0 }
 0x34b   : > { %v9041_v12 = vpop.f32.mrb[27].mxu0  ;;  %v2722_v17 = vsel %vm2721_vm2, %v2716_v15, -inf }
 0x34c   : > { %2723 = vmax.xlane.f32.xlu0 %v2722_v17 }
 0x350   : > { %v2818_v20 = vpop.f32.mrb[28].mxu0 }
 0x351   : > { %v2819_v18 = vadd.f32 %v2818_v20, %v904_v6  ;;  %v9052_v21 = vpop.f32.mrb[29].mxu0 }
 0x352   : > { %v2821_v23 = vpop.f32.mrb[30].mxu0 }
 0x353   : > { %v9053_v24 = vpop.f32.mrb[31].mxu0  ;;  %v2824_v25 = vsel %vm2721_vm2, %v2819_v18, -inf }
 0x354   : > { %2825 = vmax.xlane.f32.xlu0 %v2824_v25 }
 0x358   : > { %v2919_v26 = vpop.f32.mrb[32].mxu0 }
 0x359   : > { %v2920_v27 = vadd.f32 %v2919_v26, %v904_v6  ;;  %v9064_v28 = vpop.f32.mrb[33].mxu0 }
 0x35a   : > { %v2922_v29 = vpop.f32.mrb[34].mxu0 }
 0x35b   : > { %v9065_v30 = vpop.f32.mrb[35].mxu0  ;;  %v2925_v32 = vsel %vm2721_vm2, %v2920_v27, -inf }
 0x35c   : > { %2926 = vmax.xlane.f32.xlu1 %v2925_v32 }
 0x360   : > { %v3020_v19 = vpop.f32.mrb[36].mxu0 }
 0x361   : > { %v3021_v33 = vadd.f32 %v3020_v19, %v904_v6  ;;  %v9076_v35 = vpop.f32.mrb[37].mxu0 }
 0x362   : > { %v3023_v36 = vpop.f32.mrb[38].mxu0 }
 0x363   : > { %v9077_v39 = vpop.f32.mrb[39].mxu0  ;;  %v3026_v40 = vsel %vm2721_vm2, %v3021_v33, -inf }
 0x364   : > { %3027 = vmax.xlane.f32.xlu1 %v3026_v40 }
 0x368   : > { %v3121_v42 = vpop.f32.mrb[40].mxu0 }
 0x369   : > { %v3122_v43 = vadd.f32 %v3121_v42, %v904_v6  ;;  %v9088_v45 = vpop.f32.mrb[41].mxu0 }
 0x36a   : > { %v3124_v46 = vpop.f32.mrb[42].mxu0 }
 0x36b   : > { %v9089_v55 = vpop.f32.mrb[43].mxu0  ;;  %v3127_v48 = vsel %vm2721_vm2, %v3122_v43, -inf }
 0x36c   : > { %3128 = vmax.xlane.f32.xlu0 %v3127_v48  ;;  %v2589_v55 = vpop.f32.mrb[16].mxu1 }
 0x370   : > { %v3222_v49 = vpop.f32.mrb[44].mxu0 }
 0x371   : > { %v3223_v50 = vadd.f32 %v3222_v49, %v904_v6  ;;  %v9100_v51 = vpop.f32.mrb[45].mxu0  ;;  %v10930_v49 = vpop.f32.mrb[17].mxu1 }
 0x372   : > { %v3225_v57 = vpop.f32.mrb[46].mxu0  ;;  %v2593_v51 = vpop.f32.mrb[18].mxu1 }
 0x373   : > { %v9101_v52 = vpop.f32.mrb[47].mxu0  ;;  %v3228_v31 = vsel %vm2721_vm2, %v3223_v50, -inf  ;;  %v2594_v57 = vpop.f32.mrb[19].mxu1 }
 0x374   : > { %3229 = vmax.xlane.f32.xlu1 %v3228_v31 }
 0x378   : > { %v3323_v53 = vpop.f32.mrb[48].mxu0 }
 0x379   : > { %v3324_v56 = vadd.f32 %v3323_v53, %v904_v6  ;;  %v9112_v34 = vpop.f32.mrb[49].mxu0 }
 0x37a   : > { %v3326_v63 = vpop.f32.mrb[50].mxu0 }
 0x37b   : > { %v9113_v58 = vpop.f32.mrb[51].mxu0  ;;  %v3329_v60 = vsel %vm2721_vm2, %v3324_v56, -inf }
 0x37c   : > { %3330 = vmax.xlane.f32.xlu0 %v3329_v60 }
 0x380   : > { %v3424_v62 = vpop.f32.mrb[52].mxu0 }
 0x381   : > { %v3425_v41 = vadd.f32 %v3424_v62, %v904_v6  ;;  %v9124_v1 = vpop.f32.mrb[53].mxu0  ;;  %v10944_v62 = vpop.f32.mrb[20].mxu1 }
 0x382   : > { %v3427_v14 = vpop.f32.mrb[54].mxu0 }
 0x383   : > { %v9125_v2 = vpop.f32.mrb[55].mxu0  ;;  %v3430_v0 = vsel %vm2721_vm2, %v3425_v41, -inf }
 0x384   : > { %3431 = vmax.xlane.f32.xlu1 %v3430_v0  ;;  %v9435_v2 = vld [vmem:[%s10488_s27 + $0x40] sm:$0xff]  }
 0x385   : > { %v9436_v0 = vld [vmem:[%s10488_s27] sm:$0xff]   ;;  %8801 = vmatprep.subr.bf16.mxu0 %v9435_v2 }
 0x386   : > { %8802 = vmatpush3.bf16.msra.mxu0 %v9436_v0  ;;  %v1197_v0 = vrot.slane %v10884_v54, %v10860_v38 }
 0x3d9   : > { %v2724_v5 = vpop.xlane.xlu0 %2723 }
 0x3da   : > { %v2725_v8 = vsub.f32 %v2716_v15, %v2724_v5  ;;  %v9437_v5 = vld [vmem:[%s10488_s27 + $0x48] sm:$0xff]  }
 0x3db   : > { %8803 = vmatprep.subr.bf16.mxu0 %v9437_v5 }
 0x3dc   : > { %v2726_v9 = vmul.f32 1.442695, %v2725_v8  ;;  %v9438_v8 = vld [vmem:[%s10488_s27 + $0x8] sm:$0xff]  }
 0x3dd   : > { %8804 = vmatpush3.bf16.msra.mxu0 %v9438_v8 }
 0x3de   : > { %9579 = vpow2.f32 %v2726_v9  ;;  %v9439_v9 = vld [vmem:[%s10488_s27 + $0x50] sm:$0xff]  }
 0x3df   : > { %8805 = vmatprep.subr.bf16.mxu0 %v9439_v9  ;;  %v2672_v9 = vadd.f32 %v10944_v62, %v1197_v0  ;;  %v1201_v62 = vrot.slane %v10884_v54, %v10871_v47 }
 0x3e1   : > { %v2826_v11 = vpop.xlane.xlu0 %2825 }
 0x3e2   : > { %v2827_v12 = vsub.f32 %v2819_v18, %v2826_v11  ;;  %v9440_v11 = vld [vmem:[%s10488_s27 + $0x10] sm:$0xff]  }
 0x3e3   : > { %8806 = vmatpush3.bf16.msra.mxu0 %v9440_v11 }
 0x3e4   : > { %v2828_v17 = vmul.f32 1.442695, %v2827_v12  ;;  %v9441_v12 = vld [vmem:[%s10488_s27 + $0x58] sm:$0xff]  }
 0x3e5   : > { %8807 = vmatprep.subr.bf16.mxu0 %v9441_v12 }
 0x3e6   : > { %9581 = vpow2.f32 %v2828_v17  ;;  %v9442_v17 = vld [vmem:[%s10488_s27 + $0x18] sm:$0xff]  }
 0x3e7   : > { %8808 = vmatpush3.bf16.msra.mxu0 %v9442_v17  ;;  %v3288_v17 = vpack.c.bf16 %v2672_v9, %v2672_v9  ;;  %v9464_v9 = vld [vmem:[%s10488_s27 + $0x148] sm:$0xff]  }
 0x3e8   : > { %v10910_v20 = vpop.eup %9579 }
 0x3e9   : > { %v2927_v21 = vpop.xlane.xlu1 %2926  ;;  %v2728_v6 = vsel %vm2721_vm2, %v10910_v20, 0.0 }
 0x3ea   : > { %v2928_v23 = vsub.f32 %v2920_v27, %v2927_v21  ;;  %2729 = vadd.xlane.f32.xlu0 %v2728_v6  ;;  %v9443_v21 = vld [vmem:[%s10488_s27 + $0x60] sm:$0xff]  }
 0x3eb   : > { %v9445_v6 = vld [vmem:[%s10488_s27 + $0x20] sm:$0xff]   ;;  %8809 = vmatprep.subr.bf16.mxu0 %v9443_v21 }
 0x3ec   : > { %v2929_v24 = vmul.f32 1.442695, %v2928_v23  ;;  %8810 = vmatpush3.bf16.msra.mxu0 %v9445_v6  ;;  %v3345_v6 = vsel %vm2737_vm1, %v3288_v17, 0 }
 0x3ee   : > { %9583 = vpow2.f32 %v2929_v24  ;;  %v1177_v24 = vrot.slane %v10884_v54, %v10803_v44 }
 0x3f0   : > { %v10914_v25 = vpop.eup %9581 }
 0x3f1   : > { %v3028_v26 = vpop.xlane.xlu1 %3027  ;;  %v2830_v15 = vsel %vm2721_vm2, %v10914_v25, 0.0 }
 0x3f2   : > { %v3029_v28 = vsub.f32 %v3021_v33, %v3028_v26  ;;  %2831 = vadd.xlane.f32.xlu1 %v2830_v15  ;;  %v2551_v26 = vadd.f32 %v10891_v61, %v1177_v24 }
 0x3f4   : > { %v3030_v18 = vmul.f32 1.442695, %v3029_v28  ;;  %v1181_v28 = vrot.slane %v10884_v54, %v10813_v59 }
 0x3f6   : > { %9585 = vpow2.f32 %v3030_v18 }
 0x3f8   : > { %v10918_v29 = vpop.eup %9583 }
 0x3f9   : > { %v3129_v30 = vpop.xlane.xlu0 %3128  ;;  %v2931_v32 = vsel %vm2721_vm2, %v10918_v29, 0.0 }
 0x3fa   : > { %v3130_v27 = vsub.f32 %v3122_v43, %v3129_v30  ;;  %2932 = vadd.xlane.f32.xlu0 %v2931_v32  ;;  %v2783_v30 = vpack.c.bf16 %v2551_v26, %v2551_v26 }
 0x3fc   : > { %v3131_v19 = vmul.f32 1.442695, %v3130_v27  ;;  %v2590_v27 = vadd.f32 %v2589_v55, %v1181_v28 }
 0x3fe   : > { %9587 = vpow2.f32 %v3131_v19  ;;  %v2884_v61 = vpack.c.bf16 %v2590_v27, %v2590_v27 }
 0x400   : > { %v10922_v35 = vpop.eup %9585 }
 0x401   : > { %v3230_v36 = vpop.xlane.xlu1 %3229  ;;  %v3032_v39 = vsel %vm2721_vm2, %v10922_v35, 0.0 }
 0x402   : > { %v3231_v33 = vsub.f32 %v3223_v50, %v3230_v36  ;;  %3033 = vadd.xlane.f32.xlu1 %v3032_v39  ;;  %v2840_v36 = vsel %vm2737_vm1, %v2783_v30, 0 }
 0x404   : > { %v3232_v40 = vmul.f32 1.442695, %v3231_v33 }
 0x406   : > { %9589 = vpow2.f32 %v3232_v40 }
 0x408   : > { %v10926_v42 = vpop.eup %9587 }
 0x409   : > { %v3331_v45 = vpop.xlane.xlu0 %3330  ;;  %v3133_v46 = vsel %vm2721_vm2, %v10926_v42, 0.0 }
 0x40a   : > { %v3332_v43 = vsub.f32 %v3324_v56, %v3331_v45  ;;  %3134 = vadd.xlane.f32.xlu0 %v3133_v46  ;;  %v2941_v45 = vsel %vm2737_vm1, %v2884_v61, 0  ;;  %v9450_v61 = vld [vmem:[%s10488_s27 + $0x88] sm:$0xff]  }
 0x40c   : > { %v3333_v48 = vmul.f32 1.442695, %v3332_v43 }
 0x40e   : > { %9591 = vpow2.f32 %v3333_v48 }
 0x410   : > { %v10932_v52 = vpop.eup %9589 }
 0x411   : > { %v3432_v50 = vpop.xlane.xlu1 %3431  ;;  %v3234_v31 = vsel %vm2721_vm2, %v10932_v52, 0.0 }
 0x412   : > { %v3433_v53 = vsub.f32 %v3425_v41, %v3432_v50  ;;  %3235 = vadd.xlane.f32.xlu1 %v3234_v31  ;;  %v10946_v41 = vpop.f32.mrb[21].mxu1 }
 0x413   : > { %v2675_v1 = vpop.f32.mrb[22].mxu1  ;;  %v2674_v24 = vadd.f32 %v10946_v41, %v1201_v62  ;;  %v9444_v41 = vld [vmem:[%s10488_s27 + $0xc0] sm:$0xff]  }
 0x414   : > { %v3434_v56 = vmul.f32 1.442695, %v3433_v53  ;;  %v2676_v14 = vpop.f32.mrb[23].mxu1 }
 0x416   : > { %9593 = vpow2.f32 %v3434_v56 }
 0x418   : > { %v10936_v34 = vpop.eup %9591 }
 0x419   : > { %v3335_v63 = vsel %vm2721_vm2, %v10936_v34, 0.0 }
 0x41a   : > { %3336 = vadd.xlane.f32.xlu0 %v3335_v63 }
 0x420   : > { %v10940_v58 = vpop.eup %9593 }
 0x421   : > { %v3436_v60 = vsel %vm2721_vm2, %v10940_v58, 0.0 }
 0x422   : > { %3437 = vadd.xlane.f32.xlu1 %v3436_v60 }
 0x477   : > { %v2730_v23 = vpop.xlane.xlu0 %2729 }
 0x478   : > { %9595 = vrcp.f32 %v2730_v23 }
 0x47f   : > { %v2832_v15 = vpop.xlane.xlu1 %2831 }
 0x480   : > { %9597 = vrcp.f32 %v2832_v15  ;;  %v3389_v15 = vpack.c.bf16 %v2674_v24, %v2674_v24  ;;  %v9474_v24 = vld [vmem:[%s10488_s27 + $0x118] sm:$0xff]  }
 0x482   : > { %v9596_v18 = vpop.eup %9595 }
 0x483   : > { %v2732_v32 = vmul.f32 %v9596_v18, %v10910_v20  ;;  %v1185_v20 = vrot.slane %v10884_v54, %v10827_v10  ;;  %v3446_v18 = vsel %vm2737_vm1, %v3389_v15, 0 }
 0x485   : > { %v2733_v19 = vpack.c.bf16 %v2732_v32, %v2732_v32  ;;  %v2592_v43 = vadd.f32 %v10930_v49, %v1185_v20  ;;  %v9446_v32 = vld [vmem:[%s10488_s27 + $0x80] sm:$0xff]   ;;  %v9454_v20 = vld [vmem:[%s10488_s27 + $0x90] sm:$0xff]  }
 0x487   : > { %9045 = vmatmul.mubr.msk.bf16.vlgmr.msra.gmra.mrb[24].mxu1 %vm2721_vm2, %v2733_v19  ;;  %v2933_v39 = vpop.xlane.xlu0 %2932  ;;  %v2985_v57 = vpack.c.bf16 %v2592_v43, %v2592_v43  ;;  %v9447_v19 = vld [vmem:[%s10488_s27 + $0x68] sm:$0xff]   ;;  %v9457_v43 = vld [vmem:[%s10488_s27 + $0x38] sm:$0xff]  }
 0x488   : > { %9055 = vmatpush3.bf16.msra.mxu1 %v2840_v36  ;;  %9599 = vrcp.f32 %v2933_v39  ;;  %9056 = vmatprep.mubr.msk.bf16.mxu1 %vm10020_vm0, %v10019_v13  ;;  %v9448_v36 = vld [vmem:[%s10488_s27 + $0xc8] sm:$0xff]  }
 0x489   : > { %9066 = vmatprep.subr.bf16.mxu1 %v10019_v13  ;;  %v3042_v31 = vsel %vm2737_vm1, %v2985_v57, 0  ;;  %v9449_v39 = vld [vmem:[%s10488_s27 + $0x28] sm:$0xff]   ;;  %8811 = vmatprep.subr.bf16.mxu0 %v9447_v19 }
 0x48a   : > { %v9598_v33 = vpop.eup %9597  ;;  %8812 = vmatpush3.bf16.msra.mxu0 %v9449_v39  ;;  %v9463_v57 = vld [vmem:[%s10488_s27 + $0xe8] sm:$0xff]   ;;  %v9483_v39 = vld [vmem:[%s10488_s27 + $0x170] sm:$0xff]  }
 0x48b   : > { %v2834_v40 = vmul.f32 %v9598_v33, %v10914_v25  ;;  %v1189_v25 = vrot.slane %v10884_v54, %v10840_v16  ;;  %v9451_v33 = vld [vmem:[%s10488_s27 + $0x70] sm:$0xff]   ;;  %v9481_v19 = vld [vmem:[%s10488_s27 + $0x128] sm:$0xff]  }
 0x48c   : > { %8813 = vmatprep.subr.bf16.mxu0 %v9451_v33 }
 0x48d   : > { %v2835_v46 = vpack.c.bf16 %v2834_v40, %v2834_v40  ;;  %v2631_v49 = vadd.f32 %v10895_v3, %v1189_v25  ;;  %v9453_v40 = vld [vmem:[%s10488_s27 + $0x30] sm:$0xff]   ;;  %v9460_v25 = vld [vmem:[%s10488_s27 + $0x140] sm:$0xff]  }
 0x48e   : > { %8814 = vmatpush3.bf16.msra.mxu0 %v9453_v40  ;;  %v9485_v40 = vld [vmem:[%s10488_s27 + $0x130] sm:$0xff]  }
 0x48f   : > { %9057 = vmatmul.mubr.msk.bf16.vlgmr.msra.gmra.mrb[28].mxu1 %vm2721_vm2, %v2835_v46  ;;  %v3034_v55 = vpop.xlane.xlu1 %3033  ;;  %v3086_v63 = vpack.c.bf16 %v2631_v49, %v2631_v49  ;;  %v9456_v46 = vld [vmem:[%s10488_s27 + $0xd8] sm:$0xff]   ;;  %v9467_v49 = vld [vmem:[%s10488_s27 + $0xf0] sm:$0xff]  }
 0x490   : > { %9601 = vrcp.f32 %v3034_v55  ;;  %9067 = vmatpush3.bf16.msra.mxu1 %v2941_v45  ;;  %9068 = vmatprep.mubr.msk.bf16.mxu1 %vm10020_vm0, %v10019_v13  ;;  %v9455_v45 = vld [vmem:[%s10488_s27 + $0x78] sm:$0xff]  }
 0x491   : > { %9078 = vmatprep.subr.bf16.mxu1 %v10019_v13  ;;  %v3143_v1 = vsel %vm2737_vm1, %v3086_v63, 0  ;;  %v9458_v55 = vld [vmem:[%s10488_s27 + $0x98] sm:$0xff]   ;;  %8815 = vmatprep.subr.bf16.mxu0 %v9455_v45  ;;  %v9476_v63 = vld [vmem:[%s10488_s27 + $0x1c0] sm:$0xff]  }
 0x492   : > { %v9600_v48 = vpop.eup %9599  ;;  %8816 = vmatpush3.bf16.msra.mxu0 %v9457_v43  ;;  %v9488_v43 = vld [vmem:[%s10488_s27 + $0x1d8] sm:$0xff]  }
 0x493   : > { %v2935_v51 = vmul.f32 %v9600_v48, %v10918_v29  ;;  %v1193_v29 = vrot.slane %v10884_v54, %v10849_v22  ;;  %v9459_v48 = vld [vmem:[%s10488_s27 + $0xe0] sm:$0xff]   ;;  %8845 = vmatprep.subr.bf16.mxu0 %v9460_v25  ;;  %v9490_v25 = vld [vmem:[%s10488_s27 + $0x198] sm:$0xff]  }
 0x495   : > { %v2936_v50 = vpack.c.bf16 %v2935_v51, %v2935_v51  ;;  %v2633_v14 = vadd.f32 %v10897_v4, %v1193_v29  ;;  %v9461_v51 = vld [vmem:[%s10488_s27 + $0xa0] sm:$0xff]  }
 0x497   : > { %v3135_v53 = vpop.xlane.xlu0 %3134  ;;  %9069 = vmatmul.mubr.msk.bf16.vlgmr.msra.gmra.mrb[32].mxu1 %vm2721_vm2, %v2936_v50  ;;  %v9465_v50 = vld [vmem:[%s10488_s27 + $0xa8] sm:$0xff]  }
 0x498   : > { %9603 = vrcp.f32 %v3135_v53  ;;  %9079 = vmatpush3.bf16.msra.mxu1 %v3042_v31  ;;  %9080 = vmatprep.mubr.msk.bf16.mxu1 %vm10020_vm0, %v10019_v13  ;;  %v9469_v31 = vld [vmem:[%s10488_s27 + $0xb0] sm:$0xff]   ;;  %v9471_v53 = vld [vmem:[%s10488_s27 + $0xf8] sm:$0xff]  }
 0x499   : > { %9090 = vmatprep.subr.bf16.mxu1 %v10019_v13 }
 0x49a   : > { %v9602_v56 = vpop.eup %9601 }
 0x49b   : > { %v3036_v60 = vmul.f32 %v9602_v56, %v10922_v35  ;;  %v3187_v35 = vpack.c.bf16 %v2633_v14, %v2633_v14  ;;  %v9473_v56 = vld [vmem:[%s10488_s27 + $0xb8] sm:$0xff]  }
 0x49d   : > { %v3037_v3 = vpack.c.bf16 %v3036_v60, %v3036_v60  ;;  %v3244_v11 = vsel %vm2737_vm1, %v3187_v35, 0 }
 0x49f   : > { %9081 = vmatmul.mubr.msk.bf16.vlgmr.msra.gmra.mrb[36].mxu1 %vm2721_vm2, %v3037_v3  ;;  %v3236_v2 = vpop.xlane.xlu1 %3235 }
 0x4a0   : > { %9091 = vmatpush3.bf16.msra.mxu1 %v3143_v1  ;;  %9605 = vrcp.f32 %v3236_v2  ;;  %9092 = vmatprep.mubr.msk.bf16.mxu1 %vm10020_vm0, %v10019_v13 }
 0x4a1   : > { %9102 = vmatprep.subr.bf16.mxu1 %v10019_v13 }
 0x4a2   : > { %v9604_v5 = vpop.eup %9603 }
 0x4a3   : > { %v3137_v8 = vmul.f32 %v9604_v5, %v10926_v42  ;;  %v9462_v5 = vld [vmem:[%s10488_s27 + $0x100] sm:$0xff]  }
 0x4a5   : > { %v3138_v4 = vpack.c.bf16 %v3137_v8, %v3137_v8 }
 0x4a7   : > { %v3337_v12 = vpop.xlane.xlu0 %3336  ;;  %9093 = vmatmul.mubr.msk.bf16.vlgmr.msra.gmra.mrb[40].mxu1 %vm2721_vm2, %v3138_v4 }
 0x4a8   : > { %9607 = vrcp.f32 %v3337_v12  ;;  %9103 = vmatpush3.bf16.msra.mxu1 %v3244_v11  ;;  %9104 = vmatprep.mubr.msk.bf16.mxu1 %vm10020_vm0, %v10019_v13  ;;  %v9466_v11 = vld [vmem:[%s10488_s27 + $0x108] sm:$0xff]   ;;  %v9468_v12 = vld [vmem:[%s10488_s27 + $0x150] sm:$0xff]  }
 0x4a9   : > { %9114 = vmatprep.subr.bf16.mxu1 %v10019_v13 }
 0x4aa   : > { %v9606_v21 = vpop.eup %9605 }
 0x4ab   : > { %v3238_v42 = vmul.f32 %v9606_v21, %v10932_v52 }
 0x4ad   : > { %v3239_v23 = vpack.c.bf16 %v3238_v42, %v3238_v42  ;;  %v9470_v42 = vld [vmem:[%s10488_s27 + $0x110] sm:$0xff]  }
 0x4af   : > { %9105 = vmatmul.mubr.msk.bf16.vlgmr.msra.gmra.mrb[44].mxu1 %vm2721_vm2, %v3239_v23  ;;  %v3438_v26 = vpop.xlane.xlu1 %3437 }
 0x4b0   : > { %9609 = vrcp.f32 %v3438_v26  ;;  %9115 = vmatpush3.bf16.msra.mxu1 %v3345_v6  ;;  %9116 = vmatprep.mubr.msk.bf16.mxu1 %vm10020_vm0, %v10019_v13  ;;  %v9472_v6 = vld [vmem:[%s10488_s27 + $0x158] sm:$0xff]   ;;  %v9475_v26 = vld [vmem:[%s10488_s27 + $0x160] sm:$0xff]  }
 0x4b1   : > { %9126 = vmatprep.subr.bf16.mxu1 %v10019_v13 }
 0x4b2   : > { %v9608_v52 = vpop.eup %9607 }
 0x4b3   : > { %v3339_v54 = vmul.f32 %v9608_v52, %v10936_v34 }
 0x4b5   : > { %v3340_v28 = vpack.c.bf16 %v3339_v54, %v3339_v54 }
 0x4b7   : > { %9117 = vmatmul.mubr.msk.bf16.vlgmr.msra.gmra.mrb[48].mxu1 %vm2721_vm2, %v3340_v28  ;;  %v9477_v28 = vld [vmem:[%s10488_s27 + $0x120] sm:$0xff]  }
 0x4b8   : > { %9127 = vmatpush3.bf16.msra.mxu1 %v3446_v18  ;;  %9128 = vmatprep.mubr.msk.bf16.mxu1 %vm10020_vm0, %v10019_v13 }
 0x4b9   : > { %8823 = vmatprep.subr.bf16.mxu1 %v9444_v41  ;;  %v9478_v41 = vld [vmem:[%s10488_s27 + $0x180] sm:$0xff]  }
 0x4ba   : > { %v9610_v30 = vpop.eup %9609 }
 0x4bb   : > { %v3440_v34 = vmul.f32 %v9610_v30, %v10940_v58  ;;  %v9452_v58 = vld [vmem:[%s10488_s27 + $0xd0] sm:$0xff]  }
 0x4bd   : > { %v3441_v27 = vpack.c.bf16 %v3440_v34, %v3440_v34  ;;  %v9479_v34 = vld [vmem:[%s10488_s27 + $0x168] sm:$0xff]  }
 0x4bf   : > { %9129 = vmatmul.mubr.msk.bf16.vlgmr.msra.gmra.mrb[52].mxu1 %vm2721_vm2, %v3441_v27 }
 0x4c0   : > { %8824 = vmatpush3.bf16.msra.mxu1 %v9446_v32  ;;  %v9480_v32 = vld [vmem:[%s10488_s27 + $0x1c8] sm:$0xff]  }
 0x4c1   : > { %8825 = vmatprep.subr.bf16.mxu1 %v9448_v36  ;;  %v9482_v36 = vld [vmem:[%s10488_s27 + $0x188] sm:$0xff]  }
 0x4c4   : > { %8826 = vmatpush3.bf16.msra.mxu1 %v9450_v61  ;;  %v9484_v61 = vld [vmem:[%s10488_s27 + $0x1d0] sm:$0xff]  }
 0x4c5   : > { %8827 = vmatprep.subr.bf16.mxu1 %v9452_v58 }
 0x4c8   : > { %8828 = vmatpush3.bf16.msra.mxu1 %v9454_v20  ;;  %v9486_v20 = vld [vmem:[%s10488_s27 + $0x190] sm:$0xff]  }
 0x4c9   : > { %8829 = vmatprep.subr.bf16.mxu1 %v9456_v46  ;;  %v9487_v46 = vld [vmem:[%s10488_s27 + $0x178] sm:$0xff]  }
 0x4cc   : > { %8830 = vmatpush3.bf16.msra.mxu1 %v9458_v55 }
 0x4cd   : > { %8831 = vmatprep.subr.bf16.mxu1 %v9459_v48  ;;  %v9489_v48 = vld [vmem:[%s10488_s27 + $0x138] sm:$0xff]  }
 0x4d0   : > { %8832 = vmatpush3.bf16.msra.mxu1 %v9461_v51  ;;  %v9491_v51 = vld [vmem:[%s10488_s27 + $0x1e0] sm:$0xff]  }
 0x4d1   : > { %8833 = vmatprep.subr.bf16.mxu1 %v9463_v57 }
 0x4d4   : > { %8834 = vmatpush3.bf16.msra.mxu1 %v9465_v50 }
 0x4d5   : > { %8835 = vmatprep.subr.bf16.mxu1 %v9467_v49 }
 0x4d8   : > { %8836 = vmatpush3.bf16.msra.mxu1 %v9469_v31  ;;  %v9492_v31 = vld [vmem:[%s10488_s27 + $0x1a0] sm:$0xff]  }
 0x4d9   : > { %8837 = vmatprep.subr.bf16.mxu1 %v9471_v53 }
 0x4dc   : > { %8838 = vmatpush3.bf16.msra.mxu1 %v9473_v56 }
 0x4dd   : > { %8867 = vmatprep.subr.bf16.mxu1 %v9476_v63  ;;  %v9493_v63 = vld [vmem:[%s10488_s27 + $0x1e8] sm:$0xff]  }
 0x55a   : > { %v2775_v29 = vpop.f32.mrb[24].mxu1 }
 0x55b   : > { %v9046_v60 = vpop.f32.mrb[25].mxu1  ;;  %v3488_v35 = vpack.c.bf16 %v2775_v29, %v2775_v29 }
 0x55c   : > { %v2778_v3 = vpop.f32.mrb[26].mxu1  ;;  %v9494_v60 = vld [vmem:[%s10488_s27 + $0x1a8] sm:$0xff]  }
 0x55d   : > { %v9047_v1 = vpop.f32.mrb[27].mxu1  ;;  %v9495_v3 = vld [vmem:[%s10488_s27 + $0x1f0] sm:$0xff]  }
 0x562   : > { %v2876_v14 = vpop.f32.mrb[28].mxu1 }
 0x563   : > { %v3489_v2 = vpack.c.bf16 %v2876_v14, %v2876_v14  ;;  %v9058_v0 = vpop.f32.mrb[29].mxu1 }
 0x564   : > { %v2879_v8 = vpop.f32.mrb[30].mxu1 }
 0x565   : > { %v9059_v4 = vpop.f32.mrb[31].mxu1  ;;  %4044 = vmatprep.mubr.bf16.mxu0 %v3489_v2  ;;  %v9496_v2 = vld [vmem:[%s10488_s27 + $0x1b0] sm:$0xff]   ;;  %v9498_v8 = vld [vmem:[%s10488_s27 + $0x1b8] sm:$0xff]  }
 0x566   : > { %4045 = vmatmul.mubr.bf16.vlgmr.msra.gmra.mrb[56].mxu0 %v3488_v35 }
 0x567   : > { %8846 = vmatpush3.bf16.msra.mxu0 %v9462_v5  ;;  %v9497_v5 = vld [vmem:[%s10488_s27 + $0x1f8] sm:$0xff]   ;;  %s11898_s27 = sld [smem:[#allocation52_spill]] (!%p8745_p0) }
 0x568   : > { %8847 = vmatprep.subr.bf16.mxu0 %v9464_v9 }
 0x56a   : > { %v2977_v17 = vpop.f32.mrb[32].mxu1 }
 0x56b   : > { %v9070_v21 = vpop.f32.mrb[33].mxu1  ;;  %8848 = vmatpush3.bf16.msra.mxu0 %v9466_v11  ;;  %v3490_v18 = vpack.c.bf16 %v2977_v17, %v2977_v17 }
 0x56c   : > { %v2980_v62 = vpop.f32.mrb[34].mxu1  ;;  %8849 = vmatprep.subr.bf16.mxu0 %v9468_v12 }
 0x56d   : > { %v9071_v23 = vpop.f32.mrb[35].mxu1  ;;  %v4201_v62 = vld [vmem:[%s10495_s0 + $0x20] sm:$0xff]  ;;  %s11899_s17 = smov (!%p8745_p0), %s11898_s27 }
 0x56f   : > { %8850 = vmatpush3.bf16.msra.mxu0 %v9470_v42  ;;  %v4197_v42 = vld [vmem:[%s10495_s0] sm:$0xff] }
 0x570   : > { %8851 = vmatprep.subr.bf16.mxu0 %v9472_v6  ;;  %v4198_v6 = vld [vmem:[%s10495_s0 + $0x8] sm:$0xff]  ;;  %v8465_v23 = vcombine.low %v4197_v42, %v4201_v62 }
 0x572   : > { %v3078_v52 = vpop.f32.mrb[36].mxu1 }
 0x573   : > { %v3491_v54 = vpack.c.bf16 %v3078_v52, %v3078_v52  ;;  %v9082_v15 = vpop.f32.mrb[37].mxu1  ;;  %8852 = vmatpush3.bf16.msra.mxu0 %v9474_v24  ;;  %v8466_v24 = vcombine.high %v4197_v42, %v4201_v62  ;;  %v4205_v52 = vld [vmem:[%s10495_s0 + $0x40] sm:$0xff] }
 0x574   : > { %v3081_v30 = vpop.f32.mrb[38].mxu1  ;;  %8853 = vmatprep.subr.bf16.mxu0 %v9475_v26  ;;  %v4202_v26 = vld [vmem:[%s10495_s0 + $0x28] sm:$0xff] }
 0x575   : > { %v9083_v27 = vpop.f32.mrb[39].mxu1  ;;  %4084 = vmatprep.mubr.bf16.mxu1 %v3491_v54  ;;  %v4209_v54 = vld [vmem:[%s10495_s0 + $0x60] sm:$0xff]  ;;  %v8467_v15 = vcombine.low %v4198_v6, %v4202_v26  ;;  %v4210_v30 = vld [vmem:[%s10495_s0 + $0x68] sm:$0xff] }
 0x576   : > { %4085 = vmatmul.mubr.bf16.vlgmr.msra.gmra.mrb[56].mxu1 %v3490_v18  ;;  %v4206_v18 = vld [vmem:[%s10495_s0 + $0x48] sm:$0xff]  ;;  %v4217_v27 = vld [vmem:[%s10495_s0 + $0xa0] sm:$0xff] }
 0x577   : > { %8854 = vmatpush3.bf16.msra.mxu0 %v9477_v28  ;;  %8868 = vmatpush3.bf16.msra.mxu1 %v9478_v41  ;;  %v8468_v28 = vcombine.high %v4198_v6, %v4202_v26  ;;  %v8474_v41 = vcombine.high %v4205_v52, %v4209_v54  ;;  %v4253_v6 = vld [vmem:[%s10495_s0 + $0x1c0] sm:$0xff] }
 0x578   : > { %8855 = vmatprep.subr.bf16.mxu0 %v9479_v34  ;;  %8869 = vmatprep.subr.bf16.mxu1 %v9480_v32  ;;  %v4213_v34 = vld [vmem:[%s10495_s0 + $0x80] sm:$0xff]  ;;  %v8476_v32 = vcombine.high %v4206_v18, %v4210_v30 }
 0x57a   : > { %v3179_v33 = vpop.f32.mrb[40].mxu1 }
 0x57b   : > { %v9094_v58 = vpop.f32.mrb[41].mxu1  ;;  %8856 = vmatpush3.bf16.msra.mxu0 %v9481_v19  ;;  %8870 = vmatpush3.bf16.msra.mxu1 %v9482_v36  ;;  %v3492_v53 = vpack.c.bf16 %v3179_v33, %v3179_v33  ;;  %v4214_v19 = vld [vmem:[%s10495_s0 + $0x88] sm:$0xff]  ;;  %v8482_v33 = vcombine.high %v4213_v34, %v4217_v27 }
 0x57c   : > { %v3182_v45 = vpop.f32.mrb[42].mxu1  ;;  %8857 = vmatprep.subr.bf16.mxu0 %v9483_v39  ;;  %8871 = vmatprep.subr.bf16.mxu1 %v9484_v61  ;;  %v4218_v36 = vld [vmem:[%s10495_s0 + $0xa8] sm:$0xff]  ;;  %v8473_v39 = vcombine.low %v4205_v52, %v4209_v54  ;;  %v8475_v61 = vcombine.low %v4206_v18, %v4210_v30  ;;  %v4203_v18 = vld [vmem:[%s10495_s0 + $0x30] sm:$0xff]  ;;  %v4200_v30 = vld [vmem:[%s10495_s0 + $0x18] sm:$0xff] }
 0x57d   : > { %v9095_v55 = vpop.f32.mrb[43].mxu1  ;;  %v8484_v58 = vcombine.high %v4214_v19, %v4218_v36  ;;  %v4221_v45 = vld [vmem:[%s10495_s0 + $0xc0] sm:$0xff]  ;;  %v4258_v52 = vld [vmem:[%s10495_s0 + $0x1e8] sm:$0xff] }
 0x57f   : > { %8858 = vmatpush3.bf16.msra.mxu0 %v9485_v40  ;;  %8872 = vmatpush3.bf16.msra.mxu1 %v9486_v20  ;;  %v8481_v40 = vcombine.low %v4213_v34, %v4217_v27  ;;  %v8483_v20 = vcombine.low %v4214_v19, %v4218_v36  ;;  %v4204_v27 = vld [vmem:[%s10495_s0 + $0x38] sm:$0xff] }
 0x580   : > { %8859 = vmatprep.subr.bf16.mxu0 %v9487_v46  ;;  %8873 = vmatprep.subr.bf16.mxu1 %v9488_v43  ;;  %v4225_v46 = vld [vmem:[%s10495_s0 + $0xe0] sm:$0xff]  ;;  %v4222_v43 = vld [vmem:[%s10495_s0 + $0xc8] sm:$0xff]  ;;  %v8471_v19 = vcombine.low %v4200_v30, %v4204_v27  ;;  %v8472_v36 = vcombine.high %v4200_v30, %v4204_v27  ;;  %v4232_v27 = vld [vmem:[%s10495_s0 + $0x118] sm:$0xff] }
 0x581   : > { %v8490_v55 = vcombine.high %v4221_v45, %v4225_v46 }
 0x582   : > { %v3280_v57 = vpop.f32.mrb[44].mxu1 }
 0x583   : > { %v3493_v50 = vpack.c.bf16 %v3280_v57, %v3280_v57  ;;  %v9106_v49 = vpop.f32.mrb[45].mxu1  ;;  %8860 = vmatpush3.bf16.msra.mxu0 %v9489_v48  ;;  %8874 = vmatpush3.bf16.msra.mxu1 %v9490_v25  ;;  %v4226_v48 = vld [vmem:[%s10495_s0 + $0xe8] sm:$0xff]  ;;  %v8489_v25 = vcombine.low %v4221_v45, %v4225_v46 }
 0x584   : > { %v3283_v56 = vpop.f32.mrb[46].mxu1  ;;  %8875 = vmatprep.subr.bf16.mxu1 %v9491_v51  ;;  %4623 = vmatprep.subr.bf16.mxu0 %v8466_v24  ;;  %v8491_v51 = vcombine.low %v4222_v43, %v4226_v48  ;;  %v8492_v57 = vcombine.high %v4222_v43, %v4226_v48  ;;  %v4233_v49 = vld [vmem:[%s10495_s0 + $0x120] sm:$0xff]  ;;  %v4254_v24 = vld [vmem:[%s10495_s0 + $0x1c8] sm:$0xff] }
 0x585   : > { %v9107_v29 = vpop.f32.mrb[47].mxu1  ;;  %4124 = vmatprep.mubr.bf16.mxu0 %v3493_v50  ;;  %v4229_v50 = vld [vmem:[%s10495_s0 + $0x100] sm:$0xff] }
 0x586   : > { %4125 = vmatmul.mubr.bf16.vlgmr.msra.gmra.mrb[60].mxu0 %v3492_v53  ;;  %v8497_v53 = vcombine.low %v4229_v50, %v4233_v49  ;;  %v8498_v56 = vcombine.high %v4229_v50, %v4233_v49  ;;  %v4237_v29 = vld [vmem:[%s10495_s0 + $0x140] sm:$0xff] }
 0x587   : > { %8876 = vmatpush3.bf16.msra.mxu1 %v9492_v31  ;;  %4655 = vmatprep.mubr.bf16.mxu0 %v10018_v7  ;;  %v4230_v31 = vld [vmem:[%s10495_s0 + $0x108] sm:$0xff] }
 0x588   : > { %8877 = vmatprep.subr.bf16.mxu1 %v9493_v63  ;;  %4624 = vmatpush1.bf16.msra.mxu0 %v8465_v23  ;;  %v4234_v63 = vld [vmem:[%s10495_s0 + $0x128] sm:$0xff]  ;;  %v4257_v23 = vld [vmem:[%s10495_s0 + $0x1e0] sm:$0xff] }
 0x589   : > { %4625 = vmatprep.subr.bf16.mxu0 %v8474_v41  ;;  %v8522_v26 = vcombine.high %v4253_v6, %v4257_v23  ;;  %v8521_v54 = vcombine.low %v4253_v6, %v4257_v23  ;;  %v4199_v41 = vld [vmem:[%s10495_s0 + $0x10] sm:$0xff] }
 0x58a   : > { %v3381_v1 = vpop.f32.mrb[48].mxu1  ;;  %v8469_v34 = vcombine.low %v4199_v41, %v4203_v18 }
 0x58b   : > { %v9118_v14 = vpop.f32.mrb[49].mxu1  ;;  %8878 = vmatpush3.bf16.msra.mxu1 %v9494_v60  ;;  %v3494_v12 = vpack.c.bf16 %v3381_v1, %v3381_v1  ;;  %v4241_v60 = vld [vmem:[%s10495_s0 + $0x160] sm:$0xff]  ;;  %v8500_v1 = vcombine.high %v4230_v31, %v4234_v63 }
 0x58c   : > { %v3384_v0 = vpop.f32.mrb[50].mxu1  ;;  %8879 = vmatprep.subr.bf16.mxu1 %v9495_v3  ;;  %4626 = vmatpush1.bf16.msra.mxu0 %v8473_v39  ;;  %v8499_v3 = vcombine.low %v4230_v31, %v4234_v63  ;;  %v8506_v14 = vcombine.high %v4237_v29, %v4241_v60 }
 0x58d   : > { %v9119_v35 = vpop.f32.mrb[51].mxu1  ;;  %4627 = vmatprep.subr.bf16.mxu0 %v8482_v33  ;;  %v4242_v0 = vld [vmem:[%s10495_s0 + $0x168] sm:$0xff] }
 0x58e   : > { %v4245_v35 = vld [vmem:[%s10495_s0 + $0x180] sm:$0xff] }
 0x58f   : > { %8880 = vmatpush3.bf16.msra.mxu1 %v9496_v2  ;;  %v4238_v2 = vld [vmem:[%s10495_s0 + $0x148] sm:$0xff] }
 0x590   : > { %8881 = vmatprep.subr.bf16.mxu1 %v9497_v5  ;;  %4628 = vmatpush1.bf16.msra.mxu0 %v8481_v40  ;;  %v8508_v5 = vcombine.high %v4238_v2, %v4242_v0 }
 0x591   : > { %4629 = vmatprep.subr.bf16.mxu0 %v8490_v55 }
 0x592   : > { %v3482_v9 = vpop.f32.mrb[52].mxu1 }
 0x593   : > { %v3495_v4 = vpack.c.bf16 %v3482_v9, %v3482_v9  ;;  %v9130_v11 = vpop.f32.mrb[53].mxu1  ;;  %8882 = vmatpush3.bf16.msra.mxu1 %v9498_v8  ;;  %v4249_v8 = vld [vmem:[%s10495_s0 + $0x1a0] sm:$0xff]  ;;  %v4246_v9 = vld [vmem:[%s10495_s0 + $0x188] sm:$0xff] }
 0x594   : > { %v3485_v17 = vpop.f32.mrb[54].mxu1  ;;  %4664 = vmatprep.subr.bf16.mxu1 %v8468_v28  ;;  %4630 = vmatpush1.bf16.msra.mxu0 %v8489_v25  ;;  %v8505_v11 = vcombine.low %v4237_v29, %v4241_v60  ;;  %v8513_v42 = vcombine.low %v4245_v35, %v4249_v8  ;;  %v8524_v28 = vcombine.high %v4254_v24, %v4258_v52 }
 0x595   : > { %v9131_v21 = vpop.f32.mrb[55].mxu1  ;;  %4164 = vmatprep.mubr.bf16.mxu1 %v3495_v4  ;;  %4631 = vmatprep.subr.bf16.mxu0 %v8498_v56  ;;  %v4250_v4 = vld [vmem:[%s10495_s0 + $0x1a8] sm:$0xff]  ;;  %v8514_v17 = vcombine.high %v4245_v35, %v4249_v8  ;;  %v4212_v35 = vld [vmem:[%s10495_s0 + $0x78] sm:$0xff] }
 0x596   : > { %4165 = vmatmul.mubr.bf16.vlgmr.msra.gmra.mrb[60].mxu1 %v3494_v12  ;;  %v8507_v12 = vcombine.low %v4238_v2, %v4242_v0  ;;  %v8516_v21 = vcombine.high %v4246_v9, %v4250_v4  ;;  %v8515_v62 = vcombine.low %v4246_v9, %v4250_v4  ;;  %v4211_v0 = vld [vmem:[%s10495_s0 + $0x70] sm:$0xff] }
 0x597   : > { %4696 = vmatprep.mubr.bf16.mxu1 %v10018_v7  ;;  %4665 = vmatpush1.bf16.msra.mxu1 %v8467_v15  ;;  %v8523_v15 = vcombine.low %v4254_v24, %v4258_v52  ;;  %v4227_v52 = vld [vmem:[%s10495_s0 + $0xf0] sm:$0xff] }
 0x598   : > { %4666 = vmatprep.subr.bf16.mxu1 %v8476_v32  ;;  %4632 = vmatpush1.bf16.msra.mxu0 %v8497_v53  ;;  %v8470_v32 = vcombine.high %v4199_v41, %v4203_v18 }
 0x599   : > { %4633 = vmatprep.subr.bf16.mxu0 %v8506_v14  ;;  %v4207_v14 = vld [vmem:[%s10495_s0 + $0x50] sm:$0xff] }
 0x59a   : > { %v8478_v4 = vcombine.high %v4207_v14, %v4211_v0 }
 0x59b   : > { %4667 = vmatpush1.bf16.msra.mxu1 %v8475_v61 }
 0x59c   : > { %4668 = vmatprep.subr.bf16.mxu1 %v8484_v58  ;;  %4634 = vmatpush1.bf16.msra.mxu0 %v8505_v11 }
 0x59d   : > { %4635 = vmatprep.subr.bf16.mxu0 %v8514_v17  ;;  %v4219_v17 = vld [vmem:[%s10495_s0 + $0xb0] sm:$0xff] }
 0x59f   : > { %4669 = vmatpush1.bf16.msra.mxu1 %v8483_v20  ;;  %v905_v20 = vld [vmem:[%s10549_s8] sm:$0xff] }
 0x5a0   : > { %4670 = vmatprep.subr.bf16.mxu1 %v8492_v57  ;;  %4636 = vmatpush1.bf16.msra.mxu0 %v8513_v42  ;;  %v3627_v45 = vrot.slane %v905_v20, %v10795_v37  ;;  %v4220_v42 = vld [vmem:[%s10495_s0 + $0xb8] sm:$0xff] }
 0x5a1   : > { %4637 = vmatprep.subr.bf16.mxu0 %v8522_v26  ;;  %v4223_v26 = vld [vmem:[%s10495_s0 + $0xd0] sm:$0xff]  ;;  %v4240_v20 = vld [vmem:[%s10495_s0 + $0x158] sm:$0xff] }
 0x5a2   : > { %v8494_v18 = vcombine.high %v4223_v26, %v4227_v52 }
 0x5a3   : > { %4671 = vmatpush1.bf16.msra.mxu1 %v8491_v51 }
 0x5a4   : > { %4672 = vmatprep.subr.bf16.mxu1 %v8500_v1  ;;  %4638 = vmatpush1.bf16.msra.mxu0 %v8521_v54  ;;  %v4224_v54 = vld [vmem:[%s10495_s0 + $0xd8] sm:$0xff] }
 0x5a5   : > { %4705 = vmatprep.subr.bf16.mxu0 %v8470_v32  ;;  %v4235_v32 = vld [vmem:[%s10495_s0 + $0x130] sm:$0xff] }
 0x5a7   : > { %4673 = vmatpush1.bf16.msra.mxu1 %v8499_v3 }
 0x5a8   : > { %4674 = vmatprep.subr.bf16.mxu1 %v8508_v5  ;;  %v4208_v5 = vld [vmem:[%s10495_s0 + $0x58] sm:$0xff] }
 0x5a9   : > { %v8480_v11 = vcombine.high %v4208_v5, %v4212_v35  ;;  %v8479_v6 = vcombine.low %v4208_v5, %v4212_v35  ;;  %v4788_v5 = vld [vmem:[%s10532_s9] sm:$0xff] }
 0x5aa   : > { %v4796_v35 = vld [vmem:[%s10532_s9 + $0x40] sm:$0xff] }
 0x5ab   : > { %4675 = vmatpush1.bf16.msra.mxu1 %v8507_v12  ;;  %v4215_v12 = vld [vmem:[%s10495_s0 + $0x90] sm:$0xff] }
 0x5ac   : > { %4676 = vmatprep.subr.bf16.mxu1 %v8516_v21  ;;  %v4216_v21 = vld [vmem:[%s10495_s0 + $0x98] sm:$0xff]  ;;  %v8486_v23 = vcombine.high %v4215_v12, %v4219_v17 }
 0x5ad   : > { %v8488_v24 = vcombine.high %v4216_v21, %v4220_v42  ;;  %v8487_v41 = vcombine.low %v4216_v21, %v4220_v42  ;;  %v8530_v21 = vcombine.high %v4788_v5, %v4796_v35  ;;  %v4804_v42 = vld [vmem:[%s10532_s9 + $0x80] sm:$0xff] }
 0x5af   : > { %4677 = vmatpush1.bf16.msra.mxu1 %v8515_v62  ;;  %v8477_v62 = vcombine.low %v4207_v14, %v4211_v0 }
 0x5b0   : > { %4678 = vmatprep.subr.bf16.mxu1 %v8524_v28  ;;  %v8485_v28 = vcombine.low %v4215_v12, %v4219_v17 }
 0x5b3   : > { %4679 = vmatpush1.bf16.msra.mxu1 %v8523_v15  ;;  %v4228_v15 = vld [vmem:[%s10495_s0 + $0xf8] sm:$0xff] }
 0x5b4   : > { %4746 = vmatprep.subr.bf16.mxu1 %v8472_v36  ;;  %v8496_v30 = vcombine.high %v4224_v54, %v4228_v15  ;;  %v8493_v36 = vcombine.low %v4223_v26, %v4227_v52  ;;  %v8529_v26 = vcombine.low %v4788_v5, %v4796_v35 }
 0x639   : > { %v8817_v39 = vpop.f32.mrb[56].mxu0 }
 0x63a   : > { %v8818_v61 = vpop.f32.mrb[57].mxu0 }
 0x63b   : > { %v8819_v33 = vadd.f32 %v8818_v61, %v8817_v39  ;;  %v8820_v58 = vpop.f32.mrb[58].mxu0  ;;  %v8495_v39 = vcombine.low %v4224_v54, %v4228_v15  ;;  %v4820_v15 = vld [vmem:[%s10532_s9 + $0x100] sm:$0xff] }
 0x63c   : > { %v8821_v40 = vpop.f32.mrb[59].mxu0  ;;  %v4239_v58 = vld [vmem:[%s10495_s0 + $0x150] sm:$0xff] }
 0x63d   : > { %v4047_v55 = vadd.f32 %v8819_v33, %v3627_v45  ;;  %v4243_v40 = vld [vmem:[%s10495_s0 + $0x170] sm:$0xff]  ;;  %v4244_v45 = vld [vmem:[%s10495_s0 + $0x178] sm:$0xff] }
 0x649   : > { %v8839_v46 = vpop.f32.mrb[56].mxu1 }
 0x64a   : > { %v8840_v43 = vpop.f32.mrb[57].mxu1 }
 0x64b   : > { %v8841_v48 = vadd.f32 %v8840_v43, %v8839_v46  ;;  %v8842_v25 = vpop.f32.mrb[58].mxu1 }
 0x64c   : > { %v8843_v51 = vpop.f32.mrb[59].mxu1  ;;  %v4247_v25 = vld [vmem:[%s10495_s0 + $0x190] sm:$0xff] }
 0x64d   : > { %v4087_v57 = vadd.f32 %v8841_v48, %v4047_v55  ;;  %v8510_v55 = vcombine.high %v4239_v58, %v4243_v40  ;;  %v8512_v48 = vcombine.high %v4240_v20, %v4244_v45  ;;  %v4251_v51 = vld [vmem:[%s10495_s0 + $0x1b0] sm:$0xff] }
 0x659   : > { %v8861_v50 = vpop.f32.mrb[60].mxu0 }
 0x65a   : > { %v8862_v49 = vpop.f32.mrb[61].mxu0 }
 0x65b   : > { %v8863_v31 = vadd.f32 %v8862_v49, %v8861_v50  ;;  %v8864_v53 = vpop.f32.mrb[62].mxu0  ;;  %v4252_v50 = vld [vmem:[%s10495_s0 + $0x1b8] sm:$0xff]  ;;  %v8509_v49 = vcombine.low %v4239_v58, %v4243_v40 }
 0x65c   : > { %v8865_v56 = vpop.f32.mrb[63].mxu0  ;;  %v8518_v53 = vcombine.high %v4247_v25, %v4251_v51 }
 0x65d   : > { %v4127_v63 = vadd.f32 %v8863_v31, %v4087_v57  ;;  %v4248_v57 = vld [vmem:[%s10495_s0 + $0x198] sm:$0xff]  ;;  %v8511_v31 = vcombine.low %v4240_v20, %v4244_v45  ;;  %v4852_v20 = vld [vmem:[%s10532_s9 + $0x200] sm:$0xff] }
 0x65e   : > { %v8520_v56 = vcombine.high %v4248_v57, %v4252_v50  ;;  %v8519_v14 = vcombine.low %v4248_v57, %v4252_v50  ;;  %v4868_v57 = vld [vmem:[%s10532_s9 + $0x280] sm:$0xff] }
 0x669   : > { %v8883_v29 = vpop.f32.mrb[60].mxu1 }
 0x66a   : > { %v8884_v60 = vpop.f32.mrb[61].mxu1 }
 0x66b   : > { %v8885_v3 = vadd.f32 %v8884_v60, %v8883_v29  ;;  %v8886_v1 = vpop.f32.mrb[62].mxu1  ;;  %v4259_v29 = vld [vmem:[%s10495_s0 + $0x1f0] sm:$0xff]  ;;  %v4256_v60 = vld [vmem:[%s10495_s0 + $0x1d8] sm:$0xff] }
 0x66c   : > { %v8887_v2 = vpop.f32.mrb[63].mxu1  ;;  %v8517_v1 = vcombine.low %v4247_v25, %v4251_v51 }
 0x66d   : > { %v11119_v8 = vadd.f32 %v8885_v3, %v4127_v63  ;;  %v4255_v63 = vld [vmem:[%s10495_s0 + $0x1d0] sm:$0xff]  ;;  %v4260_v3 = vld [vmem:[%s10495_s0 + $0x1f8] sm:$0xff] }
 0x66e   : > { %v8526_v2 = vcombine.high %v4255_v63, %v4259_v29  ;;  %v8528_v0 = vcombine.high %v4256_v60, %v4260_v3  ;;  %v8525_v12 = vcombine.low %v4255_v63, %v4259_v29  ;;  %v8527_v17 = vcombine.low %v4256_v60, %v4260_v3  ;;  %v4884_v60 = vld [vmem:[%s10532_s9 + $0x300] sm:$0xff] }
 0x66f   : > { %v11123_v9 = vpack.c.bf16 %v11119_v8, %v11119_v8 }
 0x671   : > { %4656 = vmatmul.mubr.bf16.vlgmr.msra.gmra.mrb[64].mxu0 %v11123_v9  ;;  %4697 = vmatmul.mubr.bf16.vlgmr.msra.gmra.mrb[64].mxu1 %v11123_v9 }
 0x672   : > { %4706 = vmatpush1.bf16.msra.mxu0 %v8469_v34  ;;  %4747 = vmatpush1.bf16.msra.mxu1 %v8471_v19  ;;  %v4231_v34 = vld [vmem:[%s10495_s0 + $0x110] sm:$0xff]  ;;  %v4236_v19 = vld [vmem:[%s10495_s0 + $0x138] sm:$0xff] }
 0x673   : > { %4707 = vmatprep.subr.bf16.mxu0 %v8478_v4  ;;  %4748 = vmatprep.subr.bf16.mxu1 %v8480_v11  ;;  %v8502_v61 = vcombine.high %v4231_v34, %v4235_v32  ;;  %v8504_v33 = vcombine.high %v4232_v27, %v4236_v19  ;;  %v8501_v46 = vcombine.low %v4231_v34, %v4235_v32  ;;  %v4789_v4 = vld [vmem:[%s10532_s9 + $0x8] sm:$0xff] }
 0x674   : > { %4737 = vmatprep.mubr.bf16.mxu0 %v10018_v7  ;;  %4778 = vmatprep.mubr.bf16.mxu1 %v10018_v7  ;;  %v8503_v43 = vcombine.low %v4232_v27, %v4236_v19  ;;  %v4797_v11 = vld [vmem:[%s10532_s9 + $0x48] sm:$0xff]  ;;  %v4836_v19 = vld [vmem:[%s10532_s9 + $0x180] sm:$0xff] }
 0x675   : > { %v8531_v52 = vcombine.low %v4789_v4, %v4797_v11 }
 0x676   : > { %4708 = vmatpush1.bf16.msra.mxu0 %v8477_v62  ;;  %4749 = vmatpush1.bf16.msra.mxu1 %v8479_v6  ;;  %v8532_v62 = vcombine.high %v4789_v4, %v4797_v11  ;;  %v4812_v6 = vld [vmem:[%s10532_s9 + $0xc0] sm:$0xff] }
 0x677   : > { %4709 = vmatprep.subr.bf16.mxu0 %v8486_v23  ;;  %4750 = vmatprep.subr.bf16.mxu1 %v8488_v24  ;;  %v4805_v23 = vld [vmem:[%s10532_s9 + $0x88] sm:$0xff]  ;;  %v8546_v54 = vcombine.high %v4804_v42, %v4812_v6  ;;  %v8545_v34 = vcombine.low %v4804_v42, %v4812_v6  ;;  %v4900_v4 = vld [vmem:[%s10532_s9 + $0x380] sm:$0xff] }
 0x678   : > { %v4813_v24 = vld [vmem:[%s10532_s9 + $0xc8] sm:$0xff] }
 0x679   : > { %v8547_v32 = vcombine.low %v4805_v23, %v4813_v24 }
 0x67a   : > { %4710 = vmatpush1.bf16.msra.mxu0 %v8485_v28  ;;  %4751 = vmatpush1.bf16.msra.mxu1 %v8487_v41  ;;  %v8548_v28 = vcombine.high %v4805_v23, %v4813_v24  ;;  %v4828_v41 = vld [vmem:[%s10532_s9 + $0x140] sm:$0xff]  ;;  %v4790_v23 = vld [vmem:[%s10532_s9 + $0x10] sm:$0xff] }
 0x67b   : > { %4711 = vmatprep.subr.bf16.mxu0 %v8494_v18  ;;  %4752 = vmatprep.subr.bf16.mxu1 %v8496_v30  ;;  %v4821_v18 = vld [vmem:[%s10532_s9 + $0x108] sm:$0xff]  ;;  %v8562_v27 = vcombine.high %v4820_v15, %v4828_v41 }
 0x67c   : > { %v4829_v30 = vld [vmem:[%s10532_s9 + $0x148] sm:$0xff] }
 0x67d   : > { %v8563_v58 = vcombine.low %v4821_v18, %v4829_v30 }
 0x67e   : > { %4712 = vmatpush1.bf16.msra.mxu0 %v8493_v36  ;;  %4753 = vmatpush1.bf16.msra.mxu1 %v8495_v39  ;;  %v8564_v36 = vcombine.high %v4821_v18, %v4829_v30  ;;  %v4844_v39 = vld [vmem:[%s10532_s9 + $0x1c0] sm:$0xff] }
 0x67f   : > { %4713 = vmatprep.subr.bf16.mxu0 %v8502_v61  ;;  %4754 = vmatprep.subr.bf16.mxu1 %v8504_v33  ;;  %v4837_v61 = vld [vmem:[%s10532_s9 + $0x188] sm:$0xff]  ;;  %v8578_v40 = vcombine.high %v4836_v19, %v4844_v39 }
 0x680   : > { %v4845_v33 = vld [vmem:[%s10532_s9 + $0x1c8] sm:$0xff] }
 0x681   : > { %v8580_v45 = vcombine.high %v4837_v61, %v4845_v33  ;;  %v8579_v25 = vcombine.low %v4837_v61, %v4845_v33 }
 0x682   : > { %4714 = vmatpush1.bf16.msra.mxu0 %v8501_v46  ;;  %4755 = vmatpush1.bf16.msra.mxu1 %v8503_v43  ;;  %v4860_v46 = vld [vmem:[%s10532_s9 + $0x240] sm:$0xff]  ;;  %v4853_v43 = vld [vmem:[%s10532_s9 + $0x208] sm:$0xff] }
 0x683   : > { %4715 = vmatprep.subr.bf16.mxu0 %v8510_v55  ;;  %4756 = vmatprep.subr.bf16.mxu1 %v8512_v48  ;;  %v4861_v55 = vld [vmem:[%s10532_s9 + $0x248] sm:$0xff]  ;;  %v8577_v48 = vcombine.low %v4836_v19, %v4844_v39  ;;  %v8594_v51 = vcombine.high %v4852_v20, %v4860_v46  ;;  %v4807_v19 = vld [vmem:[%s10532_s9 + $0x98] sm:$0xff] }
 0x684   : > { %v8596_v50 = vcombine.high %v4853_v43, %v4861_v55  ;;  %v8595_v63 = vcombine.low %v4853_v43, %v4861_v55 }
 0x686   : > { %4716 = vmatpush1.bf16.msra.mxu0 %v8509_v49  ;;  %4757 = vmatpush1.bf16.msra.mxu1 %v8511_v31  ;;  %v4876_v49 = vld [vmem:[%s10532_s9 + $0x2c0] sm:$0xff]  ;;  %v4869_v31 = vld [vmem:[%s10532_s9 + $0x288] sm:$0xff] }
 0x687   : > { %4717 = vmatprep.subr.bf16.mxu0 %v8518_v53  ;;  %4758 = vmatprep.subr.bf16.mxu1 %v8520_v56  ;;  %v4877_v53 = vld [vmem:[%s10532_s9 + $0x2c8] sm:$0xff]  ;;  %v8593_v56 = vcombine.low %v4852_v20, %v4860_v46  ;;  %v8610_v29 = vcombine.high %v4868_v57, %v4876_v49  ;;  %v4830_v20 = vld [vmem:[%s10532_s9 + $0x150] sm:$0xff]  ;;  %v4831_v46 = vld [vmem:[%s10532_s9 + $0x158] sm:$0xff] }
 0x688   : > { %v8612_v3 = vcombine.high %v4869_v31, %v4877_v53  ;;  %v8611_v5 = vcombine.low %v4869_v31, %v4877_v53 }
 0x68a   : > { %4718 = vmatpush1.bf16.msra.mxu0 %v8517_v1  ;;  %4759 = vmatpush1.bf16.msra.mxu1 %v8519_v14  ;;  %v4892_v1 = vld [vmem:[%s10532_s9 + $0x340] sm:$0xff]  ;;  %v4885_v14 = vld [vmem:[%s10532_s9 + $0x308] sm:$0xff] }
 0x68b   : > { %4719 = vmatprep.subr.bf16.mxu0 %v8526_v2  ;;  %4760 = vmatprep.subr.bf16.mxu1 %v8528_v0  ;;  %v4893_v2 = vld [vmem:[%s10532_s9 + $0x348] sm:$0xff]  ;;  %v8609_v0 = vcombine.low %v4868_v57, %v4876_v49  ;;  %v8626_v35 = vcombine.high %v4884_v60, %v4892_v1  ;;  %v8625_v42 = vcombine.low %v4884_v60, %v4892_v1  ;;  %v4846_v57 = vld [vmem:[%s10532_s9 + $0x1d0] sm:$0xff]  ;;  %v4847_v49 = vld [vmem:[%s10532_s9 + $0x1d8] sm:$0xff] }
 0x68c   : > { %v8628_v11 = vcombine.high %v4885_v14, %v4893_v2  ;;  %v4862_v60 = vld [vmem:[%s10532_s9 + $0x250] sm:$0xff]  ;;  %v4863_v1 = vld [vmem:[%s10532_s9 + $0x258] sm:$0xff] }
 0x68e   : > { %4720 = vmatpush1.bf16.msra.mxu0 %v8525_v12  ;;  %4761 = vmatpush1.bf16.msra.mxu1 %v8527_v17  ;;  %v4908_v12 = vld [vmem:[%s10532_s9 + $0x3c0] sm:$0xff]  ;;  %v4901_v17 = vld [vmem:[%s10532_s9 + $0x388] sm:$0xff] }
 0x68f   : > { %5640 = vmatprep.subr.bf16.mxu0 %v8530_v21  ;;  %5683 = vmatprep.subr.bf16.mxu1 %v8532_v62  ;;  %v4909_v21 = vld [vmem:[%s10532_s9 + $0x3c8] sm:$0xff]  ;;  %v8627_v62 = vcombine.low %v4885_v14, %v4893_v2  ;;  %v8642_v6 = vcombine.high %v4900_v4, %v4908_v12 }
 0x690   : > { %v8644_v24 = vcombine.high %v4901_v17, %v4909_v21  ;;  %v8643_v18 = vcombine.low %v4901_v17, %v4909_v21 }
 0x691   : > { %4738 = vmatmul.mubr.bf16.vlgmr.msra.gmra.mrb[68].mxu0 %v11123_v9  ;;  %4779 = vmatmul.mubr.bf16.vlgmr.msra.gmra.mrb[68].mxu1 %v11123_v9  ;;  %v8561_v9 = vcombine.low %v4820_v15, %v4828_v41  ;;  %v8641_v15 = vcombine.low %v4900_v4, %v4908_v12  ;;  %v903_v41 = vld [vmem:[%s10527_s1 + $0x8] sm:$0x3]  ;;  %v4878_v4 = vld [vmem:[%s10532_s9 + $0x2d0] sm:$0xff]  ;;  %v4879_v12 = vld [vmem:[%s10532_s9 + $0x2d8] sm:$0xff] }
 0x692   : > { %5641 = vmatpush1.bf16.msra.mxu0 %v8529_v26  ;;  %5684 = vmatpush1.bf16.msra.mxu1 %v8531_v52  ;;  %v4798_v26 = vld [vmem:[%s10532_s9 + $0x50] sm:$0xff]  ;;  %v4791_v52 = vld [vmem:[%s10532_s9 + $0x18] sm:$0xff] }
 0x693   : > { %5642 = vmatprep.subr.bf16.mxu0 %v8546_v54  ;;  %5685 = vmatprep.subr.bf16.mxu1 %v8548_v28  ;;  %v4799_v54 = vld [vmem:[%s10532_s9 + $0x58] sm:$0xff]  ;;  %v902_v28 = vld [vmem:[%s10527_s1] sm:$0xff]  ;;  %v8534_v30 = vcombine.high %v4790_v23, %v4798_v26  ;;  %v8533_v61 = vcombine.low %v4790_v23, %v4798_v26  ;;  %v4894_v23 = vld [vmem:[%s10532_s9 + $0x350] sm:$0xff] }
 0x694   : > { %5672 = vmatprep.mubr.bf16.mxu0 %v10018_v7  ;;  %5715 = vmatprep.mubr.bf16.mxu1 %v10018_v7  ;;  %v11199_v39 = vpack.c.bf16 %v903_v41, %v902_v28  ;;  %v8535_v33 = vcombine.low %v4791_v52, %v4799_v54  ;;  %v4895_v26 = vld [vmem:[%s10532_s9 + $0x358] sm:$0xff]  ;;  %v4902_v28 = vld [vmem:[%s10532_s9 + $0x390] sm:$0xff] }
 0x696   : > { %5643 = vmatpush1.bf16.msra.mxu0 %v8545_v34  ;;  %5686 = vmatpush1.bf16.msra.mxu1 %v8547_v32  ;;  %v4806_v34 = vld [vmem:[%s10532_s9 + $0x90] sm:$0xff]  ;;  %v8536_v32 = vcombine.high %v4791_v52, %v4799_v54 }
 0x697   : > { %5644 = vmatprep.subr.bf16.mxu0 %v8562_v27  ;;  %5687 = vmatprep.subr.bf16.mxu1 %v8564_v36  ;;  %v4814_v27 = vld [vmem:[%s10532_s9 + $0xd0] sm:$0xff]  ;;  %v4815_v36 = vld [vmem:[%s10532_s9 + $0xd8] sm:$0xff] }
 0x698   : > { %v8549_v43 = vcombine.low %v4806_v34, %v4814_v27  ;;  %v8551_v55 = vcombine.low %v4807_v19, %v4815_v36 }
 0x69a   : > { %5645 = vmatpush1.bf16.msra.mxu0 %v8561_v9  ;;  %5688 = vmatpush1.bf16.msra.mxu1 %v8563_v58  ;;  %v8550_v9 = vcombine.high %v4806_v34, %v4814_v27  ;;  %v4822_v58 = vld [vmem:[%s10532_s9 + $0x110] sm:$0xff]  ;;  %v4911_v34 = vld [vmem:[%s10532_s9 + $0x3d8] sm:$0xff] }
 0x69b   : > { %5646 = vmatprep.subr.bf16.mxu0 %v8578_v40  ;;  %5689 = vmatprep.subr.bf16.mxu1 %v8580_v45  ;;  %v8552_v40 = vcombine.high %v4807_v19, %v4815_v36  ;;  %v4823_v45 = vld [vmem:[%s10532_s9 + $0x118] sm:$0xff]  ;;  %v8565_v31 = vcombine.low %v4822_v58, %v4830_v20 }
 0x69c   : > { %v8567_v53 = vcombine.low %v4823_v45, %v4831_v46 }
 0x69e   : > { %5647 = vmatpush1.bf16.msra.mxu0 %v8577_v48  ;;  %5690 = vmatpush1.bf16.msra.mxu1 %v8579_v25  ;;  %v8566_v48 = vcombine.high %v4822_v58, %v4830_v20  ;;  %v4838_v25 = vld [vmem:[%s10532_s9 + $0x190] sm:$0xff]  ;;  %v4808_v20 = vld [vmem:[%s10532_s9 + $0xa0] sm:$0xff] }
 0x69f   : > { %5648 = vmatprep.subr.bf16.mxu0 %v8594_v51  ;;  %5691 = vmatprep.subr.bf16.mxu1 %v8596_v50  ;;  %v8568_v51 = vcombine.high %v4823_v45, %v4831_v46  ;;  %v4839_v50 = vld [vmem:[%s10532_s9 + $0x198] sm:$0xff]  ;;  %v8581_v14 = vcombine.low %v4838_v25, %v4846_v57  ;;  %v4816_v45 = vld [vmem:[%s10532_s9 + $0xe0] sm:$0xff] }
 0x6a0   : > { %v8583_v2 = vcombine.low %v4839_v50, %v4847_v49 }
 0x6a2   : > { %5649 = vmatpush1.bf16.msra.mxu0 %v8593_v56  ;;  %5692 = vmatpush1.bf16.msra.mxu1 %v8595_v63  ;;  %v8582_v56 = vcombine.high %v4838_v25, %v4846_v57  ;;  %v4854_v63 = vld [vmem:[%s10532_s9 + $0x210] sm:$0xff]  ;;  %v8553_v25 = vcombine.low %v4808_v20, %v4816_v45  ;;  %v4840_v57 = vld [vmem:[%s10532_s9 + $0x1a0] sm:$0xff] }
 0x6a3   : > { %5650 = vmatprep.subr.bf16.mxu0 %v8610_v29  ;;  %5693 = vmatprep.subr.bf16.mxu1 %v8612_v3  ;;  %v8584_v29 = vcombine.high %v4839_v50, %v4847_v49  ;;  %v4855_v3 = vld [vmem:[%s10532_s9 + $0x218] sm:$0xff]  ;;  %v8597_v17 = vcombine.low %v4854_v63, %v4862_v60  ;;  %v4848_v50 = vld [vmem:[%s10532_s9 + $0x1e0] sm:$0xff] }
 0x6a4   : > { %v8599_v21 = vcombine.low %v4855_v3, %v4863_v1 }
 0x6a6   : > { %5651 = vmatpush1.bf16.msra.mxu0 %v8609_v0  ;;  %5694 = vmatpush1.bf16.msra.mxu1 %v8611_v5  ;;  %v8598_v0 = vcombine.high %v4854_v63, %v4862_v60  ;;  %v4870_v5 = vld [vmem:[%s10532_s9 + $0x290] sm:$0xff]  ;;  %v8585_v63 = vcombine.low %v4840_v57, %v4848_v50  ;;  %v4872_v60 = vld [vmem:[%s10532_s9 + $0x2a0] sm:$0xff] }
 0x6a7   : > { %5652 = vmatprep.subr.bf16.mxu0 %v8626_v35  ;;  %5695 = vmatprep.subr.bf16.mxu1 %v8628_v11  ;;  %v8600_v35 = vcombine.high %v4855_v3, %v4863_v1  ;;  %v4871_v11 = vld [vmem:[%s10532_s9 + $0x298] sm:$0xff]  ;;  %v8613_v52 = vcombine.low %v4870_v5, %v4878_v4  ;;  %v4880_v3 = vld [vmem:[%s10532_s9 + $0x2e0] sm:$0xff] }
 0x6a8   : > { %v8615_v54 = vcombine.low %v4871_v11, %v4879_v12 }
 0x6aa   : > { %5653 = vmatpush1.bf16.msra.mxu0 %v8625_v42  ;;  %5696 = vmatpush1.bf16.msra.mxu1 %v8627_v62  ;;  %v8614_v42 = vcombine.high %v4870_v5, %v4878_v4  ;;  %v4886_v62 = vld [vmem:[%s10532_s9 + $0x310] sm:$0xff]  ;;  %v8617_v5 = vcombine.low %v4872_v60, %v4880_v3  ;;  %v4904_v4 = vld [vmem:[%s10532_s9 + $0x3a0] sm:$0xff] }
 0x6ab   : > { %5654 = vmatprep.subr.bf16.mxu0 %v8642_v6  ;;  %5697 = vmatprep.subr.bf16.mxu1 %v8644_v24  ;;  %v8616_v6 = vcombine.high %v4871_v11, %v4879_v12  ;;  %v4887_v24 = vld [vmem:[%s10532_s9 + $0x318] sm:$0xff]  ;;  %v4912_v11 = vld [vmem:[%s10532_s9 + $0x3e0] sm:$0xff] }
 0x6ac   : > { %v8632_v41 = vcombine.high %v4887_v24, %v4895_v26  ;;  %v8631_v27 = vcombine.low %v4887_v24, %v4895_v26  ;;  %v4818_v24 = vld [vmem:[%s10532_s9 + $0xf0] sm:$0xff] }
 0x6ae   : > { %5655 = vmatpush1.bf16.msra.mxu0 %v8641_v15  ;;  %5698 = vmatpush1.bf16.msra.mxu1 %v8643_v18  ;;  %v8630_v15 = vcombine.high %v4886_v62, %v4894_v23  ;;  %v4910_v18 = vld [vmem:[%s10532_s9 + $0x3d0] sm:$0xff] }
 0x6af   : > { %5726 = vmatprep.subr.bf16.mxu0 %v8534_v30  ;;  %5769 = vmatprep.subr.bf16.mxu1 %v8536_v32  ;;  %v4903_v30 = vld [vmem:[%s10532_s9 + $0x398] sm:$0xff]  ;;  %v8629_v32 = vcombine.low %v4886_v62, %v4894_v23  ;;  %v8646_v19 = vcombine.high %v4902_v28, %v4910_v18  ;;  %v8649_v62 = vcombine.low %v4904_v4, %v4912_v11  ;;  %v4810_v23 = vld [vmem:[%s10532_s9 + $0xb0] sm:$0xff] }
 0x6b0   : > { %v8648_v36 = vcombine.high %v4903_v30, %v4911_v34  ;;  %v8647_v58 = vcombine.low %v4903_v30, %v4911_v34  ;;  %v4850_v30 = vld [vmem:[%s10532_s9 + $0x1f0] sm:$0xff] }
 0x6b1   : > { %5673 = vmatmul.mubr.bf16.vlgmr.msra.gmra.mrb[72].mxu0 %v11199_v39  ;;  %5716 = vmatmul.mubr.bf16.vlgmr.msra.gmra.mrb[72].mxu1 %v11199_v39 }
 0x6b2   : > { %5727 = vmatpush1.bf16.msra.mxu0 %v8533_v61  ;;  %5770 = vmatpush1.bf16.msra.mxu1 %v8535_v33  ;;  %v4792_v61 = vld [vmem:[%s10532_s9 + $0x20] sm:$0xff] }
 0x6b3   : > { %5728 = vmatprep.subr.bf16.mxu0 %v8550_v9  ;;  %5771 = vmatprep.subr.bf16.mxu1 %v8552_v40  ;;  %v4800_v33 = vld [vmem:[%s10532_s9 + $0x60] sm:$0xff]  ;;  %v8645_v9 = vcombine.low %v4902_v28, %v4910_v18  ;;  %v8557_v28 = vcombine.low %v4810_v23, %v4818_v24  ;;  %v4842_v18 = vld [vmem:[%s10532_s9 + $0x1b0] sm:$0xff] }
 0x6b4   : > { %5758 = vmatprep.mubr.bf16.mxu0 %v10018_v7  ;;  %5801 = vmatprep.mubr.bf16.mxu1 %v10018_v7  ;;  %v8538_v40 = vcombine.high %v4792_v61, %v4800_v33  ;;  %v8537_v46 = vcombine.low %v4792_v61, %v4800_v33  ;;  %v4874_v33 = vld [vmem:[%s10532_s9 + $0x2b0] sm:$0xff] }
 0x6b6   : > { %5729 = vmatpush1.bf16.msra.mxu0 %v8549_v43  ;;  %5772 = vmatpush1.bf16.msra.mxu1 %v8551_v55  ;;  %v8554_v43 = vcombine.high %v4808_v20, %v4816_v45  ;;  %v4824_v55 = vld [vmem:[%s10532_s9 + $0x120] sm:$0xff]  ;;  %v4890_v20 = vld [vmem:[%s10532_s9 + $0x330] sm:$0xff] }
 0x6b7   : > { %5730 = vmatprep.subr.bf16.mxu0 %v8566_v48  ;;  %5773 = vmatprep.subr.bf16.mxu1 %v8568_v51  ;;  %v4832_v48 = vld [vmem:[%s10532_s9 + $0x160] sm:$0xff]  ;;  %v4898_v45 = vld [vmem:[%s10532_s9 + $0x370] sm:$0xff] }
 0x6b8   : > { %v8570_v51 = vcombine.high %v4824_v55, %v4832_v48  ;;  %v8569_v49 = vcombine.low %v4824_v55, %v4832_v48  ;;  %v4906_v55 = vld [vmem:[%s10532_s9 + $0x3b0] sm:$0xff] }
 0x6b9   : > { %v4914_v48 = vld [vmem:[%s10532_s9 + $0x3f0] sm:$0xff] }
 0x6ba   : > { %5731 = vmatpush1.bf16.msra.mxu0 %v8565_v31  ;;  %5774 = vmatpush1.bf16.msra.mxu1 %v8567_v53  ;;  %v8586_v31 = vcombine.high %v4840_v57, %v4848_v50  ;;  %v4856_v53 = vld [vmem:[%s10532_s9 + $0x220] sm:$0xff]  ;;  %v8653_v57 = vcombine.low %v4906_v55, %v4914_v48 }
 0x6bb   : > { %5732 = vmatprep.subr.bf16.mxu0 %v8582_v56  ;;  %5775 = vmatprep.subr.bf16.mxu1 %v8584_v29  ;;  %v4864_v56 = vld [vmem:[%s10532_s9 + $0x260] sm:$0xff] }
 0x6bc   : > { %v8602_v29 = vcombine.high %v4856_v53, %v4864_v56  ;;  %v8601_v1 = vcombine.low %v4856_v53, %v4864_v56 }
 0x6be   : > { %5733 = vmatpush1.bf16.msra.mxu0 %v8581_v14  ;;  %5776 = vmatpush1.bf16.msra.mxu1 %v8583_v2  ;;  %v8618_v14 = vcombine.high %v4872_v60, %v4880_v3  ;;  %v4888_v2 = vld [vmem:[%s10532_s9 + $0x320] sm:$0xff]  ;;  %v4793_v3 = vld [vmem:[%s10532_s9 + $0x28] sm:$0xff] }
 0x6bf   : > { %5734 = vmatprep.subr.bf16.mxu0 %v8598_v0  ;;  %5777 = vmatprep.subr.bf16.mxu1 %v8600_v35  ;;  %v4896_v0 = vld [vmem:[%s10532_s9 + $0x360] sm:$0xff] }
 0x6c0   : > { %v8634_v35 = vcombine.high %v4888_v2, %v4896_v0  ;;  %v8633_v12 = vcombine.low %v4888_v2, %v4896_v0 }
 0x6c2   : > { %5735 = vmatpush1.bf16.msra.mxu0 %v8597_v17  ;;  %5778 = vmatpush1.bf16.msra.mxu1 %v8599_v21  ;;  %v8650_v17 = vcombine.high %v4904_v4, %v4912_v11  ;;  %v4794_v21 = vld [vmem:[%s10532_s9 + $0x30] sm:$0xff]  ;;  %v4825_v4 = vld [vmem:[%s10532_s9 + $0x128] sm:$0xff] }
 0x6c3   : > { %5736 = vmatprep.subr.bf16.mxu0 %v8614_v42  ;;  %5779 = vmatprep.subr.bf16.mxu1 %v8616_v6  ;;  %v4802_v42 = vld [vmem:[%s10532_s9 + $0x70] sm:$0xff]  ;;  %v4833_v11 = vld [vmem:[%s10532_s9 + $0x168] sm:$0xff] }
 0x6c4   : > { %v8542_v6 = vcombine.high %v4794_v21, %v4802_v42  ;;  %v8541_v26 = vcombine.low %v4794_v21, %v4802_v42  ;;  %v4841_v21 = vld [vmem:[%s10532_s9 + $0x1a8] sm:$0xff] }
 0x6c5   : > { %v4849_v42 = vld [vmem:[%s10532_s9 + $0x1e8] sm:$0xff] }
 0x6c6   : > { %5737 = vmatpush1.bf16.msra.mxu0 %v8613_v52  ;;  %5780 = vmatpush1.bf16.msra.mxu1 %v8615_v54  ;;  %v8558_v52 = vcombine.high %v4810_v23, %v4818_v24  ;;  %v4826_v54 = vld [vmem:[%s10532_s9 + $0x130] sm:$0xff]  ;;  %v4857_v23 = vld [vmem:[%s10532_s9 + $0x228] sm:$0xff] }
 0x6c7   : > { %5738 = vmatprep.subr.bf16.mxu0 %v8630_v15  ;;  %5781 = vmatprep.subr.bf16.mxu1 %v8632_v41  ;;  %v4834_v15 = vld [vmem:[%s10532_s9 + $0x170] sm:$0xff]  ;;  %v4865_v24 = vld [vmem:[%s10532_s9 + $0x268] sm:$0xff] }
 0x6c8   : > { %v8574_v41 = vcombine.high %v4826_v54, %v4834_v15  ;;  %v8573_v34 = vcombine.low %v4826_v54, %v4834_v15  ;;  %v4873_v54 = vld [vmem:[%s10532_s9 + $0x2a8] sm:$0xff] }
 0x6c9   : > { %v4881_v15 = vld [vmem:[%s10532_s9 + $0x2e8] sm:$0xff] }
 0x6ca   : > { %5739 = vmatpush1.bf16.msra.mxu0 %v8629_v32  ;;  %5782 = vmatpush1.bf16.msra.mxu1 %v8631_v27  ;;  %v8590_v32 = vcombine.high %v4842_v18, %v4850_v30  ;;  %v4858_v27 = vld [vmem:[%s10532_s9 + $0x230] sm:$0xff] }
 0x6cb   : > { %5740 = vmatprep.subr.bf16.mxu0 %v8646_v19  ;;  %5783 = vmatprep.subr.bf16.mxu1 %v8648_v36  ;;  %v4866_v19 = vld [vmem:[%s10532_s9 + $0x270] sm:$0xff]  ;;  %v8589_v36 = vcombine.low %v4842_v18, %v4850_v30  ;;  %v4889_v18 = vld [vmem:[%s10532_s9 + $0x328] sm:$0xff] }
 0x6cc   : > { %v8606_v61 = vcombine.high %v4858_v27, %v4866_v19  ;;  %v4897_v30 = vld [vmem:[%s10532_s9 + $0x368] sm:$0xff] }
 0x6ce   : > { %5741 = vmatpush1.bf16.msra.mxu0 %v8645_v9  ;;  %5784 = vmatpush1.bf16.msra.mxu1 %v8647_v58  ;;  %v4882_v9 = vld [vmem:[%s10532_s9 + $0x2f0] sm:$0xff]  ;;  %v8605_v58 = vcombine.low %v4858_v27, %v4866_v19  ;;  %v4905_v27 = vld [vmem:[%s10532_s9 + $0x3a8] sm:$0xff] }
 0x6cf   : > { %5812 = vmatprep.subr.bf16.mxu0 %v8538_v40  ;;  %v8622_v40 = vcombine.high %v4874_v33, %v4882_v9  ;;  %v4913_v19 = vld [vmem:[%s10532_s9 + $0x3e8] sm:$0xff] }
 0x6d1   : > { %5759 = vmatmul.mubr.bf16.vlgmr.msra.gmra.mrb[76].mxu0 %v11199_v39  ;;  %5802 = vmatmul.mubr.bf16.vlgmr.msra.gmra.mrb[76].mxu1 %v11199_v39 }
 0x6d2   : > { %5813 = vmatpush1.bf16.msra.mxu0 %v8537_v46  ;;  %5844 = vmatprep.mubr.bf16.mxu0 %v10018_v7  ;;  %v8621_v46 = vcombine.low %v4874_v33, %v4882_v9 }
 0x6d3   : > { %5814 = vmatprep.subr.bf16.mxu0 %v8554_v43  ;;  %5887 = vmatprep.mubr.bf16.mxu1 %v10018_v7  ;;  %v8638_v43 = vcombine.high %v4890_v20, %v4898_v45 }
 0x6d6   : > { %5815 = vmatpush1.bf16.msra.mxu0 %v8553_v25  ;;  %v8637_v25 = vcombine.low %v4890_v20, %v4898_v45 }
 0x6d7   : > { %5816 = vmatprep.subr.bf16.mxu0 %v8570_v51  ;;  %v8654_v51 = vcombine.high %v4906_v55, %v4914_v48  ;;  %v8651_v55 = vcombine.low %v4905_v27, %v4913_v19 }
 0x6da   : > { %5817 = vmatpush1.bf16.msra.mxu0 %v8569_v49 }
 0x6db   : > { %5818 = vmatprep.subr.bf16.mxu0 %v8586_v31 }
 0x6de   : > { %5819 = vmatpush1.bf16.msra.mxu0 %v8585_v63 }
 0x6df   : > { %5820 = vmatprep.subr.bf16.mxu0 %v8602_v29 }
 0x6e2   : > { %5821 = vmatpush1.bf16.msra.mxu0 %v8601_v1  ;;  %v4801_v1 = vld [vmem:[%s10532_s9 + $0x68] sm:$0xff] }
 0x6e3   : > { %5822 = vmatprep.subr.bf16.mxu0 %v8618_v14  ;;  %v4809_v14 = vld [vmem:[%s10532_s9 + $0xa8] sm:$0xff]  ;;  %v8539_v2 = vcombine.low %v4793_v3, %v4801_v1  ;;  %v8540_v0 = vcombine.high %v4793_v3, %v4801_v1  ;;  %v4835_v3 = vld [vmem:[%s10532_s9 + $0x178] sm:$0xff] }
 0x6e5   : > { %5855 = vmatprep.subr.bf16.mxu1 %v8540_v0  ;;  %v4851_v0 = vld [vmem:[%s10532_s9 + $0x1f8] sm:$0xff] }
 0x6e6   : > { %5823 = vmatpush1.bf16.msra.mxu0 %v8617_v5  ;;  %v4817_v5 = vld [vmem:[%s10532_s9 + $0xe8] sm:$0xff]  ;;  %5856 = vmatpush1.bf16.msra.mxu1 %v8539_v2  ;;  %v4843_v2 = vld [vmem:[%s10532_s9 + $0x1b8] sm:$0xff] }
 0x6e7   : > { %5824 = vmatprep.subr.bf16.mxu0 %v8634_v35  ;;  %v8556_v35 = vcombine.high %v4809_v14, %v4817_v5 }
 0x6e9   : > { %5857 = vmatprep.subr.bf16.mxu1 %v8556_v35  ;;  %v8592_v35 = vcombine.high %v4843_v2, %v4851_v0 }
 0x6ea   : > { %5825 = vmatpush1.bf16.msra.mxu0 %v8633_v12  ;;  %v8555_v12 = vcombine.low %v4809_v14, %v4817_v5 }
 0x6eb   : > { %5826 = vmatprep.subr.bf16.mxu0 %v8650_v17  ;;  %v8572_v17 = vcombine.high %v4825_v4, %v4833_v11 }
 0x6ec   : > { %5858 = vmatpush1.bf16.msra.mxu1 %v8555_v12  ;;  %v8591_v12 = vcombine.low %v4843_v2, %v4851_v0 }
 0x6ed   : > { %5859 = vmatprep.subr.bf16.mxu1 %v8572_v17  ;;  %v4875_v17 = vld [vmem:[%s10532_s9 + $0x2b8] sm:$0xff] }
 0x6ee   : > { %5827 = vmatpush1.bf16.msra.mxu0 %v8649_v62  ;;  %v8571_v62 = vcombine.low %v4825_v4, %v4833_v11  ;;  %v4859_v4 = vld [vmem:[%s10532_s9 + $0x238] sm:$0xff] }
 0x6ef   : > { %5898 = vmatprep.subr.bf16.mxu0 %v8542_v6  ;;  %v8588_v6 = vcombine.high %v4841_v21, %v4849_v42  ;;  %v4867_v11 = vld [vmem:[%s10532_s9 + $0x278] sm:$0xff] }
 0x6f0   : > { %5860 = vmatpush1.bf16.msra.mxu1 %v8571_v62 }
 0x6f1   : > { %5845 = vmatmul.mubr.bf16.vlgmr.msra.gmra.mrb[80].mxu0 %v11199_v39  ;;  %5861 = vmatprep.subr.bf16.mxu1 %v8588_v6  ;;  %v4891_v6 = vld [vmem:[%s10532_s9 + $0x338] sm:$0xff] }
 0x6f2   : > { %5899 = vmatpush1.bf16.msra.mxu0 %v8541_v26  ;;  %5930 = vmatprep.mubr.bf16.mxu0 %v10018_v7  ;;  %v8587_v26 = vcombine.low %v4841_v21, %v4849_v42  ;;  %v4883_v21 = vld [vmem:[%s10532_s9 + $0x2f8] sm:$0xff]  ;;  %v8607_v42 = vcombine.low %v4859_v4, %v4867_v11 }
 0x6f3   : > { %5900 = vmatprep.subr.bf16.mxu0 %v8558_v52  ;;  %v8604_v52 = vcombine.high %v4857_v23, %v4865_v24  ;;  %v8624_v62 = vcombine.high %v4875_v17, %v4883_v21 }
 0x6f4   : > { %5862 = vmatpush1.bf16.msra.mxu1 %v8587_v26 }
 0x6f5   : > { %5863 = vmatprep.subr.bf16.mxu1 %v8604_v52  ;;  %v11320_v52 = vld [vmem:[%s10504_s5] sm:$0xff] }
 0x6f6   : > { %5901 = vmatpush1.bf16.msra.mxu0 %v8557_v28  ;;  %v8603_v28 = vcombine.low %v4857_v23, %v4865_v24  ;;  %v4899_v23 = vld [vmem:[%s10532_s9 + $0x378] sm:$0xff]  ;;  %v8623_v24 = vcombine.low %v4875_v17, %v4883_v21 }
 0x6f7   : > { %5902 = vmatprep.subr.bf16.mxu0 %v8574_v41  ;;  %v8620_v41 = vcombine.high %v4873_v54, %v4881_v15  ;;  %v8640_v26 = vcombine.high %v4891_v6, %v4899_v23 }
 0x6f8   : > { %5864 = vmatpush1.bf16.msra.mxu1 %v8603_v28  ;;  %v4931_v28 = vrot.slane %v11320_v52, %v10813_v59 }
 0x6f9   : > { %5865 = vmatprep.subr.bf16.mxu1 %v8620_v41  ;;  %v4935_v41 = vrot.slane %v11320_v52, %v10827_v10 }
 0x6fa   : > { %5903 = vmatpush1.bf16.msra.mxu0 %v8573_v34  ;;  %v8619_v34 = vcombine.low %v4873_v54, %v4881_v15  ;;  %v4907_v54 = vld [vmem:[%s10532_s9 + $0x3b8] sm:$0xff] }
 0x6fb   : > { %5904 = vmatprep.subr.bf16.mxu0 %v8590_v32  ;;  %v8636_v32 = vcombine.high %v4889_v18, %v4897_v30  ;;  %v4915_v15 = vld [vmem:[%s10532_s9 + $0x3f8] sm:$0xff] }
 0x6fc   : > { %5866 = vmatpush1.bf16.msra.mxu1 %v8619_v34  ;;  %v8656_v34 = vcombine.high %v4907_v54, %v4915_v15 }
 0x6fd   : > { %5867 = vmatprep.subr.bf16.mxu1 %v8636_v32 }
 0x6fe   : > { %5905 = vmatpush1.bf16.msra.mxu0 %v8589_v36  ;;  %v8635_v36 = vcombine.low %v4889_v18, %v4897_v30  ;;  %v8639_v18 = vcombine.low %v4891_v6, %v4899_v23  ;;  %v4923_v30 = vrot.slane %v11320_v52, %v10795_v37  ;;  %v4943_v23 = vrot.slane %v11320_v52, %v10849_v22 }
 0x6ff   : > { %5906 = vmatprep.subr.bf16.mxu0 %v8606_v61  ;;  %v8652_v61 = vcombine.high %v4905_v27, %v4913_v19  ;;  %v4927_v27 = vrot.slane %v11320_v52, %v10803_v44 }
 0x700   : > { %5868 = vmatpush1.bf16.msra.mxu1 %v8635_v36  ;;  %v11333_v36 = vld [vmem:[%s10497_s21] sm:$0xff] }
 0x701   : > { %5869 = vmatprep.subr.bf16.mxu1 %v8652_v61  ;;  %v4278_v21 = vrot.slane %v11333_v36, %v10827_v10 }
 0x702   : > { %5907 = vmatpush1.bf16.msra.mxu0 %v8605_v58  ;;  %v4795_v58 = vld [vmem:[%s10532_s9 + $0x38] sm:$0xff] }
 0x703   : > { %5908 = vmatprep.subr.bf16.mxu0 %v8622_v40  ;;  %v4803_v40 = vld [vmem:[%s10532_s9 + $0x78] sm:$0xff] }
 0x704   : > { %5870 = vmatpush1.bf16.msra.mxu1 %v8651_v55 }
 0x706   : > { %5909 = vmatpush1.bf16.msra.mxu0 %v8621_v46 }
 0x707   : > { %5910 = vmatprep.subr.bf16.mxu0 %v8638_v43  ;;  %5888 = vmatmul.mubr.bf16.vlgmr.msra.gmra.mrb[80].mxu1 %v11199_v39 }
 0x708   : > { %5973 = vmatprep.mubr.bf16.mxu1 %v10018_v7  ;;  %v8608_v7 = vcombine.high %v4859_v4, %v4867_v11  ;;  %v4270_v11 = vrot.slane %v11333_v36, %v10803_v44 }
 0x70a   : > { %5911 = vmatpush1.bf16.msra.mxu0 %v8637_v25 }
 0x70b   : > { %5912 = vmatprep.subr.bf16.mxu0 %v8654_v51  ;;  %v8544_v51 = vcombine.high %v4795_v58, %v4803_v40 }
 0x70d   : > { %5941 = vmatprep.subr.bf16.mxu1 %v8544_v51 }
 0x70e   : > { %5913 = vmatpush1.bf16.msra.mxu0 %v8653_v57  ;;  %v4811_v57 = vld [vmem:[%s10532_s9 + $0xb8] sm:$0xff] }
 0x70f   : > { %9132 = vmatprep.subr.bf16.mxu0 %v10019_v13 }
 0x711   : > { %5931 = vmatmul.mubr.bf16.vlgmr.msra.gmra.mrb[84].mxu0 %v11199_v39 }
 0x712   : > { %9134 = vmatprep.mubr.msk.bf16.mxu0 %vm10020_vm0, %v10019_v13 }
 0x744   : > { %v11271_v50 = vpop.f32.mrb[64].mxu0  ;;  %v11273_v49 = vpop.f32.mrb[64].mxu1 }
 0x745   : > { %v11275_v31 = vpop.f32.mrb[65].mxu0  ;;  %v11277_v53 = vpop.f32.mrb[65].mxu1 }
 0x746   : > { %v4661_v56 = vpop.f32.mrb[66].mxu0  ;;  %v4702_v63 = vpop.f32.mrb[66].mxu1 }
 0x747   : > { %v4662_v29 = vpop.f32.mrb[67].mxu0  ;;  %v4703_v60 = vpop.f32.mrb[67].mxu1  ;;  %v4819_v56 = vld [vmem:[%s10532_s9 + $0xf8] sm:$0xff]  ;;  %v8543_v63 = vcombine.low %v4795_v58, %v4803_v40 }
 0x748   : > { %v8560_v29 = vcombine.high %v4811_v57, %v4819_v56  ;;  %v4827_v60 = vld [vmem:[%s10532_s9 + $0x138] sm:$0xff]  ;;  %v8559_v1 = vcombine.low %v4811_v57, %v4819_v56  ;;  %s11896_s9 = sld [smem:[#allocation37_spill]] }
 0x749   : > { %5942 = vmatpush1.bf16.msra.mxu1 %v8543_v63  ;;  %v8576_v14 = vcombine.high %v4827_v60, %v4835_v3  ;;  %v8575_v5 = vcombine.low %v4827_v60, %v4835_v3 }
 0x74a   : > { %5943 = vmatprep.subr.bf16.mxu1 %v8560_v29  ;;  %v4266_v29 = vrot.slane %v11333_v36, %v10795_v37 }
 0x74d   : > { %5944 = vmatpush1.bf16.msra.mxu1 %v8559_v1 }
 0x74e   : > { %5945 = vmatprep.subr.bf16.mxu1 %v8576_v14 }
 0x751   : > { %5946 = vmatpush1.bf16.msra.mxu1 %v8575_v5 }
 0x752   : > { %5947 = vmatprep.subr.bf16.mxu1 %v8592_v35  ;;  %v4658_v35 = vadd.f32 %v11271_v50, %v4266_v29  ;;  %v4274_v50 = vrot.slane %v11333_v36, %v10813_v59 }
 0x754   : > { %v5984_v4 = vpack.c.bf16 %v4658_v35, %v4658_v35 }
 0x755   : > { %5948 = vmatpush1.bf16.msra.mxu1 %v8591_v12  ;;  %v4660_v12 = vadd.f32 %v11275_v31, %v4270_v11  ;;  %v4947_v31 = vrot.slane %v11320_v52, %v10860_v38 }
 0x756   : > { %5949 = vmatprep.subr.bf16.mxu1 %v8608_v7  ;;  %v4699_v7 = vadd.f32 %v11273_v49, %v4274_v50  ;;  %v4701_v49 = vadd.f32 %v11277_v53, %v4278_v21 }
 0x758   : > { %v6188_v17 = vpack.c.bf16 %v4699_v7, %v4699_v7 }
 0x759   : > { %5950 = vmatpush1.bf16.msra.mxu1 %v8607_v42  ;;  %v4951_v42 = vrot.slane %v11320_v52, %v10871_v47 }
 0x75a   : > { %5951 = vmatprep.subr.bf16.mxu1 %v8624_v62  ;;  %v4939_v62 = vrot.slane %v11320_v52, %v10840_v16 }
 0x75d   : > { %5952 = vmatpush1.bf16.msra.mxu1 %v8623_v24 }
 0x75e   : > { %5953 = vmatprep.subr.bf16.mxu1 %v8640_v26 }
 0x761   : > { %5954 = vmatpush1.bf16.msra.mxu1 %v8639_v18 }
 0x762   : > { %5955 = vmatprep.subr.bf16.mxu1 %v8656_v34 }
 0x764   : > { %v11295_v33 = vpop.f32.mrb[68].mxu0  ;;  %v11297_v9 = vpop.f32.mrb[68].mxu1 }
 0x765   : > { %v11301_v20 = vpop.f32.mrb[69].mxu0  ;;  %v11303_v45 = vpop.f32.mrb[69].mxu1 }
 0x766   : > { %v4743_v46 = vpop.f32.mrb[70].mxu0  ;;  %v4784_v43 = vpop.f32.mrb[70].mxu1 }
 0x767   : > { %v4744_v48 = vpop.f32.mrb[71].mxu0  ;;  %v4785_v25 = vpop.f32.mrb[71].mxu1 }
 0x768   : > { %v8655_v48 = vcombine.low %v4907_v54, %v4915_v15 }
 0x76a   : > { %5956 = vmatpush1.bf16.msra.mxu1 %v8655_v48 }
 0x76b   : > { %9138 = vmatprep.subr.bf16.mxu1 %v10019_v13 }
 0x76d   : > { %5974 = vmatmul.mubr.bf16.vlgmr.msra.gmra.mrb[84].mxu1 %v11199_v39  ;;  %v6087_v39 = vpack.c.bf16 %v4660_v12, %v4660_v12 }
 0x76e   : > { %9140 = vmatprep.mubr.msk.bf16.mxu1 %vm10020_vm0, %v10019_v13 }
 0x784   : > { %v5674_v32 = vpop.f32.mrb[72].mxu0  ;;  %v5717_v19 = vpop.f32.mrb[72].mxu1 }
 0x785   : > { %v5676_v61 = vpop.f32.mrb[73].mxu0  ;;  %v5718_v58 = vadd.f32 %v5717_v19, %v4931_v28  ;;  %v5719_v40 = vpop.f32.mrb[73].mxu1  ;;  %v5675_v25 = vadd.f32 %v5674_v32, %v4923_v30 }
 0x786   : > { %v5678_v46 = vpop.f32.mrb[74].mxu0  ;;  %v5720_v43 = vadd.f32 %v5719_v40, %v4935_v41  ;;  %v5721_v55 = vpop.f32.mrb[74].mxu1  ;;  %v5677_v60 = vadd.f32 %v5676_v61, %v4927_v27  ;;  %v6289_v61 = vpack.c.bf16 %v4701_v49, %v4701_v49 }
 0x787   : > { %v5679_v51 = vadd.f32 %v5678_v46, %v4923_v30  ;;  %v5680_v57 = vpop.f32.mrb[75].mxu0  ;;  %v5722_v56 = vadd.f32 %v5721_v55, %v4931_v28  ;;  %v5723_v63 = vpop.f32.mrb[75].mxu1  ;;  %v4282_v30 = vrot.slane %v11333_v36, %v10840_v16 }
 0x788   : > { %v5681_v3 = vadd.f32 %v5680_v57, %v4927_v27  ;;  %v5724_v1 = vadd.f32 %v5723_v63, %v4935_v41  ;;  %v4286_v57 = vrot.slane %v11333_v36, %v10849_v22  ;;  %v4290_v63 = vrot.slane %v11333_v36, %v10860_v38 }
 0x789   : > { %v5985_v14 = vpack.c.bf16 %v5679_v51, %v5675_v25  ;;  %v6189_v2 = vpack.c.bf16 %v5722_v56, %v5718_v58  ;;  %v4740_v25 = vadd.f32 %v11295_v33, %v4282_v30 }
 0x78a   : > { %v6088_v0 = vpack.c.bf16 %v5681_v3, %v5677_v60  ;;  %v6290_v5 = vpack.c.bf16 %v5724_v1, %v5720_v43  ;;  %v4742_v56 = vadd.f32 %v11301_v20, %v4286_v57  ;;  %v4781_v29 = vadd.f32 %v11297_v9, %v4290_v63  ;;  %v11388_v60 = vld [vmem:[%s10504_s5 + $0x8] sm:$0xff] }
 0x78b   : > { %9133 = vmatpush3.bf16.xpose.msra.mxu0 %v5985_v14  ;;  %v6390_v51 = vpack.c.bf16 %v4740_v25, %v4740_v25  ;;  %v4294_v20 = vrot.slane %v11333_v36, %v10871_v47  ;;  %v4955_v1 = vrot.slane %v11388_v60, %v10795_v37  ;;  %v4959_v14 = vrot.slane %v11388_v60, %v10803_v44 }
 0x78c   : > { %9144 = vmatprep.subr.bf16.mxu0 %v10019_v13  ;;  %v6491_v33 = vpack.c.bf16 %v4742_v56, %v4742_v56  ;;  %v6592_v3 = vpack.c.bf16 %v4781_v29, %v4781_v29  ;;  %v4975_v21 = vrot.slane %v11388_v60, %v10849_v22 }
 0x78d   : > { %v4783_v9 = vadd.f32 %v11303_v45, %v4294_v20  ;;  %v4971_v45 = vrot.slane %v11388_v60, %v10840_v16 }
 0x78f   : > { %v6693_v12 = vpack.c.bf16 %v4783_v9, %v4783_v9 }
 0x792   : > { %9135 = vmatmul.mubr.bf16.vlgmr.msra.gmra.mrb[88].mxu0 %v5984_v4 }
 0x793   : > { %9145 = vmatpush3.bf16.xpose.msra.mxu0 %v6088_v0  ;;  %9146 = vmatprep.mubr.msk.bf16.mxu0 %vm10020_vm0, %v10019_v13 }
 0x794   : > { %9156 = vmatprep.subr.bf16.mxu0 %v10019_v13 }
 0x79a   : > { %9147 = vmatmul.mubr.bf16.vlgmr.msra.gmra.mrb[92].mxu0 %v6087_v39 }
 0x79b   : > { %9157 = vmatpush3.bf16.xpose.msra.mxu0 %v6189_v2  ;;  %9158 = vmatprep.mubr.msk.bf16.mxu0 %vm10020_vm0, %v10019_v13 }
 0x79c   : > { %9168 = vmatprep.subr.bf16.mxu0 %v10019_v13 }
 0x7a2   : > { %9159 = vmatmul.mubr.bf16.vlgmr.msra.gmra.mrb[96].mxu0 %v6188_v17 }
 0x7a3   : > { %9169 = vmatpush3.bf16.xpose.msra.mxu0 %v6290_v5  ;;  %9170 = vmatprep.mubr.msk.bf16.mxu0 %vm10020_vm0, %v10019_v13 }
 0x7a4   : > { %v5760_v6 = vpop.f32.mrb[76].mxu0  ;;  %9180 = vmatprep.subr.bf16.mxu0 %v10019_v13  ;;  %v5803_v24 = vpop.f32.mrb[76].mxu1 }
 0x7a5   : > { %v5762_v26 = vpop.f32.mrb[77].mxu0  ;;  %v5804_v54 = vadd.f32 %v5803_v24, %v4947_v31  ;;  %v5805_v15 = vpop.f32.mrb[77].mxu1  ;;  %v5761_v34 = vadd.f32 %v5760_v6, %v4939_v62 }
 0x7a6   : > { %v5764_v28 = vpop.f32.mrb[78].mxu0  ;;  %v5806_v41 = vadd.f32 %v5805_v15, %v4951_v42  ;;  %v5807_v18 = vpop.f32.mrb[78].mxu1  ;;  %v5763_v58 = vadd.f32 %v5762_v26, %v4943_v23 }
 0x7a7   : > { %v5765_v32 = vadd.f32 %v5764_v28, %v4939_v62  ;;  %v5766_v27 = vpop.f32.mrb[79].mxu0  ;;  %v5808_v53 = vadd.f32 %v5807_v18, %v4947_v31  ;;  %v5809_v19 = vpop.f32.mrb[79].mxu1 }
 0x7a8   : > { %v5767_v52 = vadd.f32 %v5766_v27, %v4943_v23  ;;  %v5810_v40 = vadd.f32 %v5809_v19, %v4951_v42 }
 0x7a9   : > { %v6391_v46 = vpack.c.bf16 %v5765_v32, %v5761_v34  ;;  %v6593_v43 = vpack.c.bf16 %v5808_v53, %v5804_v54 }
 0x7aa   : > { %v6492_v55 = vpack.c.bf16 %v5767_v52, %v5763_v58  ;;  %9171 = vmatmul.mubr.bf16.vlgmr.msra.gmra.mrb[100].mxu0 %v6289_v61  ;;  %v6694_v48 = vpack.c.bf16 %v5810_v40, %v5806_v41 }
 0x7ab   : > { %9181 = vmatpush3.bf16.xpose.msra.mxu0 %v6391_v46  ;;  %9182 = vmatprep.mubr.msk.bf16.mxu0 %vm10020_vm0, %v10019_v13 }
 0x7ac   : > { %9192 = vmatprep.subr.bf16.mxu0 %v10019_v13 }
 0x7b2   : > { %9183 = vmatmul.mubr.bf16.vlgmr.msra.gmra.mrb[104].mxu0 %v6390_v51 }
 0x7b3   : > { %9193 = vmatpush3.bf16.xpose.msra.mxu0 %v6492_v55  ;;  %9194 = vmatprep.mubr.msk.bf16.mxu0 %vm10020_vm0, %v10019_v13 }
 0x7b4   : > { %9204 = vmatprep.subr.bf16.mxu0 %v10019_v13 }
 0x7ba   : > { %9195 = vmatmul.mubr.bf16.vlgmr.msra.gmra.mrb[108].mxu0 %v6491_v33 }
 0x7bb   : > { %9205 = vmatpush3.bf16.xpose.msra.mxu0 %v6593_v43  ;;  %9206 = vmatprep.mubr.msk.bf16.mxu0 %vm10020_vm0, %v10019_v13 }
 0x7bc   : > { %9216 = vmatprep.subr.bf16.mxu0 %v10019_v13 }
 0x7c2   : > { %9207 = vmatmul.mubr.bf16.vlgmr.msra.gmra.mrb[112].mxu0 %v6592_v3 }
 0x7c3   : > { %9217 = vmatpush3.bf16.xpose.msra.mxu0 %v6694_v48  ;;  %9218 = vmatprep.mubr.msk.bf16.mxu0 %vm10020_vm0, %v10019_v13 }
 0x7c4   : > { %v5846_v2 = vpop.f32.mrb[80].mxu0 }
 0x7c5   : > { %v5847_v0 = vadd.f32 %v5846_v2, %v4955_v1  ;;  %v5848_v5 = vpop.f32.mrb[81].mxu0 }
 0x7c6   : > { %v11399_v35 = vadd.f32 %v5848_v5, %v4959_v14  ;;  %v5850_v4 = vpop.f32.mrb[82].mxu0 }
 0x7c7   : > { %v5851_v36 = vadd.f32 %v5850_v4, %v4955_v1  ;;  %v5852_v11 = vpop.f32.mrb[83].mxu0 }
 0x7c8   : > { %v11401_v50 = vadd.f32 %v5852_v11, %v4959_v14 }
 0x7c9   : > { %v5986_v39 = vpack.c.bf16 %v5851_v36, %v5847_v0 }
 0x7ca   : > { %9219 = vmatmul.mubr.bf16.vlgmr.msra.gmra.mrb[116].mxu0 %v6693_v12  ;;  %v6089_v7 = vpack.c.bf16 %v11401_v50, %v11399_v35 }
 0x7cb   : > { %v6045_v17 = vsel %vm6043_vm3, %v5986_v39, 0 }
 0x7cc   : > { %9139 = vmatpush3.bf16.msra.mxu1 %v6045_v17 }
 0x7cd   : > { %9150 = vmatprep.subr.bf16.mxu1 %v10019_v13 }
 0x7e4   : > { %v5932_v31 = vpop.f32.mrb[84].mxu0 }
 0x7e5   : > { %v11411_v42 = vadd.f32 %v5932_v31, %v4971_v45  ;;  %v5934_v62 = vpop.f32.mrb[85].mxu0 }
 0x7e6   : > { %v11413_v49 = vadd.f32 %v5934_v62, %v4975_v21  ;;  %v5936_v6 = vpop.f32.mrb[86].mxu0 }
 0x7e7   : > { %v11415_v23 = vadd.f32 %v5936_v6, %v4971_v45  ;;  %v5938_v24 = vpop.f32.mrb[87].mxu0 }
 0x7e8   : > { %v11417_v26 = vadd.f32 %v5938_v24, %v4975_v21 }
 0x7e9   : > { %v6392_v54 = vpack.c.bf16 %v11415_v23, %v11411_v42 }
 0x7ea   : > { %v6493_v15 = vpack.c.bf16 %v11417_v26, %v11413_v49 }
 0x7ec   : > { %v6550_v42 = vsel %vm6043_vm3, %v6493_v15, 0 }
 0x865   : > { %v6021_v28 = vpop.f32.mrb[88].mxu0 }
 0x866   : > { %v9136_v41 = vpop.f32.mrb[89].mxu0  ;;  %v6028_v18 = vsel %vm6027_vm4, %v6021_v28, -inf }
 0x867   : > { %6029 = vmax.xlane.f32.xlu0 %v6028_v18  ;;  %v6024_v30 = vpop.f32.mrb[90].mxu0 }
 0x868   : > { %v9137_v34 = vpop.f32.mrb[91].mxu0 }
 0x86d   : > { %v6124_v32 = vpop.f32.mrb[92].mxu0 }
 0x86e   : > { %v9148_v27 = vpop.f32.mrb[93].mxu0  ;;  %v6130_v53 = vsel %vm6027_vm4, %v6124_v32, -inf }
 0x86f   : > { %6131 = vmax.xlane.f32.xlu1 %v6130_v53  ;;  %v6127_v19 = vpop.f32.mrb[94].mxu0 }
 0x870   : > { %v9149_v61 = vpop.f32.mrb[95].mxu0 }
 0x875   : > { %v6225_v58 = vpop.f32.mrb[96].mxu0 }
 0x876   : > { %v9160_v52 = vpop.f32.mrb[97].mxu0  ;;  %v6231_v40 = vsel %vm6027_vm4, %v6225_v58, -inf }
 0x877   : > { %6232 = vmax.xlane.f32.xlu0 %v6231_v40  ;;  %v6228_v46 = vpop.f32.mrb[98].mxu0 }
 0x878   : > { %v9161_v43 = vpop.f32.mrb[99].mxu0 }
 0x87d   : > { %v6326_v55 = vpop.f32.mrb[100].mxu0 }
 0x87e   : > { %v9172_v48 = vpop.f32.mrb[101].mxu0  ;;  %v6332_v25 = vsel %vm6027_vm4, %v6326_v55, -inf }
 0x87f   : > { %6333 = vmax.xlane.f32.xlu1 %v6332_v25  ;;  %v6329_v51 = vpop.f32.mrb[102].mxu0 }
 0x880   : > { %v9173_v57 = vpop.f32.mrb[103].mxu0 }
 0x885   : > { %v6427_v56 = vpop.f32.mrb[104].mxu0 }
 0x886   : > { %v9184_v63 = vpop.f32.mrb[105].mxu0  ;;  %v6433_v33 = vsel %vm6027_vm4, %v6427_v56, -inf }
 0x887   : > { %6434 = vmax.xlane.f32.xlu0 %v6433_v33  ;;  %v6430_v29 = vpop.f32.mrb[106].mxu0 }
 0x888   : > { %v9185_v3 = vpop.f32.mrb[107].mxu0 }
 0x88d   : > { %v6528_v20 = vpop.f32.mrb[108].mxu0 }
 0x88e   : > { %v9196_v1 = vpop.f32.mrb[109].mxu0  ;;  %v6534_v14 = vsel %vm6027_vm4, %v6528_v20, -inf }
 0x88f   : > { %6535 = vmax.xlane.f32.xlu1 %v6534_v14  ;;  %v6531_v9 = vpop.f32.mrb[110].mxu0 }
 0x890   : > { %v9197_v2 = vpop.f32.mrb[111].mxu0 }
 0x891   : > { %v4963_v2 = vrot.slane %v11388_v60, %v10813_v59 }
 0x895   : > { %v6629_v0 = vpop.f32.mrb[112].mxu0 }
 0x896   : > { %v9208_v5 = vpop.f32.mrb[113].mxu0  ;;  %v6635_v4 = vsel %vm6027_vm4, %v6629_v0, -inf }
 0x897   : > { %6636 = vmax.xlane.f32.xlu0 %v6635_v4  ;;  %v6632_v36 = vpop.f32.mrb[114].mxu0  ;;  %v4967_v5 = vrot.slane %v11388_v60, %v10827_v10 }
 0x898   : > { %v9209_v11 = vpop.f32.mrb[115].mxu0 }
 0x89d   : > { %v11430_v12 = vpop.f32.mrb[116].mxu0 }
 0x89e   : > { %v9220_v39 = vpop.f32.mrb[117].mxu0  ;;  %v6736_v17 = vsel %vm6027_vm4, %v11430_v12, -inf }
 0x89f   : > { %6737 = vmax.xlane.f32.xlu1 %v6736_v17  ;;  %v6733_v45 = vpop.f32.mrb[118].mxu0 }
 0x8a0   : > { %v9221_v21 = vpop.f32.mrb[119].mxu0 }
 0x8f4   : > { %v6030_v31 = vpop.xlane.xlu0 %6029 }
 0x8f5   : > { %v6031_v62 = vsub.f32 %v6021_v28, %v6030_v31 }
 0x8f7   : > { %v6032_v6 = vmul.f32 1.442695, %v6031_v62 }
 0x8f9   : > { %9611 = vpow2.f32 %v6032_v6 }
 0x8fc   : > { %v6132_v24 = vpop.xlane.xlu1 %6131 }
 0x8fd   : > { %v6133_v41 = vsub.f32 %v6124_v32, %v6132_v24 }
 0x8ff   : > { %v6134_v18 = vmul.f32 1.442695, %v6133_v41 }
 0x901   : > { %9613 = vpow2.f32 %v6134_v18 }
 0x903   : > { %v11434_v30 = vpop.eup %9611 }
 0x904   : > { %v6233_v34 = vpop.xlane.xlu0 %6232  ;;  %v6034_v27 = vsel %vm6027_vm4, %v11434_v30, 0.0 }
 0x905   : > { %v6234_v53 = vsub.f32 %v6225_v58, %v6233_v34  ;;  %6035 = vadd.xlane.f32.xlu0 %v6034_v27  ;;  %v9649_v27 = vld [vmem:[#allocation2] sm:$0xff] }
 0x907   : > { %v6235_v19 = vmul.f32 1.442695, %v6234_v53  ;;  %v11480_v53 = vadd.f32 %v9649_v27, %v11119_v8  ;;  %v4979_v8 = vrot.slane %v11388_v60, %v10860_v38 }
 0x909   : > { %9615 = vpow2.f32 %v6235_v19 }
 0x90b   : > { %v11438_v61 = vpop.eup %9613 }
 0x90c   : > { %v6334_v52 = vpop.xlane.xlu1 %6333  ;;  %v6136_v28 = vsel %vm6027_vm4, %v11438_v61, 0.0 }
 0x90d   : > { %v6335_v40 = vsub.f32 %v6326_v55, %v6334_v52  ;;  %6137 = vadd.xlane.f32.xlu1 %v6136_v28  ;;  %v4176_v52 = vmul.f32 %v11480_v53, %v11480_v53 }
 0x90f   : > { %v6336_v32 = vmul.f32 1.442695, %v6335_v40  ;;  %v4983_v40 = vrot.slane %v11388_v60, %v10871_v47 }
 0x911   : > { %9617 = vpow2.f32 %v6336_v32 }
 0x913   : > { %v11442_v46 = vpop.eup %9615 }
 0x914   : > { %v6435_v43 = vpop.xlane.xlu0 %6434  ;;  %v6237_v48 = vsel %vm6027_vm4, %v11442_v46, 0.0 }
 0x915   : > { %v6436_v58 = vsub.f32 %v6427_v56, %v6435_v43  ;;  %6238 = vadd.xlane.f32.xlu0 %v6237_v48  ;;  %v5889_v56 = vpop.f32.mrb[80].mxu1 }
 0x916   : > { %v5891_v9 = vpop.f32.mrb[81].mxu1  ;;  %v11458_v36 = vadd.f32 %v5889_v56, %v4963_v2  ;;  %v9502_v56 = vld [vmem:[%s11896_s9 + $0x8] sm:$0xff]  }
 0x917   : > { %v6437_v25 = vmul.f32 1.442695, %v6436_v58  ;;  %v11460_v11 = vadd.f32 %v5891_v9, %v4967_v5  ;;  %v9504_v9 = vld [vmem:[%s11896_s9 + $0x10] sm:$0xff]  }
 0x919   : > { %9619 = vpow2.f32 %v6437_v25 }
 0x91b   : > { %v11446_v51 = vpop.eup %9617 }
 0x91c   : > { %v6536_v57 = vpop.xlane.xlu1 %6535  ;;  %v6338_v63 = vsel %vm6027_vm4, %v11446_v51, 0.0 }
 0x91d   : > { %v6537_v55 = vsub.f32 %v6528_v20, %v6536_v57  ;;  %6339 = vadd.xlane.f32.xlu1 %v6338_v63  ;;  %v5893_v20 = vpop.f32.mrb[82].mxu1 }
 0x91e   : > { %v11462_v39 = vadd.f32 %v5893_v20, %v4963_v2  ;;  %v5895_v17 = vpop.f32.mrb[83].mxu1  ;;  %v9505_v2 = vld [vmem:[%s11896_s9 + $0x58] sm:$0xff]   ;;  %v9507_v20 = vld [vmem:[%s11896_s9 + $0x60] sm:$0xff]  }
 0x91f   : > { %v6538_v33 = vmul.f32 1.442695, %v6537_v55  ;;  %v11464_v45 = vadd.f32 %v5895_v17, %v4967_v5  ;;  %v5975_v28 = vpop.f32.mrb[84].mxu1  ;;  %v9506_v5 = vld [vmem:[%s11896_s9 + $0x18] sm:$0xff]  }
 0x920   : > { %v5977_v32 = vpop.f32.mrb[85].mxu1  ;;  %v11493_v48 = vadd.f32 %v5975_v28, %v4979_v8 }
 0x921   : > { %9621 = vpow2.f32 %v6538_v33  ;;  %v6291_v31 = vpack.c.bf16 %v11464_v45, %v11460_v11  ;;  %v5979_v43 = vpop.f32.mrb[86].mxu1  ;;  %v11495_v58 = vadd.f32 %v5977_v32, %v4983_v40  ;;  %v9499_v33 = vld [vmem:[%s11896_s9 + $0x40] sm:$0xff]   ;;  %v6449_v11 = vsel %vm6043_vm3, %v6392_v54, 0 }
 0x922   : > { %v11497_v25 = vadd.f32 %v5979_v43, %v4979_v8  ;;  %v5981_v57 = vpop.f32.mrb[87].mxu1  ;;  %8921 = vmatprep.subr.bf16.mxu0 %v9499_v33 }
 0x923   : > { %v11450_v29 = vpop.eup %9619  ;;  %v11499_v63 = vadd.f32 %v5981_v57, %v4983_v40 }
 0x924   : > { %v6637_v3 = vpop.xlane.xlu0 %6636  ;;  %v6439_v1 = vsel %vm6027_vm4, %v11450_v29, 0.0  ;;  %v6594_v55 = vpack.c.bf16 %v11497_v25, %v11493_v48  ;;  %v9508_v48 = vld [vmem:[%s11896_s9 + $0xc0] sm:$0xff]  }
 0x925   : > { %v6638_v14 = vsub.f32 %v6629_v0, %v6637_v3  ;;  %6440 = vadd.xlane.f32.xlu0 %v6439_v1  ;;  %v6190_v0 = vpack.c.bf16 %v11462_v39, %v11458_v36  ;;  %v6695_v60 = vpack.c.bf16 %v11499_v63, %v11495_v58  ;;  %v9500_v3 = vld [vmem:[%s11896_s9] sm:$0xff]   ;;  %v9501_v1 = vld [vmem:[%s11896_s9 + $0x48] sm:$0xff]   ;;  %v6348_v36 = vsel %vm6043_vm3, %v6291_v31, 0 }
 0x926   : > { %8922 = vmatpush3.bf16.msra.mxu0 %v9500_v3  ;;  %v6651_v43 = vsel %vm6043_vm3, %v6594_v55, 0  ;;  %v9510_v55 = vld [vmem:[%s11896_s9 + $0x80] sm:$0xff]   ;;  %v9511_v58 = vld [vmem:[%s11896_s9 + $0x68] sm:$0xff]  }
 0x927   : > { %v6639_v4 = vmul.f32 1.442695, %v6638_v14  ;;  %8923 = vmatprep.subr.bf16.mxu0 %v9501_v1  ;;  %v9503_v14 = vld [vmem:[%s11896_s9 + $0x50] sm:$0xff]   ;;  %v6247_v28 = vsel %vm6043_vm3, %v6190_v0, 0  ;;  %v6752_v25 = vsel %vm6043_vm3, %v6695_v60, 0  ;;  %v9512_v63 = vld [vmem:[%s11896_s9 + $0xc8] sm:$0xff]  }
 0x928   : > { %v9513_v60 = vld [vmem:[%s11896_s9 + $0x28] sm:$0xff]   ;;  %v9515_v1 = vld [vmem:[%s11896_s9 + $0x70] sm:$0xff]  }
 0x929   : > { %9623 = vpow2.f32 %v6639_v4  ;;  %v9509_v4 = vld [vmem:[%s11896_s9 + $0x20] sm:$0xff]   ;;  %v9514_v3 = vld [vmem:[%s11896_s9 + $0x88] sm:$0xff]  }
 0x92a   : > { %8924 = vmatpush3.bf16.msra.mxu0 %v9502_v56  ;;  %v9517_v56 = vld [vmem:[%s11896_s9 + $0x30] sm:$0xff]  }
 0x92b   : > { %v11468_v21 = vpop.eup %9621  ;;  %8925 = vmatprep.subr.bf16.mxu0 %v9503_v14  ;;  %v9518_v14 = vld [vmem:[%s11896_s9 + $0x90] sm:$0xff]  }
 0x92c   : > { %v6738_v62 = vpop.xlane.xlu1 %6737  ;;  %v6540_v6 = vsel %vm6027_vm4, %v11468_v21, 0.0 }
 0x92d   : > { %v6739_v24 = vsub.f32 %v11430_v12, %v6738_v62  ;;  %6541 = vadd.xlane.f32.xlu1 %v6540_v6 }
 0x92e   : > { %8926 = vmatpush3.bf16.msra.mxu0 %v9504_v9  ;;  %v9519_v9 = vld [vmem:[%s11896_s9 + $0x78] sm:$0xff]  }
 0x92f   : > { %v6740_v41 = vmul.f32 1.442695, %v6739_v24  ;;  %8927 = vmatprep.subr.bf16.mxu0 %v9505_v2  ;;  %v9520_v2 = vld [vmem:[%s11896_s9 + $0xd8] sm:$0xff]  }
 0x931   : > { %9625 = vpow2.f32 %v6740_v41 }
 0x932   : > { %8928 = vmatpush3.bf16.msra.mxu0 %v9506_v5  ;;  %v9521_v5 = vld [vmem:[%s11896_s9 + $0x38] sm:$0xff]  }
 0x933   : > { %v11475_v18 = vpop.eup %9623  ;;  %8929 = vmatprep.subr.bf16.mxu0 %v9507_v20  ;;  %v9522_v20 = vld [vmem:[%s11896_s9 + $0x98] sm:$0xff]  }
 0x934   : > { %v6641_v34 = vsel %vm6027_vm4, %v11475_v18, 0.0 }
 0x935   : > { %6642 = vadd.xlane.f32.xlu0 %v6641_v34  ;;  %v6146_v34 = vsel %vm6043_vm3, %v6089_v7, 0 }
 0x936   : > { %8930 = vmatpush3.bf16.msra.mxu0 %v9509_v4  ;;  %v9523_v4 = vld [vmem:[%s11896_s9 + $0xe0] sm:$0xff]  }
 0x937   : > { %8931 = vmatprep.subr.bf16.mxu0 %v9511_v58  ;;  %v9545_v58 = vld [vmem:[%s11896_s9 + $0x128] sm:$0xff]  }
 0x939   : > { %4173 = vadd.xlane.f32.xlu0 %v11480_v53 }
 0x93a   : > { %8932 = vmatpush3.bf16.msra.mxu0 %v9513_v60  ;;  %v9547_v60 = vld [vmem:[%s11896_s9 + $0x170] sm:$0xff]  }
 0x93b   : > { %v11483_v19 = vpop.eup %9625  ;;  %8933 = vmatprep.subr.bf16.mxu0 %v9515_v1 }
 0x93c   : > { %v6742_v12 = vsel %vm6027_vm4, %v11483_v19, 0.0 }
 0x93d   : > { %6743 = vadd.xlane.f32.xlu1 %v6742_v12 }
 0x93e   : > { %8934 = vmatpush3.bf16.msra.mxu0 %v9517_v56  ;;  %v9549_v56 = vld [vmem:[%s11896_s9 + $0x130] sm:$0xff]  }
 0x93f   : > { %8935 = vmatprep.subr.bf16.mxu0 %v9519_v9 }
 0x941   : > { %4177 = vadd.xlane.f32.xlu1 %v4176_v52 }
 0x942   : > { %8936 = vmatpush3.bf16.msra.mxu0 %v9521_v5  ;;  %v9552_v5 = vld [vmem:[%s11896_s9 + $0x1d8] sm:$0xff]  }
 0x992   : > { %v6036_v17 = vpop.xlane.xlu0 %6035 }
 0x993   : > { %9627 = vrcp.f32 %v6036_v17  ;;  %v9524_v17 = vld [vmem:[%s11896_s9 + $0x140] sm:$0xff]  }
 0x994   : > { %8965 = vmatprep.subr.bf16.mxu0 %v9524_v17  ;;  %v9554_v17 = vld [vmem:[%s11896_s9 + $0x198] sm:$0xff]  }
 0x99a   : > { %v6138_v62 = vpop.xlane.xlu1 %6137 }
 0x99b   : > { %9629 = vrcp.f32 %v6138_v62  ;;  %v9525_v62 = vld [vmem:[%s11896_s9 + $0xa0] sm:$0xff]  }
 0x99d   : > { %v9628_v6 = vpop.eup %9627 }
 0x99e   : > { %v6038_v24 = vmul.f32 %v9628_v6, %v11434_v30  ;;  %v9527_v6 = vld [vmem:[%s11896_s9 + $0xe8] sm:$0xff]  }
 0x9a0   : > { %v6039_v41 = vpack.c.bf16 %v6038_v24, %v6038_v24  ;;  %v9529_v24 = vld [vmem:[%s11896_s9 + $0xa8] sm:$0xff]  }
 0x9a2   : > { %9141 = vmatmul.mubr.msk.bf16.vlgmr.msra.gmra.mrb[88].mxu1 %vm6027_vm4, %v6039_v41  ;;  %v6239_v27 = vpop.xlane.xlu0 %6238  ;;  %v9531_v41 = vld [vmem:[%s11896_s9 + $0xf0] sm:$0xff]  }
 0x9a3   : > { %9151 = vmatpush3.bf16.msra.mxu1 %v6146_v34  ;;  %9631 = vrcp.f32 %v6239_v27  ;;  %9152 = vmatprep.mubr.msk.bf16.mxu1 %vm10020_vm0, %v10019_v13  ;;  %v9533_v34 = vld [vmem:[%s11896_s9 + $0xb0] sm:$0xff]   ;;  %v9535_v27 = vld [vmem:[%s11896_s9 + $0xf8] sm:$0xff]  }
 0x9a4   : > { %9162 = vmatprep.subr.bf16.mxu1 %v10019_v13 }
 0x9a5   : > { %v9630_v12 = vpop.eup %9629 }
 0x9a6   : > { %v6140_v52 = vmul.f32 %v9630_v12, %v11438_v61  ;;  %v9537_v12 = vld [vmem:[%s11896_s9 + $0xb8] sm:$0xff]  }
 0x9a8   : > { %v6141_v30 = vpack.c.bf16 %v6140_v52, %v6140_v52  ;;  %v9540_v52 = vld [vmem:[%s11896_s9 + $0x1c0] sm:$0xff]  }
 0x9aa   : > { %9153 = vmatmul.mubr.msk.bf16.vlgmr.msra.gmra.mrb[92].mxu1 %vm6027_vm4, %v6141_v30  ;;  %v6340_v35 = vpop.xlane.xlu1 %6339 }
 0x9ab   : > { %9163 = vmatpush3.bf16.msra.mxu1 %v6247_v28  ;;  %9633 = vrcp.f32 %v6340_v35  ;;  %9164 = vmatprep.mubr.msk.bf16.mxu1 %vm10020_vm0, %v10019_v13 }
 0x9ac   : > { %9174 = vmatprep.subr.bf16.mxu1 %v10019_v13 }
 0x9ad   : > { %v9632_v50 = vpop.eup %9631 }
 0x9ae   : > { %v6241_v7 = vmul.f32 %v9632_v50, %v11442_v46 }
 0x9b0   : > { %v6242_v61 = vpack.c.bf16 %v6241_v7, %v6241_v7 }
 0x9b2   : > { %v6441_v8 = vpop.xlane.xlu0 %6440  ;;  %9165 = vmatmul.mubr.msk.bf16.vlgmr.msra.gmra.mrb[96].mxu1 %vm6027_vm4, %v6242_v61 }
 0x9b3   : > { %9635 = vrcp.f32 %v6441_v8  ;;  %9175 = vmatpush3.bf16.msra.mxu1 %v6348_v36  ;;  %9176 = vmatprep.mubr.msk.bf16.mxu1 %vm10020_vm0, %v10019_v13  ;;  %v9526_v36 = vld [vmem:[%s11896_s9 + $0x100] sm:$0xff]  }
 0x9b4   : > { %9186 = vmatprep.subr.bf16.mxu1 %v10019_v13 }
 0x9b5   : > { %v9634_v39 = vpop.eup %9633 }
 0x9b6   : > { %v6342_v0 = vmul.f32 %v9634_v39, %v11446_v51 }
 0x9b8   : > { %v6343_v46 = vpack.c.bf16 %v6342_v0, %v6342_v0 }
 0x9ba   : > { %9177 = vmatmul.mubr.msk.bf16.vlgmr.msra.gmra.mrb[100].mxu1 %vm6027_vm4, %v6343_v46  ;;  %v6542_v45 = vpop.xlane.xlu1 %6541  ;;  %v9528_v46 = vld [vmem:[%s11896_s9 + $0x148] sm:$0xff]  }
 0x9bb   : > { %9187 = vmatpush3.bf16.msra.mxu1 %v6449_v11  ;;  %9637 = vrcp.f32 %v6542_v45  ;;  %9188 = vmatprep.mubr.msk.bf16.mxu1 %vm10020_vm0, %v10019_v13  ;;  %v9530_v45 = vld [vmem:[%s11896_s9 + $0x108] sm:$0xff]  }
 0x9bc   : > { %9198 = vmatprep.subr.bf16.mxu1 %v10019_v13 }
 0x9bd   : > { %v9636_v31 = vpop.eup %9635 }
 0x9be   : > { %v6443_v40 = vmul.f32 %v9636_v31, %v11450_v29  ;;  %v9532_v31 = vld [vmem:[%s11896_s9 + $0x150] sm:$0xff]  }
 0x9c0   : > { %v6444_v51 = vpack.c.bf16 %v6443_v40, %v6443_v40 }
 0x9c2   : > { %v6643_v32 = vpop.xlane.xlu0 %6642  ;;  %9189 = vmatmul.mubr.msk.bf16.vlgmr.msra.gmra.mrb[104].mxu1 %vm6027_vm4, %v6444_v51 }
 0x9c3   : > { %9639 = vrcp.f32 %v6643_v32  ;;  %9199 = vmatpush3.bf16.msra.mxu1 %v6550_v42  ;;  %9200 = vmatprep.mubr.msk.bf16.mxu1 %vm10020_vm0, %v10019_v13  ;;  %v9534_v32 = vld [vmem:[%s11896_s9 + $0x110] sm:$0xff]  }
 0x9c4   : > { %9210 = vmatprep.subr.bf16.mxu1 %v10019_v13 }
 0x9c5   : > { %v9638_v23 = vpop.eup %9637 }
 0x9c6   : > { %v6544_v54 = vmul.f32 %v9638_v23, %v11468_v21  ;;  %v9536_v23 = vld [vmem:[%s11896_s9 + $0x158] sm:$0xff]  }
 0x9c8   : > { %v6545_v29 = vpack.c.bf16 %v6544_v54, %v6544_v54 }
 0x9ca   : > { %9201 = vmatmul.mubr.msk.bf16.vlgmr.msra.gmra.mrb[108].mxu1 %vm6027_vm4, %v6545_v29  ;;  %v6744_v49 = vpop.xlane.xlu1 %6743  ;;  %v9538_v29 = vld [vmem:[%s11896_s9 + $0x118] sm:$0xff]  }
 0x9cb   : > { %9211 = vmatpush3.bf16.msra.mxu1 %v6651_v43  ;;  %9641 = vrcp.f32 %v6744_v49  ;;  %9212 = vmatprep.mubr.msk.bf16.mxu1 %vm10020_vm0, %v10019_v13  ;;  %v9539_v43 = vld [vmem:[%s11896_s9 + $0x160] sm:$0xff]  }
 0x9cc   : > { %9222 = vmatprep.subr.bf16.mxu1 %v10019_v13 }
 0x9cd   : > { %v9640_v26 = vpop.eup %9639 }
 0x9ce   : > { %v6645_v15 = vmul.f32 %v9640_v26, %v11475_v18 }
 0x9d0   : > { %v6646_v21 = vpack.c.bf16 %v6645_v15, %v6645_v15 }
 0x9d2   : > { %9213 = vmatmul.mubr.msk.bf16.vlgmr.msra.gmra.mrb[112].mxu1 %vm6027_vm4, %v6646_v21  ;;  %v9541_v21 = vld [vmem:[%s11896_s9 + $0x120] sm:$0xff]  }
 0x9d3   : > { %9223 = vmatpush3.bf16.msra.mxu1 %v6752_v25  ;;  %9224 = vmatprep.mubr.msk.bf16.mxu1 %vm10020_vm0, %v10019_v13 }
 0x9d4   : > { %8943 = vmatprep.subr.bf16.mxu1 %v9508_v48  ;;  %v9542_v48 = vld [vmem:[%s11896_s9 + $0x180] sm:$0xff]  }
 0x9d5   : > { %v9642_v57 = vpop.eup %9641 }
 0x9d6   : > { %v6746_v18 = vmul.f32 %v9642_v57, %v11483_v19  ;;  %v9516_v19 = vld [vmem:[%s11896_s9 + $0xd0] sm:$0xff]  }
 0x9d8   : > { %v6747_v33 = vpack.c.bf16 %v6746_v18, %v6746_v18  ;;  %v9543_v18 = vld [vmem:[%s11896_s9 + $0x168] sm:$0xff]  }
 0x9da   : > { %9225 = vmatmul.mubr.msk.bf16.vlgmr.msra.gmra.mrb[116].mxu1 %vm6027_vm4, %v6747_v33 }
 0x9db   : > { %8944 = vmatpush3.bf16.msra.mxu1 %v9510_v55  ;;  %v9544_v55 = vld [vmem:[%s11896_s9 + $0x1c8] sm:$0xff]  }
 0x9dc   : > { %8945 = vmatprep.subr.bf16.mxu1 %v9512_v63  ;;  %v9546_v63 = vld [vmem:[%s11896_s9 + $0x188] sm:$0xff]  }
 0x9df   : > { %8946 = vmatpush3.bf16.msra.mxu1 %v9514_v3  ;;  %v9548_v3 = vld [vmem:[%s11896_s9 + $0x1d0] sm:$0xff]  }
 0x9e0   : > { %8947 = vmatprep.subr.bf16.mxu1 %v9516_v19 }
 0x9e3   : > { %8948 = vmatpush3.bf16.msra.mxu1 %v9518_v14  ;;  %v9550_v14 = vld [vmem:[%s11896_s9 + $0x190] sm:$0xff]  }
 0x9e4   : > { %8949 = vmatprep.subr.bf16.mxu1 %v9520_v2  ;;  %v9551_v2 = vld [vmem:[%s11896_s9 + $0x178] sm:$0xff]  }
 0x9e7   : > { %8950 = vmatpush3.bf16.msra.mxu1 %v9522_v20 }
 0x9e8   : > { %8951 = vmatprep.subr.bf16.mxu1 %v9523_v4  ;;  %v9553_v4 = vld [vmem:[%s11896_s9 + $0x138] sm:$0xff]  }
 0x9eb   : > { %8952 = vmatpush3.bf16.msra.mxu1 %v9525_v62  ;;  %v9555_v62 = vld [vmem:[%s11896_s9 + $0x1e0] sm:$0xff]  }
 0x9ec   : > { %8953 = vmatprep.subr.bf16.mxu1 %v9527_v6 }
 0x9ef   : > { %8954 = vmatpush3.bf16.msra.mxu1 %v9529_v24 }
 0x9f0   : > { %8955 = vmatprep.subr.bf16.mxu1 %v9531_v41 }
 0x9f3   : > { %8956 = vmatpush3.bf16.msra.mxu1 %v9533_v34  ;;  %v9556_v34 = vld [vmem:[%s11896_s9 + $0x1a0] sm:$0xff]  }
 0x9f4   : > { %8957 = vmatprep.subr.bf16.mxu1 %v9535_v27 }
 0x9f7   : > { %8958 = vmatpush3.bf16.msra.mxu1 %v9537_v12 }
 0x9f8   : > { %8987 = vmatprep.subr.bf16.mxu1 %v9540_v52  ;;  %v9557_v52 = vld [vmem:[%s11896_s9 + $0x1e8] sm:$0xff]  }
 0xa75   : > { %v6081_v30 = vpop.f32.mrb[88].mxu1 }
 0xa76   : > { %v9142_v28 = vpop.f32.mrb[89].mxu1  ;;  %v6794_v39 = vpack.c.bf16 %v6081_v30, %v6081_v30 }
 0xa77   : > { %v6084_v35 = vpop.f32.mrb[90].mxu1  ;;  %v9558_v28 = vld [vmem:[%s11896_s9 + $0x1a8] sm:$0xff]  }
 0xa78   : > { %v9143_v50 = vpop.f32.mrb[91].mxu1  ;;  %v9559_v35 = vld [vmem:[%s11896_s9 + $0x1f0] sm:$0xff]  }
 0xa7d   : > { %v6182_v7 = vpop.f32.mrb[92].mxu1 }
 0xa7e   : > { %v6795_v61 = vpack.c.bf16 %v6182_v7, %v6182_v7  ;;  %v9154_v8 = vpop.f32.mrb[93].mxu1 }
 0xa7f   : > { %v6185_v0 = vpop.f32.mrb[94].mxu1 }
 0xa80   : > { %v9155_v11 = vpop.f32.mrb[95].mxu1  ;;  %7350 = vmatprep.mubr.bf16.mxu0 %v6795_v61  ;;  %v9560_v61 = vld [vmem:[%s11896_s9 + $0x1b0] sm:$0xff]   ;;  %v9562_v0 = vld [vmem:[%s11896_s9 + $0x1b8] sm:$0xff]  }
 0xa81   : > { %7351 = vmatmul.mubr.bf16.vlgmr.msra.gmra.mrb[120].mxu0 %v6794_v39 }
 0xa82   : > { %8966 = vmatpush3.bf16.msra.mxu0 %v9526_v36  ;;  %v9561_v36 = vld [vmem:[%s11896_s9 + $0x1f8] sm:$0xff]  }
 0xa83   : > { %8967 = vmatprep.subr.bf16.mxu0 %v9528_v46 }
 0xa85   : > { %v6283_v40 = vpop.f32.mrb[96].mxu1 }
 0xa86   : > { %v9166_v51 = vpop.f32.mrb[97].mxu1  ;;  %8968 = vmatpush3.bf16.msra.mxu0 %v9530_v45  ;;  %v6796_v25 = vpack.c.bf16 %v6283_v40, %v6283_v40 }
 0xa87   : > { %v6286_v42 = vpop.f32.mrb[98].mxu1  ;;  %8969 = vmatprep.subr.bf16.mxu0 %v9532_v31 }
 0xa88   : > { %v9167_v54 = vpop.f32.mrb[99].mxu1 }
 0xa8a   : > { %8970 = vmatpush3.bf16.msra.mxu0 %v9534_v32  ;;  %v9563_v32 = vld [vmem:[%s10542_s15] sm:$0xff]  }
 0xa8b   : > { %8971 = vmatprep.subr.bf16.mxu0 %v9536_v23 }
 0xa8d   : > { %v6384_v49 = vpop.f32.mrb[100].mxu1 }
 0xa8e   : > { %v6797_v26 = vpack.c.bf16 %v6384_v49, %v6384_v49  ;;  %v9178_v15 = vpop.f32.mrb[101].mxu1  ;;  %8972 = vmatpush3.bf16.msra.mxu0 %v9538_v29  ;;  %v4174_v49 = vpop.xlane.xlu0 %4173 }
 0xa8f   : > { %v6387_v57 = vpop.f32.mrb[102].mxu1  ;;  %8973 = vmatprep.subr.bf16.mxu0 %v9539_v43 }
 0xa90   : > { %v9179_v33 = vpop.f32.mrb[103].mxu1  ;;  %7390 = vmatprep.mubr.bf16.mxu1 %v6797_v26  ;;  %v11642_v26 = vld [vmem:[%s10549_s8] sm:$0xff] }
 0xa91   : > { %7391 = vmatmul.mubr.bf16.vlgmr.msra.gmra.mrb[120].mxu1 %v6796_v25  ;;  %v6933_v15 = vrot.slane %v11642_v26, %v10827_v10  ;;  %v4175_v25 = vmul.f32 0.03125, %v4174_v49 }
 0xa92   : > { %8974 = vmatpush3.bf16.msra.mxu0 %v9541_v21  ;;  %8988 = vmatpush3.bf16.msra.mxu1 %v9542_v48  ;;  %v4178_v21 = vpop.xlane.xlu1 %4177 }
 0xa93   : > { %8975 = vmatprep.subr.bf16.mxu0 %v9543_v18  ;;  %8989 = vmatprep.subr.bf16.mxu1 %v9544_v55 }
 0xa95   : > { %v6485_v1 = vpop.f32.mrb[104].mxu1 }
 0xa96   : > { %v9190_v19 = vpop.f32.mrb[105].mxu1  ;;  %8976 = vmatpush3.bf16.msra.mxu0 %v9545_v58  ;;  %8990 = vmatpush3.bf16.msra.mxu1 %v9546_v63  ;;  %v6798_v27 = vpack.c.bf16 %v6485_v1, %v6485_v1  ;;  %v4179_v58 = vmul.f32 0.03125, %v4178_v21 }
 0xa97   : > { %v6488_v9 = vpop.f32.mrb[106].mxu1  ;;  %8977 = vmatprep.subr.bf16.mxu0 %v9547_v60  ;;  %8991 = vmatprep.subr.bf16.mxu1 %v9548_v3  ;;  %v4180_v3 = vmul.f32 %v4175_v25, %v4175_v25 }
 0xa98   : > { %v9191_v20 = vpop.f32.mrb[107].mxu1 }
 0xa99   : > { %v4181_v1 = vsub.f32 %v4179_v58, %v4180_v3  ;;  %v9578_v58 = vld [vmem:[%s10547_s30 + $0x38] sm:$0xff]  }
 0xa9a   : > { %8978 = vmatpush3.bf16.msra.mxu0 %v9549_v56  ;;  %8992 = vmatpush3.bf16.msra.mxu1 %v9550_v14 }
 0xa9b   : > { %8979 = vmatprep.subr.bf16.mxu0 %v9551_v2  ;;  %8993 = vmatprep.subr.bf16.mxu1 %v9552_v5  ;;  %v4183_v19 = vadd.f32 1e-05, %v4181_v1 }
 0xa9d   : > { %v6586_v6 = vpop.f32.mrb[108].mxu1  ;;  %9643 = vrsqrt.f32 %v4183_v19 }
 0xa9e   : > { %v6799_v24 = vpack.c.bf16 %v6586_v6, %v6586_v6  ;;  %v9202_v41 = vpop.f32.mrb[109].mxu1  ;;  %8980 = vmatpush3.bf16.msra.mxu0 %v9553_v4  ;;  %8994 = vmatpush3.bf16.msra.mxu1 %v9554_v17  ;;  %v4182_v4 = vsub.f32 %v11480_v53, %v4175_v25  ;;  %v7500_v25 = vrot.slane %v11642_v26, %v10849_v22 }
 0xa9f   : > { %v6589_v12 = vpop.f32.mrb[110].mxu1  ;;  %8995 = vmatprep.subr.bf16.mxu1 %v9555_v62  ;;  %9228 = vmatprep.subr.bf16.mxu0 %v10019_v13  ;;  %v4189_v62 = vrot.slane %v11642_v26, %v10803_v44  ;;  %v4194_v41 = vrot.slane %v11642_v26, %v10813_v59  ;;  %v9565_v59 = vld [vmem:[%s10542_s15 + $0x10] sm:$0xff]  }
 0xaa0   : > { %v9203_v30 = vpop.f32.mrb[111].mxu1  ;;  %7430 = vmatprep.mubr.bf16.mxu0 %v6799_v24 }
 0xaa1   : > { %7431 = vmatmul.mubr.bf16.vlgmr.msra.gmra.mrb[124].mxu0 %v6798_v27 }
 0xaa2   : > { %8996 = vmatpush3.bf16.msra.mxu1 %v9556_v34  ;;  %9244 = vmatprep.mubr.msk.bf16.mxu0 %vm10020_vm0, %v10019_v13 }
 0xaa3   : > { %8997 = vmatprep.subr.bf16.mxu1 %v9557_v52  ;;  %9229 = vmatpush3.bf16.msra.mxu0 %v9563_v32 }
 0xaa4   : > { %9230 = vmatprep.subr.bf16.mxu0 %v10019_v13 }
 0xaa5   : > { %v6687_v50 = vpop.f32.mrb[112].mxu1 }
 0xaa6   : > { %v9214_v7 = vpop.f32.mrb[113].mxu1  ;;  %8998 = vmatpush3.bf16.msra.mxu1 %v9558_v28  ;;  %v6800_v31 = vpack.c.bf16 %v6687_v50, %v6687_v50  ;;  %v9564_v50 = vld [vmem:[%s10542_s15 + $0x8] sm:$0xff]  }
 0xaa7   : > { %v6690_v8 = vpop.f32.mrb[114].mxu1  ;;  %8999 = vmatprep.subr.bf16.mxu1 %v9559_v35  ;;  %v9644_v20 = vpop.eup %9643  ;;  %9231 = vmatpush3.bf16.msra.mxu0 %v9564_v50  ;;  %v9566_v7 = vld [vmem:[%s10542_s15 + $0x18] sm:$0xff]   ;;  %v10021_v50 = vmov (!%p8745_p0), 0.0  }
 0xaa8   : > { %v9215_v39 = vpop.f32.mrb[115].mxu1  ;;  %v4185_v17 = vmul.f32 %v9644_v20, %v4182_v4  ;;  %9232 = vmatprep.subr.bf16.mxu0 %v10019_v13  ;;  %v9568_v8 = vld [vmem:[%s10542_s15 + $0x28] sm:$0xff]  }
 0xaa9   : > { %v9570_v39 = vld [vmem:[%s10542_s15 + $0x38] sm:$0xff]  }
 0xaaa   : > { %9000 = vmatpush3.bf16.msra.mxu1 %v9560_v61  ;;  %v4190_v24 = vmul.f32 %v4189_v62, %v4185_v17  ;;  %v9567_v61 = vld [vmem:[%s10542_s15 + $0x20] sm:$0xff]  }
 0xaab   : > { %9001 = vmatprep.subr.bf16.mxu1 %v9561_v36  ;;  %9233 = vmatpush3.bf16.msra.mxu0 %v9565_v59  ;;  %v9569_v36 = vld [vmem:[%s10542_s15 + $0x30] sm:$0xff]   ;;  %v9654_v59 = vld [vmem:[%s11899_s17 + $0x18] sm:$0xff] (!%p8745_p0)  }
 0xaac   : > { %v4195_v28 = vadd.f32 %v4194_v41, %v4190_v24  ;;  %9234 = vmatprep.subr.bf16.mxu0 %v10019_v13 }
 0xaad   : > { %v6788_v46 = vpop.f32.mrb[116].mxu1 }
 0xaae   : > { %v6801_v11 = vpack.c.bf16 %v6788_v46, %v6788_v46  ;;  %v9226_v45 = vpop.f32.mrb[117].mxu1  ;;  %9002 = vmatpush3.bf16.msra.mxu1 %v9562_v0  ;;  %v9571_v0 = vld [vmem:[%s10547_s30] sm:$0xff]   ;;  %v9572_v46 = vld [vmem:[%s10547_s30 + $0x8] sm:$0xff]  }
 0xaaf   : > { %v6791_v40 = vpop.f32.mrb[118].mxu1  ;;  %9248 = vmatprep.subr.bf16.mxu1 %v10019_v13  ;;  %9235 = vmatpush3.bf16.msra.mxu0 %v9566_v7  ;;  %v9574_v45 = vld [vmem:[%s10547_s30 + $0x18] sm:$0xff]   ;;  %v9655_v7 = vld [vmem:[%s11899_s17 + $0x20] sm:$0xff] (!%p8745_p0)  }
 0xab0   : > { %v9227_v51 = vpop.f32.mrb[119].mxu1  ;;  %7470 = vmatprep.mubr.bf16.mxu1 %v6801_v11  ;;  %9236 = vmatprep.subr.bf16.mxu0 %v10019_v13  ;;  %v9573_v11 = vld [vmem:[%s10547_s30 + $0x10] sm:$0xff]   ;;  %v9576_v40 = vld [vmem:[%s10547_s30 + $0x28] sm:$0xff]  }
 0xab1   : > { %7471 = vmatmul.mubr.bf16.vlgmr.msra.gmra.mrb[124].mxu1 %v6800_v31  ;;  %v9575_v31 = vld [vmem:[%s10547_s30 + $0x20] sm:$0xff]  }
 0xab2   : > { %9264 = vmatprep.mubr.msk.bf16.mxu1 %vm10020_vm0, %v10019_v13  ;;  %9249 = vmatpush3.bf16.msra.mxu1 %v9571_v0  ;;  %v8746_v0 = vld [vmem:[%s11900_s23] ss:$0 sm:$0xff] (!%p8745_p0) }
 0xab3   : > { %9237 = vmatpush3.bf16.msra.mxu0 %v9567_v61  ;;  %9250 = vmatprep.subr.bf16.mxu1 %v10019_v13  ;;  %v9656_v61 = vld [vmem:[%s11899_s17 + $0x28] sm:$0xff] (!%p8745_p0)  }
 0xab4   : > { %9238 = vmatprep.subr.bf16.mxu0 %v10019_v13 }
 0xab6   : > { %9251 = vmatpush3.bf16.msra.mxu1 %v9572_v46 }
 0xab7   : > { %9239 = vmatpush3.bf16.msra.mxu0 %v9568_v8  ;;  %9252 = vmatprep.subr.bf16.mxu1 %v10019_v13  ;;  %v9657_v8 = vld [vmem:[%s11899_s17 + $0x30] sm:$0xff] (!%p8745_p0)  }
 0xab8   : > { %9240 = vmatprep.subr.bf16.mxu0 %v10019_v13 }
 0xaba   : > { %9253 = vmatpush3.bf16.msra.mxu1 %v9573_v11 }
 0xabb   : > { %9241 = vmatpush3.bf16.msra.mxu0 %v9569_v36  ;;  %9254 = vmatprep.subr.bf16.mxu1 %v10019_v13  ;;  %v9658_v36 = vld [vmem:[%s11899_s17 + $0x38] sm:$0xff] (!%p8745_p0)  }
 0xabc   : > { %9242 = vmatprep.subr.bf16.mxu0 %v10019_v13 }
 0xabe   : > { %9255 = vmatpush3.bf16.msra.mxu1 %v9574_v45 }
 0xabf   : > { %9243 = vmatpush3.bf16.msra.mxu0 %v9570_v39  ;;  %9256 = vmatprep.subr.bf16.mxu1 %v10019_v13 }
 0xac0   : > { %9268 = vmatprep.subr.bf16.mxu0 (!%p8745_p0), %v10021_v50 }
 0xac2   : > { %9257 = vmatpush3.bf16.msra.mxu1 %v9575_v31 }
 0xac3   : > { %9258 = vmatprep.subr.bf16.mxu1 %v10019_v13 }
 0xac6   : > { %9259 = vmatpush3.bf16.msra.mxu1 %v9576_v40 }
 0xac7   : > { %9260 = vmatprep.subr.bf16.mxu1 %v10019_v13 }
 0xb54   : > { %v8937_v42 = vpop.f32.mrb[120].mxu0 }
 0xb55   : > { %v8938_v23 = vpop.f32.mrb[121].mxu0 }
 0xb56   : > { %v8939_v54 = vadd.f32 %v8938_v23, %v8937_v42  ;;  %v8940_v29 = vpop.f32.mrb[122].mxu0 }
 0xb57   : > { %v8941_v43 = vpop.f32.mrb[123].mxu0 }
 0xb58   : > { %v7353_v18 = vadd.f32 %v8939_v54, %v6933_v15  ;;  %v7495_v15 = vrot.slane %v11642_v26, %v10840_v16 }
 0xb64   : > { %v8959_v48 = vpop.f32.mrb[120].mxu1 }
 0xb65   : > { %v8960_v57 = vpop.f32.mrb[121].mxu1 }
 0xb66   : > { %v8961_v55 = vadd.f32 %v8960_v57, %v8959_v48  ;;  %v8962_v33 = vpop.f32.mrb[122].mxu1 }
 0xb67   : > { %v8963_v63 = vpop.f32.mrb[123].mxu1  ;;  %v9577_v33 = vld [vmem:[%s10547_s30 + $0x30] sm:$0xff]  }
 0xb68   : > { %v7393_v60 = vadd.f32 %v8961_v55, %v7353_v18  ;;  %9261 = vmatpush3.bf16.msra.mxu1 %v9577_v33  ;;  %v7522_v63 = vrot.slane %v11642_v26, %v10860_v38 }
 0xb69   : > { %9262 = vmatprep.subr.bf16.mxu1 %v10019_v13 }
 0xb6c   : > { %9263 = vmatpush3.bf16.msra.mxu1 %v9578_v58 }
 0xb74   : > { %v8981_v56 = vpop.f32.mrb[124].mxu0 }
 0xb75   : > { %v8982_v14 = vpop.f32.mrb[125].mxu0 }
 0xb76   : > { %v8983_v9 = vadd.f32 %v8982_v14, %v8981_v56  ;;  %v8984_v2 = vpop.f32.mrb[126].mxu0  ;;  %v7632_v14 = vrot.slane %v11642_v26, %v10871_v47 }
 0xb77   : > { %v8985_v5 = vpop.f32.mrb[127].mxu0 }
 0xb78   : > { %v7433_v10 = vadd.f32 %v8983_v9, %v7393_v60 }
 0xb84   : > { %v9003_v6 = vpop.f32.mrb[124].mxu1 }
 0xb85   : > { %v9004_v34 = vpop.f32.mrb[125].mxu1 }
 0xb86   : > { %v9005_v27 = vadd.f32 %v9004_v34, %v9003_v6  ;;  %v9006_v12 = vpop.f32.mrb[126].mxu1 }
 0xb87   : > { %v9007_v52 = vpop.f32.mrb[127].mxu1 }
 0xb88   : > { %v7473_v30 = vadd.f32 %v9005_v27, %v7433_v10  ;;  %v906_v27 = vld [vmem:[%s10549_s8 + $0x8] sm:$0xff] }
 0xb89   : > { %v7738_v26 = vrot.slane %v906_v27, %v10795_v37  ;;  %v7743_v52 = vrot.slane %v906_v27, %v10803_v44  ;;  %v9652_v37 = vld [vmem:[%s11899_s17 + $0x8] sm:$0xff] (!%p8745_p0)   ;;  %v9653_v44 = vld [vmem:[%s11899_s17 + $0x10] sm:$0xff] (!%p8745_p0)  }
 0xb8a   : > { %v7478_v53 = vadd.f32 %v7473_v30, %v4195_v28 }
 0xb8c   : > { %7479 = vadd.xlane.f32.xlu0 %v7478_v53  ;;  %v7482_v35 = vmul.f32 %v7478_v53, %v7478_v53 }
 0xb8e   : > { %7483 = vadd.xlane.f32.xlu1 %v7482_v35  ;;  %v9651_v35 = vld [vmem:[%s11898_s27] sm:$0xff] (!%p8745_p0)  }
 0xc19   : > { %v7480_v51 = vpop.xlane.xlu0 %7479 }
 0xc1a   : > { %v7481_v32 = vmul.f32 0.03125, %v7480_v51 }
 0xc1b   : > { %v7484_v42 = vpop.xlane.xlu1 %7483 }
 0xc1c   : > { %v7486_v23 = vmul.f32 %v7481_v32, %v7481_v32  ;;  %v7485_v54 = vmul.f32 0.03125, %v7484_v42  ;;  %v7488_v49 = vsub.f32 %v7478_v53, %v7481_v32 }
 0xc1e   : > { %v7487_v29 = vsub.f32 %v7485_v54, %v7486_v23 }
 0xc20   : > { %v7489_v43 = vadd.f32 1e-05, %v7487_v29 }
 0xc22   : > { %9645 = vrsqrt.f32 %v7489_v43 }
 0xc2c   : > { %v9646_v21 = vpop.eup %9645 }
 0xc2d   : > { %v7491_v48 = vmul.f32 %v9646_v21, %v7488_v49 }
 0xc2f   : > { %v7496_v57 = vmul.f32 %v7495_v15, %v7491_v48 }
 0xc31   : > { %v7501_v18 = vadd.f32 %v7500_v25, %v7496_v57 }
 0xc33   : > { %v7502_v55 = vpack.c.bf16 %v7501_v18, %v7501_v18 }
 0xc35   : > { %9245 = vmatmul.mubr.bf16.vlgmr.msra.gmra.mrb[128].mxu0 %v7502_v55 }
 0xc36   : > { %9269 = vmatpush3.bf16.msra.mxu0 (!%p8745_p0), %v9651_v35  ;;  %9284 = vmatprep.mubr.msk.bf16.mxu0 (!%p8745_p0), %vm10022_vm5, %v10021_v50 }
 0xc37   : > { %9270 = vmatprep.subr.bf16.mxu0 (!%p8745_p0), %v10021_v50 }
 0xc3a   : > { %9271 = vmatpush3.bf16.msra.mxu0 (!%p8745_p0), %v9652_v37 }
 0xc3b   : > { %9272 = vmatprep.subr.bf16.mxu0 (!%p8745_p0), %v10021_v50 }
 0xc3e   : > { %9273 = vmatpush3.bf16.msra.mxu0 (!%p8745_p0), %v9653_v44 }
 0xc3f   : > { %9274 = vmatprep.subr.bf16.mxu0 (!%p8745_p0), %v10021_v50 }
 0xc42   : > { %9275 = vmatpush3.bf16.msra.mxu0 (!%p8745_p0), %v9654_v59 }
 0xc43   : > { %9276 = vmatprep.subr.bf16.mxu0 (!%p8745_p0), %v10021_v50 }
 0xc46   : > { %9277 = vmatpush3.bf16.msra.mxu0 (!%p8745_p0), %v9655_v7 }
 0xc47   : > { %9278 = vmatprep.subr.bf16.mxu0 (!%p8745_p0), %v10021_v50 }
 0xc4a   : > { %9279 = vmatpush3.bf16.msra.mxu0 (!%p8745_p0), %v9656_v61 }
 0xc4b   : > { %9280 = vmatprep.subr.bf16.mxu0 (!%p8745_p0), %v10021_v50 }
 0xc4e   : > { %9281 = vmatpush3.bf16.msra.mxu0 (!%p8745_p0), %v9657_v8 }
 0xc4f   : > { %9282 = vmatprep.subr.bf16.mxu0 (!%p8745_p0), %v10021_v50 }
 0xc52   : > { %9283 = vmatpush3.bf16.msra.mxu0 (!%p8745_p0), %v9658_v36 }
 0xd08   : > { %v7605_v60 = vpop.f32.mrb[128].mxu0 }
 0xd09   : > { %v7606_v16 = vadd.f32 %v7605_v60, %v7522_v63  ;;  %v9246_v3 = vpop.f32.mrb[129].mxu0 }
 0xd0a   : > { %v7608_v1 = vpop.f32.mrb[130].mxu0 }
 0xd0b   : > { %v7611_v19 = vmax.f32 %v7606_v16, 0.0  ;;  %v9247_v56 = vpop.f32.mrb[131].mxu0 }
 0xd0d   : > { %v7612_v22 = vpack.c.bf16 %v7611_v19, %v7611_v19 }
 0xd0f   : > { %9265 = vmatmul.mubr.bf16.vlgmr.msra.gmra.mrb[128].mxu1 %v7612_v22 }
 0xde2   : > { %v7715_v9 = vpop.f32.mrb[128].mxu1 }
 0xde3   : > { %v7716_v2 = vadd.f32 %v7715_v9, %v7632_v14  ;;  %v9266_v13 = vpop.f32.mrb[129].mxu1 }
 0xde4   : > { %v7718_v5 = vpop.f32.mrb[130].mxu1 }
 0xde5   : > { %v7721_v10 = vadd.f32 %v7716_v2, %v7501_v18  ;;  %v9267_v20 = vpop.f32.mrb[131].mxu1 }
 0xde7   : > { %7722 = vadd.xlane.f32.xlu0 %v7721_v10  ;;  %v7725_v38 = vmul.f32 %v7721_v10, %v7721_v10 }
 0xde9   : > { %7726 = vadd.xlane.f32.xlu1 %v7725_v38 }
 0xe74   : > { %v7723_v4 = vpop.xlane.xlu0 %7722 }
 0xe75   : > { %v7724_v17 = vmul.f32 0.03125, %v7723_v4 }
 0xe76   : > { %v7727_v62 = vpop.xlane.xlu1 %7726 }
 0xe77   : > { %v7729_v6 = vmul.f32 %v7724_v17, %v7724_v17  ;;  %v7728_v24 = vmul.f32 0.03125, %v7727_v62  ;;  %v7731_v47 = vsub.f32 %v7721_v10, %v7724_v17 }
 0xe79   : > { %v7730_v41 = vsub.f32 %v7728_v24, %v7729_v6 }
 0xe7b   : > { %v7732_v34 = vadd.f32 1e-05, %v7730_v41 }
 0xe7d   : > { %9647 = vrsqrt.f32 %v7732_v34 }
 0xe87   : > { %v9648_v12 = vpop.eup %9647 }
 0xe88   : > { %v7734_v30 = vmul.f32 %v9648_v12, %v7731_v47  ;;  %7749 = sbr.rel (%p8745_p0) target bundleno = 3943 (0xf67), region = 120 }
 0xe8a   : > { %v7739_v28 = vmul.f32 %v7738_v26, %v7734_v30 }
 0xe8c   : > { %v7744_v53 = vadd.f32 %v7743_v52, %v7739_v28 }
 0xe8e   : > { %7745 = vst [vmem:[#allocation2] sm:$0xff] %v7744_v53  ;;  %v7750_v39 = vpack.c.bf16 (!%p8745_p0), %v7744_v53, %v7744_v53 }
 0xe90   : > { %9285 = vmatmul.mubr.bf16.vlgmr.msra.gmra.mrb[0].mxu0 %v7750_v39 }
 0xf63   : > { %v7856_v46 = vpop.f32.mrb[0].mxu0 }
 0xf64   : > { %v7857_v11 = vadd.f32 %v8746_v0, %v7856_v46  ;;  %v9286_v45 = vpop.f32.mrb[1].mxu0 }
 0xf65   : > { %v7859_v31 = vpop.f32.mrb[2].mxu0 }
 0xf66   : > { %7862 = vst [vmem:[%s864_s4] sm:$0xff] %v7857_v11  ;;  %v9287_v40 = vpop.f32.mrb[3].mxu0 }
 0xf67 PF: > { %s11901_s12 = sld [smem:[#allocation27_spill]]  ;;  %s11902_s11 = sld [smem:[#allocation22_spill]] }
 0xf68   : > { %s11903_s30 = sld [smem:[#allocation35_spill]]  ;;  %s11904_s9 = sld [smem:[#allocation54_spill]] }
 0xf69   : > { %s7877_s29 = sshll.u32 %s864_s4, 4  ;;  %s10023_s21 = smov [#allocation15]   ;;  %s7878_s29 = int_to_ptr.vmem [resolvable:$true] %s7877_s29 }
 0xf6a   : > { %s9869_s0 = scalar_lea.vmem %s7878_s29, 128  ;;  %s9873_s5 = sshll.u32 %s10023_s21, 4  ;;  %s9874_s5 = int_to_ptr.vmem [resolvable:$false] %s9873_s5 }
 0xf6b   : > { %p9870_p4 = scmp.ne.s32.totalorder %s7878_s29, %s9869_s0  ;;  %s9875_s8 = scalar_lea.vmem %s9874_s5, 256 }
 0xf6c   : > { %p9876_p1 = scmp.lt.s32.totalorder %s7878_s29, %s9874_s5  ;;  %p9877_p5 = scmp.lt.s32.totalorder %s9875_s8, %s9869_s0 }
 0xf6d   : > { %s8756_s6 = sshll.u32 %s11901_s12, 7  ;;  %s11905_s26 = sand.u32 1, %s11902_s11  }
 0xf6e   : > { %s11724_s25 = scalar_lea.hbm %s11904_s9, %s8756_s6  ;;  %s7864_s27 = scalar_lea.sflag [#allocation5], %s11905_s26 }
 0xf6f   : > { %p11906_p9 = scmp.ne.s32.totalorder %s11903_s30, 0  ;;  %p9878_p8 = por %p9877_p5, %p9876_p1 }
 0xf71   : > { %p9871_p2 = pnand %p9870_p4, %p11906_p9 }
 0xf73   : > { %p9872_p7 = pneg %p9871_p2 }
 0xf75   : > { %p9879_p12 = pnand %p9878_p8, %p9872_p7 }
 0xf77   : > { %9882 = shalt.err (!%p9879_p12)
}
 0xf78   : > { %s9883_s3 = scalar_lea.hbm %s11724_s25, 128  ;;  %s9887_s2 = scalar_lea.hbm %s11904_s9, 256 }
 0xf79   : > { %p9884_p6 = scmp.ne.s32.totalorder %s11724_s25, %s9883_s3  ;;  %p9888_p11 = scmp.lt.u32.totalorder %s11724_s25, %s11904_s9 }
 0xf7a   : > { %p9889_p3 = scmp.lt.u32.totalorder %s9887_s2, %s9883_s3  ;;  %p9891_p4 = scmp.lt.u32.totalorder %s9883_s3, %s11724_s25 }
 0xf7b   : > { %p9885_p10 = pnand %p9884_p6, %p11906_p9 }
 0xf7c   : > { %p9890_p0 = por %p9889_p3, %p9888_p11 }
 0xf7d   : > { %p9886_p13 = pneg %p9885_p10 }
 0xf7e   : > { %p9892_p2 = por %p9891_p4, %p9890_p0 }
 0xf80   : > { %p9893_p7 = pnand %p9892_p2, %p9886_p13 }
 0xf82   : > { %9896 = shalt.err (!%p9893_p7)
}
 0xf83   : > { %9306 = dma.vmem_to_hbm [thread:$0]  (%p11906_p9), %s7878_s29, 128, %s11724_s25, %s7864_s27  }
 0xf84 PF: > { %s11907_s1 = sld [smem:[#allocation30_spill]]  ;;  %s11908_s14 = sld [smem:[#allocation21_spill]] }
 0xf85   : > { %s11909_s10 = sld [smem:[#allocation36_spill]] }
 0xf8a   : > { %p9335_p1 = scmp.ge.s32.totalorder %s11907_s1, 2  ;;  %s7889_s20 = sand.u32 1, %s11908_s14  }
 0xf8b   : > { %p11910_p5 = scmp.ne.s32.totalorder %s11909_s10, 0  ;;  %s7890_s24 = scalar_lea.sflag [#allocation5], %s7889_s20 }
 0xf8d   : > { %p9331_p8 = pnand %p9335_p1, %p11910_p5 }
 0xf8f   : > { %9958 = dma.done.wait (!%p9331_p8), %s7890_s24, 128  }
 0xf90   : > { %9960 = vsyncadd (!%p9331_p8), %s7890_s24, 4294967168  ;;  %s41_s0 = sadd.s32 1, %s11907_s1   ;;  %s11911_s21 = sld [smem:[#allocation22_spill]] }
 0xf91   : > { %p38_p12 = scmp.ge.s32.totalorder %s41_s0, 6   ;;  %s11912_s22 = sld [smem:[#allocation23_spill]] }
 0xf92   : > { %s11913_s23 = sld [smem:[#allocation34_spill]]  ;;  %s11914_s24 = sld [smem:[#allocation24_spill]] }
 0xf93   : > { %s11915_s25 = sld [smem:[#allocation25_spill]]  ;;  %s11916_s26 = sld [smem:[#allocation33_spill]] }
 0xf94   : > { %s11917_s27 = sld [smem:[#allocation28_spill]]  ;;  %s11918_s28 = sld [smem:[#allocation29_spill]] }
 0xf95   : > { %s11919_s29 = sld [smem:[#allocation31_spill]]  ;;  %s11920_s30 = sld [smem:[#allocation32_spill]] }
 0xf96   :  { %40 = sbr.rel (!%p38_p12) target bundleno = 33 (0x21), region = 227 }
 0xf9d   :  { %7895 = vsyncpa [#allocation4], 1 }
 0xf9e   :  { %7897 = vsyncpa [#allocation4 + $0x1], 1 }
 0xf9f   :  { %7898 = vsyncpa [#allocation7], 1 }
 0xfa0   :  { %7900 = vsyncpa [#allocation7 + $0x1], 1 }
 0xfa1   :  { %7901 = vsyncpa [#allocation10], 1 }
 0xfa2   :  { %7903 = vsyncpa [#allocation10 + $0x1], 1 }
 0xfa3   :  { %7904 = vsyncpa [#allocation13], 1 }
 0xfa4   :  { %7906 = vsyncpa [#allocation13 + $0x1], 1 }
 0xfa5   :  { %7907 = vsyncpa [#allocation5], 1 }
 0xfa6   :  { %7909 = vsyncpa [#allocation5 + $0x1], 1 }

</bundles_post_ra>
